<compile_context>
chip_gen: v7x
topology: tpu7x:2x2x1
jax: 0.10.0
libtpu: 0.0.40
codegen_flags: <defaults>
</compile_context>

<pallas_src>
import functools

import jax
import jax.numpy as jnp
from jax.experimental import pallas as pl
from jax.experimental.pallas import tpu as pltpu


# -----------------------------------------------------------------------------
# Pallas kernels
# -----------------------------------------------------------------------------
def _conv_bn_relu_kernel(p_ref, w_ref, b_ref, g_ref, bt_ref, o_ref):
    """patches[R, Cin*K*K] @ w[Cin*K*K, Cout_pad] + b (bf16 operands, f32 MXU
    accumulation), then train-mode BatchNorm over the batch*spatial rows and
    ReLU.  Cout is lane-padded to 128; padded lanes stay exactly zero because
    their bias/gamma/beta padding is zero."""
    y = jnp.dot(p_ref[...], w_ref[...], preferred_element_type=jnp.float32) + b_ref[...]
    mean = jnp.mean(y, axis=0, keepdims=True)
    var = jnp.mean(jnp.square(y - mean), axis=0, keepdims=True)  # biased, like torch BN
    y = (y - mean) * jax.lax.rsqrt(var + 1e-5) * g_ref[...] + bt_ref[...]
    o_ref[...] = jnp.maximum(y, 0.0).astype(o_ref.dtype)


def _dueling_kernel(x_ref, w1_ref, s1_ref, b1_ref, w2_ref, b2_ref, o_ref, acc_ref):
    """One dueling branch (grid axis 0: 0=value, 1=advantage), K-tiled over the
    feature dim (grid axis 1, reduction into a f32 VMEM accumulator).

    w1 is int8 with per-output-column scales: the int8 block is widened to bf16
    on the VPU right before the MXU dot (hidden under the HBM weight stream)
    and the dequant scale is applied once in the k==last epilogue."""
    k = pl.program_id(1)

    @pl.when(k == 0)
    def _():
        acc_ref[...] = jnp.zeros_like(acc_ref)

    # int8 -> f32 -> bf16 widen (VPU), then bf16 x bf16 MXU dot with f32 accumulation.
    w_blk = w1_ref[...].astype(jnp.float32).astype(jnp.bfloat16)
    acc_ref[...] += jnp.dot(x_ref[...], w_blk, preferred_element_type=jnp.float32)

    @pl.when(k == pl.num_programs(1) - 1)
    def _():
        h = jnp.maximum(acc_ref[...] * s1_ref[...] + b1_ref[...], 0.0)
        z = jnp.dot(h, w2_ref[0], preferred_element_type=jnp.float32) + b2_ref[0]
        o_ref[0] = z


# -----------------------------------------------------------------------------
# Wrappers
# -----------------------------------------------------------------------------
def _im2col_nhwc(x, k, s, pad):
    """x: [N, H, W, C] -> patches [N*OH*OW, C*K*K] with the last dim ordered
    (C, KH, KW) to match torch's Conv2d weight flatten order.  XLA glue.
    TODO(synk): move this (kh,kw) accumulation into the conv kernel / fuse the
    whole conv stack + head into one pallas_call to drop launches and HBM
    round trips; re-budget VMEM for v7x's 64 MiB when doing so."""
    x = jnp.pad(x, ((0, 0), (pad, pad), (pad, pad), (0, 0)))
    n, hp, wp, c = x.shape
    oh = (hp - k) // s + 1
    ow = (wp - k) // s + 1
    cols = [x[:, kh:kh + (oh - 1) * s + 1:s, kw:kw + (ow - 1) * s + 1:s, :]
            for kh in range(k) for kw in range(k)]      # each [N, OH, OW, C]
    p = jnp.stack(cols, axis=-1)                        # [N, OH, OW, C, K*K]
    return p.reshape(n * oh * ow, c * k * k), oh, ow


def conv_bn_relu(patches, w_mat, b, gamma, beta, cout):
    r, kk = patches.shape
    cpad = w_mat.shape[1]                               # lane-padded Cout (>= cout)
    y = pl.pallas_call(
        _conv_bn_relu_kernel,
        out_shape=jax.ShapeDtypeStruct((r, cpad), jnp.bfloat16),
        grid=(1,),
        in_specs=[
            pl.BlockSpec((r, kk), lambda i: (0, 0)),
            pl.BlockSpec((kk, cpad), lambda i: (0, 0)),
            pl.BlockSpec((1, cpad), lambda i: (0, 0)),
            pl.BlockSpec((1, cpad), lambda i: (0, 0)),
            pl.BlockSpec((1, cpad), lambda i: (0, 0)),
        ],
        out_specs=pl.BlockSpec((r, cpad), lambda i: (0, 0)),
    )(patches, w_mat, b, gamma, beta)
    return y if cpad == cout else y[:, :cout]


def dueling_head(feats, wh1_q, wh1_s, bh1, wh2, bh2, action_size, *, tk=3456):
    """feats [N, F] bf16 (NHWC flatten order) -> q [N, A].
    wh1_q int8 [F, 1024] = [value | advantage] columns, wh1_s f32 per-column
    scales, bh1 [1, 1024]; wh2/bh2 stacked per branch with the action dim
    zero-padded to 128 lanes (value branch lives in column 0)."""
    n, f = feats.shape
    h = bh1.shape[1] // 2                               # 512
    apad = wh2.shape[-1]                                # 128 (lane-padded action dim)
    assert f % tk == 0 and tk % 128 == 0
    nk = f // tk

    flops = 2 * n * f * 2 * h + 2 * 2 * n * h * apad
    bytes_accessed = (wh1_q.size                        # int8 weight stream (dominant)
                      + 2 * n * f * 2                   # feats, once per branch, bf16
                      + wh1_s.size * 4 + bh1.size * 4
                      + wh2.size * 4 + bh2.size * 4
                      + 2 * n * apad * 4)

    out = pl.pallas_call(
        _dueling_kernel,
        out_shape=jax.ShapeDtypeStruct((2, n, apad), jnp.float32),
        grid=(2, nk),
        in_specs=[
            pl.BlockSpec((n, tk), lambda b, k: (0, k)),          # feats (bf16)
            pl.BlockSpec((tk, h), lambda b, k: (k, b)),          # wh1 int8: branch column half
            pl.BlockSpec((1, h), lambda b, k: (0, b)),           # per-column dequant scales
            pl.BlockSpec((1, h), lambda b, k: (0, b)),           # bh1: branch half
            pl.BlockSpec((1, h, apad), lambda b, k: (b, 0, 0)),  # wh2: branch slab
            pl.BlockSpec((1, 1, apad), lambda b, k: (b, 0, 0)),  # bh2: branch slab
        ],
        out_specs=pl.BlockSpec((1, n, apad), lambda b, k: (b, 0, 0)),
        scratch_shapes=[pltpu.VMEM((n, h), jnp.float32)],
        compiler_params=pltpu.CompilerParams(
            dimension_semantics=("parallel", "arbitrary"),       # branch axis -> 2 TCs on v7x
            vmem_limit_bytes=32 * 1024 * 1024),
        cost_estimate=pl.CostEstimate(flops=flops, transcendentals=0,
                                      bytes_accessed=bytes_accessed),
    )(feats, wh1_q, wh1_s, bh1, wh2, bh2)

    v = out[0, :, 0:1]                                  # value branch (column 0)
    adv = out[1, :, :action_size]                       # advantage branch (real columns)
    return v + (adv - jnp.mean(adv, axis=1, keepdims=True))


# -----------------------------------------------------------------------------
# Parameters (deterministic synthetic init, shapes follow the torch module)
# -----------------------------------------------------------------------------
def init_params(key, action_size):
    ks = jax.random.split(key, 14)

    def rnd(k, shape, scale):
        return jax.random.normal(k, shape, dtype=jnp.float32) * scale

    def pad_cols(m, tgt):
        return jnp.pad(m, ((0, 0), (0, tgt - m.shape[1])))

    p = {}
    # conv weights in torch layout [Cout, Cin, KH, KW] -> im2col matrices [Cin*K*K, Cout]
    c1w = rnd(ks[0], (32, 4, 8, 8), 0.05)
    c2w = rnd(ks[2], (64, 32, 4, 4), 0.05)
    c3w = rnd(ks[4], (128, 64, 3, 3), 0.05)

    # conv1: fold x/255 into the weight; pad Cout 32 -> 128 lanes (unmasked stores).
    p["w1"] = pad_cols(c1w.reshape(32, -1).T / 255.0, 128).astype(jnp.bfloat16)
    p["b1"] = pad_cols(rnd(ks[1], (1, 32), 0.05), 128)
    p["g1"] = pad_cols(jnp.ones((1, 32), jnp.float32), 128)
    p["be1"] = jnp.zeros((1, 128), jnp.float32)
    # conv2: pad Cout 64 -> 128 lanes.
    p["w2"] = pad_cols(c2w.reshape(64, -1).T, 128).astype(jnp.bfloat16)
    p["b2"] = pad_cols(rnd(ks[3], (1, 64), 0.05), 128)
    p["g2"] = pad_cols(jnp.ones((1, 64), jnp.float32), 128)
    p["be2"] = jnp.zeros((1, 128), jnp.float32)
    # conv3: already lane-dense (Cout=128).
    p["w3"] = (c3w.reshape(128, -1).T).astype(jnp.bfloat16)
    p["b3"] = rnd(ks[5], (1, 128), 0.05)
    p["g3"] = jnp.ones((1, 128), jnp.float32)
    p["be3"] = jnp.zeros((1, 128), jnp.float32)

    # FC heads: torch Linear weights [out, in] -> stored transposed [in, out]
    feat_dim = 128 * 9 * 9  # 10368, matches CNNFeatureExtractor._to_linear for 80x80 input
    wv1 = rnd(ks[6], (512, feat_dim), 0.01).T
    bv1 = rnd(ks[7], (512,), 0.01)
    wv2 = rnd(ks[8], (1, 512), 0.05).T
    bv2 = rnd(ks[9], (1,), 0.05)
    wa1 = rnd(ks[10], (512, feat_dim), 0.01).T
    ba1 = rnd(ks[11], (512,), 0.01)
    wa2 = rnd(ks[12], (action_size, 512), 0.05).T
    ba2 = rnd(ks[13], (action_size,), 0.05)

    # Branch-concatenated first FC layer:
    #   * rows permuted from torch's NCHW flatten order (c*81 + h*9 + w) to the
    #     kernel's NHWC order (h*1152 + w*128 + c) so feats = conv3_out.reshape(n,-1)
    #     feeds the head directly (no feature transpose);
    #   * quantized to int8 with per-output-column scales (dequant in-kernel).
    wh1 = jnp.concatenate([wv1, wa1], axis=1)                        # [F, 1024] f32, NCHW rows
    wh1 = wh1.reshape(128, 9, 9, 1024).transpose(1, 2, 0, 3).reshape(feat_dim, 1024)
    amax = jnp.max(jnp.abs(wh1), axis=0, keepdims=True)              # [1, 1024]
    scale = jnp.where(amax > 0, amax / 127.0, jnp.ones_like(amax))
    p["wh1_q"] = jnp.round(wh1 / scale).astype(jnp.int8)             # [F, 1024] int8
    p["wh1_s"] = scale                                               # [1, 1024] f32
    p["bh1"] = jnp.concatenate([bv1, ba1]).reshape(1, 1024)

    # Per-branch second FC layer; action dim zero-padded to 128 lanes so the
    # epilogue matmul and output stores are lane-dense.  Value lives in col 0.
    apad = 128
    w2v = jnp.pad(wv2, ((0, 0), (0, apad - 1)))                      # [512, 128]
    b2v = jnp.pad(bv2, ((0, apad - 1),))                             # [128]
    w2a = jnp.pad(wa2, ((0, 0), (0, apad - action_size)))            # [512, 128]
    b2a = jnp.pad(ba2, ((0, apad - action_size),))                   # [128]
    p["wh2"] = jnp.stack([w2v, w2a], axis=0)                         # [2, 512, 128]
    p["bh2"] = jnp.stack([b2v, b2a], axis=0).reshape(2, 1, apad)     # [2, 1, 128]
    return p


# -----------------------------------------------------------------------------
# Full forward (DuelingQNet.forward)
# -----------------------------------------------------------------------------
def dueling_qnet_forward(x_nchw, p, *, action_size):
    n = x_nchw.shape[0]
    # NCHW -> NHWC; the module's x/255 is folded into p["w1"] on the host.
    x = jnp.transpose(x_nchw, (0, 2, 3, 1)).astype(jnp.bfloat16)

    # conv1 (4->32, k8, s4, p1) + BN + ReLU
    pt, oh, ow = _im2col_nhwc(x, k=8, s=4, pad=1)
    x = conv_bn_relu(pt, p["w1"], p["b1"], p["g1"], p["be1"], 32).reshape(n, oh, ow, 32)

    # conv2 (32->64, k4, s2, p1) + BN + ReLU
    pt, oh, ow = _im2col_nhwc(x, k=4, s=2, pad=1)
    x = conv_bn_relu(pt, p["w2"], p["b2"], p["g2"], p["be2"], 64).reshape(n, oh, ow, 64)

    # conv3 (64->128, k3, s1, p1) + BN + ReLU -> [n*9*9, 128] bf16
    pt, oh, ow = _im2col_nhwc(x, k=3, s=1, pad=1)
    x = conv_bn_relu(pt, p["w3"], p["b3"], p["g3"], p["be3"], 128)

    # Flatten: rows are already (n, oh, ow) with channels last; wh1's rows were
    # permuted to the same NHWC order at init, so a plain reshape replaces the
    # old NCHW transpose (one fewer XLA transpose + HBM round trip).
    feats = x.reshape(n, oh * ow * 128)                              # [N, 10368] bf16

    # TODO(synk): fuse conv2+conv3+flatten+head into a single pallas_call with
    # in-kernel (kh,kw)-unrolled im2col, keeping the <1 MB of activations
    # VMEM-resident and streaming only wh1 from HBM (re-budget for v7x 64 MiB).
    return dueling_head(feats, p["wh1_q"], p["wh1_s"], p["bh1"], p["wh2"], p["bh2"],
                        action_size)


if __name__ == "__main__":
    action_size = 6
    key = jax.random.PRNGKey(0)
    k_in, k_par = jax.random.split(key)

    # batch=2 frames of 4x80x80 (80x80 is required so the flatten size matches
    # the module's hard-coded _to_linear = 10368)
    x = jax.random.uniform(k_in, (2, 4, 80, 80), dtype=jnp.float32,
                           minval=0.0, maxval=255.0)
    params = init_params(k_par, action_size)

    fwd = jax.jit(functools.partial(dueling_qnet_forward, action_size=action_size))
    q = jax.block_until_ready(fwd(x, params))
    assert q.shape == (2, action_size) and q.dtype == jnp.float32
    print("KERNEL_OK")
</pallas_src>

<mosaic_0001>
module attributes {stable_mosaic.version = 11 : i64} {
  func.func @_conv_bn_relu_kernel(%arg0: i32, %arg1: memref<722x256xbf16, #tpu.memory_space<vmem>>, %arg2: memref<256x128xbf16, #tpu.memory_space<vmem>>, %arg3: memref<1x128xf32, #tpu.memory_space<vmem>>, %arg4: memref<1x128xf32, #tpu.memory_space<vmem>>, %arg5: memref<1x128xf32, #tpu.memory_space<vmem>>, %arg6: memref<722x128xbf16, #tpu.memory_space<vmem>>) attributes {dimension_semantics = [#tpu.dimension_semantics<arbitrary>], iteration_bounds = array<i64: 1>, scalar_prefetch = 0 : i64, scratch_operands = 0 : i64, tpu.core_type = #tpu.core_type<tc>, window_params = [{pipeline_mode = #tpu.pipeline_mode<synchronous>, transform_indices = @transform_0, window_bounds = array<i64: 722, 256>}, {pipeline_mode = #tpu.pipeline_mode<synchronous>, transform_indices = @transform_1, window_bounds = array<i64: 256, 128>}, {pipeline_mode = #tpu.pipeline_mode<synchronous>, transform_indices = @transform_2, window_bounds = array<i64: 1, 128>}, {pipeline_mode = #tpu.pipeline_mode<synchronous>, transform_indices = @transform_3, window_bounds = array<i64: 1, 128>}, {pipeline_mode = #tpu.pipeline_mode<synchronous>, transform_indices = @transform_4, window_bounds = array<i64: 1, 128>}, {pipeline_mode = #tpu.pipeline_mode<synchronous>, transform_indices = @transform_5, window_bounds = array<i64: 722, 128>}]} {
    %c0 = arith.constant 0 : index
    %c0_0 = arith.constant 0 : index
    %0 = vector.load %arg1[%c0, %c0_0] : memref<722x256xbf16, #tpu.memory_space<vmem>>, vector<722x256xbf16>
    %c0_1 = arith.constant 0 : index
    %c0_2 = arith.constant 0 : index
    %1 = vector.load %arg2[%c0_1, %c0_2] : memref<256x128xbf16, #tpu.memory_space<vmem>>, vector<256x128xbf16>
    %cst = arith.constant dense<0.000000e+00> : vector<722x128xf32>
    %2 = tpu.matmul %0, %1, %cst {dimension_numbers = #tpu.dot_dimension_numbers<[1], [0], [0], [1], [0, 0, 1, 1], [], []>} : vector<722x256xbf16>, vector<256x128xbf16>, vector<722x128xf32> -> vector<722x128xf32>
    %c0_3 = arith.constant 0 : index
    %c0_4 = arith.constant 0 : index
    %3 = vector.load %arg3[%c0_3, %c0_4] : memref<1x128xf32, #tpu.memory_space<vmem>>, vector<1x128xf32>
    %4 = vector.broadcast %3 : vector<1x128xf32> to vector<722x128xf32>
    %5 = arith.addf %2, %4 : vector<722x128xf32>
    %cst_5 = arith.constant dense<0.000000e+00> : vector<128xf32>
    %6 = vector.multi_reduction <add>, %5, %cst_5 [0] : vector<722x128xf32> to vector<128xf32>
    %7 = vector.shape_cast %6 : vector<128xf32> to vector<1x128xf32>
    %cst_6 = arith.constant 7.220000e+02 : f32
    %8 = vector.broadcast %cst_6 : f32 to vector<1x128xf32>
    %9 = arith.divf %7, %8 : vector<1x128xf32>
    %10 = vector.broadcast %9 : vector<1x128xf32> to vector<722x128xf32>
    %11 = arith.subf %5, %10 : vector<722x128xf32>
    %12 = arith.mulf %11, %11 : vector<722x128xf32>
    %cst_7 = arith.constant dense<0.000000e+00> : vector<128xf32>
    %13 = vector.multi_reduction <add>, %12, %cst_7 [0] : vector<722x128xf32> to vector<128xf32>
    %14 = vector.shape_cast %13 : vector<128xf32> to vector<1x128xf32>
    %cst_8 = arith.constant 7.220000e+02 : f32
    %15 = vector.broadcast %cst_8 : f32 to vector<1x128xf32>
    %16 = arith.divf %14, %15 : vector<1x128xf32>
    %17 = vector.broadcast %9 : vector<1x128xf32> to vector<722x128xf32>
    %18 = arith.subf %5, %17 : vector<722x128xf32>
    %cst_9 = arith.constant 9.99999974E-6 : f32
    %19 = vector.broadcast %cst_9 : f32 to vector<1x128xf32>
    %20 = arith.addf %16, %19 : vector<1x128xf32>
    %21 = math.rsqrt %20 : vector<1x128xf32>
    %22 = vector.broadcast %21 : vector<1x128xf32> to vector<722x128xf32>
    %23 = arith.mulf %18, %22 : vector<722x128xf32>
    %c0_10 = arith.constant 0 : index
    %c0_11 = arith.constant 0 : index
    %24 = vector.load %arg4[%c0_10, %c0_11] : memref<1x128xf32, #tpu.memory_space<vmem>>, vector<1x128xf32>
    %25 = vector.broadcast %24 : vector<1x128xf32> to vector<722x128xf32>
    %26 = arith.mulf %23, %25 : vector<722x128xf32>
    %c0_12 = arith.constant 0 : index
    %c0_13 = arith.constant 0 : index
    %27 = vector.load %arg5[%c0_12, %c0_13] : memref<1x128xf32, #tpu.memory_space<vmem>>, vector<1x128xf32>
    %28 = vector.broadcast %27 : vector<1x128xf32> to vector<722x128xf32>
    %29 = arith.addf %26, %28 : vector<722x128xf32>
    %cst_14 = arith.constant 0.000000e+00 : f32
    %30 = vector.broadcast %cst_14 : f32 to vector<722x128xf32>
    %31 = arith.maximumf %29, %30 : vector<722x128xf32>
    %32 = arith.truncf %31 : vector<722x128xf32> to vector<722x128xbf16>
    %c0_15 = arith.constant 0 : index
    %c0_16 = arith.constant 0 : index
    %33 = vector.load %arg6[%c0_15, %c0_16] : memref<722x128xbf16, #tpu.memory_space<vmem>>, vector<722x128xbf16>
    tpu.vector_store %arg6[%c0_15, %c0_16], %32 {strides = array<i32>} : memref<722x128xbf16, #tpu.memory_space<vmem>>, vector<722x128xbf16>,
    return
  }
  func.func @transform_0(%arg0: i32) -> (i32, i32) {
    %c0_i32 = arith.constant 0 : i32
    %c0_i32_0 = arith.constant 0 : i32
    %c0_i32_1 = arith.constant 0 : i32
    return %c0_i32, %c0_i32_0 : i32, i32
  }
  func.func @transform_1(%arg0: i32) -> (i32, i32) {
    %c0_i32 = arith.constant 0 : i32
    %c0_i32_0 = arith.constant 0 : i32
    %c0_i32_1 = arith.constant 0 : i32
    return %c0_i32, %c0_i32_0 : i32, i32
  }
  func.func @transform_2(%arg0: i32) -> (i32, i32) {
    %c0_i32 = arith.constant 0 : i32
    %c0_i32_0 = arith.constant 0 : i32
    %c0_i32_1 = arith.constant 0 : i32
    return %c0_i32, %c0_i32_0 : i32, i32
  }
  func.func @transform_3(%arg0: i32) -> (i32, i32) {
    %c0_i32 = arith.constant 0 : i32
    %c0_i32_0 = arith.constant 0 : i32
    %c0_i32_1 = arith.constant 0 : i32
    return %c0_i32, %c0_i32_0 : i32, i32
  }
  func.func @transform_4(%arg0: i32) -> (i32, i32) {
    %c0_i32 = arith.constant 0 : i32
    %c0_i32_0 = arith.constant 0 : i32
    %c0_i32_1 = arith.constant 0 : i32
    return %c0_i32, %c0_i32_0 : i32, i32
  }
  func.func @transform_5(%arg0: i32) -> (i32, i32) {
    %c0_i32 = arith.constant 0 : i32
    %c0_i32_0 = arith.constant 0 : i32
    %c0_i32_1 = arith.constant 0 : i32
    return %c0_i32, %c0_i32_0 : i32, i32
  }
}

module attributes {stable_mosaic.version = 11 : i64} {
  func.func @_conv_bn_relu_kernel(%arg0: i32, %arg1: memref<162x512xbf16, #tpu.memory_space<vmem>>, %arg2: memref<512x128xbf16, #tpu.memory_space<vmem>>, %arg3: memref<1x128xf32, #tpu.memory_space<vmem>>, %arg4: memref<1x128xf32, #tpu.memory_space<vmem>>, %arg5: memref<1x128xf32, #tpu.memory_space<vmem>>, %arg6: memref<162x128xbf16, #tpu.memory_space<vmem>>) attributes {dimension_semantics = [#tpu.dimension_semantics<arbitrary>], iteration_bounds = array<i64: 1>, scalar_prefetch = 0 : i64, scratch_operands = 0 : i64, tpu.core_type = #tpu.core_type<tc>, window_params = [{pipeline_mode = #tpu.pipeline_mode<synchronous>, transform_indices = @transform_0, window_bounds = array<i64: 162, 512>}, {pipeline_mode = #tpu.pipeline_mode<synchronous>, transform_indices = @transform_1, window_bounds = array<i64: 512, 128>}, {pipeline_mode = #tpu.pipeline_mode<synchronous>, transform_indices = @transform_2, window_bounds = array<i64: 1, 128>}, {pipeline_mode = #tpu.pipeline_mode<synchronous>, transform_indices = @transform_3, window_bounds = array<i64: 1, 128>}, {pipeline_mode = #tpu.pipeline_mode<synchronous>, transform_indices = @transform_4, window_bounds = array<i64: 1, 128>}, {pipeline_mode = #tpu.pipeline_mode<synchronous>, transform_indices = @transform_5, window_bounds = array<i64: 162, 128>}]} {
    %c0 = arith.constant 0 : index
    %c0_0 = arith.constant 0 : index
    %0 = vector.load %arg1[%c0, %c0_0] : memref<162x512xbf16, #tpu.memory_space<vmem>>, vector<162x512xbf16>
    %c0_1 = arith.constant 0 : index
    %c0_2 = arith.constant 0 : index
    %1 = vector.load %arg2[%c0_1, %c0_2] : memref<512x128xbf16, #tpu.memory_space<vmem>>, vector<512x128xbf16>
    %cst = arith.constant dense<0.000000e+00> : vector<162x128xf32>
    %2 = tpu.matmul %0, %1, %cst {dimension_numbers = #tpu.dot_dimension_numbers<[1], [0], [0], [1], [0, 0, 1, 1], [], []>} : vector<162x512xbf16>, vector<512x128xbf16>, vector<162x128xf32> -> vector<162x128xf32>
    %c0_3 = arith.constant 0 : index
    %c0_4 = arith.constant 0 : index
    %3 = vector.load %arg3[%c0_3, %c0_4] : memref<1x128xf32, #tpu.memory_space<vmem>>, vector<1x128xf32>
    %4 = vector.broadcast %3 : vector<1x128xf32> to vector<162x128xf32>
    %5 = arith.addf %2, %4 : vector<162x128xf32>
    %cst_5 = arith.constant dense<0.000000e+00> : vector<128xf32>
    %6 = vector.multi_reduction <add>, %5, %cst_5 [0] : vector<162x128xf32> to vector<128xf32>
    %7 = vector.shape_cast %6 : vector<128xf32> to vector<1x128xf32>
    %cst_6 = arith.constant 1.620000e+02 : f32
    %8 = vector.broadcast %cst_6 : f32 to vector<1x128xf32>
    %9 = arith.divf %7, %8 : vector<1x128xf32>
    %10 = vector.broadcast %9 : vector<1x128xf32> to vector<162x128xf32>
    %11 = arith.subf %5, %10 : vector<162x128xf32>
    %12 = arith.mulf %11, %11 : vector<162x128xf32>
    %cst_7 = arith.constant dense<0.000000e+00> : vector<128xf32>
    %13 = vector.multi_reduction <add>, %12, %cst_7 [0] : vector<162x128xf32> to vector<128xf32>
    %14 = vector.shape_cast %13 : vector<128xf32> to vector<1x128xf32>
    %cst_8 = arith.constant 1.620000e+02 : f32
    %15 = vector.broadcast %cst_8 : f32 to vector<1x128xf32>
    %16 = arith.divf %14, %15 : vector<1x128xf32>
    %17 = vector.broadcast %9 : vector<1x128xf32> to vector<162x128xf32>
    %18 = arith.subf %5, %17 : vector<162x128xf32>
    %cst_9 = arith.constant 9.99999974E-6 : f32
    %19 = vector.broadcast %cst_9 : f32 to vector<1x128xf32>
    %20 = arith.addf %16, %19 : vector<1x128xf32>
    %21 = math.rsqrt %20 : vector<1x128xf32>
    %22 = vector.broadcast %21 : vector<1x128xf32> to vector<162x128xf32>
    %23 = arith.mulf %18, %22 : vector<162x128xf32>
    %c0_10 = arith.constant 0 : index
    %c0_11 = arith.constant 0 : index
    %24 = vector.load %arg4[%c0_10, %c0_11] : memref<1x128xf32, #tpu.memory_space<vmem>>, vector<1x128xf32>
    %25 = vector.broadcast %24 : vector<1x128xf32> to vector<162x128xf32>
    %26 = arith.mulf %23, %25 : vector<162x128xf32>
    %c0_12 = arith.constant 0 : index
    %c0_13 = arith.constant 0 : index
    %27 = vector.load %arg5[%c0_12, %c0_13] : memref<1x128xf32, #tpu.memory_space<vmem>>, vector<1x128xf32>
    %28 = vector.broadcast %27 : vector<1x128xf32> to vector<162x128xf32>
    %29 = arith.addf %26, %28 : vector<162x128xf32>
    %cst_14 = arith.constant 0.000000e+00 : f32
    %30 = vector.broadcast %cst_14 : f32 to vector<162x128xf32>
    %31 = arith.maximumf %29, %30 : vector<162x128xf32>
    %32 = arith.truncf %31 : vector<162x128xf32> to vector<162x128xbf16>
    %c0_15 = arith.constant 0 : index
    %c0_16 = arith.constant 0 : index
    %33 = vector.load %arg6[%c0_15, %c0_16] : memref<162x128xbf16, #tpu.memory_space<vmem>>, vector<162x128xbf16>
    tpu.vector_store %arg6[%c0_15, %c0_16], %32 {strides = array<i32>} : memref<162x128xbf16, #tpu.memory_space<vmem>>, vector<162x128xbf16>,
    return
  }
  func.func @transform_0(%arg0: i32) -> (i32, i32) {
    %c0_i32 = arith.constant 0 : i32
    %c0_i32_0 = arith.constant 0 : i32
    %c0_i32_1 = arith.constant 0 : i32
    return %c0_i32, %c0_i32_0 : i32, i32
  }
  func.func @transform_1(%arg0: i32) -> (i32, i32) {
    %c0_i32 = arith.constant 0 : i32
    %c0_i32_0 = arith.constant 0 : i32
    %c0_i32_1 = arith.constant 0 : i32
    return %c0_i32, %c0_i32_0 : i32, i32
  }
  func.func @transform_2(%arg0: i32) -> (i32, i32) {
    %c0_i32 = arith.constant 0 : i32
    %c0_i32_0 = arith.constant 0 : i32
    %c0_i32_1 = arith.constant 0 : i32
    return %c0_i32, %c0_i32_0 : i32, i32
  }
  func.func @transform_3(%arg0: i32) -> (i32, i32) {
    %c0_i32 = arith.constant 0 : i32
    %c0_i32_0 = arith.constant 0 : i32
    %c0_i32_1 = arith.constant 0 : i32
    return %c0_i32, %c0_i32_0 : i32, i32
  }
  func.func @transform_4(%arg0: i32) -> (i32, i32) {
    %c0_i32 = arith.constant 0 : i32
    %c0_i32_0 = arith.constant 0 : i32
    %c0_i32_1 = arith.constant 0 : i32
    return %c0_i32, %c0_i32_0 : i32, i32
  }
  func.func @transform_5(%arg0: i32) -> (i32, i32) {
    %c0_i32 = arith.constant 0 : i32
    %c0_i32_0 = arith.constant 0 : i32
    %c0_i32_1 = arith.constant 0 : i32
    return %c0_i32, %c0_i32_0 : i32, i32
  }
}

module attributes {stable_mosaic.version = 11 : i64} {
  func.func @_conv_bn_relu_kernel(%arg0: i32, %arg1: memref<162x576xbf16, #tpu.memory_space<vmem>>, %arg2: memref<576x128xbf16, #tpu.memory_space<vmem>>, %arg3: memref<1x128xf32, #tpu.memory_space<vmem>>, %arg4: memref<1x128xf32, #tpu.memory_space<vmem>>, %arg5: memref<1x128xf32, #tpu.memory_space<vmem>>, %arg6: memref<162x128xbf16, #tpu.memory_space<vmem>>) attributes {dimension_semantics = [#tpu.dimension_semantics<arbitrary>], iteration_bounds = array<i64: 1>, scalar_prefetch = 0 : i64, scratch_operands = 0 : i64, tpu.core_type = #tpu.core_type<tc>, window_params = [{pipeline_mode = #tpu.pipeline_mode<synchronous>, transform_indices = @transform_0, window_bounds = array<i64: 162, 576>}, {pipeline_mode = #tpu.pipeline_mode<synchronous>, transform_indices = @transform_1, window_bounds = array<i64: 576, 128>}, {pipeline_mode = #tpu.pipeline_mode<synchronous>, transform_indices = @transform_2, window_bounds = array<i64: 1, 128>}, {pipeline_mode = #tpu.pipeline_mode<synchronous>, transform_indices = @transform_3, window_bounds = array<i64: 1, 128>}, {pipeline_mode = #tpu.pipeline_mode<synchronous>, transform_indices = @transform_4, window_bounds = array<i64: 1, 128>}, {pipeline_mode = #tpu.pipeline_mode<synchronous>, transform_indices = @transform_5, window_bounds = array<i64: 162, 128>}]} {
    %c0 = arith.constant 0 : index
    %c0_0 = arith.constant 0 : index
    %0 = vector.load %arg1[%c0, %c0_0] : memref<162x576xbf16, #tpu.memory_space<vmem>>, vector<162x576xbf16>
    %c0_1 = arith.constant 0 : index
    %c0_2 = arith.constant 0 : index
    %1 = vector.load %arg2[%c0_1, %c0_2] : memref<576x128xbf16, #tpu.memory_space<vmem>>, vector<576x128xbf16>
    %cst = arith.constant dense<0.000000e+00> : vector<162x128xf32>
    %2 = tpu.matmul %0, %1, %cst {dimension_numbers = #tpu.dot_dimension_numbers<[1], [0], [0], [1], [0, 0, 1, 1], [], []>} : vector<162x576xbf16>, vector<576x128xbf16>, vector<162x128xf32> -> vector<162x128xf32>
    %c0_3 = arith.constant 0 : index
    %c0_4 = arith.constant 0 : index
    %3 = vector.load %arg3[%c0_3, %c0_4] : memref<1x128xf32, #tpu.memory_space<vmem>>, vector<1x128xf32>
    %4 = vector.broadcast %3 : vector<1x128xf32> to vector<162x128xf32>
    %5 = arith.addf %2, %4 : vector<162x128xf32>
    %cst_5 = arith.constant dense<0.000000e+00> : vector<128xf32>
    %6 = vector.multi_reduction <add>, %5, %cst_5 [0] : vector<162x128xf32> to vector<128xf32>
    %7 = vector.shape_cast %6 : vector<128xf32> to vector<1x128xf32>
    %cst_6 = arith.constant 1.620000e+02 : f32
    %8 = vector.broadcast %cst_6 : f32 to vector<1x128xf32>
    %9 = arith.divf %7, %8 : vector<1x128xf32>
    %10 = vector.broadcast %9 : vector<1x128xf32> to vector<162x128xf32>
    %11 = arith.subf %5, %10 : vector<162x128xf32>
    %12 = arith.mulf %11, %11 : vector<162x128xf32>
    %cst_7 = arith.constant dense<0.000000e+00> : vector<128xf32>
    %13 = vector.multi_reduction <add>, %12, %cst_7 [0] : vector<162x128xf32> to vector<128xf32>
    %14 = vector.shape_cast %13 : vector<128xf32> to vector<1x128xf32>
    %cst_8 = arith.constant 1.620000e+02 : f32
    %15 = vector.broadcast %cst_8 : f32 to vector<1x128xf32>
    %16 = arith.divf %14, %15 : vector<1x128xf32>
    %17 = vector.broadcast %9 : vector<1x128xf32> to vector<162x128xf32>
    %18 = arith.subf %5, %17 : vector<162x128xf32>
    %cst_9 = arith.constant 9.99999974E-6 : f32
    %19 = vector.broadcast %cst_9 : f32 to vector<1x128xf32>
    %20 = arith.addf %16, %19 : vector<1x128xf32>
    %21 = math.rsqrt %20 : vector<1x128xf32>
    %22 = vector.broadcast %21 : vector<1x128xf32> to vector<162x128xf32>
    %23 = arith.mulf %18, %22 : vector<162x128xf32>
    %c0_10 = arith.constant 0 : index
    %c0_11 = arith.constant 0 : index
    %24 = vector.load %arg4[%c0_10, %c0_11] : memref<1x128xf32, #tpu.memory_space<vmem>>, vector<1x128xf32>
    %25 = vector.broadcast %24 : vector<1x128xf32> to vector<162x128xf32>
    %26 = arith.mulf %23, %25 : vector<162x128xf32>
    %c0_12 = arith.constant 0 : index
    %c0_13 = arith.constant 0 : index
    %27 = vector.load %arg5[%c0_12, %c0_13] : memref<1x128xf32, #tpu.memory_space<vmem>>, vector<1x128xf32>
    %28 = vector.broadcast %27 : vector<1x128xf32> to vector<162x128xf32>
    %29 = arith.addf %26, %28 : vector<162x128xf32>
    %cst_14 = arith.constant 0.000000e+00 : f32
    %30 = vector.broadcast %cst_14 : f32 to vector<162x128xf32>
    %31 = arith.maximumf %29, %30 : vector<162x128xf32>
    %32 = arith.truncf %31 : vector<162x128xf32> to vector<162x128xbf16>
    %c0_15 = arith.constant 0 : index
    %c0_16 = arith.constant 0 : index
    %33 = vector.load %arg6[%c0_15, %c0_16] : memref<162x128xbf16, #tpu.memory_space<vmem>>, vector<162x128xbf16>
    tpu.vector_store %arg6[%c0_15, %c0_16], %32 {strides = array<i32>} : memref<162x128xbf16, #tpu.memory_space<vmem>>, vector<162x128xbf16>,
    return
  }
  func.func @transform_0(%arg0: i32) -> (i32, i32) {
    %c0_i32 = arith.constant 0 : i32
    %c0_i32_0 = arith.constant 0 : i32
    %c0_i32_1 = arith.constant 0 : i32
    return %c0_i32, %c0_i32_0 : i32, i32
  }
  func.func @transform_1(%arg0: i32) -> (i32, i32) {
    %c0_i32 = arith.constant 0 : i32
    %c0_i32_0 = arith.constant 0 : i32
    %c0_i32_1 = arith.constant 0 : i32
    return %c0_i32, %c0_i32_0 : i32, i32
  }
  func.func @transform_2(%arg0: i32) -> (i32, i32) {
    %c0_i32 = arith.constant 0 : i32
    %c0_i32_0 = arith.constant 0 : i32
    %c0_i32_1 = arith.constant 0 : i32
    return %c0_i32, %c0_i32_0 : i32, i32
  }
  func.func @transform_3(%arg0: i32) -> (i32, i32) {
    %c0_i32 = arith.constant 0 : i32
    %c0_i32_0 = arith.constant 0 : i32
    %c0_i32_1 = arith.constant 0 : i32
    return %c0_i32, %c0_i32_0 : i32, i32
  }
  func.func @transform_4(%arg0: i32) -> (i32, i32) {
    %c0_i32 = arith.constant 0 : i32
    %c0_i32_0 = arith.constant 0 : i32
    %c0_i32_1 = arith.constant 0 : i32
    return %c0_i32, %c0_i32_0 : i32, i32
  }
  func.func @transform_5(%arg0: i32) -> (i32, i32) {
    %c0_i32 = arith.constant 0 : i32
    %c0_i32_0 = arith.constant 0 : i32
    %c0_i32_1 = arith.constant 0 : i32
    return %c0_i32, %c0_i32_0 : i32, i32
  }
}

module attributes {stable_mosaic.version = 11 : i64} {
  func.func @_dueling_kernel(%arg0: i32, %arg1: i32, %arg2: memref<2x3456xbf16, #tpu.memory_space<vmem>>, %arg3: memref<3456x512xi8, #tpu.memory_space<vmem>>, %arg4: memref<1x512xf32, #tpu.memory_space<vmem>>, %arg5: memref<1x512xf32, #tpu.memory_space<vmem>>, %arg6: memref<1x512x128xf32, #tpu.memory_space<vmem>>, %arg7: memref<1x1x128xf32, #tpu.memory_space<vmem>>, %arg8: memref<1x2x128xf32, #tpu.memory_space<vmem>>, %arg9: memref<2x512xf32, #tpu.memory_space<vmem>>) attributes {dimension_semantics = [#tpu.dimension_semantics<parallel>, #tpu.dimension_semantics<arbitrary>], iteration_bounds = array<i64: 2, 3>, scalar_prefetch = 0 : i64, scratch_operands = 1 : i64, tpu.core_type = #tpu.core_type<tc>, window_params = [{transform_indices = @transform_0, window_bounds = array<i64: 2, 3456>}, {transform_indices = @transform_1, window_bounds = array<i64: 3456, 512>}, {transform_indices = @transform_2, window_bounds = array<i64: 1, 512>}, {transform_indices = @transform_3, window_bounds = array<i64: 1, 512>}, {transform_indices = @transform_4, window_bounds = array<i64: 1, 512, 128>}, {transform_indices = @transform_5, window_bounds = array<i64: 1, 1, 128>}, {transform_indices = @transform_6, window_bounds = array<i64: 1, 2, 128>}]} {
    %c0_i32 = arith.constant 0 : i32
    %0 = arith.cmpi eq, %arg1, %c0_i32 : i32
    %1 = arith.extui %0 : i1 to i32
    %c0_i32_0 = arith.constant 0 : i32
    %2 = arith.cmpi ne, %1, %c0_i32_0 : i32
    scf.if %2 {
      %cst_9 = arith.constant 0.000000e+00 : f32
      %14 = vector.broadcast %cst_9 : f32 to vector<2x512xf32>
      %c0_10 = arith.constant 0 : index
      %c0_11 = arith.constant 0 : index
      %15 = vector.load %arg9[%c0_10, %c0_11] : memref<2x512xf32, #tpu.memory_space<vmem>>, vector<2x512xf32>
      tpu.vector_store %arg9[%c0_10, %c0_11], %14 {strides = array<i32>} : memref<2x512xf32, #tpu.memory_space<vmem>>, vector<2x512xf32>,
    } else {
    }
    %c0 = arith.constant 0 : index
    %c0_1 = arith.constant 0 : index
    %3 = vector.load %arg3[%c0, %c0_1] : memref<3456x512xi8, #tpu.memory_space<vmem>>, vector<3456x512xi8>
    %4 = arith.sitofp %3 : vector<3456x512xi8> to vector<3456x512xf32>
    %5 = arith.truncf %4 : vector<3456x512xf32> to vector<3456x512xbf16>
    %c0_2 = arith.constant 0 : index
    %c0_3 = arith.constant 0 : index
    %6 = vector.load %arg9[%c0_2, %c0_3] : memref<2x512xf32, #tpu.memory_space<vmem>>, vector<2x512xf32>
    %c0_4 = arith.constant 0 : index
    %c0_5 = arith.constant 0 : index
    %7 = vector.load %arg2[%c0_4, %c0_5] : memref<2x3456xbf16, #tpu.memory_space<vmem>>, vector<2x3456xbf16>
    %cst = arith.constant dense<0.000000e+00> : vector<2x512xf32>
    %8 = tpu.matmul %7, %5, %cst {dimension_numbers = #tpu.dot_dimension_numbers<[1], [0], [0], [1], [0, 0, 1, 1], [], []>} : vector<2x3456xbf16>, vector<3456x512xbf16>, vector<2x512xf32> -> vector<2x512xf32>
    %9 = arith.addf %6, %8 : vector<2x512xf32>
    %c0_6 = arith.constant 0 : index
    %c0_7 = arith.constant 0 : index
    %10 = vector.load %arg9[%c0_6, %c0_7] : memref<2x512xf32, #tpu.memory_space<vmem>>, vector<2x512xf32>
    tpu.vector_store %arg9[%c0_6, %c0_7], %9 {strides = array<i32>} : memref<2x512xf32, #tpu.memory_space<vmem>>, vector<2x512xf32>,
    %c2_i32 = arith.constant 2 : i32
    %11 = arith.cmpi eq, %arg1, %c2_i32 : i32
    %12 = arith.extui %11 : i1 to i32
    %c0_i32_8 = arith.constant 0 : i32
    %13 = arith.cmpi ne, %12, %c0_i32_8 : i32
    scf.if %13 {
      %c0_9 = arith.constant 0 : index
      %c0_10 = arith.constant 0 : index
      %14 = vector.load %arg9[%c0_9, %c0_10] : memref<2x512xf32, #tpu.memory_space<vmem>>, vector<2x512xf32>
      %c0_11 = arith.constant 0 : index
      %c0_12 = arith.constant 0 : index
      %15 = vector.load %arg4[%c0_11, %c0_12] : memref<1x512xf32, #tpu.memory_space<vmem>>, vector<1x512xf32>
      %16 = vector.broadcast %15 : vector<1x512xf32> to vector<2x512xf32>
      %17 = arith.mulf %14, %16 : vector<2x512xf32>
      %c0_13 = arith.constant 0 : index
      %c0_14 = arith.constant 0 : index
      %18 = vector.load %arg5[%c0_13, %c0_14] : memref<1x512xf32, #tpu.memory_space<vmem>>, vector<1x512xf32>
      %19 = vector.broadcast %18 : vector<1x512xf32> to vector<2x512xf32>
      %20 = arith.addf %17, %19 : vector<2x512xf32>
      %cst_15 = arith.constant 0.000000e+00 : f32
      %21 = vector.broadcast %cst_15 : f32 to vector<2x512xf32>
      %22 = arith.maximumf %20, %21 : vector<2x512xf32>
      %c0_16 = arith.constant 0 : index
      %c0_17 = arith.constant 0 : index
      %c0_18 = arith.constant 0 : index
      %23 = vector.load %arg6[%c0_16, %c0_17, %c0_18] : memref<1x512x128xf32, #tpu.memory_space<vmem>>, vector<1x512x128xf32>
      %24 = vector.shape_cast %23 : vector<1x512x128xf32> to vector<512x128xf32>
      %cst_19 = arith.constant dense<0.000000e+00> : vector<2x128xf32>
      %25 = tpu.matmul %22, %24, %cst_19 {dimension_numbers = #tpu.dot_dimension_numbers<[1], [0], [0], [1], [0, 0, 1, 1], [], []>} : vector<2x512xf32>, vector<512x128xf32>, vector<2x128xf32> -> vector<2x128xf32>
      %c0_20 = arith.constant 0 : index
      %c0_21 = arith.constant 0 : index
      %c0_22 = arith.constant 0 : index
      %26 = vector.load %arg7[%c0_20, %c0_21, %c0_22] : memref<1x1x128xf32, #tpu.memory_space<vmem>>, vector<1x1x128xf32>
      %27 = vector.shape_cast %26 : vector<1x1x128xf32> to vector<1x128xf32>
      %28 = vector.broadcast %27 : vector<1x128xf32> to vector<2x128xf32>
      %29 = arith.addf %25, %28 : vector<2x128xf32>
      %c0_23 = arith.constant 0 : index
      %c0_24 = arith.constant 0 : index
      %c0_25 = arith.constant 0 : index
      %30 = vector.load %arg8[%c0_23, %c0_24, %c0_25] : memref<1x2x128xf32, #tpu.memory_space<vmem>>, vector<1x2x128xf32>
      %31 = vector.shape_cast %30 : vector<1x2x128xf32> to vector<2x128xf32>
      %32 = vector.shape_cast %29 : vector<2x128xf32> to vector<1x2x128xf32>
      tpu.vector_store %arg8[%c0_23, %c0_24, %c0_25], %32 {strides = array<i32>} : memref<1x2x128xf32, #tpu.memory_space<vmem>>, vector<1x2x128xf32>,
    } else {
    }
    return
  }
  func.func @transform_0(%arg0: i32, %arg1: i32) -> (i32, i32) {
    %c0_i32 = arith.constant 0 : i32
    %c0_i32_0 = arith.constant 0 : i32
    return %c0_i32, %arg1 : i32, i32
  }
  func.func @transform_1(%arg0: i32, %arg1: i32) -> (i32, i32) {
    %c0_i32 = arith.constant 0 : i32
    return %arg1, %arg0 : i32, i32
  }
  func.func @transform_2(%arg0: i32, %arg1: i32) -> (i32, i32) {
    %c0_i32 = arith.constant 0 : i32
    %c0_i32_0 = arith.constant 0 : i32
    return %c0_i32, %arg0 : i32, i32
  }
  func.func @transform_3(%arg0: i32, %arg1: i32) -> (i32, i32) {
    %c0_i32 = arith.constant 0 : i32
    %c0_i32_0 = arith.constant 0 : i32
    return %c0_i32, %arg0 : i32, i32
  }
  func.func @transform_4(%arg0: i32, %arg1: i32) -> (i32, i32, i32) {
    %c0_i32 = arith.constant 0 : i32
    %c0_i32_0 = arith.constant 0 : i32
    %c0_i32_1 = arith.constant 0 : i32
    return %arg0, %c0_i32, %c0_i32_0 : i32, i32, i32
  }
  func.func @transform_5(%arg0: i32, %arg1: i32) -> (i32, i32, i32) {
    %c0_i32 = arith.constant 0 : i32
    %c0_i32_0 = arith.constant 0 : i32
    %c0_i32_1 = arith.constant 0 : i32
    return %arg0, %c0_i32, %c0_i32_0 : i32, i32, i32
  }
  func.func @transform_6(%arg0: i32, %arg1: i32) -> (i32, i32, i32) {
    %c0_i32 = arith.constant 0 : i32
    %c0_i32_0 = arith.constant 0 : i32
    %c0_i32_1 = arith.constant 0 : i32
    return %arg0, %c0_i32, %c0_i32_0 : i32, i32, i32
  }
}

</mosaic_0001>

<bundles_post_ra>
// kernel: dueling_qnet_forward.4
= control target key start
LH: loop header
LB: loop body
LE: loop exit
PB: predicated region body
PF: predicated region fallthrough
CT: control target
= control target key end

     0   :  { %v3074_v0 = vmov 0   ;;  %vm1193_vm0 = vcmask 1041408   ;;  %s5965_s1 = inlined_call_operand.vmem [shape: bf16[256,128], index: 1, kind: input, shape index: {}]   ;;  %s5966_s0 = inlined_call_operand.vmem [shape: bf16[722,256], index: 0, kind: input, shape index: {}]   ;;  %s5967_s2 = inlined_call_operand.vmem [shape: f32[1,128], index: 2, kind: input, shape index: {}]   ;;  %s5968_s3 = inlined_call_operand.vmem [shape: f32[1,128], index: 3, kind: input, shape index: {}]   ;;  %s5969_s4 = inlined_call_operand.vmem [shape: f32[1,128], index: 4, kind: input, shape index: {}]   ;;  %s5970_s5 = inlined_call_operand.vmem [shape: bf16[722,128], index: 5, kind: output, shape index: {}]  }
   0x1   :  { %704 = vmatprep.subr.bf16.mxu0 %v3074_v0  ;;  %v2919_v1 = vld [vmem:[%s5965_s1] sm:$0xff]   ;;  %2886 = vmatprep.subr.bf16.mxu1 %v3074_v0  ;;  %v2920_v2 = vld [vmem:[%s5965_s1 + $0x8] sm:$0xff]   ;;  %v2921_v3 = vld [vmem:[%s5965_s1 + $0x10] sm:$0xff]  }
   0x2   :  { %705 = vmatpush1.bf16.msra.mxu0 %v2919_v1  ;;  %2902 = vmatpush1.bf16.msra.mxu1 %v2919_v1  ;;  %v2922_v4 = vld [vmem:[%s5965_s1 + $0x18] sm:$0xff]   ;;  %v2923_v5 = vld [vmem:[%s5965_s1 + $0x20] sm:$0xff]   ;;  %v2924_v7 = vld [vmem:[%s5965_s1 + $0x28] sm:$0xff]  }
   0x3   :  { %706 = vmatprep.subr.bf16.mxu0 %v3074_v0  ;;  %2887 = vmatprep.subr.bf16.mxu1 %v3074_v0  ;;  %v2937_v6 = vld [vmem:[%s5966_s0 + $0x4] ss:$8 sps:$4 sm:$0xff]   ;;  %v2925_v8 = vld [vmem:[%s5965_s1 + $0x30] sm:$0xff]   ;;  %v2926_v9 = vld [vmem:[%s5965_s1 + $0x38] sm:$0xff]  }
   0x4   :  { %736 = vmatprep.mubr.bf16.mxu0 %v2937_v6  ;;  %v2927_v10 = vld [vmem:[%s5965_s1 + $0x40] sm:$0xff]   ;;  %v2972_v11 = vld [vmem:[%s5966_s0 + $0x174] ss:$8 sps:$4 sm:$0xff]   ;;  %v2928_v12 = vld [vmem:[%s5965_s1 + $0x48] sm:$0xff]  }
   0x5   :  { %920 = vmatprep.mubr.bf16.mxu1 %v2972_v11  ;;  %v2929_v13 = vld [vmem:[%s5965_s1 + $0x50] sm:$0xff]   ;;  %v2930_v14 = vld [vmem:[%s5965_s1 + $0x58] sm:$0xff]   ;;  %v2931_v15 = vld [vmem:[%s5965_s1 + $0x60] sm:$0xff]  }
   0x6   :  { %707 = vmatpush1.bf16.msra.mxu0 %v2920_v2  ;;  %2903 = vmatpush1.bf16.msra.mxu1 %v2920_v2  ;;  %v2932_v16 = vld [vmem:[%s5965_s1 + $0x68] sm:$0xff]   ;;  %v2933_v17 = vld [vmem:[%s5965_s1 + $0x70] sm:$0xff]   ;;  %v2934_v18 = vld [vmem:[%s5965_s1 + $0x78] sm:$0xff]  }
   0x7   :  { %708 = vmatprep.subr.bf16.mxu0 %v3074_v0  ;;  %2888 = vmatprep.subr.bf16.mxu1 %v3074_v0  ;;  %v2935_v19 = vld [vmem:[%s5966_s0] ss:$8 sps:$4 sm:$0xff]   ;;  %v2970_v20 = vld [vmem:[%s5966_s0 + $0x170] ss:$8 sps:$4 sm:$0xff]   ;;  %v2938_v21 = vld [vmem:[%s5966_s0 + $0x14] ss:$8 sps:$4 sm:$0xff]  }
   0x8   :  { %v2976_v22 = vld [vmem:[%s5966_s0 + $0x184] ss:$8 sps:$4 sm:$0xff]   ;;  %v2940_v23 = vld [vmem:[%s5966_s0 + $0x10] ss:$8 sps:$4 sm:$0xff]   ;;  %v2979_v24 = vld [vmem:[%s5966_s0 + $0x180] ss:$8 sps:$4 sm:$0xff]  }
   0x9   :  { %v2941_v25 = vld [vmem:[%s5966_s0 + $0x24] ss:$8 sps:$4 sm:$0xff]   ;;  %v2982_v26 = vld [vmem:[%s5966_s0 + $0x194] ss:$8 sps:$4 sm:$0xff]   ;;  %v2943_v27 = vld [vmem:[%s5966_s0 + $0x20] ss:$8 sps:$4 sm:$0xff]  }
   0xa   :  { %709 = vmatpush1.bf16.msra.mxu0 %v2921_v3  ;;  %2904 = vmatpush1.bf16.msra.mxu1 %v2921_v3  ;;  %v2985_v28 = vld [vmem:[%s5966_s0 + $0x190] ss:$8 sps:$4 sm:$0xff]   ;;  %v2944_v29 = vld [vmem:[%s5966_s0 + $0x34] ss:$8 sps:$4 sm:$0xff]   ;;  %v2988_v30 = vld [vmem:[%s5966_s0 + $0x1a4] ss:$8 sps:$4 sm:$0xff]  }
   0xb   :  { %710 = vmatprep.subr.bf16.mxu0 %v3074_v0  ;;  %2889 = vmatprep.subr.bf16.mxu1 %v3074_v0  ;;  %v2946_v31 = vld [vmem:[%s5966_s0 + $0x30] ss:$8 sps:$4 sm:$0xff]   ;;  %v2991_v32 = vld [vmem:[%s5966_s0 + $0x1a0] ss:$8 sps:$4 sm:$0xff]   ;;  %v2947_v33 = vld [vmem:[%s5966_s0 + $0x44] ss:$8 sps:$4 sm:$0xff]  }
   0xc   :  { %v2994_v34 = vld [vmem:[%s5966_s0 + $0x1b4] ss:$8 sps:$4 sm:$0xff]   ;;  %v2949_v35 = vld [vmem:[%s5966_s0 + $0x40] ss:$8 sps:$4 sm:$0xff]   ;;  %v2997_v36 = vld [vmem:[%s5966_s0 + $0x1b0] ss:$8 sps:$4 sm:$0xff]  }
   0xd   :  { %v2950_v37 = vld [vmem:[%s5966_s0 + $0x54] ss:$8 sps:$4 sm:$0xff]   ;;  %v3000_v38 = vld [vmem:[%s5966_s0 + $0x1c4] ss:$8 sps:$4 sm:$0xff]   ;;  %v2952_v39 = vld [vmem:[%s5966_s0 + $0x50] ss:$8 sps:$4 sm:$0xff]  }
   0xe   :  { %711 = vmatpush1.bf16.msra.mxu0 %v2922_v4  ;;  %2905 = vmatpush1.bf16.msra.mxu1 %v2922_v4  ;;  %v3003_v40 = vld [vmem:[%s5966_s0 + $0x1c0] ss:$8 sps:$4 sm:$0xff]   ;;  %v2953_v41 = vld [vmem:[%s5966_s0 + $0x64] ss:$8 sps:$4 sm:$0xff]   ;;  %v3006_v42 = vld [vmem:[%s5966_s0 + $0x1d4] ss:$8 sps:$4 sm:$0xff]  }
   0xf   :  { %712 = vmatprep.subr.bf16.mxu0 %v3074_v0  ;;  %2890 = vmatprep.subr.bf16.mxu1 %v3074_v0  ;;  %v2955_v43 = vld [vmem:[%s5966_s0 + $0x60] ss:$8 sps:$4 sm:$0xff]   ;;  %v3009_v44 = vld [vmem:[%s5966_s0 + $0x1d0] ss:$8 sps:$4 sm:$0xff]   ;;  %v2956_v45 = vld [vmem:[%s5966_s0 + $0x74] ss:$8 sps:$4 sm:$0xff]  }
  0x10   :  { %v3012_v46 = vld [vmem:[%s5966_s0 + $0x1e4] ss:$8 sps:$4 sm:$0xff]   ;;  %v2958_v47 = vld [vmem:[%s5966_s0 + $0x70] ss:$8 sps:$4 sm:$0xff]   ;;  %v3015_v48 = vld [vmem:[%s5966_s0 + $0x1e0] ss:$8 sps:$4 sm:$0xff]  }
  0x11   :  { %v2959_v49 = vld [vmem:[%s5966_s0 + $0x84] ss:$8 sps:$4 sm:$0xff]   ;;  %v3018_v50 = vld [vmem:[%s5966_s0 + $0x1f4] ss:$8 sps:$4 sm:$0xff]   ;;  %v2961_v51 = vld [vmem:[%s5966_s0 + $0x80] ss:$8 sps:$4 sm:$0xff]  }
  0x12   :  { %713 = vmatpush1.bf16.msra.mxu0 %v2923_v5  ;;  %2906 = vmatpush1.bf16.msra.mxu1 %v2923_v5  ;;  %v3021_v52 = vld [vmem:[%s5966_s0 + $0x1f0] ss:$8 sps:$4 sm:$0xff]   ;;  %v2962_v53 = vld [vmem:[%s5966_s0 + $0x94] ss:$8 sps:$4 sm:$0xff]   ;;  %v3024_v54 = vld [vmem:[%s5966_s0 + $0x204] ss:$8 sps:$4 sm:$0xff]  }
  0x13   :  { %714 = vmatprep.subr.bf16.mxu0 %v3074_v0  ;;  %2891 = vmatprep.subr.bf16.mxu1 %v3074_v0  ;;  %v2964_v55 = vld [vmem:[%s5966_s0 + $0x90] ss:$8 sps:$4 sm:$0xff]   ;;  %v3027_v56 = vld [vmem:[%s5966_s0 + $0x200] ss:$8 sps:$4 sm:$0xff]   ;;  %v2965_v57 = vld [vmem:[%s5966_s0 + $0xa4] ss:$8 sps:$4 sm:$0xff]  }
  0x14   :  { %v3030_v58 = vld [vmem:[%s5966_s0 + $0x214] ss:$8 sps:$4 sm:$0xff]   ;;  %v2967_v59 = vld [vmem:[%s5966_s0 + $0xa0] ss:$8 sps:$4 sm:$0xff]   ;;  %v3033_v60 = vld [vmem:[%s5966_s0 + $0x210] ss:$8 sps:$4 sm:$0xff]  }
  0x15   :  { %v2968_v61 = vld [vmem:[%s5966_s0 + $0xb4] ss:$8 sps:$4 sm:$0xff]   ;;  %v3036_v62 = vld [vmem:[%s5966_s0 + $0x224] ss:$8 sps:$4 sm:$0xff]   ;;  %v2973_v63 = vld [vmem:[%s5966_s0 + $0xb0] ss:$8 sps:$4 sm:$0xff]  }
  0x16   :  { %715 = vmatpush1.bf16.msra.mxu0 %v2924_v7  ;;  %2907 = vmatpush1.bf16.msra.mxu1 %v2924_v7  ;;  %v2974_v1 = vld [vmem:[%s5966_s0 + $0xc4] ss:$8 sps:$4 sm:$0xff]   ;;  %v3040_v2 = vld [vmem:[%s5966_s0 + $0x234] ss:$8 sps:$4 sm:$0xff]   ;;  %v2978_v3 = vld [vmem:[%s5966_s0 + $0xc0] ss:$8 sps:$4 sm:$0xff]  }
  0x17   :  { %716 = vmatprep.subr.bf16.mxu0 %v3074_v0  ;;  %2892 = vmatprep.subr.bf16.mxu1 %v3074_v0  ;;  %v3042_v4 = vld [vmem:[%s5966_s0 + $0x230] ss:$8 sps:$4 sm:$0xff]   ;;  %v2980_v5 = vld [vmem:[%s5966_s0 + $0xd4] ss:$8 sps:$4 sm:$0xff]   ;;  %v3043_v6 = vld [vmem:[%s5966_s0 + $0x244] ss:$8 sps:$4 sm:$0xff]  }
  0x18   :  { %v2984_v7 = vld [vmem:[%s5966_s0 + $0xd0] ss:$8 sps:$4 sm:$0xff]   ;;  %v2990_v11 = vld [vmem:[%s5966_s0 + $0xe0] ss:$8 sps:$4 sm:$0xff]  }
  0x1a   :  { %717 = vmatpush1.bf16.msra.mxu0 %v2925_v8  ;;  %2908 = vmatpush1.bf16.msra.mxu1 %v2925_v8  ;;  %v3045_v8 = vld [vmem:[%s5966_s0 + $0x240] ss:$8 sps:$4 sm:$0xff]  }
  0x1b   :  { %718 = vmatprep.subr.bf16.mxu0 %v3074_v0  ;;  %2893 = vmatprep.subr.bf16.mxu1 %v3074_v0 }
  0x1e   :  { %719 = vmatpush1.bf16.msra.mxu0 %v2926_v9  ;;  %2909 = vmatpush1.bf16.msra.mxu1 %v2926_v9  ;;  %v2986_v9 = vld [vmem:[%s5966_s0 + $0xe4] ss:$8 sps:$4 sm:$0xff]  }
  0x1f   :  { %720 = vmatprep.subr.bf16.mxu0 %v3074_v0  ;;  %2894 = vmatprep.subr.bf16.mxu1 %v3074_v0 }
  0x22   :  { %721 = vmatpush1.bf16.msra.mxu0 %v2927_v10  ;;  %2910 = vmatpush1.bf16.msra.mxu1 %v2927_v10  ;;  %v3046_v10 = vld [vmem:[%s5966_s0 + $0x254] ss:$8 sps:$4 sm:$0xff]  }
  0x23   :  { %722 = vmatprep.subr.bf16.mxu0 %v3074_v0  ;;  %2895 = vmatprep.subr.bf16.mxu1 %v3074_v0 }
  0x26   :  { %723 = vmatpush1.bf16.msra.mxu0 %v2928_v12  ;;  %2911 = vmatpush1.bf16.msra.mxu1 %v2928_v12  ;;  %v3048_v12 = vld [vmem:[%s5966_s0 + $0x250] ss:$8 sps:$4 sm:$0xff]  }
  0x27   :  { %724 = vmatprep.subr.bf16.mxu0 %v3074_v0  ;;  %2896 = vmatprep.subr.bf16.mxu1 %v3074_v0 }
  0x2a   :  { %725 = vmatpush1.bf16.msra.mxu0 %v2929_v13  ;;  %2912 = vmatpush1.bf16.msra.mxu1 %v2929_v13  ;;  %v2992_v13 = vld [vmem:[%s5966_s0 + $0xf4] ss:$8 sps:$4 sm:$0xff]  }
  0x2b   :  { %726 = vmatprep.subr.bf16.mxu0 %v3074_v0  ;;  %2897 = vmatprep.subr.bf16.mxu1 %v3074_v0 }
  0x2e   :  { %727 = vmatpush1.bf16.msra.mxu0 %v2930_v14  ;;  %2913 = vmatpush1.bf16.msra.mxu1 %v2930_v14  ;;  %v3049_v14 = vld [vmem:[%s5966_s0 + $0x264] ss:$8 sps:$4 sm:$0xff]  }
  0x2f   :  { %728 = vmatprep.subr.bf16.mxu0 %v3074_v0  ;;  %2898 = vmatprep.subr.bf16.mxu1 %v3074_v0 }
  0x32   :  { %729 = vmatpush1.bf16.msra.mxu0 %v2931_v15  ;;  %2914 = vmatpush1.bf16.msra.mxu1 %v2931_v15  ;;  %v2996_v15 = vld [vmem:[%s5966_s0 + $0xf0] ss:$8 sps:$4 sm:$0xff]  }
  0x33   :  { %730 = vmatprep.subr.bf16.mxu0 %v3074_v0  ;;  %2899 = vmatprep.subr.bf16.mxu1 %v3074_v0 }
  0x36   :  { %731 = vmatpush1.bf16.msra.mxu0 %v2932_v16  ;;  %2915 = vmatpush1.bf16.msra.mxu1 %v2932_v16  ;;  %v3051_v16 = vld [vmem:[%s5966_s0 + $0x260] ss:$8 sps:$4 sm:$0xff]  }
  0x37   :  { %732 = vmatprep.subr.bf16.mxu0 %v3074_v0  ;;  %2900 = vmatprep.subr.bf16.mxu1 %v3074_v0 }
  0x3a   :  { %733 = vmatpush1.bf16.msra.mxu0 %v2933_v17  ;;  %2916 = vmatpush1.bf16.msra.mxu1 %v2933_v17  ;;  %v2998_v17 = vld [vmem:[%s5966_s0 + $0x104] ss:$8 sps:$4 sm:$0xff]  }
  0x3b   :  { %734 = vmatprep.subr.bf16.mxu0 %v3074_v0  ;;  %2901 = vmatprep.subr.bf16.mxu1 %v3074_v0  ;;  %v3039_v0 = vld [vmem:[%s5966_s0 + $0x220] ss:$8 sps:$4 sm:$0xff]  }
  0x3e   :  { %735 = vmatpush1.bf16.msra.mxu0 %v2934_v18  ;;  %2917 = vmatpush1.bf16.msra.mxu1 %v2934_v18  ;;  %v3052_v18 = vld [vmem:[%s5966_s0 + $0x274] ss:$8 sps:$4 sm:$0xff]  }
  0x41   :  { %737 = vmatmul.mubr.bf16.vlgmr.msra.gmra.mrb[0].mxu0 %v2935_v19  ;;  %921 = vmatmul.mubr.bf16.vlgmr.msra.gmra.mrb[0].mxu1 %v2970_v20  ;;  %v3002_v19 = vld [vmem:[%s5966_s0 + $0x100] ss:$8 sps:$4 sm:$0xff]   ;;  %v3054_v20 = vld [vmem:[%s5966_s0 + $0x270] ss:$8 sps:$4 sm:$0xff]  }
  0x42   :  { %744 = vmatprep.mubr.bf16.mxu0 %v2938_v21  ;;  %928 = vmatprep.mubr.bf16.mxu1 %v2976_v22  ;;  %v3004_v21 = vld [vmem:[%s5966_s0 + $0x114] ss:$8 sps:$4 sm:$0xff]   ;;  %v3055_v22 = vld [vmem:[%s5966_s0 + $0x284] ss:$8 sps:$4 sm:$0xff]  }
  0x49   :  { %745 = vmatmul.mubr.bf16.gmra.mrb[4].mxu0 %v2940_v23  ;;  %929 = vmatmul.mubr.bf16.gmra.mrb[4].mxu1 %v2979_v24  ;;  %v3008_v23 = vld [vmem:[%s5966_s0 + $0x110] ss:$8 sps:$4 sm:$0xff]   ;;  %v3057_v24 = vld [vmem:[%s5966_s0 + $0x280] ss:$8 sps:$4 sm:$0xff]  }
  0x4a   :  { %752 = vmatprep.mubr.bf16.mxu0 %v2941_v25  ;;  %936 = vmatprep.mubr.bf16.mxu1 %v2982_v26  ;;  %v3010_v25 = vld [vmem:[%s5966_s0 + $0x124] ss:$8 sps:$4 sm:$0xff]   ;;  %v3058_v26 = vld [vmem:[%s5966_s0 + $0x294] ss:$8 sps:$4 sm:$0xff]  }
  0x51   :  { %753 = vmatmul.mubr.bf16.gmra.mrb[8].mxu0 %v2943_v27  ;;  %937 = vmatmul.mubr.bf16.gmra.mrb[8].mxu1 %v2985_v28  ;;  %v3014_v27 = vld [vmem:[%s5966_s0 + $0x120] ss:$8 sps:$4 sm:$0xff]   ;;  %v3060_v28 = vld [vmem:[%s5966_s0 + $0x290] ss:$8 sps:$4 sm:$0xff]  }
  0x52   :  { %760 = vmatprep.mubr.bf16.mxu0 %v2944_v29  ;;  %944 = vmatprep.mubr.bf16.mxu1 %v2988_v30  ;;  %v3016_v29 = vld [vmem:[%s5966_s0 + $0x134] ss:$8 sps:$4 sm:$0xff]   ;;  %v3061_v30 = vld [vmem:[%s5966_s0 + $0x2a4] ss:$8 sps:$4 sm:$0xff]  }
  0x59   :  { %761 = vmatmul.mubr.bf16.gmra.mrb[12].mxu0 %v2946_v31  ;;  %945 = vmatmul.mubr.bf16.gmra.mrb[12].mxu1 %v2991_v32  ;;  %v3020_v31 = vld [vmem:[%s5966_s0 + $0x130] ss:$8 sps:$4 sm:$0xff]   ;;  %v3063_v32 = vld [vmem:[%s5966_s0 + $0x2a0] ss:$8 sps:$4 sm:$0xff]  }
  0x5a   :  { %768 = vmatprep.mubr.bf16.mxu0 %v2947_v33  ;;  %952 = vmatprep.mubr.bf16.mxu1 %v2994_v34  ;;  %v3022_v33 = vld [vmem:[%s5966_s0 + $0x144] ss:$8 sps:$4 sm:$0xff]   ;;  %v3064_v34 = vld [vmem:[%s5966_s0 + $0x2b4] ss:$8 sps:$4 sm:$0xff]  }
  0x61   :  { %769 = vmatmul.mubr.bf16.gmra.mrb[16].mxu0 %v2949_v35  ;;  %953 = vmatmul.mubr.bf16.gmra.mrb[16].mxu1 %v2997_v36  ;;  %v3026_v35 = vld [vmem:[%s5966_s0 + $0x140] ss:$8 sps:$4 sm:$0xff]   ;;  %v3066_v36 = vld [vmem:[%s5966_s0 + $0x2b0] ss:$8 sps:$4 sm:$0xff]  }
  0x62   :  { %776 = vmatprep.mubr.bf16.mxu0 %v2950_v37  ;;  %960 = vmatprep.mubr.bf16.mxu1 %v3000_v38  ;;  %v3028_v37 = vld [vmem:[%s5966_s0 + $0x154] ss:$8 sps:$4 sm:$0xff]   ;;  %v3067_v38 = vld [vmem:[%s5966_s0 + $0x2c4] ss:$8 sps:$4 sm:$0xff]  }
  0x69   :  { %777 = vmatmul.mubr.bf16.gmra.mrb[20].mxu0 %v2952_v39  ;;  %961 = vmatmul.mubr.bf16.gmra.mrb[20].mxu1 %v3003_v40  ;;  %v111_v39 = vld [vmem:[%s5966_s0 + $0x2d0] sm:$0x11] }
  0x6a   :  { %784 = vmatprep.mubr.bf16.mxu0 %v2953_v41  ;;  %968 = vmatprep.mubr.bf16.mxu1 %v3006_v42  ;;  %v3032_v40 = vld [vmem:[%s5966_s0 + $0x150] ss:$8 sps:$4 sm:$0xff]   ;;  %v3069_v41 = vld [vmem:[%s5966_s0 + $0x2c0] ss:$8 sps:$4 sm:$0xff]   ;;  %v3034_v42 = vld [vmem:[%s5966_s0 + $0x164] ss:$8 sps:$4 sm:$0xff]  }
  0x71   :  { %785 = vmatmul.mubr.bf16.gmra.mrb[24].mxu0 %v2955_v43  ;;  %969 = vmatmul.mubr.bf16.gmra.mrb[24].mxu1 %v3009_v44  ;;  %v2416_v43 = vcombine.high %v111_v39, %v111_v39  ;;  %v3038_v44 = vld [vmem:[%s5966_s0 + $0x160] ss:$8 sps:$4 sm:$0xff]  }
  0x72   :  { %792 = vmatprep.mubr.bf16.mxu0 %v2956_v45  ;;  %976 = vmatprep.mubr.bf16.mxu1 %v3012_v46  ;;  %v2415_v45 = vcombine.low %v111_v39, %v111_v39 }
  0x79   :  { %793 = vmatmul.mubr.bf16.gmra.mrb[28].mxu0 %v2958_v47  ;;  %977 = vmatmul.mubr.bf16.gmra.mrb[28].mxu1 %v3015_v48 }
  0x7a   :  { %800 = vmatprep.mubr.bf16.mxu0 %v2959_v49  ;;  %984 = vmatprep.mubr.bf16.mxu1 %v3018_v50 }
  0x81   :  { %801 = vmatmul.mubr.bf16.gmra.mrb[32].mxu0 %v2961_v51  ;;  %985 = vmatmul.mubr.bf16.gmra.mrb[32].mxu1 %v3021_v52 }
  0x82   :  { %808 = vmatprep.mubr.bf16.mxu0 %v2962_v53  ;;  %992 = vmatprep.mubr.bf16.mxu1 %v3024_v54 }
  0x89   :  { %809 = vmatmul.mubr.bf16.gmra.mrb[36].mxu0 %v2964_v55  ;;  %993 = vmatmul.mubr.bf16.gmra.mrb[36].mxu1 %v3027_v56 }
  0x8a   :  { %816 = vmatprep.mubr.bf16.mxu0 %v2965_v57  ;;  %1000 = vmatprep.mubr.bf16.mxu1 %v3030_v58 }
  0x91   :  { %817 = vmatmul.mubr.bf16.gmra.mrb[40].mxu0 %v2967_v59  ;;  %1001 = vmatmul.mubr.bf16.gmra.mrb[40].mxu1 %v3033_v60 }
  0x92   :  { %824 = vmatprep.mubr.bf16.mxu0 %v2968_v61  ;;  %1008 = vmatprep.mubr.bf16.mxu1 %v3036_v62 }
  0x99   :  { %825 = vmatmul.mubr.bf16.gmra.mrb[44].mxu0 %v2973_v63  ;;  %1009 = vmatmul.mubr.bf16.gmra.mrb[44].mxu1 %v3039_v0 }
  0x9a   :  { %832 = vmatprep.mubr.bf16.mxu0 %v2974_v1  ;;  %1016 = vmatprep.mubr.bf16.mxu1 %v3040_v2 }
  0xa1   :  { %833 = vmatmul.mubr.bf16.gmra.mrb[48].mxu0 %v2978_v3  ;;  %1017 = vmatmul.mubr.bf16.gmra.mrb[48].mxu1 %v3042_v4 }
  0xa2   :  { %840 = vmatprep.mubr.bf16.mxu0 %v2980_v5  ;;  %1024 = vmatprep.mubr.bf16.mxu1 %v3043_v6 }
  0xa9   :  { %841 = vmatmul.mubr.bf16.gmra.mrb[52].mxu0 %v2984_v7  ;;  %1025 = vmatmul.mubr.bf16.gmra.mrb[52].mxu1 %v3045_v8 }
  0xaa   :  { %848 = vmatprep.mubr.bf16.mxu0 %v2986_v9  ;;  %1032 = vmatprep.mubr.bf16.mxu1 %v3046_v10 }
  0xb1   :  { %849 = vmatmul.mubr.bf16.gmra.mrb[56].mxu0 %v2990_v11  ;;  %1033 = vmatmul.mubr.bf16.gmra.mrb[56].mxu1 %v3048_v12 }
  0xb2   :  { %856 = vmatprep.mubr.bf16.mxu0 %v2992_v13  ;;  %1040 = vmatprep.mubr.bf16.mxu1 %v3049_v14 }
  0xb9   :  { %857 = vmatmul.mubr.bf16.gmra.mrb[60].mxu0 %v2996_v15  ;;  %1041 = vmatmul.mubr.bf16.gmra.mrb[60].mxu1 %v3051_v16 }
  0xba   :  { %864 = vmatprep.mubr.bf16.mxu0 %v2998_v17  ;;  %1048 = vmatprep.mubr.bf16.mxu1 %v3052_v18 }
  0xc1   :  { %865 = vmatmul.mubr.bf16.gmra.mrb[64].mxu0 %v3002_v19  ;;  %1049 = vmatmul.mubr.bf16.gmra.mrb[64].mxu1 %v3054_v20 }
  0xc2   :  { %872 = vmatprep.mubr.bf16.mxu0 %v3004_v21  ;;  %1056 = vmatprep.mubr.bf16.mxu1 %v3055_v22 }
  0xc9   :  { %873 = vmatmul.mubr.bf16.gmra.mrb[68].mxu0 %v3008_v23  ;;  %1057 = vmatmul.mubr.bf16.gmra.mrb[68].mxu1 %v3057_v24 }
  0xca   :  { %880 = vmatprep.mubr.bf16.mxu0 %v3010_v25  ;;  %1064 = vmatprep.mubr.bf16.mxu1 %v3058_v26 }
  0xd1   :  { %881 = vmatmul.mubr.bf16.gmra.mrb[72].mxu0 %v3014_v27  ;;  %1065 = vmatmul.mubr.bf16.gmra.mrb[72].mxu1 %v3060_v28 }
  0xd2   :  { %888 = vmatprep.mubr.bf16.mxu0 %v3016_v29  ;;  %1072 = vmatprep.mubr.bf16.mxu1 %v3061_v30  ;;  %v3485_v30 = vld [vmem:[%s5967_s2] ss:$0 sm:$0xff] }
  0xd9   :  { %889 = vmatmul.mubr.bf16.gmra.mrb[76].mxu0 %v3020_v31  ;;  %1073 = vmatmul.mubr.bf16.gmra.mrb[76].mxu1 %v3063_v32 }
  0xda   :  { %896 = vmatprep.mubr.bf16.mxu0 %v3022_v33  ;;  %1080 = vmatprep.mubr.bf16.mxu1 %v3064_v34 }
  0xe1   :  { %897 = vmatmul.mubr.bf16.gmra.mrb[80].mxu0 %v3026_v35  ;;  %1081 = vmatmul.mubr.bf16.gmra.mrb[80].mxu1 %v3066_v36 }
  0xe2   :  { %904 = vmatprep.mubr.bf16.mxu0 %v3028_v37  ;;  %1088 = vmatprep.mubr.bf16.mxu1 %v3067_v38 }
  0xe9   :  { %905 = vmatmul.mubr.bf16.gmra.mrb[84].mxu0 %v3032_v40  ;;  %1089 = vmatmul.mubr.bf16.gmra.mrb[84].mxu1 %v3069_v41 }
  0xea   :  { %912 = vmatprep.mubr.bf16.mxu0 %v3034_v42  ;;  %1096 = vmatprep.mubr.bf16.mxu1 %v2416_v43 }
  0xf1   :  { %913 = vmatmul.mubr.bf16.gmra.mrb[88].mxu0 %v3038_v44  ;;  %1097 = vmatmul.mubr.bf16.gmra.mrb[88].mxu1 %v2415_v45 }
 0x114   :  { %v738_v46 = vpop.f32.mrb[0].mxu0  ;;  %v3458_v47 = vpop.f32.mrb[0].mxu1 }
 0x115   :  { %v740_v48 = vpop.f32.mrb[1].mxu0  ;;  %v924_v49 = vpop.f32.mrb[1].mxu1  ;;  %v3493_v34 = vadd.f32 %v3485_v30, %v738_v46 }
 0x116   :  { %v741_v50 = vpop.f32.mrb[2].mxu0  ;;  %v3460_v51 = vpop.f32.mrb[2].mxu1 }
 0x117   :  { %v743_v52 = vpop.f32.mrb[3].mxu0  ;;  %v927_v53 = vpop.f32.mrb[3].mxu1  ;;  %v3488_v31 = vadd.f32 %v3485_v30, %v741_v50 }
 0x119   :  { %v1104_v40 = vadd.f32 %v3488_v31, %v3493_v34 }
 0x11c   :  { %v746_v54 = vpop.f32.mrb[4].mxu0  ;;  %v3462_v55 = vpop.f32.mrb[4].mxu1 }
 0x11d   :  { %v748_v56 = vpop.f32.mrb[5].mxu0  ;;  %v932_v57 = vpop.f32.mrb[5].mxu1  ;;  %v3496_v35 = vadd.f32 %v3485_v30, %v746_v54 }
 0x11e   :  { %v749_v58 = vpop.f32.mrb[6].mxu0  ;;  %v3464_v59 = vpop.f32.mrb[6].mxu1 }
 0x11f   :  { %v751_v60 = vpop.f32.mrb[7].mxu0  ;;  %v935_v61 = vpop.f32.mrb[7].mxu1  ;;  %6122 = vst [vmem:[#allocation2_spill] sm:$0xff] %v3496_v35  ;;  %v1105_v43 = vadd.f32 %v1104_v40, %v3496_v35  ;;  %v3504_v44 = vadd.f32 %v3485_v30, %v749_v58 }
 0x121   :  { %6123 = vst [vmem:[#allocation3_spill] sm:$0xff] %v3504_v44  ;;  %v1106_v49 = vadd.f32 %v1105_v43, %v3504_v44 }
 0x124   :  { %v754_v62 = vpop.f32.mrb[8].mxu0  ;;  %v3466_v63 = vpop.f32.mrb[8].mxu1 }
 0x125   :  { %v756_v0 = vpop.f32.mrb[9].mxu0  ;;  %v940_v1 = vpop.f32.mrb[9].mxu1  ;;  %v3507_v45 = vadd.f32 %v3485_v30, %v754_v62 }
 0x126   :  { %v757_v2 = vpop.f32.mrb[10].mxu0  ;;  %v3468_v3 = vpop.f32.mrb[10].mxu1 }
 0x127   :  { %v759_v4 = vpop.f32.mrb[11].mxu0  ;;  %v943_v5 = vpop.f32.mrb[11].mxu1  ;;  %6124 = vst [vmem:[#allocation4_spill] sm:$0xff] %v3507_v45  ;;  %v1107_v56 = vadd.f32 %v1106_v49, %v3507_v45  ;;  %v3516_v57 = vadd.f32 %v3485_v30, %v757_v2 }
 0x129   :  { %6125 = vst [vmem:[#allocation5_spill] sm:$0xff] %v3516_v57  ;;  %v1108_v62 = vadd.f32 %v1107_v56, %v3516_v57 }
 0x12c   :  { %v762_v6 = vpop.f32.mrb[12].mxu0  ;;  %v3470_v7 = vpop.f32.mrb[12].mxu1 }
 0x12d   :  { %v764_v8 = vpop.f32.mrb[13].mxu0  ;;  %v948_v9 = vpop.f32.mrb[13].mxu1  ;;  %v3519_v61 = vadd.f32 %v3485_v30, %v762_v6 }
 0x12e   :  { %v765_v10 = vpop.f32.mrb[14].mxu0  ;;  %v3472_v11 = vpop.f32.mrb[14].mxu1 }
 0x12f   :  { %v767_v12 = vpop.f32.mrb[15].mxu0  ;;  %v951_v13 = vpop.f32.mrb[15].mxu1  ;;  %6126 = vst [vmem:[#allocation6_spill] sm:$0xff] %v3519_v61  ;;  %v1109_v4 = vadd.f32 %v1108_v62, %v3519_v61  ;;  %v3526_v5 = vadd.f32 %v3485_v30, %v765_v10 }
 0x131   :  { %6127 = vst [vmem:[#allocation7_spill] sm:$0xff] %v3526_v5 }
 0x134   :  { %v770_v14 = vpop.f32.mrb[16].mxu0  ;;  %v3474_v15 = vpop.f32.mrb[16].mxu1 }
 0x135   :  { %v772_v16 = vpop.f32.mrb[17].mxu0  ;;  %v956_v17 = vpop.f32.mrb[17].mxu1  ;;  %v3531_v13 = vadd.f32 %v3485_v30, %v770_v14 }
 0x136   :  { %v773_v18 = vpop.f32.mrb[18].mxu0  ;;  %v3476_v19 = vpop.f32.mrb[18].mxu1  ;;  %v1110_v17 = vadd.f32 %v1109_v4, %v3526_v5 }
 0x137   :  { %v775_v20 = vpop.f32.mrb[19].mxu0  ;;  %v959_v21 = vpop.f32.mrb[19].mxu1  ;;  %6128 = vst [vmem:[#allocation8_spill] sm:$0xff] %v3531_v13 }
 0x138   :  { %v1111_v20 = vadd.f32 %v1110_v17, %v3531_v13  ;;  %v3536_v21 = vadd.f32 %v3485_v30, %v773_v18 }
 0x13a   :  { %6129 = vst [vmem:[#allocation9_spill] sm:$0xff] %v3536_v21 }
 0x13c   :  { %v778_v22 = vpop.f32.mrb[20].mxu0  ;;  %v3478_v23 = vpop.f32.mrb[20].mxu1 }
 0x13d   :  { %v780_v24 = vpop.f32.mrb[21].mxu0  ;;  %v964_v25 = vpop.f32.mrb[21].mxu1 }
 0x13e   :  { %v781_v26 = vpop.f32.mrb[22].mxu0  ;;  %v3480_v27 = vpop.f32.mrb[22].mxu1  ;;  %v3541_v25 = vadd.f32 %v3485_v30, %v778_v22 }
 0x13f   :  { %v783_v28 = vpop.f32.mrb[23].mxu0  ;;  %v967_v29 = vpop.f32.mrb[23].mxu1  ;;  %v3548_v18 = vadd.f32 %v3485_v30, %v781_v26 }
 0x140   :  { %6130 = vst [vmem:[#allocation10_spill] sm:$0xff] %v3541_v25 }
 0x141   :  { %6131 = vst [vmem:[#allocation11_spill] sm:$0xff] %v3548_v18 }
 0x144   :  { %v786_v32 = vpop.f32.mrb[24].mxu0  ;;  %v3490_v33 = vpop.f32.mrb[24].mxu1 }
 0x145   :  { %v788_v36 = vpop.f32.mrb[25].mxu0  ;;  %v972_v37 = vpop.f32.mrb[25].mxu1  ;;  %v3551_v43 = vadd.f32 %v3485_v30, %v786_v32 }
 0x146   :  { %v789_v38 = vpop.f32.mrb[26].mxu0  ;;  %v3498_v39 = vpop.f32.mrb[26].mxu1  ;;  %v1112_v37 = vadd.f32 %v1111_v20, %v3536_v21 }
 0x147   :  { %v791_v41 = vpop.f32.mrb[27].mxu0  ;;  %v975_v42 = vpop.f32.mrb[27].mxu1  ;;  %6132 = vst [vmem:[#allocation12_spill] sm:$0xff] %v3551_v43  ;;  %v3560_v4 = vadd.f32 %v3485_v30, %v789_v38 }
 0x148   :  { %v1113_v42 = vadd.f32 %v1112_v37, %v3541_v25 }
 0x149   :  { %6133 = vst [vmem:[#allocation13_spill] sm:$0xff] %v3560_v4 }
 0x14c   :  { %v794_v46 = vpop.f32.mrb[28].mxu0  ;;  %v3509_v48 = vpop.f32.mrb[28].mxu1 }
 0x14d   :  { %v796_v50 = vpop.f32.mrb[29].mxu0  ;;  %v980_v52 = vpop.f32.mrb[29].mxu1  ;;  %v3563_v32 = vadd.f32 %v3485_v30, %v794_v46 }
 0x14e   :  { %v797_v53 = vpop.f32.mrb[30].mxu0  ;;  %v3512_v54 = vpop.f32.mrb[30].mxu1  ;;  %v1114_v50 = vadd.f32 %v1113_v42, %v3548_v18 }
 0x14f   :  { %v799_v58 = vpop.f32.mrb[31].mxu0  ;;  %v983_v60 = vpop.f32.mrb[31].mxu1  ;;  %6134 = vst [vmem:[#allocation14_spill] sm:$0xff] %v3563_v32  ;;  %v3570_v20 = vadd.f32 %v3485_v30, %v797_v53 }
 0x150   :  { %v1115_v62 = vadd.f32 %v1114_v50, %v3551_v43 }
 0x151   :  { %6135 = vst [vmem:[#allocation15_spill] sm:$0xff] %v3570_v20 }
 0x154   :  { %v802_v0 = vpop.f32.mrb[32].mxu0  ;;  %v3522_v1 = vpop.f32.mrb[32].mxu1 }
 0x155   :  { %v804_v8 = vpop.f32.mrb[33].mxu0  ;;  %v988_v9 = vpop.f32.mrb[33].mxu1 }
 0x156   :  { %v805_v12 = vpop.f32.mrb[34].mxu0  ;;  %v3528_v2 = vpop.f32.mrb[34].mxu1  ;;  %v1116_v9 = vadd.f32 %v1115_v62, %v3560_v4 }
 0x157   :  { %v807_v6 = vpop.f32.mrb[35].mxu0  ;;  %v991_v16 = vpop.f32.mrb[35].mxu1 }
 0x158   :  { %v1117_v17 = vadd.f32 %v1116_v9, %v3563_v32 }
 0x15a   :  { %v1118_v42 = vadd.f32 %v1117_v17, %v3570_v20 }
 0x15c   :  { %v810_v24 = vpop.f32.mrb[36].mxu0  ;;  %v3538_v10 = vpop.f32.mrb[36].mxu1 }
 0x15d   :  { %v812_v28 = vpop.f32.mrb[37].mxu0  ;;  %v996_v29 = vpop.f32.mrb[37].mxu1  ;;  %v3585_v62 = vadd.f32 %v3485_v30, %v810_v24 }
 0x15e   :  { %v813_v36 = vpop.f32.mrb[38].mxu0  ;;  %v3543_v14 = vpop.f32.mrb[38].mxu1 }
 0x15f   :  { %v815_v40 = vpop.f32.mrb[39].mxu0  ;;  %v999_v41 = vpop.f32.mrb[39].mxu1  ;;  %6138 = vst [vmem:[#allocation18_spill] sm:$0xff] %v3585_v62 }
 0x160   :  { %v3575_v40 = vadd.f32 %v3485_v30, %v802_v0 }
 0x162   :  { %6136 = vst [vmem:[#allocation16_spill] sm:$0xff] %v3575_v40  ;;  %v1119_v50 = vadd.f32 %v1118_v42, %v3575_v40 }
 0x164   :  { %v818_v49 = vpop.f32.mrb[40].mxu0  ;;  %v3553_v22 = vpop.f32.mrb[40].mxu1 }
 0x165   :  { %v820_v52 = vpop.f32.mrb[41].mxu0  ;;  %v1004_v56 = vpop.f32.mrb[41].mxu1 }
 0x166   :  { %v821_v58 = vpop.f32.mrb[42].mxu0  ;;  %v3556_v60 = vpop.f32.mrb[42].mxu1  ;;  %v3580_v52 = vadd.f32 %v3485_v30, %v805_v12  ;;  %v3592_v12 = vadd.f32 %v3485_v30, %v813_v36 }
 0x167   :  { %v823_v26 = vpop.f32.mrb[43].mxu0  ;;  %v1007_v8 = vpop.f32.mrb[43].mxu1 }
 0x168   :  { %6137 = vst [vmem:[#allocation17_spill] sm:$0xff] %v3580_v52  ;;  %6139 = vst [vmem:[#allocation19_spill] sm:$0xff] %v3592_v12 }
 0x16c   :  { %v826_v6 = vpop.f32.mrb[44].mxu0  ;;  %v3566_v16 = vpop.f32.mrb[44].mxu1 }
 0x16d   :  { %v828_v28 = vpop.f32.mrb[45].mxu0  ;;  %v1012_v29 = vpop.f32.mrb[45].mxu1 }
 0x16e   :  { %v829_v37 = vpop.f32.mrb[46].mxu0  ;;  %v3572_v38 = vpop.f32.mrb[46].mxu1  ;;  %v1120_v28 = vadd.f32 %v1119_v50, %v3580_v52 }
 0x16f   :  { %v831_v46 = vpop.f32.mrb[47].mxu0  ;;  %v1015_v41 = vpop.f32.mrb[47].mxu1 }
 0x170   :  { %v1121_v46 = vadd.f32 %v1120_v28, %v3585_v62  ;;  %v3595_v41 = vadd.f32 %v3485_v30, %v818_v49  ;;  %v3604_v28 = vadd.f32 %v3485_v30, %v821_v58  ;;  %v3607_v49 = vadd.f32 %v3485_v30, %v826_v6 }
 0x172   :  { %6140 = vst [vmem:[#allocation20_spill] sm:$0xff] %v3595_v41  ;;  %6141 = vst [vmem:[#allocation21_spill] sm:$0xff] %v3604_v28 }
 0x173   :  { %6142 = vst [vmem:[#allocation22_spill] sm:$0xff] %v3607_v49 }
 0x174   :  { %v834_v56 = vpop.f32.mrb[48].mxu0  ;;  %v3582_v53 = vpop.f32.mrb[48].mxu1 }
 0x175   :  { %v836_v26 = vpop.f32.mrb[49].mxu0  ;;  %v1020_v8 = vpop.f32.mrb[49].mxu1 }
 0x176   :  { %v837_v9 = vpop.f32.mrb[50].mxu0  ;;  %v3587_v0 = vpop.f32.mrb[50].mxu1  ;;  %v1122_v26 = vadd.f32 %v1121_v46, %v3592_v12  ;;  %v3614_v46 = vadd.f32 %v3485_v30, %v829_v37 }
 0x177   :  { %v839_v29 = vpop.f32.mrb[51].mxu0  ;;  %v1023_v17 = vpop.f32.mrb[51].mxu1  ;;  %v3624_v12 = vadd.f32 %v3485_v30, %v837_v9 }
 0x178   :  { %v1123_v50 = vadd.f32 %v1122_v26, %v3595_v41  ;;  %6143 = vst [vmem:[#allocation23_spill] sm:$0xff] %v3614_v46 }
 0x179   :  { %6145 = vst [vmem:[#allocation25_spill] sm:$0xff] %v3624_v12 }
 0x17a   :  { %v1124_v17 = vadd.f32 %v1123_v50, %v3604_v28 }
 0x17c   :  { %v842_v42 = vpop.f32.mrb[52].mxu0  ;;  %v3597_v24 = vpop.f32.mrb[52].mxu1 }
 0x17d   :  { %v844_v8 = vpop.f32.mrb[53].mxu0  ;;  %v1028_v40 = vpop.f32.mrb[53].mxu1 }
 0x17e   :  { %v845_v20 = vpop.f32.mrb[54].mxu0  ;;  %v3600_v32 = vpop.f32.mrb[54].mxu1  ;;  %v1125_v40 = vadd.f32 %v1124_v17, %v3607_v49 }
 0x17f   :  { %v847_v36 = vpop.f32.mrb[55].mxu0  ;;  %v1031_v29 = vpop.f32.mrb[55].mxu1  ;;  %v3636_v9 = vadd.f32 %v3485_v30, %v845_v20 }
 0x180   :  { %v3619_v36 = vadd.f32 %v3485_v30, %v834_v56  ;;  %v1126_v50 = vadd.f32 %v1125_v40, %v3614_v46 }
 0x181   :  { %6147 = vst [vmem:[#allocation27_spill] sm:$0xff] %v3636_v9 }
 0x182   :  { %6144 = vst [vmem:[#allocation24_spill] sm:$0xff] %v3619_v36  ;;  %v1127_v28 = vadd.f32 %v1126_v50, %v3619_v36 }
 0x184   :  { %v850_v62 = vpop.f32.mrb[56].mxu0  ;;  %v3610_v52 = vpop.f32.mrb[56].mxu1 }
 0x185   :  { %v852_v8 = vpop.f32.mrb[57].mxu0  ;;  %v1036_v26 = vpop.f32.mrb[57].mxu1  ;;  %v3639_v36 = vadd.f32 %v3485_v30, %v850_v62 }
 0x186   :  { %v853_v41 = vpop.f32.mrb[58].mxu0  ;;  %v3616_v58 = vpop.f32.mrb[58].mxu1  ;;  %v3629_v8 = vadd.f32 %v3485_v30, %v842_v42 }
 0x187   :  { %v855_v6 = vpop.f32.mrb[59].mxu0  ;;  %v1039_v29 = vpop.f32.mrb[59].mxu1  ;;  %6148 = vst [vmem:[#allocation28_spill] sm:$0xff] %v3639_v36 }
 0x188   :  { %6146 = vst [vmem:[#allocation26_spill] sm:$0xff] %v3629_v8  ;;  %v1128_v6 = vadd.f32 %v1127_v28, %v3624_v12 }
 0x18a   :  { %v1129_v50 = vadd.f32 %v1128_v6, %v3629_v8  ;;  %v3648_v6 = vadd.f32 %v3485_v30, %v853_v41 }
 0x18c   :  { %v858_v17 = vpop.f32.mrb[60].mxu0  ;;  %v3626_v37 = vpop.f32.mrb[60].mxu1  ;;  %6149 = vst [vmem:[#allocation29_spill] sm:$0xff] %v3648_v6 }
 0x18d   :  { %v860_v26 = vpop.f32.mrb[61].mxu0  ;;  %v1044_v49 = vpop.f32.mrb[61].mxu1  ;;  %v3651_v62 = vadd.f32 %v3485_v30, %v858_v17 }
 0x18e   :  { %v861_v4 = vpop.f32.mrb[62].mxu0  ;;  %v3631_v56 = vpop.f32.mrb[62].mxu1  ;;  %v1130_v49 = vadd.f32 %v1129_v50, %v3636_v9 }
 0x18f   :  { %v863_v29 = vpop.f32.mrb[63].mxu0  ;;  %v1047_v40 = vpop.f32.mrb[63].mxu1  ;;  %6150 = vst [vmem:[#allocation30_spill] sm:$0xff] %v3651_v62  ;;  %v3658_v50 = vadd.f32 %v3485_v30, %v861_v4 }
 0x190   :  { %v1131_v28 = vadd.f32 %v1130_v49, %v3639_v36 }
 0x191   :  { %6151 = vst [vmem:[#allocation31_spill] sm:$0xff] %v3658_v50 }
 0x192   :  { %v1132_v40 = vadd.f32 %v1131_v28, %v3648_v6 }
 0x194   :  { %v866_v46 = vpop.f32.mrb[64].mxu0  ;;  %v3641_v42 = vpop.f32.mrb[64].mxu1 }
 0x195   :  { %v868_v26 = vpop.f32.mrb[65].mxu0  ;;  %v1052_v43 = vpop.f32.mrb[65].mxu1 }
 0x196   :  { %v869_v18 = vpop.f32.mrb[66].mxu0  ;;  %v3644_v25 = vpop.f32.mrb[66].mxu1  ;;  %v1133_v43 = vadd.f32 %v1132_v40, %v3651_v62 }
 0x197   :  { %v871_v20 = vpop.f32.mrb[67].mxu0  ;;  %v1055_v29 = vpop.f32.mrb[67].mxu1  ;;  %v3668_v9 = vadd.f32 %v3485_v30, %v869_v18 }
 0x198   :  { %v3663_v20 = vadd.f32 %v3485_v30, %v866_v46  ;;  %v1134_v28 = vadd.f32 %v1133_v43, %v3658_v50 }
 0x199   :  { %6153 = vst [vmem:[#allocation33_spill] sm:$0xff] %v3668_v9 }
 0x19a   :  { %6152 = vst [vmem:[#allocation32_spill] sm:$0xff] %v3663_v20  ;;  %v1135_v6 = vadd.f32 %v1134_v28, %v3663_v20 }
 0x19c   :  { %v874_v8 = vpop.f32.mrb[68].mxu0  ;;  %v3654_v12 = vpop.f32.mrb[68].mxu1 }
 0x19d   :  { %v876_v26 = vpop.f32.mrb[69].mxu0  ;;  %v1060_v49 = vpop.f32.mrb[69].mxu1 }
 0x19e   :  { %v877_v36 = vpop.f32.mrb[70].mxu0  ;;  %v3660_v41 = vpop.f32.mrb[70].mxu1  ;;  %v3673_v26 = vadd.f32 %v3485_v30, %v874_v8 }
 0x19f   :  { %v879_v17 = vpop.f32.mrb[71].mxu0  ;;  %v1063_v29 = vpop.f32.mrb[71].mxu1  ;;  %v3680_v18 = vadd.f32 %v3485_v30, %v877_v36 }
 0x1a0   :  { %6154 = vst [vmem:[#allocation34_spill] sm:$0xff] %v3673_v26  ;;  %v1136_v17 = vadd.f32 %v1135_v6, %v3668_v9 }
 0x1a1   :  { %6155 = vst [vmem:[#allocation35_spill] sm:$0xff] %v3680_v18 }
 0x1a2   :  { %v1137_v28 = vadd.f32 %v1136_v17, %v3673_v26 }
 0x1a4   :  { %v882_v40 = vpop.f32.mrb[72].mxu0  ;;  %v3670_v4 = vpop.f32.mrb[72].mxu1 }
 0x1a5   :  { %v884_v49 = vpop.f32.mrb[73].mxu0  ;;  %v1068_v62 = vpop.f32.mrb[73].mxu1  ;;  %v3683_v20 = vadd.f32 %v3485_v30, %v882_v40 }
 0x1a6   :  { %v885_v21 = vpop.f32.mrb[74].mxu0  ;;  %v3675_v46 = vpop.f32.mrb[74].mxu1  ;;  %v1138_v62 = vadd.f32 %v1137_v28, %v3680_v18 }
 0x1a7   :  { %v887_v29 = vpop.f32.mrb[75].mxu0  ;;  %v1071_v43 = vpop.f32.mrb[75].mxu1  ;;  %6156 = vst [vmem:[#allocation36_spill] sm:$0xff] %v3683_v20  ;;  %v3692_v17 = vadd.f32 %v3485_v30, %v885_v21 }
 0x1a8   :  { %v1139_v6 = vadd.f32 %v1138_v62, %v3683_v20 }
 0x1a9   :  { %6157 = vst [vmem:[#allocation37_spill] sm:$0xff] %v3692_v17 }
 0x1aa   :  { %v1140_v43 = vadd.f32 %v1139_v6, %v3692_v17 }
 0x1ac   :  { %v890_v50 = vpop.f32.mrb[76].mxu0  ;;  %v3685_v8 = vpop.f32.mrb[76].mxu1 }
 0x1ad   :  { %v892_v49 = vpop.f32.mrb[77].mxu0  ;;  %v1076_v13 = vpop.f32.mrb[77].mxu1  ;;  %v3695_v40 = vadd.f32 %v3485_v30, %v890_v50 }
 0x1ae   :  { %v893_v5 = vpop.f32.mrb[78].mxu0  ;;  %v3688_v61 = vpop.f32.mrb[78].mxu1 }
 0x1af   :  { %v895_v36 = vpop.f32.mrb[79].mxu0  ;;  %v1079_v29 = vpop.f32.mrb[79].mxu1  ;;  %6158 = vst [vmem:[#allocation38_spill] sm:$0xff] %v3695_v40  ;;  %v1141_v13 = vadd.f32 %v1140_v43, %v3695_v40  ;;  %v3702_v28 = vadd.f32 %v3485_v30, %v893_v5 }
 0x1b1   :  { %6159 = vst [vmem:[#allocation39_spill] sm:$0xff] %v3702_v28  ;;  %v1142_v6 = vadd.f32 %v1141_v13, %v3702_v28 }
 0x1b4   :  { %v898_v26 = vpop.f32.mrb[80].mxu0  ;;  %v3698_v9 = vpop.f32.mrb[80].mxu1 }
 0x1b5   :  { %v900_v49 = vpop.f32.mrb[81].mxu0  ;;  %v1084_v62 = vpop.f32.mrb[81].mxu1  ;;  %v3707_v36 = vadd.f32 %v3485_v30, %v898_v26 }
 0x1b6   :  { %v901_v20 = vpop.f32.mrb[82].mxu0  ;;  %v3704_v21 = vpop.f32.mrb[82].mxu1 }
 0x1b7   :  { %6160 = vst [vmem:[#allocation40_spill] sm:$0xff] %v3707_v36  ;;  %v903_v50 = vpop.f32.mrb[83].mxu0  ;;  %v1087_v29 = vpop.f32.mrb[83].mxu1  ;;  %v1143_v17 = vadd.f32 %v1142_v6, %v3707_v36  ;;  %v3712_v18 = vadd.f32 %v3485_v30, %v901_v20 }
 0x1b9   :  { %v1144_v50 = vadd.f32 %v1143_v17, %v3712_v18 }
 0x1bc   :  { %v906_v43 = vpop.f32.mrb[84].mxu0  ;;  %v3714_v5 = vpop.f32.mrb[84].mxu1 }
 0x1bd   :  { %v3717_v49 = vadd.f32 %v3485_v30, %v906_v43  ;;  %v908_v62 = vpop.f32.mrb[85].mxu0  ;;  %v1092_v40 = vpop.f32.mrb[85].mxu1 }
 0x1be   :  { %v909_v57 = vpop.f32.mrb[86].mxu0  ;;  %v3719_v26 = vpop.f32.mrb[86].mxu1 }
 0x1bf   :  { %v911_v29 = vpop.f32.mrb[87].mxu0  ;;  %v1095_v13 = vpop.f32.mrb[87].mxu1  ;;  %v1145_v6 = vadd.f32 %v1144_v50, %v3717_v49  ;;  %v3724_v20 = vadd.f32 %v3485_v30, %v909_v57 }
 0x1c0   :  { %v3738_v13 = vadd.f32 %v3485_v30, %v3458_v47 }
 0x1c1   :  { %v1146_v43 = vadd.f32 %v1145_v6, %v3724_v20 }
 0x1c4   :  { %v914_v36 = vpop.f32.mrb[88].mxu0  ;;  %v3726_v28 = vpop.f32.mrb[88].mxu1 }
 0x1c5   :  { %v3730_v62 = vadd.f32 %v3485_v30, %v914_v36  ;;  %v916_v40 = vpop.f32.mrb[89].mxu0  ;;  %v1100_v45 = vpop.f32.mrb[89].mxu1  ;;  %v3743_v36 = vadd.f32 %v3485_v30, %v3460_v51 }
 0x1c6   :  { %v917_v44 = vpop.f32.mrb[90].mxu0  ;;  %v1101_v35 = vpop.f32.mrb[90].mxu1  ;;  %v3758_v40 = vadd.f32 %v3485_v30, %v3466_v63 }
 0x1c7   :  { %v1147_v17 = vadd.f32 %v1146_v43, %v3730_v62  ;;  %v3734_v29 = vadd.f32 %v3485_v30, %v917_v44  ;;  %v919_v50 = vpop.f32.mrb[91].mxu0  ;;  %v1102_v57 = vpop.f32.mrb[91].mxu1  ;;  %v3748_v35 = vadd.f32 %v3485_v30, %v3462_v55  ;;  %v3753_v43 = vadd.f32 %v3485_v30, %v3464_v59 }
 0x1c8   :  { %v3768_v50 = vadd.f32 %v3485_v30, %v3470_v7  ;;  %v3773_v57 = vadd.f32 %v3485_v30, %v3472_v11 }
 0x1c9   :  { %v1148_v6 = vadd.f32 %v1147_v17, %v3734_v29  ;;  %v3763_v17 = vadd.f32 %v3485_v30, %v3468_v3 }
 0x1cb   :  { %v1149_v45 = vadd.f32 %v1148_v6, %v3738_v13  ;;  %v3778_v6 = vadd.f32 %v3485_v30, %v3474_v15 }
 0x1cd   :  { %v1150_v44 = vadd.f32 %v1149_v45, %v3743_v36  ;;  %v3783_v45 = vadd.f32 %v3485_v30, %v3476_v19 }
 0x1cf   :  { %v1151_v47 = vadd.f32 %v1150_v44, %v3748_v35  ;;  %v3788_v44 = vadd.f32 %v3485_v30, %v3478_v23 }
 0x1d1   :  { %v1152_v51 = vadd.f32 %v1151_v47, %v3753_v43  ;;  %v3793_v47 = vadd.f32 %v3485_v30, %v3480_v27 }
 0x1d3   :  { %v1153_v55 = vadd.f32 %v1152_v51, %v3758_v40  ;;  %v3798_v51 = vadd.f32 %v3485_v30, %v3490_v33 }
 0x1d5   :  { %v1154_v59 = vadd.f32 %v1153_v55, %v3763_v17  ;;  %v3803_v55 = vadd.f32 %v3485_v30, %v3498_v39 }
 0x1d7   :  { %v1155_v63 = vadd.f32 %v1154_v59, %v3768_v50  ;;  %v3808_v59 = vadd.f32 %v3485_v30, %v3509_v48 }
 0x1d9   :  { %v1156_v3 = vadd.f32 %v1155_v63, %v3773_v57  ;;  %v3813_v63 = vadd.f32 %v3485_v30, %v3512_v54 }
 0x1db   :  { %v1157_v7 = vadd.f32 %v1156_v3, %v3778_v6  ;;  %v3818_v3 = vadd.f32 %v3485_v30, %v3522_v1 }
 0x1dd   :  { %v1158_v11 = vadd.f32 %v1157_v7, %v3783_v45  ;;  %v3823_v7 = vadd.f32 %v3485_v30, %v3528_v2 }
 0x1df   :  { %v1159_v15 = vadd.f32 %v1158_v11, %v3788_v44  ;;  %v3828_v11 = vadd.f32 %v3485_v30, %v3538_v10 }
 0x1e1   :  { %v1160_v19 = vadd.f32 %v1159_v15, %v3793_v47  ;;  %v3833_v15 = vadd.f32 %v3485_v30, %v3543_v14 }
 0x1e3   :  { %v1161_v23 = vadd.f32 %v1160_v19, %v3798_v51  ;;  %v3838_v19 = vadd.f32 %v3485_v30, %v3553_v22 }
 0x1e5   :  { %v1162_v27 = vadd.f32 %v1161_v23, %v3803_v55  ;;  %v3843_v23 = vadd.f32 %v3485_v30, %v3556_v60  ;;  %v3859_v60 = vadd.f32 %v3485_v30, %v3582_v53 }
 0x1e7   :  { %v1163_v33 = vadd.f32 %v1162_v27, %v3808_v59  ;;  %v3848_v27 = vadd.f32 %v3485_v30, %v3566_v16  ;;  %v3864_v16 = vadd.f32 %v3485_v30, %v3587_v0 }
 0x1e9   :  { %v1164_v39 = vadd.f32 %v1163_v33, %v3813_v63  ;;  %v3853_v33 = vadd.f32 %v3485_v30, %v3572_v38  ;;  %v3869_v38 = vadd.f32 %v3485_v30, %v3597_v24  ;;  %v1043_v24 = vadd.f32 %v3485_v30, %v3626_v37 }
 0x1ea   :  { %v1062_v37 = vadd.f32 %v3485_v30, %v3660_v41  ;;  %v1083_v41 = vadd.f32 %v3485_v30, %v3698_v9 }
 0x1eb   :  { %v1165_v48 = vadd.f32 %v1164_v39, %v3818_v3  ;;  %6161 = vst [vmem:[#allocation41_spill] sm:$0xff] %v3869_v38 }
 0x1ed   :  { %v1166_v54 = vadd.f32 %v1165_v48, %v3823_v7 }
 0x1ef   :  { %v1167_v1 = vadd.f32 %v1166_v54, %v3828_v11 }
 0x1f1   :  { %v1168_v2 = vadd.f32 %v1167_v1, %v3833_v15 }
 0x1f3   :  { %v1169_v10 = vadd.f32 %v1168_v2, %v3838_v19  ;;  %v3874_v2 = vadd.f32 %v3485_v30, %v3600_v32  ;;  %v1046_v32 = vadd.f32 %v3485_v30, %v3631_v56  ;;  %v1067_v56 = vadd.f32 %v3485_v30, %v3670_v4 }
 0x1f4   :  { %v1086_v4 = vadd.f32 %v3485_v30, %v3704_v21 }
 0x1f5   :  { %v1170_v14 = vadd.f32 %v1169_v10, %v3843_v23  ;;  %6162 = vst [vmem:[#allocation42_spill] sm:$0xff] %v3874_v2  ;;  %v3879_v10 = vadd.f32 %v3485_v30, %v3610_v52  ;;  %v1054_v52 = vadd.f32 %v3485_v30, %v3644_v25  ;;  %v1075_v25 = vadd.f32 %v3485_v30, %v3685_v8 }
 0x1f7   :  { %v1171_v22 = vadd.f32 %v1170_v14, %v3848_v27  ;;  %6163 = vst [vmem:[#allocation43_spill] sm:$0xff] %v3879_v10  ;;  %v1038_v14 = vadd.f32 %v3485_v30, %v3616_v58  ;;  %v1059_v58 = vadd.f32 %v3485_v30, %v3654_v12  ;;  %v1078_v12 = vadd.f32 %v3485_v30, %v3688_v61 }
 0x1f8   :  { %v1094_v61 = vadd.f32 %v3485_v30, %v3719_v26 }
 0x1f9   :  { %v1172_v39 = vadd.f32 %v1171_v22, %v3853_v33 }
 0x1fb   :  { %v1173_v48 = vadd.f32 %v1172_v39, %v3859_v60 }
 0x1fd   :  { %v1174_v54 = vadd.f32 %v1173_v48, %v3864_v16 }
 0x1ff   :  { %v1175_v1 = vadd.f32 %v1174_v54, %v3869_v38  ;;  %v1051_v54 = vadd.f32 %v3485_v30, %v3641_v42  ;;  %v1070_v42 = vadd.f32 %v3485_v30, %v3675_v46  ;;  %v1091_v46 = vadd.f32 %v3485_v30, %v3714_v5 }
 0x201   :  { %v1176_v53 = vadd.f32 %v1175_v1, %v3874_v2 }
 0x203   :  { %v1177_v0 = vadd.f32 %v1176_v53, %v3879_v10 }
 0x205   :  { %v1178_v22 = vadd.f32 %v1177_v0, %v1038_v14 }
 0x207   :  { %v1179_v39 = vadd.f32 %v1178_v22, %v1043_v24 }
 0x209   :  { %v1180_v48 = vadd.f32 %v1179_v39, %v1046_v32 }
 0x20b   :  { %v1181_v1 = vadd.f32 %v1180_v48, %v1051_v54 }
 0x20d   :  { %v1182_v53 = vadd.f32 %v1181_v1, %v1054_v52 }
 0x20f   :  { %v1183_v0 = vadd.f32 %v1182_v53, %v1059_v58 }
 0x211   :  { %v1184_v22 = vadd.f32 %v1183_v0, %v1062_v37 }
 0x213   :  { %v1185_v39 = vadd.f32 %v1184_v22, %v1067_v56 }
 0x215   :  { %v1186_v48 = vadd.f32 %v1185_v39, %v1070_v42  ;;  %v3912_v39 = vadd.f32 %v3485_v30, %v3726_v28 }
 0x217   :  { %v1187_v1 = vadd.f32 %v1186_v48, %v1075_v25  ;;  %v1194_v9 = vsel %vm1193_vm0, %v3912_v39, 0.0 }
 0x219   :  { %v1188_v53 = vadd.f32 %v1187_v1, %v1078_v12 }
 0x21b   :  { %v1189_v0 = vadd.f32 %v1188_v53, %v1083_v41 }
 0x21d   :  { %v1190_v22 = vadd.f32 %v1189_v0, %v1086_v4 }
 0x21f   :  { %v1191_v8 = vadd.f32 %v1190_v22, %v1091_v46 }
 0x221   :  { %v1192_v48 = vadd.f32 %v1191_v8, %v1094_v61 }
 0x223   :  { %v1195_v1 = vadd.f32 %v1194_v9, %v1192_v48 }
 0x225   :  { %v1196_v53 = vrot.slane %v1195_v1, 4 }
 0x227   :  { %v1197_v21 = vadd.f32 %v1196_v53, %v1195_v1  ;;  %v6176_v53 = vld [vmem:[#allocation5_spill] sm:$0xff] }
 0x229   :  { %v1198_v0 = vrot.slane %v1197_v21, 2 }
 0x22b   :  { %v1199_v10 = vadd.f32 %v1198_v0, %v1197_v21 }
 0x22d   :  { %v1200_v2 = vrot.slane %v1199_v10, 1 }
 0x22f   :  { %v1201_v5 = vadd.f32 %v1200_v2, %v1199_v10 }
 0x231   :  { %v3918_v38 = vmul.f32 0.0013850415, %v1201_v5 }
 0x233   :  { %v3921_v28 = vsub.f32 %v1038_v14, %v3918_v38  ;;  %v3924_v22 = vsub.f32 %v1043_v24, %v3918_v38  ;;  %v3927_v30 = vsub.f32 %v1046_v32, %v3918_v38  ;;  %v3930_v26 = vsub.f32 %v1051_v54, %v3918_v38 }
 0x234   :  { %v3933_v8 = vsub.f32 %v1054_v52, %v3918_v38  ;;  %v3936_v48 = vsub.f32 %v1059_v58, %v3918_v38  ;;  %v3939_v2 = vsub.f32 %v1062_v37, %v3918_v38  ;;  %v3942_v10 = vsub.f32 %v1067_v56, %v3918_v38 }
 0x235   :  { %v3945_v14 = vsub.f32 %v1070_v42, %v3918_v38  ;;  %v3948_v24 = vsub.f32 %v1075_v25, %v3918_v38  ;;  %v3951_v32 = vsub.f32 %v1078_v12, %v3918_v38  ;;  %v3954_v54 = vsub.f32 %v1083_v41, %v3918_v38  ;;  %v6170_v25 = vld [vmem:[#allocation2_spill] sm:$0xff] }
 0x236   :  { %v3957_v52 = vsub.f32 %v1086_v4, %v3918_v38  ;;  %v3960_v58 = vsub.f32 %v1091_v46, %v3918_v38  ;;  %v3963_v37 = vsub.f32 %v1094_v61, %v3918_v38  ;;  %v3967_v56 = vsub.f32 %v3493_v34, %v3918_v38  ;;  %v6172_v46 = vld [vmem:[#allocation3_spill] sm:$0xff]  ;;  %v6174_v34 = vld [vmem:[#allocation4_spill] sm:$0xff] }
 0x237   :  { %6164 = vst [vmem:[#allocation44_spill] sm:$0xff] %v3951_v32  ;;  %6165 = vst [vmem:[#allocation45_spill] sm:$0xff] %v3954_v54  ;;  %v3971_v42 = vsub.f32 %v3488_v31, %v3918_v38  ;;  %v3975_v12 = vsub.f32 %v6170_v25, %v3918_v38  ;;  %v3983_v61 = vsub.f32 %v6172_v46, %v3918_v38  ;;  %v6178_v25 = vld [vmem:[#allocation6_spill] sm:$0xff] }
 0x238   :  { %6166 = vst [vmem:[#allocation46_spill] sm:$0xff] %v3957_v52  ;;  %6167 = vst [vmem:[#allocation47_spill] sm:$0xff] %v3960_v58  ;;  %v1295_v41 = vmul.f32 %v3967_v56, %v3967_v56  ;;  %v3987_v9 = vsub.f32 %v6174_v34, %v3918_v38  ;;  %v3993_v21 = vsub.f32 %v6176_v53, %v3918_v38  ;;  %v6182_v53 = vld [vmem:[#allocation8_spill] sm:$0xff] }
 0x239   :  { %6168 = vst [vmem:[#allocation48_spill] sm:$0xff] %v3967_v56  ;;  %6169 = vst [vmem:[#allocation49_spill] sm:$0xff] %v3971_v42  ;;  %v1296_v4 = vmul.f32 %v3971_v42, %v3971_v42  ;;  %v1297_v31 = vmul.f32 %v3975_v12, %v3975_v12  ;;  %v1298_v0 = vmul.f32 %v3983_v61, %v3983_v61  ;;  %v6180_v56 = vld [vmem:[#allocation7_spill] sm:$0xff] }
 0x23a   :  { %6171 = vst [vmem:[#allocation2_spill] sm:$0xff] %v3975_v12  ;;  %6173 = vst [vmem:[#allocation3_spill] sm:$0xff] %v3983_v61  ;;  %v3999_v46 = vsub.f32 %v6178_v25, %v3918_v38  ;;  %v1299_v34 = vmul.f32 %v3987_v9, %v3987_v9  ;;  %v4005_v12 = vsub.f32 %v6180_v56, %v3918_v38  ;;  %v6184_v25 = vld [vmem:[#allocation9_spill] sm:$0xff] }
 0x23b   :  { %6175 = vst [vmem:[#allocation4_spill] sm:$0xff] %v3987_v9  ;;  %v1386_v1 = vadd.f32 %v1296_v4, %v1295_v41  ;;  %6177 = vst [vmem:[#allocation5_spill] sm:$0xff] %v3993_v21  ;;  %v1300_v41 = vmul.f32 %v3993_v21, %v3993_v21  ;;  %v4011_v61 = vsub.f32 %v6182_v53, %v3918_v38  ;;  %v6188_v53 = vld [vmem:[#allocation11_spill] sm:$0xff] }
 0x23c   :  { %6179 = vst [vmem:[#allocation6_spill] sm:$0xff] %v3999_v46  ;;  %6181 = vst [vmem:[#allocation7_spill] sm:$0xff] %v4005_v12  ;;  %v4017_v9 = vsub.f32 %v6184_v25, %v3918_v38  ;;  %v1302_v56 = vmul.f32 %v4005_v12, %v4005_v12  ;;  %v6190_v25 = vld [vmem:[#allocation12_spill] sm:$0xff] }
 0x23d   :  { %v1387_v5 = vadd.f32 %v1386_v1, %v1297_v31  ;;  %6183 = vst [vmem:[#allocation8_spill] sm:$0xff] %v4011_v61  ;;  %v1301_v31 = vmul.f32 %v3999_v46, %v3999_v46  ;;  %v4029_v46 = vsub.f32 %v6188_v53, %v3918_v38  ;;  %v4035_v12 = vsub.f32 %v6190_v25, %v3918_v38  ;;  %v6194_v53 = vld [vmem:[#allocation14_spill] sm:$0xff]  ;;  %v6196_v25 = vld [vmem:[#allocation15_spill] sm:$0xff] }
 0x23e   :  { %6185 = vst [vmem:[#allocation9_spill] sm:$0xff] %v4017_v9 }
 0x23f   :  { %v1388_v42 = vadd.f32 %v1387_v5, %v1298_v0  ;;  %v6186_v5 = vld [vmem:[#allocation10_spill] sm:$0xff]  ;;  %6189 = vst [vmem:[#allocation11_spill] sm:$0xff] %v4029_v46  ;;  %6191 = vst [vmem:[#allocation12_spill] sm:$0xff] %v4035_v12 }
 0x240   :  { %v4023_v21 = vsub.f32 %v6186_v5, %v3918_v38  ;;  %v6192_v5 = vld [vmem:[#allocation13_spill] sm:$0xff] }
 0x241   :  { %v1389_v4 = vadd.f32 %v1388_v42, %v1299_v34  ;;  %v1303_v42 = vmul.f32 %v4011_v61, %v4011_v61  ;;  %v4041_v61 = vsub.f32 %v6192_v5, %v3918_v38  ;;  %v6198_v5 = vld [vmem:[#allocation16_spill] sm:$0xff] }
 0x242   :  { %6187 = vst [vmem:[#allocation10_spill] sm:$0xff] %v4023_v21 }
 0x243   :  { %v1390_v1 = vadd.f32 %v1389_v4, %v1300_v41  ;;  %v1304_v41 = vmul.f32 %v4017_v9, %v4017_v9  ;;  %6193 = vst [vmem:[#allocation13_spill] sm:$0xff] %v4041_v61  ;;  %v4047_v9 = vsub.f32 %v6194_v53, %v3918_v38  ;;  %v6200_v53 = vld [vmem:[#allocation17_spill] sm:$0xff] }
 0x245   :  { %v1391_v0 = vadd.f32 %v1390_v1, %v1301_v31  ;;  %v1305_v31 = vmul.f32 %v4023_v21, %v4023_v21  ;;  %6195 = vst [vmem:[#allocation14_spill] sm:$0xff] %v4047_v9  ;;  %v4053_v21 = vsub.f32 %v6196_v25, %v3918_v38  ;;  %v6202_v25 = vld [vmem:[#allocation18_spill] sm:$0xff] }
 0x247   :  { %v1392_v34 = vadd.f32 %v1391_v0, %v1302_v56  ;;  %v1306_v56 = vmul.f32 %v4029_v46, %v4029_v46  ;;  %6197 = vst [vmem:[#allocation15_spill] sm:$0xff] %v4053_v21  ;;  %v4059_v46 = vsub.f32 %v6198_v5, %v3918_v38  ;;  %v6204_v5 = vld [vmem:[#allocation19_spill] sm:$0xff] }
 0x249   :  { %v1393_v4 = vadd.f32 %v1392_v34, %v1303_v42  ;;  %v1307_v42 = vmul.f32 %v4035_v12, %v4035_v12  ;;  %6199 = vst [vmem:[#allocation16_spill] sm:$0xff] %v4059_v46  ;;  %v4065_v12 = vsub.f32 %v6200_v53, %v3918_v38  ;;  %v6206_v53 = vld [vmem:[#allocation20_spill] sm:$0xff] }
 0x24b   :  { %v1394_v1 = vadd.f32 %v1393_v4, %v1304_v41  ;;  %v1308_v41 = vmul.f32 %v4041_v61, %v4041_v61  ;;  %6201 = vst [vmem:[#allocation17_spill] sm:$0xff] %v4065_v12  ;;  %v4071_v61 = vsub.f32 %v6202_v25, %v3918_v38  ;;  %v6208_v25 = vld [vmem:[#allocation21_spill] sm:$0xff] }
 0x24d   :  { %v1395_v0 = vadd.f32 %v1394_v1, %v1305_v31  ;;  %v1309_v31 = vmul.f32 %v4047_v9, %v4047_v9  ;;  %6203 = vst [vmem:[#allocation18_spill] sm:$0xff] %v4071_v61  ;;  %v4077_v9 = vsub.f32 %v6204_v5, %v3918_v38  ;;  %v6210_v5 = vld [vmem:[#allocation22_spill] sm:$0xff] }
 0x24f   :  { %v1396_v34 = vadd.f32 %v1395_v0, %v1306_v56  ;;  %v1310_v56 = vmul.f32 %v4053_v21, %v4053_v21  ;;  %6205 = vst [vmem:[#allocation19_spill] sm:$0xff] %v4077_v9  ;;  %v4083_v21 = vsub.f32 %v6206_v53, %v3918_v38  ;;  %v6212_v53 = vld [vmem:[#allocation23_spill] sm:$0xff] }
 0x251   :  { %v1397_v4 = vadd.f32 %v1396_v34, %v1307_v42  ;;  %v1311_v42 = vmul.f32 %v4059_v46, %v4059_v46  ;;  %6207 = vst [vmem:[#allocation20_spill] sm:$0xff] %v4083_v21  ;;  %v4089_v46 = vsub.f32 %v6208_v25, %v3918_v38  ;;  %v6214_v25 = vld [vmem:[#allocation24_spill] sm:$0xff] }
 0x253   :  { %v1398_v1 = vadd.f32 %v1397_v4, %v1308_v41  ;;  %v1312_v41 = vmul.f32 %v4065_v12, %v4065_v12  ;;  %6209 = vst [vmem:[#allocation21_spill] sm:$0xff] %v4089_v46  ;;  %v4095_v12 = vsub.f32 %v6210_v5, %v3918_v38  ;;  %v6216_v5 = vld [vmem:[#allocation25_spill] sm:$0xff] }
 0x255   :  { %v1399_v0 = vadd.f32 %v1398_v1, %v1309_v31  ;;  %v1313_v31 = vmul.f32 %v4071_v61, %v4071_v61  ;;  %6211 = vst [vmem:[#allocation22_spill] sm:$0xff] %v4095_v12  ;;  %v4101_v61 = vsub.f32 %v6212_v53, %v3918_v38  ;;  %v6218_v53 = vld [vmem:[#allocation26_spill] sm:$0xff] }
 0x257   :  { %v1400_v34 = vadd.f32 %v1399_v0, %v1310_v56  ;;  %v1314_v56 = vmul.f32 %v4077_v9, %v4077_v9  ;;  %6213 = vst [vmem:[#allocation23_spill] sm:$0xff] %v4101_v61  ;;  %v4107_v9 = vsub.f32 %v6214_v25, %v3918_v38  ;;  %v6220_v25 = vld [vmem:[#allocation27_spill] sm:$0xff] }
 0x259   :  { %v1401_v4 = vadd.f32 %v1400_v34, %v1311_v42  ;;  %v1315_v42 = vmul.f32 %v4083_v21, %v4083_v21  ;;  %6215 = vst [vmem:[#allocation24_spill] sm:$0xff] %v4107_v9  ;;  %v4113_v21 = vsub.f32 %v6216_v5, %v3918_v38  ;;  %v6222_v5 = vld [vmem:[#allocation28_spill] sm:$0xff] }
 0x25b   :  { %v1402_v1 = vadd.f32 %v1401_v4, %v1312_v41  ;;  %v1316_v41 = vmul.f32 %v4089_v46, %v4089_v46  ;;  %6217 = vst [vmem:[#allocation25_spill] sm:$0xff] %v4113_v21  ;;  %v4119_v46 = vsub.f32 %v6218_v53, %v3918_v38  ;;  %v6224_v53 = vld [vmem:[#allocation29_spill] sm:$0xff] }
 0x25d   :  { %v1403_v0 = vadd.f32 %v1402_v1, %v1313_v31  ;;  %v1317_v31 = vmul.f32 %v4095_v12, %v4095_v12  ;;  %6219 = vst [vmem:[#allocation26_spill] sm:$0xff] %v4119_v46  ;;  %v4125_v12 = vsub.f32 %v6220_v25, %v3918_v38  ;;  %v6226_v25 = vld [vmem:[#allocation30_spill] sm:$0xff] }
 0x25f   :  { %v1404_v34 = vadd.f32 %v1403_v0, %v1314_v56  ;;  %v1318_v56 = vmul.f32 %v4101_v61, %v4101_v61  ;;  %6221 = vst [vmem:[#allocation27_spill] sm:$0xff] %v4125_v12  ;;  %v4131_v61 = vsub.f32 %v6222_v5, %v3918_v38  ;;  %v6228_v5 = vld [vmem:[#allocation31_spill] sm:$0xff] }
 0x261   :  { %v1405_v4 = vadd.f32 %v1404_v34, %v1315_v42  ;;  %v1319_v42 = vmul.f32 %v4107_v9, %v4107_v9  ;;  %6223 = vst [vmem:[#allocation28_spill] sm:$0xff] %v4131_v61  ;;  %v4137_v9 = vsub.f32 %v6224_v53, %v3918_v38  ;;  %v6230_v53 = vld [vmem:[#allocation32_spill] sm:$0xff] }
 0x263   :  { %v1406_v1 = vadd.f32 %v1405_v4, %v1316_v41  ;;  %v1320_v41 = vmul.f32 %v4113_v21, %v4113_v21  ;;  %6225 = vst [vmem:[#allocation29_spill] sm:$0xff] %v4137_v9  ;;  %v4143_v21 = vsub.f32 %v6226_v25, %v3918_v38  ;;  %v6232_v25 = vld [vmem:[#allocation33_spill] sm:$0xff] }
 0x265   :  { %v1407_v0 = vadd.f32 %v1406_v1, %v1317_v31  ;;  %v1321_v31 = vmul.f32 %v4119_v46, %v4119_v46  ;;  %6227 = vst [vmem:[#allocation30_spill] sm:$0xff] %v4143_v21  ;;  %v4149_v46 = vsub.f32 %v6228_v5, %v3918_v38  ;;  %v6234_v5 = vld [vmem:[#allocation34_spill] sm:$0xff] }
 0x267   :  { %v1408_v34 = vadd.f32 %v1407_v0, %v1318_v56  ;;  %v1322_v56 = vmul.f32 %v4125_v12, %v4125_v12  ;;  %6229 = vst [vmem:[#allocation31_spill] sm:$0xff] %v4149_v46  ;;  %v4155_v12 = vsub.f32 %v6230_v53, %v3918_v38  ;;  %v6236_v53 = vld [vmem:[#allocation35_spill] sm:$0xff] }
 0x269   :  { %v1409_v4 = vadd.f32 %v1408_v34, %v1319_v42  ;;  %v1323_v42 = vmul.f32 %v4131_v61, %v4131_v61  ;;  %6231 = vst [vmem:[#allocation32_spill] sm:$0xff] %v4155_v12  ;;  %v4161_v61 = vsub.f32 %v6232_v25, %v3918_v38  ;;  %v6238_v25 = vld [vmem:[#allocation36_spill] sm:$0xff] }
 0x26b   :  { %v1410_v1 = vadd.f32 %v1409_v4, %v1320_v41  ;;  %v1324_v41 = vmul.f32 %v4137_v9, %v4137_v9  ;;  %6233 = vst [vmem:[#allocation33_spill] sm:$0xff] %v4161_v61  ;;  %v4167_v9 = vsub.f32 %v6234_v5, %v3918_v38  ;;  %v6239_v5 = vld [vmem:[#allocation37_spill] sm:$0xff] }
 0x26d   :  { %v1411_v0 = vadd.f32 %v1410_v1, %v1321_v31  ;;  %v1325_v31 = vmul.f32 %v4143_v21, %v4143_v21  ;;  %6235 = vst [vmem:[#allocation34_spill] sm:$0xff] %v4167_v9  ;;  %v4173_v21 = vsub.f32 %v6236_v53, %v3918_v38  ;;  %v6240_v53 = vld [vmem:[#allocation38_spill] sm:$0xff] }
 0x26f   :  { %v1412_v34 = vadd.f32 %v1411_v0, %v1322_v56  ;;  %v1326_v56 = vmul.f32 %v4149_v46, %v4149_v46  ;;  %6237 = vst [vmem:[#allocation35_spill] sm:$0xff] %v4173_v21  ;;  %v4179_v46 = vsub.f32 %v6238_v25, %v3918_v38  ;;  %v6241_v25 = vld [vmem:[#allocation39_spill] sm:$0xff] }
 0x271   :  { %v1413_v4 = vadd.f32 %v1412_v34, %v1323_v42  ;;  %v1327_v42 = vmul.f32 %v4155_v12, %v4155_v12  ;;  %v4185_v12 = vsub.f32 %v6239_v5, %v3918_v38  ;;  %v6242_v5 = vld [vmem:[#allocation40_spill] sm:$0xff] }
 0x273   :  { %v1414_v1 = vadd.f32 %v1413_v4, %v1324_v41  ;;  %v1328_v41 = vmul.f32 %v4161_v61, %v4161_v61  ;;  %v4191_v61 = vsub.f32 %v6240_v53, %v3918_v38  ;;  %v4209_v53 = vsub.f32 %v3712_v18, %v3918_v38 }
 0x275   :  { %v1415_v0 = vadd.f32 %v1414_v1, %v1325_v31  ;;  %v1329_v31 = vmul.f32 %v4167_v9, %v4167_v9  ;;  %v4197_v9 = vsub.f32 %v6241_v25, %v3918_v38  ;;  %v4215_v25 = vsub.f32 %v3717_v49, %v3918_v38 }
 0x276   :  { %v1336_v18 = vmul.f32 %v4209_v53, %v4209_v53 }
 0x277   :  { %v1416_v34 = vadd.f32 %v1415_v0, %v1326_v56  ;;  %v1330_v56 = vmul.f32 %v4173_v21, %v4173_v21  ;;  %v4203_v21 = vsub.f32 %v6242_v5, %v3918_v38  ;;  %v4221_v5 = vsub.f32 %v3724_v20, %v3918_v38 }
 0x278   :  { %v1337_v49 = vmul.f32 %v4215_v25, %v4215_v25 }
 0x279   :  { %v1417_v4 = vadd.f32 %v1416_v34, %v1327_v42  ;;  %v1331_v42 = vmul.f32 %v4179_v46, %v4179_v46  ;;  %v1338_v20 = vmul.f32 %v4221_v5, %v4221_v5 }
 0x27b   :  { %v1418_v1 = vadd.f32 %v1417_v4, %v1328_v41  ;;  %v1332_v41 = vmul.f32 %v4185_v12, %v4185_v12 }
 0x27d   :  { %v1419_v0 = vadd.f32 %v1418_v1, %v1329_v31  ;;  %v1333_v31 = vmul.f32 %v4191_v61, %v4191_v61 }
 0x27f   :  { %v1420_v34 = vadd.f32 %v1419_v0, %v1330_v56  ;;  %v1334_v56 = vmul.f32 %v4197_v9, %v4197_v9 }
 0x281   :  { %v1421_v4 = vadd.f32 %v1420_v34, %v1331_v42  ;;  %v1335_v42 = vmul.f32 %v4203_v21, %v4203_v21 }
 0x283   :  { %v1422_v1 = vadd.f32 %v1421_v4, %v1332_v41  ;;  %v4227_v4 = vsub.f32 %v3730_v62, %v3918_v38 }
 0x285   :  { %v1423_v0 = vadd.f32 %v1422_v1, %v1333_v31  ;;  %v4233_v1 = vsub.f32 %v3734_v29, %v3918_v38  ;;  %v1339_v62 = vmul.f32 %v4227_v4, %v4227_v4 }
 0x287   :  { %v1424_v34 = vadd.f32 %v1423_v0, %v1334_v56  ;;  %v4239_v0 = vsub.f32 %v3738_v13, %v3918_v38  ;;  %v1340_v29 = vmul.f32 %v4233_v1, %v4233_v1 }
 0x289   :  { %v1425_v41 = vadd.f32 %v1424_v34, %v1335_v42  ;;  %v4245_v34 = vsub.f32 %v3743_v36, %v3918_v38  ;;  %v1341_v13 = vmul.f32 %v4239_v0, %v4239_v0 }
 0x28b   :  { %v1426_v31 = vadd.f32 %v1425_v41, %v1336_v18  ;;  %v4251_v41 = vsub.f32 %v3748_v35, %v3918_v38  ;;  %v1342_v36 = vmul.f32 %v4245_v34, %v4245_v34 }
 0x28d   :  { %v1427_v56 = vadd.f32 %v1426_v31, %v1337_v49  ;;  %v4257_v31 = vsub.f32 %v3753_v43, %v3918_v38  ;;  %v1343_v35 = vmul.f32 %v4251_v41, %v4251_v41 }
 0x28f   :  { %v1428_v42 = vadd.f32 %v1427_v56, %v1338_v20  ;;  %v4263_v56 = vsub.f32 %v3758_v40, %v3918_v38  ;;  %v1344_v43 = vmul.f32 %v4257_v31, %v4257_v31 }
 0x291   :  { %v1429_v18 = vadd.f32 %v1428_v42, %v1339_v62  ;;  %v4269_v42 = vsub.f32 %v3763_v17, %v3918_v38  ;;  %v1345_v40 = vmul.f32 %v4263_v56, %v4263_v56 }
 0x293   :  { %v1430_v49 = vadd.f32 %v1429_v18, %v1340_v29  ;;  %v4275_v18 = vsub.f32 %v3768_v50, %v3918_v38  ;;  %v1346_v17 = vmul.f32 %v4269_v42, %v4269_v42 }
 0x295   :  { %v1431_v20 = vadd.f32 %v1430_v49, %v1341_v13  ;;  %v4281_v49 = vsub.f32 %v3773_v57, %v3918_v38  ;;  %v1347_v50 = vmul.f32 %v4275_v18, %v4275_v18 }
 0x297   :  { %v1432_v62 = vadd.f32 %v1431_v20, %v1342_v36  ;;  %v4287_v20 = vsub.f32 %v3778_v6, %v3918_v38  ;;  %v1348_v57 = vmul.f32 %v4281_v49, %v4281_v49 }
 0x299   :  { %v1433_v29 = vadd.f32 %v1432_v62, %v1343_v35  ;;  %v4293_v62 = vsub.f32 %v3783_v45, %v3918_v38  ;;  %v1349_v6 = vmul.f32 %v4287_v20, %v4287_v20 }
 0x29b   :  { %v1434_v13 = vadd.f32 %v1433_v29, %v1344_v43  ;;  %v4299_v29 = vsub.f32 %v3788_v44, %v3918_v38  ;;  %v1350_v45 = vmul.f32 %v4293_v62, %v4293_v62 }
 0x29d   :  { %v1435_v36 = vadd.f32 %v1434_v13, %v1345_v40  ;;  %v4305_v13 = vsub.f32 %v3793_v47, %v3918_v38  ;;  %v1351_v44 = vmul.f32 %v4299_v29, %v4299_v29 }
 0x29f   :  { %v1436_v35 = vadd.f32 %v1435_v36, %v1346_v17  ;;  %v4311_v36 = vsub.f32 %v3798_v51, %v3918_v38  ;;  %v1352_v47 = vmul.f32 %v4305_v13, %v4305_v13 }
 0x2a1   :  { %v1437_v43 = vadd.f32 %v1436_v35, %v1347_v50  ;;  %v4317_v35 = vsub.f32 %v3803_v55, %v3918_v38  ;;  %v1353_v51 = vmul.f32 %v4311_v36, %v4311_v36 }
 0x2a3   :  { %v1438_v40 = vadd.f32 %v1437_v43, %v1348_v57  ;;  %v4323_v43 = vsub.f32 %v3808_v59, %v3918_v38  ;;  %v1354_v55 = vmul.f32 %v4317_v35, %v4317_v35 }
 0x2a5   :  { %v1439_v17 = vadd.f32 %v1438_v40, %v1349_v6  ;;  %v4329_v40 = vsub.f32 %v3813_v63, %v3918_v38  ;;  %v1355_v59 = vmul.f32 %v4323_v43, %v4323_v43 }
 0x2a7   :  { %v1440_v50 = vadd.f32 %v1439_v17, %v1350_v45  ;;  %v4335_v17 = vsub.f32 %v3818_v3, %v3918_v38  ;;  %v1356_v63 = vmul.f32 %v4329_v40, %v4329_v40 }
 0x2a9   :  { %v1441_v57 = vadd.f32 %v1440_v50, %v1351_v44  ;;  %v4341_v50 = vsub.f32 %v3823_v7, %v3918_v38  ;;  %v1357_v3 = vmul.f32 %v4335_v17, %v4335_v17 }
 0x2ab   :  { %v1442_v6 = vadd.f32 %v1441_v57, %v1352_v47  ;;  %v4347_v57 = vsub.f32 %v3828_v11, %v3918_v38  ;;  %v1358_v7 = vmul.f32 %v4341_v50, %v4341_v50 }
 0x2ad   :  { %v1443_v45 = vadd.f32 %v1442_v6, %v1353_v51  ;;  %v4353_v6 = vsub.f32 %v3833_v15, %v3918_v38  ;;  %v1359_v11 = vmul.f32 %v4347_v57, %v4347_v57 }
 0x2af   :  { %v1444_v44 = vadd.f32 %v1443_v45, %v1354_v55  ;;  %v4359_v45 = vsub.f32 %v3838_v19, %v3918_v38  ;;  %v1360_v15 = vmul.f32 %v4353_v6, %v4353_v6 }
 0x2b1   :  { %v1445_v47 = vadd.f32 %v1444_v44, %v1355_v59  ;;  %v4365_v44 = vsub.f32 %v3843_v23, %v3918_v38  ;;  %v1361_v19 = vmul.f32 %v4359_v45, %v4359_v45 }
 0x2b3   :  { %v1446_v51 = vadd.f32 %v1445_v47, %v1356_v63  ;;  %6243 = vst [vmem:[#allocation36_spill] sm:$0xff] %v4365_v44  ;;  %v4371_v47 = vsub.f32 %v3848_v27, %v3918_v38  ;;  %v1362_v23 = vmul.f32 %v4365_v44, %v4365_v44 }
 0x2b5   :  { %v1447_v55 = vadd.f32 %v1446_v51, %v1357_v3  ;;  %6244 = vst [vmem:[#allocation37_spill] sm:$0xff] %v4371_v47  ;;  %v4377_v51 = vsub.f32 %v3853_v33, %v3918_v38  ;;  %v1363_v27 = vmul.f32 %v4371_v47, %v4371_v47 }
 0x2b7   :  { %v1448_v59 = vadd.f32 %v1447_v55, %v1358_v7  ;;  %6245 = vst [vmem:[#allocation38_spill] sm:$0xff] %v4377_v51  ;;  %v4383_v55 = vsub.f32 %v3859_v60, %v3918_v38  ;;  %v1364_v33 = vmul.f32 %v4377_v51, %v4377_v51 }
 0x2b9   :  { %v1449_v63 = vadd.f32 %v1448_v59, %v1359_v11  ;;  %v4389_v59 = vsub.f32 %v3864_v16, %v3918_v38  ;;  %v1365_v60 = vmul.f32 %v4383_v55, %v4383_v55 }
 0x2bb   :  { %v1450_v3 = vadd.f32 %v1449_v63, %v1360_v15  ;;  %6246 = vst [vmem:[#allocation39_spill] sm:$0xff] %v4389_v59  ;;  %v6247_v63 = vld [vmem:[#allocation41_spill] sm:$0xff]  ;;  %v1366_v16 = vmul.f32 %v4389_v59, %v4389_v59  ;;  %v1370_v59 = vmul.f32 %v3921_v28, %v3921_v28 }
 0x2bc   :  { %v4395_v44 = vsub.f32 %v6247_v63, %v3918_v38 }
 0x2bd   :  { %v1451_v7 = vadd.f32 %v1450_v3, %v1361_v19  ;;  %v6249_v3 = vld [vmem:[#allocation42_spill] sm:$0xff] }
 0x2be   :  { %6248 = vst [vmem:[#allocation40_spill] sm:$0xff] %v4395_v44  ;;  %v4401_v47 = vsub.f32 %v6249_v3, %v3918_v38 }
 0x2bf   :  { %v1452_v11 = vadd.f32 %v1451_v7, %v1362_v23  ;;  %v6250_v7 = vld [vmem:[#allocation43_spill] sm:$0xff] }
 0x2c0   :  { %v4407_v51 = vsub.f32 %v6250_v7, %v3918_v38  ;;  %v1368_v63 = vmul.f32 %v4401_v47, %v4401_v47 }
 0x2c1   :  { %v1453_v15 = vadd.f32 %v1452_v11, %v1363_v27  ;;  %v1367_v27 = vmul.f32 %v4395_v44, %v4395_v44  ;;  %v1372_v44 = vmul.f32 %v3927_v30, %v3927_v30 }
 0x2c3   :  { %v1454_v19 = vadd.f32 %v1453_v15, %v1364_v33  ;;  %v1369_v15 = vmul.f32 %v4407_v51, %v4407_v51 }
 0x2c5   :  { %v1455_v23 = vadd.f32 %v1454_v19, %v1365_v60  ;;  %v1371_v19 = vmul.f32 %v3924_v22, %v3924_v22 }
 0x2c7   :  { %v1456_v11 = vadd.f32 %v1455_v23, %v1366_v16  ;;  %v1373_v23 = vmul.f32 %v3930_v26, %v3930_v26 }
 0x2c9   :  { %v1457_v33 = vadd.f32 %v1456_v11, %v1367_v27  ;;  %v1374_v11 = vmul.f32 %v3933_v8, %v3933_v8 }
 0x2cb   :  { %v1458_v3 = vadd.f32 %v1457_v33, %v1368_v63  ;;  %v1375_v33 = vmul.f32 %v3936_v48, %v3936_v48 }
 0x2cd   :  { %v1459_v60 = vadd.f32 %v1458_v3, %v1369_v15  ;;  %v1376_v3 = vmul.f32 %v3939_v2, %v3939_v2 }
 0x2cf   :  { %v1460_v7 = vadd.f32 %v1459_v60, %v1370_v59  ;;  %v1377_v60 = vmul.f32 %v3942_v10, %v3942_v10 }
 0x2d1   :  { %v1461_v16 = vadd.f32 %v1460_v7, %v1371_v19  ;;  %v1378_v7 = vmul.f32 %v3945_v14, %v3945_v14 }
 0x2d3   :  { %v1462_v27 = vadd.f32 %v1461_v16, %v1372_v44  ;;  %v1379_v16 = vmul.f32 %v3948_v24, %v3948_v24 }
 0x2d5   :  { %v1463_v63 = vadd.f32 %v1462_v27, %v1373_v23  ;;  %v1380_v27 = vmul.f32 %v3951_v32, %v3951_v32 }
 0x2d7   :  { %v1464_v15 = vadd.f32 %v1463_v63, %v1374_v11  ;;  %v1381_v63 = vmul.f32 %v3954_v54, %v3954_v54 }
 0x2d9   :  { %v1465_v59 = vadd.f32 %v1464_v15, %v1375_v33  ;;  %v4441_v15 = vsub.f32 %v3912_v39, %v3918_v38 }
 0x2db   :  { %v1466_v19 = vadd.f32 %v1465_v59, %v1376_v3  ;;  %6251 = vst [vmem:[#allocation41_spill] sm:$0xff] %v4441_v15  ;;  %v1382_v3 = vmul.f32 %v3957_v52, %v3957_v52 }
 0x2dd   :  { %v1467_v44 = vadd.f32 %v1466_v19, %v1377_v60  ;;  %v1383_v60 = vmul.f32 %v3960_v58, %v3960_v58 }
 0x2df   :  { %v1468_v23 = vadd.f32 %v1467_v44, %v1378_v7  ;;  %v1385_v7 = vmul.f32 %v4441_v15, %v4441_v15  ;;  %v1384_v44 = vmul.f32 %v3963_v37, %v3963_v37 }
 0x2e1   :  { %v1469_v11 = vadd.f32 %v1468_v23, %v1379_v16 }
 0x2e3   :  { %v1470_v33 = vadd.f32 %v1469_v11, %v1380_v27  ;;  %v1475_v27 = vsel %vm1193_vm0, %v1385_v7, 0.0  ;;  %v6254_v7 = vld [vmem:[#allocation2_spill] sm:$0xff] }
 0x2e5   :  { %v1471_v59 = vadd.f32 %v1470_v33, %v1381_v63 }
 0x2e7   :  { %v1472_v19 = vadd.f32 %v1471_v59, %v1382_v3  ;;  %v6252_v59 = vld [vmem:[#allocation48_spill] sm:$0xff] }
 0x2e9   :  { %v1473_v16 = vadd.f32 %v1472_v19, %v1383_v60  ;;  %v6253_v60 = vld [vmem:[#allocation49_spill] sm:$0xff] }
 0x2eb   :  { %v1474_v23 = vadd.f32 %v1473_v16, %v1384_v44  ;;  %v6257_v16 = vld [vmem:[#allocation5_spill] sm:$0xff] }
 0x2ed   :  { %v1476_v38 = vadd.f32 %v1475_v27, %v1474_v23  ;;  %v6258_v27 = vld [vmem:[#allocation6_spill] sm:$0xff] }
 0x2ef   :  { %v1477_v39 = vrot.slane %v1476_v38, 4 }
 0x2f1   :  { %v1478_v11 = vadd.f32 %v1477_v39, %v1476_v38  ;;  %v6259_v39 = vld [vmem:[#allocation7_spill] sm:$0xff] }
 0x2f3   :  { %v1479_v54 = vrot.slane %v1478_v11, 2 }
 0x2f5   :  { %v1480_v52 = vadd.f32 %v1479_v54, %v1478_v11  ;;  %v6255_v54 = vld [vmem:[#allocation3_spill] sm:$0xff] }
 0x2f7   :  { %v1481_v63 = vrot.slane %v1480_v52, 1 }
 0x2f9   :  { %v1482_v33 = vadd.f32 %v1481_v63, %v1480_v52  ;;  %v6261_v63 = vld [vmem:[#allocation8_spill] sm:$0xff] }
 0x2fb   :  { %v1483_v32 = vmul.f32 0.0013850415, %v1482_v33 }
 0x2fd   :  { %v1484_v58 = vadd.f32 1e-05, %v1483_v32  ;;  %v6256_v32 = vld [vmem:[#allocation4_spill] sm:$0xff] }
 0x2ff   :  { %3072 = vrsqrt.f32 %v1484_v58 }
 0x309   :  { %v4452_v3 = vpop.eup %3072 }
 0x30a   :  { %v4456_v15 = vmul.f32 %v4452_v3, %v6252_v59  ;;  %v4460_v19 = vmul.f32 %v4452_v3, %v6253_v60  ;;  %v4464_v44 = vmul.f32 %v4452_v3, %v6254_v7  ;;  %v4468_v52 = vmul.f32 %v4452_v3, %v6255_v54  ;;  %v6263_v59 = vld [vmem:[#allocation9_spill] sm:$0xff]  ;;  %v6265_v7 = vld [vmem:[#allocation10_spill] sm:$0xff] }
 0x30b   :  { %v4472_v58 = vmul.f32 %v4452_v3, %v6256_v32  ;;  %v4476_v23 = vmul.f32 %v4452_v3, %v6257_v16  ;;  %v4480_v38 = vmul.f32 %v4452_v3, %v6258_v27  ;;  %v4484_v11 = vmul.f32 %v4452_v3, %v6259_v39  ;;  %v6267_v32 = vld [vmem:[#allocation11_spill] sm:$0xff]  ;;  %v6269_v27 = vld [vmem:[#allocation12_spill] sm:$0xff] }
 0x30c   :  { %v4488_v33 = vmul.f32 %v4452_v3, %v6261_v63  ;;  %v4492_v60 = vmul.f32 %v4452_v3, %v6263_v59  ;;  %v4496_v54 = vmul.f32 %v4452_v3, %v6265_v7  ;;  %v4500_v16 = vmul.f32 %v4452_v3, %v6267_v32 }
 0x30d   :  { %6260 = vst [vmem:[#allocation42_spill] sm:$0xff] %v4484_v11  ;;  %v4504_v39 = vmul.f32 %v4452_v3, %v6269_v27  ;;  %v6271_v11 = vld [vmem:[#allocation13_spill] sm:$0xff] }
 0x30e   :  { %6262 = vst [vmem:[#allocation43_spill] sm:$0xff] %v4488_v33  ;;  %6264 = vst [vmem:[#allocation48_spill] sm:$0xff] %v4492_v60  ;;  %v4508_v63 = vmul.f32 %v4452_v3, %v6271_v11  ;;  %v6273_v33 = vld [vmem:[#allocation14_spill] sm:$0xff]  ;;  %v6275_v60 = vld [vmem:[#allocation15_spill] sm:$0xff] }
 0x30f   :  { %6266 = vst [vmem:[#allocation49_spill] sm:$0xff] %v4496_v54  ;;  %6268 = vst [vmem:[#allocation2_spill] sm:$0xff] %v4500_v16  ;;  %v4512_v59 = vmul.f32 %v4452_v3, %v6273_v33  ;;  %v4516_v7 = vmul.f32 %v4452_v3, %v6275_v60  ;;  %v6277_v54 = vld [vmem:[#allocation16_spill] sm:$0xff]  ;;  %v6279_v16 = vld [vmem:[#allocation17_spill] sm:$0xff] }
 0x310   :  { %6270 = vst [vmem:[#allocation3_spill] sm:$0xff] %v4504_v39  ;;  %6272 = vst [vmem:[#allocation4_spill] sm:$0xff] %v4508_v63  ;;  %v4520_v32 = vmul.f32 %v4452_v3, %v6277_v54  ;;  %v4524_v27 = vmul.f32 %v4452_v3, %v6279_v16  ;;  %v6281_v39 = vld [vmem:[#allocation18_spill] sm:$0xff]  ;;  %v6283_v63 = vld [vmem:[#allocation19_spill] sm:$0xff] }
 0x311   :  { %6274 = vst [vmem:[#allocation5_spill] sm:$0xff] %v4512_v59  ;;  %6276 = vst [vmem:[#allocation6_spill] sm:$0xff] %v4516_v7  ;;  %v4528_v11 = vmul.f32 %v4452_v3, %v6281_v39  ;;  %v4532_v33 = vmul.f32 %v4452_v3, %v6283_v63  ;;  %v6285_v59 = vld [vmem:[#allocation20_spill] sm:$0xff]  ;;  %v6287_v7 = vld [vmem:[#allocation21_spill] sm:$0xff] }
 0x312   :  { %6278 = vst [vmem:[#allocation7_spill] sm:$0xff] %v4520_v32  ;;  %6280 = vst [vmem:[#allocation8_spill] sm:$0xff] %v4524_v27  ;;  %v4536_v60 = vmul.f32 %v4452_v3, %v6285_v59  ;;  %v4540_v54 = vmul.f32 %v4452_v3, %v6287_v7  ;;  %v6289_v32 = vld [vmem:[#allocation22_spill] sm:$0xff]  ;;  %v6291_v27 = vld [vmem:[#allocation23_spill] sm:$0xff] }
 0x313   :  { %6282 = vst [vmem:[#allocation9_spill] sm:$0xff] %v4528_v11  ;;  %6284 = vst [vmem:[#allocation10_spill] sm:$0xff] %v4532_v33  ;;  %v4544_v16 = vmul.f32 %v4452_v3, %v6289_v32  ;;  %v4548_v39 = vmul.f32 %v4452_v3, %v6291_v27  ;;  %v6293_v11 = vld [vmem:[#allocation24_spill] sm:$0xff]  ;;  %v6295_v33 = vld [vmem:[#allocation25_spill] sm:$0xff] }
 0x314   :  { %6286 = vst [vmem:[#allocation11_spill] sm:$0xff] %v4536_v60  ;;  %6288 = vst [vmem:[#allocation12_spill] sm:$0xff] %v4540_v54  ;;  %v4552_v63 = vmul.f32 %v4452_v3, %v6293_v11  ;;  %v4556_v59 = vmul.f32 %v4452_v3, %v6295_v33  ;;  %v6297_v60 = vld [vmem:[#allocation26_spill] sm:$0xff]  ;;  %v6299_v54 = vld [vmem:[#allocation27_spill] sm:$0xff] }
 0x315   :  { %6290 = vst [vmem:[#allocation13_spill] sm:$0xff] %v4544_v16  ;;  %6292 = vst [vmem:[#allocation14_spill] sm:$0xff] %v4548_v39  ;;  %v4560_v7 = vmul.f32 %v4452_v3, %v6297_v60  ;;  %v4564_v32 = vmul.f32 %v4452_v3, %v6299_v54  ;;  %v6301_v16 = vld [vmem:[#allocation28_spill] sm:$0xff]  ;;  %v6303_v39 = vld [vmem:[#allocation29_spill] sm:$0xff] }
 0x316   :  { %6294 = vst [vmem:[#allocation15_spill] sm:$0xff] %v4552_v63  ;;  %6296 = vst [vmem:[#allocation16_spill] sm:$0xff] %v4556_v59  ;;  %v4568_v27 = vmul.f32 %v4452_v3, %v6301_v16  ;;  %v4572_v11 = vmul.f32 %v4452_v3, %v6303_v39  ;;  %v6305_v63 = vld [vmem:[#allocation30_spill] sm:$0xff]  ;;  %v6306_v59 = vld [vmem:[#allocation31_spill] sm:$0xff] }
 0x317   :  { %6298 = vst [vmem:[#allocation17_spill] sm:$0xff] %v4560_v7  ;;  %6300 = vst [vmem:[#allocation18_spill] sm:$0xff] %v4564_v32  ;;  %v4576_v33 = vmul.f32 %v4452_v3, %v6305_v63  ;;  %v4580_v60 = vmul.f32 %v4452_v3, %v6306_v59  ;;  %v6307_v7 = vld [vmem:[#allocation32_spill] sm:$0xff]  ;;  %v6308_v32 = vld [vmem:[#allocation33_spill] sm:$0xff]  ;;  %v4600_v59 = vmul.f32 %v4452_v3, %v4179_v46 }
 0x318   :  { %6302 = vst [vmem:[#allocation19_spill] sm:$0xff] %v4568_v27  ;;  %6304 = vst [vmem:[#allocation20_spill] sm:$0xff] %v4572_v11  ;;  %v4584_v54 = vmul.f32 %v4452_v3, %v6307_v7  ;;  %v4588_v16 = vmul.f32 %v4452_v3, %v6308_v32  ;;  %v6309_v27 = vld [vmem:[#allocation34_spill] sm:$0xff]  ;;  %v6310_v11 = vld [vmem:[#allocation35_spill] sm:$0xff]  ;;  %v4604_v7 = vmul.f32 %v4452_v3, %v4185_v12 }
 0x319   :  { %v4592_v39 = vmul.f32 %v4452_v3, %v6309_v27  ;;  %v4596_v63 = vmul.f32 %v4452_v3, %v6310_v11  ;;  %v4608_v32 = vmul.f32 %v4452_v3, %v4191_v61  ;;  %v4612_v27 = vmul.f32 %v4452_v3, %v4197_v9 }
 0x31a   :  { %v4616_v11 = vmul.f32 %v4452_v3, %v4203_v21  ;;  %v4620_v46 = vmul.f32 %v4452_v3, %v4209_v53  ;;  %v4624_v12 = vmul.f32 %v4452_v3, %v4215_v25  ;;  %v4628_v61 = vmul.f32 %v4452_v3, %v4221_v5 }
 0x31b   :  { %v4632_v9 = vmul.f32 %v4452_v3, %v4227_v4  ;;  %v4636_v21 = vmul.f32 %v4452_v3, %v4233_v1  ;;  %v4640_v53 = vmul.f32 %v4452_v3, %v4239_v0  ;;  %v4644_v25 = vmul.f32 %v4452_v3, %v4245_v34 }
 0x31c   :  { %v4648_v5 = vmul.f32 %v4452_v3, %v4251_v41  ;;  %v4652_v4 = vmul.f32 %v4452_v3, %v4257_v31  ;;  %v4656_v1 = vmul.f32 %v4452_v3, %v4263_v56  ;;  %v4660_v0 = vmul.f32 %v4452_v3, %v4269_v42 }
 0x31d   :  { %v4664_v34 = vmul.f32 %v4452_v3, %v4275_v18  ;;  %v4668_v41 = vmul.f32 %v4452_v3, %v4281_v49  ;;  %v4672_v31 = vmul.f32 %v4452_v3, %v4287_v20  ;;  %v4676_v56 = vmul.f32 %v4452_v3, %v4293_v62 }
 0x31e   :  { %v4680_v42 = vmul.f32 %v4452_v3, %v4299_v29  ;;  %v4684_v18 = vmul.f32 %v4452_v3, %v4305_v13  ;;  %v4688_v49 = vmul.f32 %v4452_v3, %v4311_v36  ;;  %v4692_v20 = vmul.f32 %v4452_v3, %v4317_v35 }
 0x31f   :  { %v4696_v62 = vmul.f32 %v4452_v3, %v4323_v43  ;;  %v4700_v29 = vmul.f32 %v4452_v3, %v4329_v40  ;;  %v4704_v13 = vmul.f32 %v4452_v3, %v4335_v17  ;;  %v4708_v36 = vmul.f32 %v4452_v3, %v4341_v50 }
 0x320   :  { %v4712_v35 = vmul.f32 %v4452_v3, %v4347_v57  ;;  %v4716_v43 = vmul.f32 %v4452_v3, %v4353_v6  ;;  %v4720_v40 = vmul.f32 %v4452_v3, %v4359_v45  ;;  %v4736_v6 = vmul.f32 %v4452_v3, %v4383_v55 }
 0x321   :  { %6311 = vst [vmem:[#allocation21_spill] sm:$0xff] %v4700_v29  ;;  %6312 = vst [vmem:[#allocation22_spill] sm:$0xff] %v4704_v13  ;;  %v6316_v29 = vld [vmem:[#allocation36_spill] sm:$0xff]  ;;  %v6317_v13 = vld [vmem:[#allocation37_spill] sm:$0xff]  ;;  %v4756_v55 = vmul.f32 %v4452_v3, %v3921_v28 }
 0x322   :  { %6313 = vst [vmem:[#allocation23_spill] sm:$0xff] %v4708_v36  ;;  %6314 = vst [vmem:[#allocation24_spill] sm:$0xff] %v4716_v43  ;;  %v4724_v17 = vmul.f32 %v4452_v3, %v6316_v29  ;;  %v4728_v50 = vmul.f32 %v4452_v3, %v6317_v13  ;;  %v6318_v36 = vld [vmem:[#allocation38_spill] sm:$0xff]  ;;  %v6319_v43 = vld [vmem:[#allocation39_spill] sm:$0xff]  ;;  %v4748_v13 = vmul.f32 %v4452_v3, %v4401_v47 }
 0x323   :  { %6315 = vst [vmem:[#allocation25_spill] sm:$0xff] %v4720_v40  ;;  %v4732_v57 = vmul.f32 %v4452_v3, %v6318_v36  ;;  %v4740_v45 = vmul.f32 %v4452_v3, %v6319_v43  ;;  %v6320_v40 = vld [vmem:[#allocation40_spill] sm:$0xff]  ;;  %v4752_v36 = vmul.f32 %v4452_v3, %v4407_v51  ;;  %v4760_v43 = vmul.f32 %v4452_v3, %v3924_v22  ;;  %v4777_v28 = vld [vmem:[%s5968_s3] ss:$0 sm:$0xff] }
 0x324   :  { %v4744_v29 = vmul.f32 %v4452_v3, %v6320_v40  ;;  %v4764_v40 = vmul.f32 %v4452_v3, %v3927_v30  ;;  %v4768_v47 = vmul.f32 %v4452_v3, %v3930_v26  ;;  %v4772_v51 = vmul.f32 %v4452_v3, %v3933_v8 }
 0x325   :  { %v4781_v22 = vmul.f32 %v4452_v3, %v3936_v48  ;;  %v4785_v30 = vmul.f32 %v4452_v3, %v3939_v2  ;;  %v4789_v26 = vmul.f32 %v4452_v3, %v3942_v10  ;;  %v4793_v8 = vmul.f32 %v4452_v3, %v3945_v14 }
 0x326   :  { %6321 = vst [vmem:[#allocation26_spill] sm:$0xff] %v4768_v47  ;;  %6322 = vst [vmem:[#allocation27_spill] sm:$0xff] %v4772_v51  ;;  %v4797_v51 = vmul.f32 %v4452_v3, %v3948_v24  ;;  %v6327_v47 = vld [vmem:[#allocation44_spill] sm:$0xff]  ;;  %v4817_v24 = vmul.f32 %v4452_v3, %v3963_v37  ;;  %v4837_v37 = vmul.f32 %v4777_v28, %v4468_v52 }
 0x327   :  { %6323 = vst [vmem:[#allocation28_spill] sm:$0xff] %v4781_v22  ;;  %6324 = vst [vmem:[#allocation29_spill] sm:$0xff] %v4785_v30  ;;  %v4801_v48 = vmul.f32 %v4452_v3, %v6327_v47  ;;  %v6328_v22 = vld [vmem:[#allocation45_spill] sm:$0xff]  ;;  %v6329_v30 = vld [vmem:[#allocation46_spill] sm:$0xff] }
 0x328   :  { %6325 = vst [vmem:[#allocation30_spill] sm:$0xff] %v4789_v26  ;;  %6326 = vst [vmem:[#allocation31_spill] sm:$0xff] %v4797_v51  ;;  %v4805_v2 = vmul.f32 %v4452_v3, %v6328_v22  ;;  %v4809_v10 = vmul.f32 %v4452_v3, %v6329_v30  ;;  %v6330_v26 = vld [vmem:[#allocation47_spill] sm:$0xff]  ;;  %v6331_v51 = vld [vmem:[#allocation41_spill] sm:$0xff]  ;;  %v4825_v22 = vmul.f32 %v4777_v28, %v4456_v15 }
 0x329   :  { %v4813_v14 = vmul.f32 %v4452_v3, %v6330_v26  ;;  %v4821_v47 = vmul.f32 %v4452_v3, %v6331_v51  ;;  %v4829_v30 = vmul.f32 %v4777_v28, %v4460_v19  ;;  %v4833_v26 = vmul.f32 %v4777_v28, %v4464_v44  ;;  %6333 = vst [vmem:[#allocation33_spill] sm:$0xff] %v4837_v37  ;;  %v6337_v51 = vld [vmem:[#allocation42_spill] sm:$0xff]  ;;  %v6341_v37 = vld [vmem:[#allocation48_spill] sm:$0xff] }
 0x32a   :  { %v4841_v3 = vmul.f32 %v4777_v28, %v4472_v58  ;;  %v4845_v15 = vmul.f32 %v4777_v28, %v4476_v23  ;;  %v4849_v19 = vmul.f32 %v4777_v28, %v4480_v38  ;;  %v4853_v44 = vmul.f32 %v4777_v28, %v6337_v51 }
 0x32b   :  { %6332 = vst [vmem:[#allocation32_spill] sm:$0xff] %v4833_v26  ;;  %v6339_v26 = vld [vmem:[#allocation43_spill] sm:$0xff]  ;;  %v4861_v58 = vmul.f32 %v4777_v28, %v6341_v37 }
 0x32c   :  { %6334 = vst [vmem:[#allocation34_spill] sm:$0xff] %v4841_v3  ;;  %6335 = vst [vmem:[#allocation35_spill] sm:$0xff] %v4845_v15  ;;  %v4857_v52 = vmul.f32 %v4777_v28, %v6339_v26  ;;  %v6343_v3 = vld [vmem:[#allocation49_spill] sm:$0xff]  ;;  %v6345_v15 = vld [vmem:[#allocation2_spill] sm:$0xff] }
 0x32d   :  { %6336 = vst [vmem:[#allocation36_spill] sm:$0xff] %v4849_v19  ;;  %6338 = vst [vmem:[#allocation37_spill] sm:$0xff] %v4853_v44  ;;  %v4865_v23 = vmul.f32 %v4777_v28, %v6343_v3  ;;  %v4869_v38 = vmul.f32 %v4777_v28, %v6345_v15  ;;  %v6347_v19 = vld [vmem:[#allocation3_spill] sm:$0xff]  ;;  %v6349_v44 = vld [vmem:[#allocation4_spill] sm:$0xff] }
 0x32e   :  { %6340 = vst [vmem:[#allocation38_spill] sm:$0xff] %v4857_v52  ;;  %6342 = vst [vmem:[#allocation39_spill] sm:$0xff] %v4861_v58  ;;  %v4873_v51 = vmul.f32 %v4777_v28, %v6347_v19  ;;  %v4877_v26 = vmul.f32 %v4777_v28, %v6349_v44  ;;  %v6351_v52 = vld [vmem:[#allocation5_spill] sm:$0xff]  ;;  %v6353_v58 = vld [vmem:[#allocation6_spill] sm:$0xff] }
 0x32f   :  { %6344 = vst [vmem:[#allocation40_spill] sm:$0xff] %v4865_v23  ;;  %6346 = vst [vmem:[#allocation44_spill] sm:$0xff] %v4869_v38  ;;  %v4881_v37 = vmul.f32 %v4777_v28, %v6351_v52  ;;  %v4885_v3 = vmul.f32 %v4777_v28, %v6353_v58  ;;  %v6355_v23 = vld [vmem:[#allocation7_spill] sm:$0xff]  ;;  %v6357_v38 = vld [vmem:[#allocation8_spill] sm:$0xff] }
 0x330   :  { %6348 = vst [vmem:[#allocation45_spill] sm:$0xff] %v4873_v51  ;;  %6350 = vst [vmem:[#allocation46_spill] sm:$0xff] %v4877_v26  ;;  %v4889_v15 = vmul.f32 %v4777_v28, %v6355_v23  ;;  %v4893_v19 = vmul.f32 %v4777_v28, %v6357_v38  ;;  %v6359_v51 = vld [vmem:[#allocation9_spill] sm:$0xff]  ;;  %v6361_v26 = vld [vmem:[#allocation10_spill] sm:$0xff] }
 0x331   :  { %6352 = vst [vmem:[#allocation47_spill] sm:$0xff] %v4881_v37  ;;  %6354 = vst [vmem:[#allocation41_spill] sm:$0xff] %v4885_v3  ;;  %v4897_v44 = vmul.f32 %v4777_v28, %v6359_v51  ;;  %v4901_v52 = vmul.f32 %v4777_v28, %v6361_v26  ;;  %v6363_v37 = vld [vmem:[#allocation11_spill] sm:$0xff]  ;;  %v6365_v3 = vld [vmem:[#allocation12_spill] sm:$0xff] }
 0x332   :  { %6356 = vst [vmem:[#allocation42_spill] sm:$0xff] %v4889_v15  ;;  %6358 = vst [vmem:[#allocation43_spill] sm:$0xff] %v4893_v19  ;;  %v4905_v58 = vmul.f32 %v4777_v28, %v6363_v37  ;;  %v4909_v23 = vmul.f32 %v4777_v28, %v6365_v3  ;;  %v6367_v15 = vld [vmem:[#allocation13_spill] sm:$0xff]  ;;  %v6369_v19 = vld [vmem:[#allocation14_spill] sm:$0xff] }
 0x333   :  { %6360 = vst [vmem:[#allocation48_spill] sm:$0xff] %v4897_v44  ;;  %6362 = vst [vmem:[#allocation49_spill] sm:$0xff] %v4901_v52  ;;  %v4913_v38 = vmul.f32 %v4777_v28, %v6367_v15  ;;  %v4917_v51 = vmul.f32 %v4777_v28, %v6369_v19  ;;  %v6371_v44 = vld [vmem:[#allocation15_spill] sm:$0xff]  ;;  %v6372_v52 = vld [vmem:[#allocation16_spill] sm:$0xff] }
 0x334   :  { %6364 = vst [vmem:[#allocation2_spill] sm:$0xff] %v4905_v58  ;;  %6366 = vst [vmem:[#allocation3_spill] sm:$0xff] %v4909_v23  ;;  %v4921_v26 = vmul.f32 %v4777_v28, %v6371_v44  ;;  %v4925_v37 = vmul.f32 %v4777_v28, %v6372_v52  ;;  %v6373_v58 = vld [vmem:[#allocation17_spill] sm:$0xff]  ;;  %v6374_v23 = vld [vmem:[#allocation18_spill] sm:$0xff]  ;;  %v4945_v52 = vmul.f32 %v4777_v28, %v4576_v33 }
 0x335   :  { %6368 = vst [vmem:[#allocation4_spill] sm:$0xff] %v4913_v38  ;;  %6370 = vst [vmem:[#allocation5_spill] sm:$0xff] %v4917_v51  ;;  %v4929_v3 = vmul.f32 %v4777_v28, %v6373_v58  ;;  %v4933_v15 = vmul.f32 %v4777_v28, %v6374_v23  ;;  %v6375_v38 = vld [vmem:[#allocation19_spill] sm:$0xff]  ;;  %v6376_v51 = vld [vmem:[#allocation20_spill] sm:$0xff]  ;;  %v4949_v58 = vmul.f32 %v4777_v28, %v4580_v60 }
 0x336   :  { %v4937_v19 = vmul.f32 %v4777_v28, %v6375_v38  ;;  %v4941_v44 = vmul.f32 %v4777_v28, %v6376_v51  ;;  %v4953_v23 = vmul.f32 %v4777_v28, %v4584_v54  ;;  %v4957_v38 = vmul.f32 %v4777_v28, %v4588_v16 }
 0x337   :  { %v4961_v51 = vmul.f32 %v4777_v28, %v4592_v39  ;;  %v4965_v33 = vmul.f32 %v4777_v28, %v4596_v63  ;;  %v4969_v60 = vmul.f32 %v4777_v28, %v4600_v59  ;;  %v4973_v54 = vmul.f32 %v4777_v28, %v4604_v7 }
 0x338   :  { %v4977_v16 = vmul.f32 %v4777_v28, %v4608_v32  ;;  %v4981_v39 = vmul.f32 %v4777_v28, %v4612_v27  ;;  %v4985_v63 = vmul.f32 %v4777_v28, %v4616_v11  ;;  %v4989_v59 = vmul.f32 %v4777_v28, %v4620_v46 }
 0x339   :  { %v4993_v7 = vmul.f32 %v4777_v28, %v4624_v12  ;;  %v4997_v32 = vmul.f32 %v4777_v28, %v4628_v61  ;;  %v5001_v27 = vmul.f32 %v4777_v28, %v4632_v9  ;;  %v5005_v11 = vmul.f32 %v4777_v28, %v4636_v21 }
 0x33a   :  { %v5009_v46 = vmul.f32 %v4777_v28, %v4640_v53  ;;  %v5013_v12 = vmul.f32 %v4777_v28, %v4644_v25  ;;  %v5017_v61 = vmul.f32 %v4777_v28, %v4648_v5  ;;  %v5021_v9 = vmul.f32 %v4777_v28, %v4652_v4 }
 0x33b   :  { %v5025_v21 = vmul.f32 %v4777_v28, %v4656_v1  ;;  %v5029_v53 = vmul.f32 %v4777_v28, %v4660_v0  ;;  %v5033_v25 = vmul.f32 %v4777_v28, %v4664_v34  ;;  %v5037_v5 = vmul.f32 %v4777_v28, %v4668_v41 }
 0x33c   :  { %v5041_v4 = vmul.f32 %v4777_v28, %v4672_v31  ;;  %v5045_v1 = vmul.f32 %v4777_v28, %v4676_v56  ;;  %v5049_v0 = vmul.f32 %v4777_v28, %v4680_v42  ;;  %v5053_v34 = vmul.f32 %v4777_v28, %v4684_v18 }
 0x33d   :  { %v5057_v41 = vmul.f32 %v4777_v28, %v4688_v49  ;;  %v5061_v31 = vmul.f32 %v4777_v28, %v4692_v20  ;;  %v5065_v56 = vmul.f32 %v4777_v28, %v4696_v62  ;;  %v5081_v20 = vmul.f32 %v4777_v28, %v4712_v35 }
 0x33e   :  { %6377 = vst [vmem:[#allocation6_spill] sm:$0xff] %v5045_v1  ;;  %6378 = vst [vmem:[#allocation7_spill] sm:$0xff] %v5049_v0  ;;  %v6382_v1 = vld [vmem:[#allocation21_spill] sm:$0xff]  ;;  %v6383_v0 = vld [vmem:[#allocation22_spill] sm:$0xff]  ;;  %v5101_v35 = vmul.f32 %v4777_v28, %v4732_v57  ;;  %v5121_v57 = vmul.f32 %v4777_v28, %v4752_v36 }
 0x33f   :  { %6379 = vst [vmem:[#allocation8_spill] sm:$0xff] %v5053_v34  ;;  %6380 = vst [vmem:[#allocation9_spill] sm:$0xff] %v5061_v31  ;;  %v5069_v42 = vmul.f32 %v4777_v28, %v6382_v1  ;;  %v5073_v18 = vmul.f32 %v4777_v28, %v6383_v0  ;;  %v6384_v34 = vld [vmem:[#allocation23_spill] sm:$0xff]  ;;  %v6385_v31 = vld [vmem:[#allocation24_spill] sm:$0xff]  ;;  %v5093_v0 = vmul.f32 %v4777_v28, %v4724_v17 }
 0x340   :  { %6381 = vst [vmem:[#allocation10_spill] sm:$0xff] %v5065_v56  ;;  %v5077_v49 = vmul.f32 %v4777_v28, %v6384_v34  ;;  %v5085_v62 = vmul.f32 %v4777_v28, %v6385_v31  ;;  %v6386_v56 = vld [vmem:[#allocation25_spill] sm:$0xff]  ;;  %v5097_v34 = vmul.f32 %v4777_v28, %v4728_v50  ;;  %v5105_v31 = vmul.f32 %v4777_v28, %v4736_v6 }
 0x341   :  { %v5089_v1 = vmul.f32 %v4777_v28, %v6386_v56  ;;  %v5109_v56 = vmul.f32 %v4777_v28, %v4740_v45  ;;  %v5113_v17 = vmul.f32 %v4777_v28, %v4744_v29  ;;  %v5117_v50 = vmul.f32 %v4777_v28, %v4748_v13  ;;  %6389 = vst [vmem:[#allocation13_spill] sm:$0xff] %v5121_v57  ;;  %v6395_v57 = vld [vmem:[#allocation28_spill] sm:$0xff] }
 0x342   :  { %v5125_v6 = vmul.f32 %v4777_v28, %v4756_v55  ;;  %v5129_v45 = vmul.f32 %v4777_v28, %v4760_v43  ;;  %v5133_v29 = vmul.f32 %v4777_v28, %v4764_v40  ;;  %v5145_v55 = vmul.f32 %v4777_v28, %v6395_v57  ;;  %v5150_v43 = vld [vmem:[%s5969_s4] ss:$0 sm:$0xff] }
 0x343   :  { %6387 = vst [vmem:[#allocation11_spill] sm:$0xff] %v5113_v17  ;;  %6388 = vst [vmem:[#allocation12_spill] sm:$0xff] %v5117_v50  ;;  %v6392_v17 = vld [vmem:[#allocation26_spill] sm:$0xff]  ;;  %v6393_v50 = vld [vmem:[#allocation27_spill] sm:$0xff] }
 0x344   :  { %6390 = vst [vmem:[#allocation14_spill] sm:$0xff] %v5129_v45  ;;  %6391 = vst [vmem:[#allocation15_spill] sm:$0xff] %v5133_v29  ;;  %v5137_v13 = vmul.f32 %v4777_v28, %v6392_v17  ;;  %v5141_v36 = vmul.f32 %v4777_v28, %v6393_v50  ;;  %v6397_v45 = vld [vmem:[#allocation29_spill] sm:$0xff]  ;;  %v6398_v29 = vld [vmem:[#allocation30_spill] sm:$0xff]  ;;  %v5162_v50 = vmul.f32 %v4777_v28, %v4793_v8 }
 0x345   :  { %6396 = vst [vmem:[#allocation17_spill] sm:$0xff] %v5145_v55  ;;  %v5154_v40 = vmul.f32 %v4777_v28, %v6397_v45  ;;  %v5158_v17 = vmul.f32 %v4777_v28, %v6398_v29  ;;  %v5170_v55 = vmul.f32 %v4777_v28, %v4801_v48  ;;  %v5174_v45 = vmul.f32 %v4777_v28, %v4805_v2 }
 0x346   :  { %6394 = vst [vmem:[#allocation16_spill] sm:$0xff] %v5141_v36  ;;  %v6399_v36 = vld [vmem:[#allocation31_spill] sm:$0xff]  ;;  %v5178_v29 = vmul.f32 %v4777_v28, %v4809_v10  ;;  %v5182_v8 = vmul.f32 %v4777_v28, %v4813_v14  ;;  %v5190_v48 = vmul.f32 %v4777_v28, %v4821_v47  ;;  %v5194_v2 = vadd.f32 %v5150_v43, %v4825_v22 }
 0x347   :  { %v5166_v57 = vmul.f32 %v4777_v28, %v6399_v36  ;;  %v5186_v36 = vmul.f32 %v4777_v28, %v4817_v24  ;;  %v5198_v10 = vadd.f32 %v5150_v43, %v4829_v30  ;;  %v6411_v47 = vld [vmem:[#allocation35_spill] sm:$0xff] }
 0x348   :  { %6400 = vst [vmem:[#allocation18_spill] sm:$0xff] %v5178_v29  ;;  %6401 = vst [vmem:[#allocation19_spill] sm:$0xff] %v5182_v8  ;;  %v6405_v29 = vld [vmem:[#allocation32_spill] sm:$0xff]  ;;  %v6407_v8 = vld [vmem:[#allocation33_spill] sm:$0xff]  ;;  %v5214_v22 = vadd.f32 %v5150_v43, %v6411_v47 }
 0x349   :  { %6402 = vst [vmem:[#allocation20_spill] sm:$0xff] %v5186_v36  ;;  %6403 = vst [vmem:[#allocation21_spill] sm:$0xff] %v5194_v2  ;;  %v5202_v14 = vadd.f32 %v5150_v43, %v6405_v29  ;;  %v5206_v24 = vadd.f32 %v5150_v43, %v6407_v8  ;;  %v6409_v36 = vld [vmem:[#allocation34_spill] sm:$0xff]  ;;  %v6413_v2 = vld [vmem:[#allocation36_spill] sm:$0xff] }
 0x34a   :  { %6404 = vst [vmem:[#allocation22_spill] sm:$0xff] %v5198_v10  ;;  %v5210_v28 = vadd.f32 %v5150_v43, %v6409_v36  ;;  %6412 = vst [vmem:[#allocation26_spill] sm:$0xff] %v5214_v22  ;;  %v5218_v30 = vadd.f32 %v5150_v43, %v6413_v2  ;;  %v6415_v10 = vld [vmem:[#allocation37_spill] sm:$0xff]  ;;  %v6423_v22 = vld [vmem:[#allocation44_spill] sm:$0xff] }
 0x34b   :  { %6406 = vst [vmem:[#allocation23_spill] sm:$0xff] %v5202_v14  ;;  %6408 = vst [vmem:[#allocation24_spill] sm:$0xff] %v5206_v24  ;;  %v5222_v29 = vadd.f32 %v5150_v43, %v6415_v10  ;;  %v6417_v14 = vld [vmem:[#allocation38_spill] sm:$0xff]  ;;  %v6419_v24 = vld [vmem:[#allocation39_spill] sm:$0xff]  ;;  %v5238_v2 = vadd.f32 %v5150_v43, %v6423_v22 }
 0x34c   :  { %6410 = vst [vmem:[#allocation25_spill] sm:$0xff] %v5210_v28  ;;  %6414 = vst [vmem:[#allocation27_spill] sm:$0xff] %v5218_v30  ;;  %v5226_v8 = vadd.f32 %v5150_v43, %v6417_v14  ;;  %v5230_v36 = vadd.f32 %v5150_v43, %v6419_v24  ;;  %v6421_v28 = vld [vmem:[#allocation40_spill] sm:$0xff]  ;;  %v6425_v30 = vld [vmem:[#allocation45_spill] sm:$0xff] }
 0x34d   :  { %6416 = vst [vmem:[#allocation28_spill] sm:$0xff] %v5222_v29  ;;  %v5234_v47 = vadd.f32 %v5150_v43, %v6421_v28  ;;  %6424 = vst [vmem:[#allocation32_spill] sm:$0xff] %v5238_v2  ;;  %v5242_v10 = vadd.f32 %v5150_v43, %v6425_v30  ;;  %v6427_v29 = vld [vmem:[#allocation46_spill] sm:$0xff]  ;;  %v6435_v2 = vld [vmem:[#allocation43_spill] sm:$0xff] }
 0x34e   :  { %6418 = vst [vmem:[#allocation29_spill] sm:$0xff] %v5226_v8  ;;  %6420 = vst [vmem:[#allocation30_spill] sm:$0xff] %v5230_v36  ;;  %v5246_v14 = vadd.f32 %v5150_v43, %v6427_v29  ;;  %v6429_v8 = vld [vmem:[#allocation47_spill] sm:$0xff]  ;;  %v6431_v36 = vld [vmem:[#allocation41_spill] sm:$0xff]  ;;  %v5262_v30 = vadd.f32 %v5150_v43, %v6435_v2 }
 0x34f   :  { %6422 = vst [vmem:[#allocation31_spill] sm:$0xff] %v5234_v47  ;;  %6426 = vst [vmem:[#allocation33_spill] sm:$0xff] %v5242_v10  ;;  %v5250_v24 = vadd.f32 %v5150_v43, %v6429_v8  ;;  %v5254_v28 = vadd.f32 %v5150_v43, %v6431_v36  ;;  %v6433_v47 = vld [vmem:[#allocation42_spill] sm:$0xff]  ;;  %v6437_v10 = vld [vmem:[#allocation48_spill] sm:$0xff] }
 0x350   :  { %6428 = vst [vmem:[#allocation34_spill] sm:$0xff] %v5246_v14  ;;  %v5258_v22 = vadd.f32 %v5150_v43, %v6433_v47  ;;  %6436 = vst [vmem:[#allocation38_spill] sm:$0xff] %v5262_v30  ;;  %v5266_v29 = vadd.f32 %v5150_v43, %v6437_v10  ;;  %v6438_v14 = vld [vmem:[#allocation49_spill] sm:$0xff] }
 0x351   :  { %6430 = vst [vmem:[#allocation35_spill] sm:$0xff] %v5250_v24  ;;  %6432 = vst [vmem:[#allocation36_spill] sm:$0xff] %v5254_v28  ;;  %v5270_v8 = vadd.f32 %v5150_v43, %v6438_v14  ;;  %v6439_v24 = vld [vmem:[#allocation2_spill] sm:$0xff]  ;;  %v6440_v28 = vld [vmem:[#allocation3_spill] sm:$0xff]  ;;  %v5290_v14 = vadd.f32 %v5150_v43, %v4921_v26  ;;  %v5310_v26 = vadd.f32 %v5150_v43, %v4941_v44 }
 0x352   :  { %6434 = vst [vmem:[#allocation37_spill] sm:$0xff] %v5258_v22  ;;  %v5274_v36 = vadd.f32 %v5150_v43, %v6439_v24  ;;  %v5278_v47 = vadd.f32 %v5150_v43, %v6440_v28  ;;  %v6441_v22 = vld [vmem:[#allocation4_spill] sm:$0xff]  ;;  %v6442_v30 = vld [vmem:[#allocation5_spill] sm:$0xff]  ;;  %v5294_v24 = vadd.f32 %v5150_v43, %v4925_v37  ;;  %v5298_v28 = vadd.f32 %v5150_v43, %v4929_v3 }
 0x353   :  { %v5282_v2 = vadd.f32 %v5150_v43, %v6441_v22  ;;  %v5286_v10 = vadd.f32 %v5150_v43, %v6442_v30  ;;  %v5302_v22 = vadd.f32 %v5150_v43, %v4933_v15  ;;  %v5306_v30 = vadd.f32 %v5150_v43, %v4937_v19 }
 0x354   :  { %v5314_v37 = vadd.f32 %v5150_v43, %v4945_v52  ;;  %v5318_v3 = vadd.f32 %v5150_v43, %v4949_v58  ;;  %v5322_v15 = vadd.f32 %v5150_v43, %v4953_v23  ;;  %v5326_v19 = vadd.f32 %v5150_v43, %v4957_v38 }
 0x355   :  { %v5330_v44 = vadd.f32 %v5150_v43, %v4961_v51  ;;  %v5334_v52 = vadd.f32 %v5150_v43, %v4965_v33  ;;  %v5338_v58 = vadd.f32 %v5150_v43, %v4969_v60  ;;  %v5342_v23 = vadd.f32 %v5150_v43, %v4973_v54 }
 0x356   :  { %v5346_v38 = vadd.f32 %v5150_v43, %v4977_v16  ;;  %v5350_v51 = vadd.f32 %v5150_v43, %v4981_v39  ;;  %v5354_v33 = vadd.f32 %v5150_v43, %v4985_v63  ;;  %v5358_v60 = vadd.f32 %v5150_v43, %v4989_v59 }
 0x357   :  { %v5362_v54 = vadd.f32 %v5150_v43, %v4993_v7  ;;  %v5366_v16 = vadd.f32 %v5150_v43, %v4997_v32  ;;  %v5370_v39 = vadd.f32 %v5150_v43, %v5001_v27  ;;  %v5374_v63 = vadd.f32 %v5150_v43, %v5005_v11 }
 0x358   :  { %6443 = vst [vmem:[#allocation39_spill] sm:$0xff] %v5346_v38  ;;  %6444 = vst [vmem:[#allocation40_spill] sm:$0xff] %v5350_v51  ;;  %v5378_v59 = vadd.f32 %v5150_v43, %v5009_v46  ;;  %v5382_v7 = vadd.f32 %v5150_v43, %v5013_v12  ;;  %v5386_v32 = vadd.f32 %v5150_v43, %v5017_v61 }
 0x359   :  { %6445 = vst [vmem:[#allocation44_spill] sm:$0xff] %v5354_v33  ;;  %6446 = vst [vmem:[#allocation45_spill] sm:$0xff] %v5362_v54  ;;  %v5390_v27 = vadd.f32 %v5150_v43, %v5021_v9  ;;  %v5394_v11 = vadd.f32 %v5150_v43, %v5025_v21  ;;  %v5398_v46 = vadd.f32 %v5150_v43, %v5029_v53 }
 0x35a   :  { %6447 = vst [vmem:[#allocation46_spill] sm:$0xff] %v5366_v16  ;;  %v5402_v12 = vadd.f32 %v5150_v43, %v5033_v25  ;;  %v5406_v61 = vadd.f32 %v5150_v43, %v5037_v5  ;;  %v5410_v9 = vadd.f32 %v5150_v43, %v5041_v4  ;;  %v5426_v5 = vadd.f32 %v5150_v43, %v5057_v41 }
 0x35b   :  { %6448 = vst [vmem:[#allocation47_spill] sm:$0xff] %v5390_v27  ;;  %6449 = vst [vmem:[#allocation41_spill] sm:$0xff] %v5394_v11  ;;  %v6453_v27 = vld [vmem:[#allocation6_spill] sm:$0xff]  ;;  %v6455_v11 = vld [vmem:[#allocation7_spill] sm:$0xff]  ;;  %v5446_v41 = vadd.f32 %v5150_v43, %v5077_v49  ;;  %v5466_v49 = vadd.f32 %v5150_v43, %v5097_v34 }
 0x35c   :  { %6450 = vst [vmem:[#allocation42_spill] sm:$0xff] %v5398_v46  ;;  %6451 = vst [vmem:[#allocation43_spill] sm:$0xff] %v5406_v61  ;;  %v5414_v21 = vadd.f32 %v5150_v43, %v6453_v27  ;;  %v5418_v53 = vadd.f32 %v5150_v43, %v6455_v11  ;;  %v6457_v46 = vld [vmem:[#allocation8_spill] sm:$0xff]  ;;  %v6460_v61 = vld [vmem:[#allocation9_spill] sm:$0xff]  ;;  %v5438_v11 = vadd.f32 %v5150_v43, %v5069_v42 }
 0x35d   :  { %6452 = vst [vmem:[#allocation48_spill] sm:$0xff] %v5410_v9  ;;  %v5422_v25 = vadd.f32 %v5150_v43, %v6457_v46  ;;  %6459 = vst [vmem:[#allocation4_spill] sm:$0xff] %v5426_v5  ;;  %v5430_v4 = vadd.f32 %v5150_v43, %v6460_v61  ;;  %v6462_v9 = vld [vmem:[#allocation10_spill] sm:$0xff]  ;;  %v5442_v46 = vadd.f32 %v5150_v43, %v5073_v18  ;;  %v6552_v5 = vld [vmem:[#allocation21_spill] sm:$0xff] }
 0x35e   :  { %6454 = vst [vmem:[#allocation49_spill] sm:$0xff] %v5414_v21  ;;  %6456 = vst [vmem:[#allocation2_spill] sm:$0xff] %v5418_v53  ;;  %v5434_v27 = vadd.f32 %v5150_v43, %v6462_v9  ;;  %v5450_v61 = vadd.f32 %v5150_v43, %v5081_v20  ;;  %v5454_v9 = vadd.f32 %v5150_v43, %v5085_v62 }
 0x35f   :  { %6458 = vst [vmem:[#allocation3_spill] sm:$0xff] %v5422_v25  ;;  %6461 = vst [vmem:[#allocation5_spill] sm:$0xff] %v5430_v4  ;;  %v5458_v42 = vadd.f32 %v5150_v43, %v5089_v1  ;;  %v5462_v18 = vadd.f32 %v5150_v43, %v5093_v0  ;;  %v5470_v20 = vadd.f32 %v5150_v43, %v5101_v35  ;;  %v6554_v4 = vld [vmem:[#allocation22_spill] sm:$0xff] }
 0x360   :  { %6463 = vst [vmem:[#allocation6_spill] sm:$0xff] %v5434_v27  ;;  %6464 = vst [vmem:[#allocation7_spill] sm:$0xff] %v5438_v11  ;;  %v5474_v62 = vadd.f32 %v5150_v43, %v5105_v31  ;;  %v5478_v1 = vadd.f32 %v5150_v43, %v5109_v56  ;;  %v5494_v31 = vadd.f32 %v5150_v43, %v5125_v6 }
 0x361   :  { %6465 = vst [vmem:[#allocation8_spill] sm:$0xff] %v5442_v46  ;;  %6466 = vst [vmem:[#allocation9_spill] sm:$0xff] %v5446_v41  ;;  %v6560_v41 = vld [vmem:[#allocation25_spill] sm:$0xff] }
 0x362   :  { %6467 = vst [vmem:[#allocation10_spill] sm:$0xff] %v5450_v61  ;;  %6468 = vst [vmem:[#allocation50_spill] sm:$0xff] %v5454_v9  ;;  %v6522_v38 = vld [vmem:[#allocation47_spill] sm:$0xff]  ;;  %v6523_v51 = vld [vmem:[#allocation41_spill] sm:$0xff] }
 0x363   :  { %6469 = vst [vmem:[#allocation51_spill] sm:$0xff] %v5458_v42  ;;  %6470 = vst [vmem:[#allocation52_spill] sm:$0xff] %v5462_v18  ;;  %v6475_v42 = vld [vmem:[#allocation11_spill] sm:$0xff]  ;;  %v6477_v18 = vld [vmem:[#allocation12_spill] sm:$0xff] }
 0x364   :  { %6471 = vst [vmem:[#allocation53_spill] sm:$0xff] %v5466_v49  ;;  %6472 = vst [vmem:[#allocation54_spill] sm:$0xff] %v5470_v20  ;;  %v5482_v0 = vadd.f32 %v5150_v43, %v6475_v42  ;;  %v5486_v34 = vadd.f32 %v5150_v43, %v6477_v18  ;;  %v6479_v49 = vld [vmem:[#allocation13_spill] sm:$0xff]  ;;  %v5506_v18 = vadd.f32 %v5150_v43, %v5137_v13  ;;  %v6524_v33 = vld [vmem:[#allocation42_spill] sm:$0xff] }
 0x365   :  { %6473 = vst [vmem:[#allocation55_spill] sm:$0xff] %v5474_v62  ;;  %6474 = vst [vmem:[#allocation56_spill] sm:$0xff] %v5478_v1  ;;  %v5490_v35 = vadd.f32 %v5150_v43, %v6479_v49  ;;  %v6482_v62 = vld [vmem:[#allocation14_spill] sm:$0xff]  ;;  %v6484_v1 = vld [vmem:[#allocation15_spill] sm:$0xff]  ;;  %v5526_v13 = vadd.f32 %v5150_v43, %v5162_v50 }
 0x366   :  { %6476 = vst [vmem:[#allocation11_spill] sm:$0xff] %v5482_v0  ;;  %6478 = vst [vmem:[#allocation12_spill] sm:$0xff] %v5486_v34  ;;  %v5498_v56 = vadd.f32 %v5150_v43, %v6482_v62  ;;  %v5502_v42 = vadd.f32 %v5150_v43, %v6484_v1  ;;  %v6487_v34 = vld [vmem:[#allocation16_spill] sm:$0xff]  ;;  %v5518_v62 = vadd.f32 %v5150_v43, %v5154_v40  ;;  %v6512_v0 = vld [vmem:[#allocation29_spill] sm:$0xff] }
 0x367   :  { %6480 = vst [vmem:[#allocation13_spill] sm:$0xff] %v5490_v35  ;;  %6481 = vst [vmem:[#allocation57_spill] sm:$0xff] %v5494_v31  ;;  %v5510_v49 = vadd.f32 %v5150_v43, %v6487_v34  ;;  %v6489_v35 = vld [vmem:[#allocation17_spill] sm:$0xff]  ;;  %v5522_v1 = vadd.f32 %v5150_v43, %v5158_v17  ;;  %v5530_v34 = vadd.f32 %v5150_v43, %v5166_v57  ;;  %v6525_v54 = vld [vmem:[#allocation43_spill] sm:$0xff]  ;;  %v6561_v31 = vmax.f32 %v6560_v41, 0.0 }
 0x368   :  { %6483 = vst [vmem:[#allocation14_spill] sm:$0xff] %v5498_v56  ;;  %6485 = vst [vmem:[#allocation15_spill] sm:$0xff] %v5502_v42  ;;  %v5514_v6 = vadd.f32 %v5150_v43, %v6489_v35  ;;  %v5534_v35 = vadd.f32 %v5150_v43, %v5170_v55  ;;  %v5538_v40 = vadd.f32 %v5150_v43, %v5174_v45  ;;  %v6516_v45 = vld [vmem:[#allocation33_spill] sm:$0xff]  ;;  %v6521_v56 = vld [vmem:[#allocation38_spill] sm:$0xff] }
 0x369   :  { %6486 = vst [vmem:[#allocation58_spill] sm:$0xff] %v5506_v18  ;;  %6488 = vst [vmem:[#allocation16_spill] sm:$0xff] %v5510_v49  ;;  %v5554_v55 = vadd.f32 %v5150_v43, %v5190_v48  ;;  %v6519_v18 = vld [vmem:[#allocation36_spill] sm:$0xff]  ;;  %v6555_v49 = vmax.f32 %v6554_v4, 0.0  ;;  %v6562_v61 = vld [vmem:[#allocation26_spill] sm:$0xff]  ;;  %v6571_v41 = vmax.f32 %v6516_v45, 0.0 }
 0x36a   :  { %6490 = vst [vmem:[#allocation17_spill] sm:$0xff] %v5514_v6  ;;  %6491 = vst [vmem:[#allocation59_spill] sm:$0xff] %v5518_v62  ;;  %v6497_v62 = vld [vmem:[#allocation18_spill] sm:$0xff]  ;;  %v6526_v16 = vld [vmem:[#allocation48_spill] sm:$0xff]  ;;  %v6586_v45 = vmax.f32 %v5302_v22, 0.0 }
 0x36b   :  { %6492 = vst [vmem:[#allocation60_spill] sm:$0xff] %v5522_v1  ;;  %6493 = vst [vmem:[#allocation61_spill] sm:$0xff] %v5526_v13  ;;  %v5542_v17 = vadd.f32 %v5150_v43, %v6497_v62  ;;  %v6499_v1 = vld [vmem:[#allocation19_spill] sm:$0xff]  ;;  %v6501_v13 = vld [vmem:[#allocation20_spill] sm:$0xff] }
 0x36c   :  { %6494 = vst [vmem:[#allocation62_spill] sm:$0xff] %v5530_v34  ;;  %6495 = vst [vmem:[#allocation63_spill] sm:$0xff] %v5534_v35  ;;  %v5546_v50 = vadd.f32 %v5150_v43, %v6499_v1  ;;  %v5550_v57 = vadd.f32 %v5150_v43, %v6501_v13  ;;  %v6511_v13 = vld [vmem:[#allocation28_spill] sm:$0xff]  ;;  %v6513_v43 = vld [vmem:[#allocation30_spill] sm:$0xff] }
 0x36d   :  { %6496 = vst [vmem:[#allocation64_spill] sm:$0xff] %v5538_v40  ;;  %6498 = vst [vmem:[#allocation18_spill] sm:$0xff] %v5542_v17  ;;  %v6515_v35 = vld [vmem:[#allocation32_spill] sm:$0xff]  ;;  %v6517_v6 = vld [vmem:[#allocation34_spill] sm:$0xff]  ;;  %v6553_v40 = vmax.f32 %v6552_v5, 0.0  ;;  %v6566_v48 = vmax.f32 %v6511_v13, 0.0 }
 0x36e   :  { %6500 = vst [vmem:[#allocation19_spill] sm:$0xff] %v5546_v50  ;;  %6502 = vst [vmem:[#allocation20_spill] sm:$0xff] %v5550_v57  ;;  %v6518_v62 = vld [vmem:[#allocation35_spill] sm:$0xff]  ;;  %v6520_v1 = vld [vmem:[#allocation37_spill] sm:$0xff]  ;;  %v6563_v57 = vmax.f32 %v6562_v61, 0.0  ;;  %v6567_v5 = vmax.f32 %v6512_v0, 0.0 }
 0x36f   :  { %6503 = vst [vmem:[#allocation65_spill] sm:$0xff] %v5554_v55  ;;  %v6514_v55 = vld [vmem:[#allocation31_spill] sm:$0xff]  ;;  %v2620_v27 = vpack.c.bf16 %v6555_v49, %v6553_v40  ;;  %v6558_v42 = vld [vmem:[#allocation24_spill] sm:$0xff]  ;;  %v6568_v4 = vmax.f32 %v6513_v43, 0.0  ;;  %v6572_v61 = vmax.f32 %v6517_v6, 0.0  ;;  %v6588_v13 = vmax.f32 %v5310_v26, 0.0 }
 0x370   :  { %v6556_v17 = vld [vmem:[#allocation23_spill] sm:$0xff]  ;;  %v6559_v46 = vmax.f32 %v6558_v42, 0.0  ;;  %v2630_v9 = vpack.c.bf16 %v6563_v57, %v6561_v31  ;;  %v6569_v40 = vmax.f32 %v6514_v55, 0.0  ;;  %v6575_v42 = vmax.f32 %v6520_v1, 0.0 }
 0x371   :  { %v6557_v11 = vmax.f32 %v6556_v17, 0.0  ;;  %v6564_v20 = vld [vmem:[#allocation27_spill] sm:$0xff]  ;;  %v2640_v49 = vpack.c.bf16 %v6568_v4, %v6567_v5  ;;  %v2650_v31 = vpack.c.bf16 %v6572_v61, %v6571_v41  ;;  %2621 = vst [vmem:[%s5970_s5] sm:$0xff] %v2620_v27   ;;  %v6576_v27 = vmax.f32 %v6521_v56, 0.0 }
 0x372   :  { %v6565_v21 = vmax.f32 %v6564_v20, 0.0  ;;  %2843 = vst [vmem:[%s5970_s5 + $0x10] sm:$0xff] %v2630_v9   ;;  %v6574_v20 = vmax.f32 %v6519_v18, 0.0  ;;  %v6579_v9 = vmax.f32 %v5274_v36, 0.0  ;;  %v6584_v56 = vmax.f32 %v5294_v24, 0.0 }
 0x373   :  { %v2625_v50 = vpack.c.bf16 %v6559_v46, %v6557_v11  ;;  %v6570_v11 = vmax.f32 %v6515_v35, 0.0  ;;  %v2660_v6 = vpack.c.bf16 %v6576_v27, %v6575_v42  ;;  %v6578_v35 = vmax.f32 %v5270_v8, 0.0  ;;  %2845 = vst [vmem:[%s5970_s5 + $0x20] sm:$0xff] %v2640_v49   ;;  %2847 = vst [vmem:[%s5970_s5 + $0x30] sm:$0xff] %v2650_v31   ;;  %v6604_v49 = vld [vmem:[#allocation45_spill] sm:$0xff] }
 0x374   :  { %v6582_v8 = vmax.f32 %v5286_v10, 0.0  ;;  %v6585_v55 = vmax.f32 %v5298_v28, 0.0  ;;  %v6587_v1 = vmax.f32 %v5306_v30, 0.0  ;;  %v6590_v10 = vmax.f32 %v5318_v3, 0.0 }
 0x375   :  { %v2645_v46 = vpack.c.bf16 %v6570_v11, %v6569_v40  ;;  %2842 = vst [vmem:[%s5970_s5 + $0x8] sm:$0xff] %v2625_v50   ;;  %v6580_v50 = vmax.f32 %v5278_v47, 0.0  ;;  %v6583_v47 = vmax.f32 %v5290_v14, 0.0  ;;  %2849 = vst [vmem:[%s5970_s5 + $0x40] sm:$0xff] %v2660_v6   ;;  %v6591_v24 = vmax.f32 %v5322_v15, 0.0  ;;  %v6599_v15 = vld [vmem:[#allocation40_spill] sm:$0xff] }
 0x376   :  { %v6551_v25 = vld [vmem:[#allocation65_spill] sm:$0xff]  ;;  %v2690_v43 = vpack.c.bf16 %v6588_v13, %v6587_v1  ;;  %v6592_v28 = vmax.f32 %v5326_v19, 0.0  ;;  %v6593_v30 = vmax.f32 %v5330_v44, 0.0  ;;  %v6594_v26 = vmax.f32 %v5334_v52, 0.0  ;;  %v6601_v52 = vld [vmem:[#allocation44_spill] sm:$0xff]  ;;  %v6606_v11 = vld [vmem:[#allocation46_spill] sm:$0xff] }
 0x377   :  { %v1863_v34 = vmax.f32 %v6551_v25, 0.0  ;;  %v2635_v25 = vpack.c.bf16 %v6566_v48, %v6565_v21  ;;  %v6573_v21 = vmax.f32 %v6518_v62, 0.0  ;;  %v2670_v57 = vpack.c.bf16 %v6580_v50, %v6579_v9  ;;  %2846 = vst [vmem:[%s5970_s5 + $0x28] sm:$0xff] %v2645_v46   ;;  %v6635_v13 = vld [vmem:[#allocation9_spill] sm:$0xff] }
 0x378   :  { %v2680_v18 = vpack.c.bf16 %v6584_v56, %v6583_v47  ;;  %v2685_v62 = vpack.c.bf16 %v6586_v45, %v6585_v55  ;;  %v2700_v22 = vpack.c.bf16 %v6592_v28, %v6591_v24  ;;  %v6595_v48 = vmax.f32 %v5338_v58, 0.0  ;;  %2855 = vst [vmem:[%s5970_s5 + $0x70] sm:$0xff] %v2690_v43   ;;  %v6629_v56 = vld [vmem:[#allocation6_spill] sm:$0xff]  ;;  %v6631_v55 = vld [vmem:[#allocation7_spill] sm:$0xff] }
 0x379   :  { %v2616_v53 = vpack.c.bf16 %v1863_v34, %v1863_v34  ;;  %2844 = vst [vmem:[%s5970_s5 + $0x18] sm:$0xff] %v2635_v25   ;;  %v2655_v0 = vpack.c.bf16 %v6574_v20, %v6573_v21  ;;  %v6577_v34 = vmax.f32 %v5266_v29, 0.0  ;;  %v6581_v29 = vmax.f32 %v5282_v2, 0.0  ;;  %2851 = vst [vmem:[%s5970_s5 + $0x50] sm:$0xff] %v2670_v57   ;;  %v6625_v57 = vld [vmem:[#allocation4_spill] sm:$0xff]  ;;  %v6639_v24 = vld [vmem:[#allocation50_spill] sm:$0xff] }
 0x37a   :  { %v6589_v2 = vmax.f32 %v5314_v37, 0.0  ;;  %v6596_v25 = vmax.f32 %v5342_v23, 0.0  ;;  %2853 = vst [vmem:[%s5970_s5 + $0x60] sm:$0xff] %v2680_v18   ;;  %2854 = vst [vmem:[%s5970_s5 + $0x68] sm:$0xff] %v2685_v62   ;;  %v6597_v37 = vld [vmem:[#allocation39_spill] sm:$0xff]  ;;  %v6600_v19 = vmax.f32 %v6599_v15, 0.0 }
 0x37b   :  { %v2665_v17 = vpack.c.bf16 %v6578_v35, %v6577_v34  ;;  %v2675_v36 = vpack.c.bf16 %v6582_v8, %v6581_v29  ;;  %2319 = vst [vmem:[%s5970_s5 + $0x168] sm:$0x1] %v2616_v53  ;;  %2848 = vst [vmem:[%s5970_s5 + $0x38] sm:$0xff] %v2655_v0   ;;  %v2705_v53 = vpack.c.bf16 %v6594_v26, %v6593_v30  ;;  %v6598_v3 = vmax.f32 %v6597_v37, 0.0  ;;  %v6627_v8 = vld [vmem:[#allocation5_spill] sm:$0xff]  ;;  %v6641_v30 = vld [vmem:[#allocation51_spill] sm:$0xff] }
 0x37c   :  { %v2695_v14 = vpack.c.bf16 %v6590_v10, %v6589_v2  ;;  %v2710_v5 = vpack.c.bf16 %v6596_v25, %v6595_v48  ;;  %v6602_v58 = vmax.f32 %v6601_v52, 0.0  ;;  %v6603_v23 = vmax.f32 %v5358_v60, 0.0  ;;  %2857 = vst [vmem:[%s5970_s5 + $0x80] sm:$0xff] %v2700_v22   ;;  %v6637_v10 = vld [vmem:[#allocation10_spill] sm:$0xff] }
 0x37d   :  { %2850 = vst [vmem:[%s5970_s5 + $0x48] sm:$0xff] %v2665_v17   ;;  %2852 = vst [vmem:[%s5970_s5 + $0x58] sm:$0xff] %v2675_v36   ;;  %v2715_v44 = vpack.c.bf16 %v6600_v19, %v6598_v3  ;;  %v6605_v40 = vmax.f32 %v6604_v49, 0.0  ;;  %v6607_v46 = vmax.f32 %v6606_v11, 0.0  ;;  %v6608_v61 = vmax.f32 %v5370_v39, 0.0  ;;  %v6647_v3 = vld [vmem:[#allocation54_spill] sm:$0xff] }
 0x37e   :  { %v2720_v4 = vpack.c.bf16 %v6603_v23, %v6602_v58  ;;  %v6609_v31 = vmax.f32 %v5374_v63, 0.0  ;;  %2856 = vst [vmem:[%s5970_s5 + $0x78] sm:$0xff] %v2695_v14   ;;  %2858 = vst [vmem:[%s5970_s5 + $0x88] sm:$0xff] %v2705_v53   ;;  %v6610_v60 = vmax.f32 %v5378_v59, 0.0  ;;  %v6611_v39 = vmax.f32 %v5382_v7, 0.0  ;;  %v6621_v59 = vld [vmem:[#allocation2_spill] sm:$0xff] }
 0x37f   :  { %v2725_v41 = vpack.c.bf16 %v6607_v46, %v6605_v40  ;;  %2859 = vst [vmem:[%s5970_s5 + $0x90] sm:$0xff] %v2710_v5   ;;  %v6612_v20 = vmax.f32 %v5386_v32, 0.0  ;;  %v6613_v0 = vmax.f32 %v6522_v38, 0.0  ;;  %v6614_v27 = vmax.f32 %v6523_v51, 0.0  ;;  %2860 = vst [vmem:[%s5970_s5 + $0x98] sm:$0xff] %v2715_v44   ;;  %v6619_v51 = vld [vmem:[#allocation49_spill] sm:$0xff] }
 0x380   :  { %v2730_v21 = vpack.c.bf16 %v6609_v31, %v6608_v61  ;;  %v2735_v63 = vpack.c.bf16 %v6611_v39, %v6610_v60  ;;  %v6615_v6 = vmax.f32 %v6524_v33, 0.0  ;;  %v6616_v35 = vmax.f32 %v5402_v12, 0.0  ;;  %2861 = vst [vmem:[%s5970_s5 + $0xa0] sm:$0xff] %v2720_v4   ;;  %v6623_v32 = vld [vmem:[#allocation3_spill] sm:$0xff]  ;;  %v6643_v53 = vld [vmem:[#allocation52_spill] sm:$0xff]  ;;  %v6645_v5 = vld [vmem:[#allocation53_spill] sm:$0xff] }
 0x381   :  { %v2740_v42 = vpack.c.bf16 %v6613_v0, %v6612_v20  ;;  %v6617_v17 = vmax.f32 %v6525_v54, 0.0  ;;  %2862 = vst [vmem:[%s5970_s5 + $0xa8] sm:$0xff] %v2725_v41   ;;  %v6618_v38 = vmax.f32 %v6526_v16, 0.0  ;;  %v6620_v33 = vmax.f32 %v6619_v51, 0.0  ;;  %v6633_v16 = vld [vmem:[#allocation8_spill] sm:$0xff]  ;;  %v6649_v44 = vld [vmem:[#allocation55_spill] sm:$0xff] }
 0x382   :  { %v2745_v34 = vpack.c.bf16 %v6615_v6, %v6614_v27  ;;  %2863 = vst [vmem:[%s5970_s5 + $0xb0] sm:$0xff] %v2730_v21   ;;  %v6622_v7 = vmax.f32 %v6621_v59, 0.0  ;;  %v6624_v12 = vmax.f32 %v6623_v32, 0.0  ;;  %v6626_v29 = vmax.f32 %v6625_v57, 0.0  ;;  %2864 = vst [vmem:[%s5970_s5 + $0xb8] sm:$0xff] %v2735_v63   ;;  %v6651_v58 = vld [vmem:[#allocation56_spill] sm:$0xff] }
 0x383   :  { %v2750_v9 = vpack.c.bf16 %v6617_v17, %v6616_v35  ;;  %v2755_v54 = vpack.c.bf16 %v6620_v33, %v6618_v38  ;;  %v6628_v36 = vmax.f32 %v6627_v8, 0.0  ;;  %v6630_v18 = vmax.f32 %v6629_v56, 0.0  ;;  %2865 = vst [vmem:[%s5970_s5 + $0xc0] sm:$0xff] %v2740_v42   ;;  %v6653_v49 = vld [vmem:[#allocation11_spill] sm:$0xff]  ;;  %v6655_v11 = vld [vmem:[#allocation12_spill] sm:$0xff]  ;;  %v6657_v61 = vld [vmem:[#allocation13_spill] sm:$0xff] }
 0x384   :  { %v2760_v50 = vpack.c.bf16 %v6624_v12, %v6622_v7  ;;  %v6632_v45 = vmax.f32 %v6631_v55, 0.0  ;;  %2866 = vst [vmem:[%s5970_s5 + $0xc8] sm:$0xff] %v2745_v34   ;;  %v6634_v1 = vmax.f32 %v6633_v16, 0.0  ;;  %v6636_v43 = vmax.f32 %v6635_v13, 0.0  ;;  %v6659_v21 = vld [vmem:[#allocation57_spill] sm:$0xff]  ;;  %v6661_v63 = vld [vmem:[#allocation14_spill] sm:$0xff] }
 0x385   :  { %v2765_v47 = vpack.c.bf16 %v6628_v36, %v6626_v29  ;;  %2867 = vst [vmem:[%s5970_s5 + $0xd0] sm:$0xff] %v2750_v9   ;;  %v6638_v14 = vmax.f32 %v6637_v10, 0.0  ;;  %v6640_v28 = vmax.f32 %v6639_v24, 0.0  ;;  %v6642_v26 = vmax.f32 %v6641_v30, 0.0  ;;  %2868 = vst [vmem:[%s5970_s5 + $0xd8] sm:$0xff] %v2755_v54   ;;  %v6663_v0 = vld [vmem:[#allocation15_spill] sm:$0xff] }
 0x386   :  { %v2770_v62 = vpack.c.bf16 %v6632_v45, %v6630_v18  ;;  %v2775_v2 = vpack.c.bf16 %v6636_v43, %v6634_v1  ;;  %v6644_v48 = vmax.f32 %v6643_v53, 0.0  ;;  %v6646_v37 = vmax.f32 %v6645_v5, 0.0  ;;  %2869 = vst [vmem:[%s5970_s5 + $0xe0] sm:$0xff] %v2760_v50   ;;  %v6665_v6 = vld [vmem:[#allocation58_spill] sm:$0xff]  ;;  %v6667_v35 = vld [vmem:[#allocation16_spill] sm:$0xff]  ;;  %v6669_v38 = vld [vmem:[#allocation17_spill] sm:$0xff] }
 0x387   :  { %v2780_v22 = vpack.c.bf16 %v6640_v28, %v6638_v14  ;;  %v6648_v15 = vmax.f32 %v6647_v3, 0.0  ;;  %2870 = vst [vmem:[%s5970_s5 + $0xe8] sm:$0xff] %v2765_v47   ;;  %v6650_v52 = vmax.f32 %v6649_v44, 0.0  ;;  %v6652_v23 = vmax.f32 %v6651_v58, 0.0  ;;  %v6671_v33 = vld [vmem:[#allocation59_spill] sm:$0xff]  ;;  %v6673_v7 = vld [vmem:[#allocation60_spill] sm:$0xff] }
 0x388   :  { %v2785_v25 = vpack.c.bf16 %v6644_v48, %v6642_v26  ;;  %2871 = vst [vmem:[%s5970_s5 + $0xf0] sm:$0xff] %v2770_v62   ;;  %v6654_v40 = vmax.f32 %v6653_v49, 0.0  ;;  %v6656_v46 = vmax.f32 %v6655_v11, 0.0  ;;  %v6658_v31 = vmax.f32 %v6657_v61, 0.0  ;;  %2872 = vst [vmem:[%s5970_s5 + $0xf8] sm:$0xff] %v2775_v2   ;;  %v6675_v12 = vld [vmem:[#allocation61_spill] sm:$0xff] }
 0x389   :  { %v2790_v19 = vpack.c.bf16 %v6648_v15, %v6646_v37  ;;  %v2795_v4 = vpack.c.bf16 %v6652_v23, %v6650_v52  ;;  %v6660_v60 = vmax.f32 %v6659_v21, 0.0  ;;  %v6662_v20 = vmax.f32 %v6661_v63, 0.0  ;;  %2873 = vst [vmem:[%s5970_s5 + $0x100] sm:$0xff] %v2780_v22   ;;  %v6677_v29 = vld [vmem:[#allocation62_spill] sm:$0xff]  ;;  %v6679_v36 = vld [vmem:[#allocation63_spill] sm:$0xff]  ;;  %v6681_v18 = vld [vmem:[#allocation64_spill] sm:$0xff] }
 0x38a   :  { %v2800_v41 = vpack.c.bf16 %v6656_v46, %v6654_v40  ;;  %v6664_v42 = vmax.f32 %v6663_v0, 0.0  ;;  %2874 = vst [vmem:[%s5970_s5 + $0x108] sm:$0xff] %v2785_v25   ;;  %v6666_v34 = vmax.f32 %v6665_v6, 0.0  ;;  %v6668_v17 = vmax.f32 %v6667_v35, 0.0  ;;  %v6683_v45 = vld [vmem:[#allocation18_spill] sm:$0xff]  ;;  %v6685_v1 = vld [vmem:[#allocation19_spill] sm:$0xff] }
 0x38b   :  { %v2805_v39 = vpack.c.bf16 %v6660_v60, %v6658_v31  ;;  %2875 = vst [vmem:[%s5970_s5 + $0x110] sm:$0xff] %v2790_v19   ;;  %v6670_v51 = vmax.f32 %v6669_v38, 0.0  ;;  %v6672_v54 = vmax.f32 %v6671_v33, 0.0  ;;  %v6674_v32 = vmax.f32 %v6673_v7, 0.0  ;;  %2876 = vst [vmem:[%s5970_s5 + $0x118] sm:$0xff] %v2795_v4   ;;  %v6687_v43 = vld [vmem:[#allocation20_spill] sm:$0xff] }
 0x38c   :  { %v2810_v27 = vpack.c.bf16 %v6664_v42, %v6662_v20  ;;  %v2815_v9 = vpack.c.bf16 %v6668_v17, %v6666_v34  ;;  %v6676_v50 = vmax.f32 %v6675_v12, 0.0  ;;  %v6678_v8 = vmax.f32 %v6677_v29, 0.0  ;;  %2877 = vst [vmem:[%s5970_s5 + $0x120] sm:$0xff] %v2800_v41  }
 0x38d   :  { %v2820_v59 = vpack.c.bf16 %v6672_v54, %v6670_v51  ;;  %v6680_v47 = vmax.f32 %v6679_v36, 0.0  ;;  %2878 = vst [vmem:[%s5970_s5 + $0x128] sm:$0xff] %v2805_v39   ;;  %v6682_v55 = vmax.f32 %v6681_v18, 0.0  ;;  %v6684_v62 = vmax.f32 %v6683_v45, 0.0 }
 0x38e   :  { %v2825_v57 = vpack.c.bf16 %v6676_v50, %v6674_v32  ;;  %2879 = vst [vmem:[%s5970_s5 + $0x130] sm:$0xff] %v2810_v27   ;;  %v6686_v13 = vmax.f32 %v6685_v1, 0.0  ;;  %v6688_v2 = vmax.f32 %v6687_v43, 0.0  ;;  %2880 = vst [vmem:[%s5970_s5 + $0x138] sm:$0xff] %v2815_v9  }
 0x38f   :  { %v2830_v56 = vpack.c.bf16 %v6680_v47, %v6678_v8  ;;  %v2835_v16 = vpack.c.bf16 %v6684_v62, %v6682_v55  ;;  %2881 = vst [vmem:[%s5970_s5 + $0x140] sm:$0xff] %v2820_v59  }
 0x390   :  { %v2840_v10 = vpack.c.bf16 %v6688_v2, %v6686_v13  ;;  %2882 = vst [vmem:[%s5970_s5 + $0x148] sm:$0xff] %v2825_v57  }
 0x391   :  { %2883 = vst [vmem:[%s5970_s5 + $0x150] sm:$0xff] %v2830_v56   ;;  %2884 = vst [vmem:[%s5970_s5 + $0x158] sm:$0xff] %v2835_v16  }
 0x392   :  { %2885 = vst [vmem:[%s5970_s5 + $0x160] sm:$0xff] %v2840_v10  }

// kernel: dueling_qnet_forward.5
= control target key start
LH: loop header
LB: loop body
LE: loop exit
PB: predicated region body
PF: predicated region fallthrough
CT: control target
= control target key end

     0   :  { %vm799_vm0 = vcmask 1041408   ;;  %s2020_s1 = inlined_call_operand.vmem [shape: bf16[512,128], index: 1, kind: input, shape index: {}]   ;;  %s2021_s0 = inlined_call_operand.vmem [shape: bf16[162,512], index: 0, kind: input, shape index: {}]   ;;  %s2022_s2 = inlined_call_operand.vmem [shape: f32[1,128], index: 2, kind: input, shape index: {}]   ;;  %s2023_s3 = inlined_call_operand.vmem [shape: f32[1,128], index: 3, kind: input, shape index: {}]   ;;  %s2024_s4 = inlined_call_operand.vmem [shape: f32[1,128], index: 4, kind: input, shape index: {}]   ;;  %s2025_s5 = inlined_call_operand.vmem [shape: bf16[162,128], index: 5, kind: output, shape index: {}]  }
   0x1   :  { %v1434_v0 = vld [vmem:[%s2020_s1 + $0x40] sm:$0xff]   ;;  %v1438_v4 = vld [vmem:[%s2020_s1 + $0x48] sm:$0xff]   ;;  %v1442_v8 = vld [vmem:[%s2020_s1 + $0x50] sm:$0xff]  }
   0x2   :  { %v1435_v1 = vld [vmem:[%s2020_s1 + $0xc0] sm:$0xff]   ;;  %1270 = vmatprep.subr.bf16.mxu0 %v1434_v0  ;;  %v1439_v5 = vld [vmem:[%s2020_s1 + $0xc8] sm:$0xff]   ;;  %v1443_v9 = vld [vmem:[%s2020_s1 + $0xd0] sm:$0xff]  }
   0x3   :  { %v1436_v2 = vld [vmem:[%s2020_s1] sm:$0xff]   ;;  %1352 = vmatprep.subr.bf16.mxu1 %v1435_v1  ;;  %v1440_v6 = vld [vmem:[%s2020_s1 + $0x8] sm:$0xff]   ;;  %v1444_v10 = vld [vmem:[%s2020_s1 + $0x10] sm:$0xff]  }
   0x4   :  { %v1437_v3 = vld [vmem:[%s2020_s1 + $0x80] sm:$0xff]   ;;  %1271 = vmatpush3.bf16.msra.mxu0 %v1436_v2  ;;  %v1441_v7 = vld [vmem:[%s2020_s1 + $0x88] sm:$0xff]   ;;  %v1445_v11 = vld [vmem:[%s2020_s1 + $0x90] sm:$0xff]  }
   0x5   :  { %1353 = vmatpush3.bf16.msra.mxu1 %v1437_v3  ;;  %1272 = vmatprep.subr.bf16.mxu0 %v1438_v4  ;;  %v1446_v12 = vld [vmem:[%s2020_s1 + $0x58] sm:$0xff]   ;;  %v1450_v16 = vld [vmem:[%s2020_s1 + $0x60] sm:$0xff]   ;;  %v1454_v20 = vld [vmem:[%s2020_s1 + $0x68] sm:$0xff]  }
   0x6   :  { %1354 = vmatprep.subr.bf16.mxu1 %v1439_v5  ;;  %v1447_v13 = vld [vmem:[%s2020_s1 + $0xd8] sm:$0xff]   ;;  %v1451_v17 = vld [vmem:[%s2020_s1 + $0xe0] sm:$0xff]   ;;  %v1455_v21 = vld [vmem:[%s2020_s1 + $0xe8] sm:$0xff]  }
   0x7   :  { %v1448_v14 = vld [vmem:[%s2020_s1 + $0x18] sm:$0xff]   ;;  %v1452_v18 = vld [vmem:[%s2020_s1 + $0x20] sm:$0xff]   ;;  %v1456_v22 = vld [vmem:[%s2020_s1 + $0x28] sm:$0xff]  }
   0x8   :  { %1273 = vmatpush3.bf16.msra.mxu0 %v1440_v6  ;;  %v1449_v15 = vld [vmem:[%s2020_s1 + $0x98] sm:$0xff]   ;;  %v1453_v19 = vld [vmem:[%s2020_s1 + $0xa0] sm:$0xff]   ;;  %v1457_v23 = vld [vmem:[%s2020_s1 + $0xa8] sm:$0xff]  }
   0x9   :  { %1355 = vmatpush3.bf16.msra.mxu1 %v1441_v7  ;;  %1274 = vmatprep.subr.bf16.mxu0 %v1442_v8  ;;  %v1458_v24 = vld [vmem:[%s2020_s1 + $0x70] sm:$0xff]   ;;  %v1462_v28 = vld [vmem:[%s2020_s1 + $0x78] sm:$0xff]   ;;  %v61_v6 = vld [vmem:[%s2021_s0 + $0x140] sm:$0x11] }
   0xa   :  { %1356 = vmatprep.subr.bf16.mxu1 %v1443_v9  ;;  %v1459_v25 = vld [vmem:[%s2020_s1 + $0xf0] sm:$0xff]   ;;  %v1463_v29 = vld [vmem:[%s2020_s1 + $0xf8] sm:$0xff]   ;;  %v62_v7 = vld [vmem:[%s2021_s0 + $0x148] sm:$0x11] }
   0xb   :  { %v1460_v26 = vld [vmem:[%s2020_s1 + $0x30] sm:$0xff]   ;;  %v1464_v30 = vld [vmem:[%s2020_s1 + $0x38] sm:$0xff]  }
   0xc   :  { %1275 = vmatpush3.bf16.msra.mxu0 %v1444_v10  ;;  %v1461_v27 = vld [vmem:[%s2020_s1 + $0xb0] sm:$0xff]   ;;  %v1465_v31 = vld [vmem:[%s2020_s1 + $0xb8] sm:$0xff]   ;;  %v1132_v10 = vcombine.high %v61_v6, %v61_v6 }
   0xd   :  { %1357 = vmatpush3.bf16.msra.mxu1 %v1445_v11  ;;  %1276 = vmatprep.subr.bf16.mxu0 %v1446_v12  ;;  %v1466_v32 = vld [vmem:[%s2021_s0] ss:$16 sps:$4 sm:$0xff]   ;;  %v1468_v33 = vld [vmem:[%s2021_s0 + $0x4] ss:$16 sps:$4 sm:$0xff]   ;;  %v1469_v34 = vld [vmem:[%s2021_s0 + $0x8] ss:$16 sps:$4 sm:$0xff]   ;;  %v1134_v11 = vcombine.high %v62_v7, %v62_v7  ;;  %v1131_v12 = vcombine.low %v61_v6, %v61_v6 }
   0xe   :  { %1358 = vmatprep.subr.bf16.mxu1 %v1447_v13  ;;  %v1471_v35 = vld [vmem:[%s2021_s0 + $0xc] ss:$16 sps:$4 sm:$0xff]   ;;  %572 = vmatprep.mubr.bf16.mxu0 %v1468_v33  ;;  %v1472_v36 = vld [vmem:[%s2021_s0 + $0x24] ss:$16 sps:$4 sm:$0xff]   ;;  %v1476_v38 = vld [vmem:[%s2021_s0 + $0x20] ss:$16 sps:$4 sm:$0xff]   ;;  %v1133_v13 = vcombine.low %v62_v7, %v62_v7 }
   0xf   :  { %692 = vmatprep.mubr.bf16.mxu1 %v1471_v35  ;;  %v1474_v37 = vld [vmem:[%s2021_s0 + $0x2c] ss:$16 sps:$4 sm:$0xff]   ;;  %v1477_v39 = vld [vmem:[%s2021_s0 + $0x28] ss:$16 sps:$4 sm:$0xff]   ;;  %v1478_v40 = vld [vmem:[%s2021_s0 + $0x44] ss:$16 sps:$4 sm:$0xff]  }
  0x10   :  { %1277 = vmatpush3.bf16.msra.mxu0 %v1448_v14  ;;  %v1480_v41 = vld [vmem:[%s2021_s0 + $0x4c] ss:$16 sps:$4 sm:$0xff]   ;;  %v1482_v42 = vld [vmem:[%s2021_s0 + $0x40] ss:$16 sps:$4 sm:$0xff]   ;;  %v1483_v43 = vld [vmem:[%s2021_s0 + $0x48] ss:$16 sps:$4 sm:$0xff]  }
  0x11   :  { %1359 = vmatpush3.bf16.msra.mxu1 %v1449_v15  ;;  %1278 = vmatprep.subr.bf16.mxu0 %v1450_v16  ;;  %v1484_v44 = vld [vmem:[%s2021_s0 + $0x64] ss:$16 sps:$4 sm:$0xff]   ;;  %v1486_v45 = vld [vmem:[%s2021_s0 + $0x6c] ss:$16 sps:$4 sm:$0xff]   ;;  %v1488_v46 = vld [vmem:[%s2021_s0 + $0x60] ss:$16 sps:$4 sm:$0xff]  }
  0x12   :  { %1360 = vmatprep.subr.bf16.mxu1 %v1451_v17  ;;  %v1489_v47 = vld [vmem:[%s2021_s0 + $0x68] ss:$16 sps:$4 sm:$0xff]   ;;  %v1490_v48 = vld [vmem:[%s2021_s0 + $0x84] ss:$16 sps:$4 sm:$0xff]   ;;  %v1492_v49 = vld [vmem:[%s2021_s0 + $0x8c] ss:$16 sps:$4 sm:$0xff]  }
  0x13   :  { %v1494_v50 = vld [vmem:[%s2021_s0 + $0x80] ss:$16 sps:$4 sm:$0xff]   ;;  %v1495_v51 = vld [vmem:[%s2021_s0 + $0x88] ss:$16 sps:$4 sm:$0xff]   ;;  %v1496_v52 = vld [vmem:[%s2021_s0 + $0xa4] ss:$16 sps:$4 sm:$0xff]  }
  0x14   :  { %1279 = vmatpush3.bf16.msra.mxu0 %v1452_v18  ;;  %v1498_v53 = vld [vmem:[%s2021_s0 + $0xac] ss:$16 sps:$4 sm:$0xff]   ;;  %v1500_v54 = vld [vmem:[%s2021_s0 + $0xa0] ss:$16 sps:$4 sm:$0xff]   ;;  %v1501_v55 = vld [vmem:[%s2021_s0 + $0xa8] ss:$16 sps:$4 sm:$0xff]  }
  0x15   :  { %1361 = vmatpush3.bf16.msra.mxu1 %v1453_v19  ;;  %1280 = vmatprep.subr.bf16.mxu0 %v1454_v20  ;;  %v1502_v56 = vld [vmem:[%s2021_s0 + $0xc4] ss:$16 sps:$4 sm:$0xff]   ;;  %v1504_v57 = vld [vmem:[%s2021_s0 + $0xcc] ss:$16 sps:$4 sm:$0xff]   ;;  %v1506_v58 = vld [vmem:[%s2021_s0 + $0xc0] ss:$16 sps:$4 sm:$0xff]  }
  0x16   :  { %1362 = vmatprep.subr.bf16.mxu1 %v1455_v21  ;;  %v1507_v59 = vld [vmem:[%s2021_s0 + $0xc8] ss:$16 sps:$4 sm:$0xff]   ;;  %v1508_v60 = vld [vmem:[%s2021_s0 + $0xe4] ss:$16 sps:$4 sm:$0xff]   ;;  %v1510_v61 = vld [vmem:[%s2021_s0 + $0xec] ss:$16 sps:$4 sm:$0xff]  }
  0x17   :  { %v1512_v62 = vld [vmem:[%s2021_s0 + $0xe0] ss:$16 sps:$4 sm:$0xff]   ;;  %v1513_v63 = vld [vmem:[%s2021_s0 + $0xe8] ss:$16 sps:$4 sm:$0xff]   ;;  %v1514_v0 = vld [vmem:[%s2021_s0 + $0x104] ss:$16 sps:$4 sm:$0xff]  }
  0x18   :  { %1281 = vmatpush3.bf16.msra.mxu0 %v1456_v22  ;;  %v1516_v1 = vld [vmem:[%s2021_s0 + $0x10c] ss:$16 sps:$4 sm:$0xff]   ;;  %v1518_v2 = vld [vmem:[%s2021_s0 + $0x100] ss:$16 sps:$4 sm:$0xff]   ;;  %v1519_v3 = vld [vmem:[%s2021_s0 + $0x108] ss:$16 sps:$4 sm:$0xff]  }
  0x19   :  { %1363 = vmatpush3.bf16.msra.mxu1 %v1457_v23  ;;  %1282 = vmatprep.subr.bf16.mxu0 %v1458_v24  ;;  %v1520_v4 = vld [vmem:[%s2021_s0 + $0x124] ss:$16 sps:$4 sm:$0xff]   ;;  %v1522_v5 = vld [vmem:[%s2021_s0 + $0x12c] ss:$16 sps:$4 sm:$0xff]   ;;  %v1524_v8 = vld [vmem:[%s2021_s0 + $0x120] ss:$16 sps:$4 sm:$0xff]  }
  0x1a   :  { %1364 = vmatprep.subr.bf16.mxu1 %v1459_v25  ;;  %v1525_v9 = vld [vmem:[%s2021_s0 + $0x128] ss:$16 sps:$4 sm:$0xff]   ;;  %v1787_v16 = vld [vmem:[%s2022_s2] ss:$0 sm:$0xff] }
  0x1c   :  { %1283 = vmatpush3.bf16.msra.mxu0 %v1460_v26 }
  0x1d   :  { %1365 = vmatpush3.bf16.msra.mxu1 %v1461_v27  ;;  %1284 = vmatprep.subr.bf16.mxu0 %v1462_v28 }
  0x1e   :  { %1366 = vmatprep.subr.bf16.mxu1 %v1463_v29 }
  0x20   :  { %1285 = vmatpush3.bf16.msra.mxu0 %v1464_v30 }
  0x21   :  { %1367 = vmatpush3.bf16.msra.mxu1 %v1465_v31 }
  0x23   :  { %573 = vmatmul.mubr.bf16.vlgmr.msra.gmra.mrb[0].mxu0 %v1466_v32 }
  0x24   :  { %693 = vmatmul.mubr.bf16.vlgmr.msra.gmra.mrb[0].mxu1 %v1469_v34  ;;  %580 = vmatprep.mubr.bf16.mxu0 %v1472_v36 }
  0x25   :  { %700 = vmatprep.mubr.bf16.mxu1 %v1474_v37 }
  0x2b   :  { %581 = vmatmul.mubr.bf16.gmra.mrb[4].mxu0 %v1476_v38 }
  0x2c   :  { %701 = vmatmul.mubr.bf16.gmra.mrb[4].mxu1 %v1477_v39  ;;  %588 = vmatprep.mubr.bf16.mxu0 %v1478_v40 }
  0x2d   :  { %708 = vmatprep.mubr.bf16.mxu1 %v1480_v41 }
  0x33   :  { %589 = vmatmul.mubr.bf16.gmra.mrb[8].mxu0 %v1482_v42 }
  0x34   :  { %709 = vmatmul.mubr.bf16.gmra.mrb[8].mxu1 %v1483_v43  ;;  %596 = vmatprep.mubr.bf16.mxu0 %v1484_v44 }
  0x35   :  { %716 = vmatprep.mubr.bf16.mxu1 %v1486_v45 }
  0x3b   :  { %597 = vmatmul.mubr.bf16.gmra.mrb[12].mxu0 %v1488_v46 }
  0x3c   :  { %717 = vmatmul.mubr.bf16.gmra.mrb[12].mxu1 %v1489_v47  ;;  %604 = vmatprep.mubr.bf16.mxu0 %v1490_v48 }
  0x3d   :  { %724 = vmatprep.mubr.bf16.mxu1 %v1492_v49 }
  0x43   :  { %605 = vmatmul.mubr.bf16.gmra.mrb[16].mxu0 %v1494_v50 }
  0x44   :  { %725 = vmatmul.mubr.bf16.gmra.mrb[16].mxu1 %v1495_v51  ;;  %612 = vmatprep.mubr.bf16.mxu0 %v1496_v52 }
  0x45   :  { %732 = vmatprep.mubr.bf16.mxu1 %v1498_v53 }
  0x4b   :  { %613 = vmatmul.mubr.bf16.gmra.mrb[20].mxu0 %v1500_v54 }
  0x4c   :  { %733 = vmatmul.mubr.bf16.gmra.mrb[20].mxu1 %v1501_v55  ;;  %620 = vmatprep.mubr.bf16.mxu0 %v1502_v56 }
  0x4d   :  { %740 = vmatprep.mubr.bf16.mxu1 %v1504_v57 }
  0x53   :  { %621 = vmatmul.mubr.bf16.gmra.mrb[24].mxu0 %v1506_v58 }
  0x54   :  { %741 = vmatmul.mubr.bf16.gmra.mrb[24].mxu1 %v1507_v59  ;;  %628 = vmatprep.mubr.bf16.mxu0 %v1508_v60 }
  0x55   :  { %748 = vmatprep.mubr.bf16.mxu1 %v1510_v61 }
  0x5b   :  { %629 = vmatmul.mubr.bf16.gmra.mrb[28].mxu0 %v1512_v62 }
  0x5c   :  { %749 = vmatmul.mubr.bf16.gmra.mrb[28].mxu1 %v1513_v63  ;;  %636 = vmatprep.mubr.bf16.mxu0 %v1514_v0 }
  0x5d   :  { %756 = vmatprep.mubr.bf16.mxu1 %v1516_v1 }
  0x63   :  { %637 = vmatmul.mubr.bf16.gmra.mrb[32].mxu0 %v1518_v2 }
  0x64   :  { %757 = vmatmul.mubr.bf16.gmra.mrb[32].mxu1 %v1519_v3  ;;  %644 = vmatprep.mubr.bf16.mxu0 %v1520_v4 }
  0x65   :  { %764 = vmatprep.mubr.bf16.mxu1 %v1522_v5 }
  0x6b   :  { %645 = vmatmul.mubr.bf16.gmra.mrb[36].mxu0 %v1524_v8 }
  0x6c   :  { %765 = vmatmul.mubr.bf16.gmra.mrb[36].mxu1 %v1525_v9  ;;  %652 = vmatprep.mubr.bf16.mxu0 %v1132_v10 }
  0x6d   :  { %772 = vmatprep.mubr.bf16.mxu1 %v1134_v11 }
  0x73   :  { %653 = vmatmul.mubr.bf16.gmra.mrb[40].mxu0 %v1131_v12 }
  0x74   :  { %773 = vmatmul.mubr.bf16.gmra.mrb[40].mxu1 %v1133_v13 }
  0xf6   :  { %v1286_v14 = vpop.f32.mrb[0].mxu0 }
  0xf7   :  { %v1368_v15 = vpop.f32.mrb[0].mxu1  ;;  %v1287_v17 = vpop.f32.mrb[1].mxu0 }
  0xf8   :  { %v1288_v18 = vadd.f32 %v1287_v17, %v1286_v14  ;;  %v1369_v19 = vpop.f32.mrb[1].mxu1  ;;  %v1289_v20 = vpop.f32.mrb[2].mxu0 }
  0xf9   :  { %v1370_v21 = vadd.f32 %v1369_v19, %v1368_v15  ;;  %v1371_v22 = vpop.f32.mrb[2].mxu1  ;;  %v1290_v23 = vpop.f32.mrb[3].mxu0 }
  0xfa   :  { %v575_v24 = vadd.f32 %v1288_v18, %v1787_v16  ;;  %v1291_v25 = vadd.f32 %v1290_v23, %v1289_v20  ;;  %v1372_v26 = vpop.f32.mrb[3].mxu1 }
  0xfb   :  { %v1373_v27 = vadd.f32 %v1372_v26, %v1371_v22 }
  0xfc   :  { %v1790_v28 = vadd.f32 %v1370_v21, %v575_v24  ;;  %v578_v29 = vadd.f32 %v1291_v25, %v1787_v16 }
  0xfe   :  { %v1793_v30 = vadd.f32 %v1373_v27, %v578_v29  ;;  %v1292_v31 = vpop.f32.mrb[4].mxu0 }
  0xff   :  { %v1374_v32 = vpop.f32.mrb[4].mxu1  ;;  %v1293_v33 = vpop.f32.mrb[5].mxu0 }
 0x100   :  { %v780_v34 = vadd.f32 %v1793_v30, %v1790_v28  ;;  %v1294_v35 = vadd.f32 %v1293_v33, %v1292_v31  ;;  %v1375_v36 = vpop.f32.mrb[5].mxu1  ;;  %v1295_v37 = vpop.f32.mrb[6].mxu0 }
 0x101   :  { %v1376_v38 = vadd.f32 %v1375_v36, %v1374_v32  ;;  %v1377_v39 = vpop.f32.mrb[6].mxu1  ;;  %v1296_v40 = vpop.f32.mrb[7].mxu0 }
 0x102   :  { %v583_v41 = vadd.f32 %v1294_v35, %v1787_v16  ;;  %v1297_v42 = vadd.f32 %v1296_v40, %v1295_v37  ;;  %v1378_v43 = vpop.f32.mrb[7].mxu1 }
 0x103   :  { %v1379_v44 = vadd.f32 %v1378_v43, %v1377_v39 }
 0x104   :  { %v1798_v45 = vadd.f32 %v1376_v38, %v583_v41  ;;  %v586_v46 = vadd.f32 %v1297_v42, %v1787_v16 }
 0x106   :  { %v781_v47 = vadd.f32 %v780_v34, %v1798_v45  ;;  %v1802_v48 = vadd.f32 %v1379_v44, %v586_v46  ;;  %v1298_v49 = vpop.f32.mrb[8].mxu0 }
 0x107   :  { %v1380_v50 = vpop.f32.mrb[8].mxu1  ;;  %v1299_v51 = vpop.f32.mrb[9].mxu0 }
 0x108   :  { %v782_v52 = vadd.f32 %v781_v47, %v1802_v48  ;;  %v1300_v53 = vadd.f32 %v1299_v51, %v1298_v49  ;;  %v1381_v54 = vpop.f32.mrb[9].mxu1  ;;  %v1301_v55 = vpop.f32.mrb[10].mxu0 }
 0x109   :  { %v1382_v56 = vadd.f32 %v1381_v54, %v1380_v50  ;;  %v1383_v57 = vpop.f32.mrb[10].mxu1  ;;  %v1302_v58 = vpop.f32.mrb[11].mxu0 }
 0x10a   :  { %v591_v59 = vadd.f32 %v1300_v53, %v1787_v16  ;;  %v1303_v60 = vadd.f32 %v1302_v58, %v1301_v55  ;;  %v1384_v61 = vpop.f32.mrb[11].mxu1 }
 0x10b   :  { %v1385_v62 = vadd.f32 %v1384_v61, %v1383_v57 }
 0x10c   :  { %v1806_v63 = vadd.f32 %v1382_v56, %v591_v59  ;;  %v594_v0 = vadd.f32 %v1303_v60, %v1787_v16 }
 0x10e   :  { %v783_v1 = vadd.f32 %v782_v52, %v1806_v63  ;;  %v1810_v2 = vadd.f32 %v1385_v62, %v594_v0  ;;  %v1304_v3 = vpop.f32.mrb[12].mxu0 }
 0x10f   :  { %v1386_v4 = vpop.f32.mrb[12].mxu1  ;;  %v1305_v5 = vpop.f32.mrb[13].mxu0 }
 0x110   :  { %v784_v6 = vadd.f32 %v783_v1, %v1810_v2  ;;  %v1306_v7 = vadd.f32 %v1305_v5, %v1304_v3  ;;  %v1387_v8 = vpop.f32.mrb[13].mxu1  ;;  %v1307_v9 = vpop.f32.mrb[14].mxu0 }
 0x111   :  { %v1388_v10 = vadd.f32 %v1387_v8, %v1386_v4  ;;  %v1389_v11 = vpop.f32.mrb[14].mxu1  ;;  %v1308_v12 = vpop.f32.mrb[15].mxu0 }
 0x112   :  { %v599_v13 = vadd.f32 %v1306_v7, %v1787_v16  ;;  %v1309_v14 = vadd.f32 %v1308_v12, %v1307_v9  ;;  %v1390_v15 = vpop.f32.mrb[15].mxu1 }
 0x113   :  { %v1391_v17 = vadd.f32 %v1390_v15, %v1389_v11 }
 0x114   :  { %v1814_v18 = vadd.f32 %v1388_v10, %v599_v13  ;;  %v602_v19 = vadd.f32 %v1309_v14, %v1787_v16 }
 0x116   :  { %v785_v20 = vadd.f32 %v784_v6, %v1814_v18  ;;  %v1818_v21 = vadd.f32 %v1391_v17, %v602_v19  ;;  %v1310_v22 = vpop.f32.mrb[16].mxu0 }
 0x117   :  { %v1392_v23 = vpop.f32.mrb[16].mxu1  ;;  %v1311_v24 = vpop.f32.mrb[17].mxu0 }
 0x118   :  { %v786_v25 = vadd.f32 %v785_v20, %v1818_v21  ;;  %v1312_v26 = vadd.f32 %v1311_v24, %v1310_v22  ;;  %v1393_v27 = vpop.f32.mrb[17].mxu1  ;;  %v1313_v29 = vpop.f32.mrb[18].mxu0 }
 0x119   :  { %v1394_v31 = vadd.f32 %v1393_v27, %v1392_v23  ;;  %v1395_v32 = vpop.f32.mrb[18].mxu1  ;;  %v1314_v33 = vpop.f32.mrb[19].mxu0 }
 0x11a   :  { %v607_v34 = vadd.f32 %v1312_v26, %v1787_v16  ;;  %v1315_v35 = vadd.f32 %v1314_v33, %v1313_v29  ;;  %v1396_v36 = vpop.f32.mrb[19].mxu1 }
 0x11b   :  { %v1397_v37 = vadd.f32 %v1396_v36, %v1395_v32 }
 0x11c   :  { %v1822_v38 = vadd.f32 %v1394_v31, %v607_v34  ;;  %v610_v39 = vadd.f32 %v1315_v35, %v1787_v16 }
 0x11e   :  { %v787_v40 = vadd.f32 %v786_v25, %v1822_v38  ;;  %v1826_v41 = vadd.f32 %v1397_v37, %v610_v39  ;;  %v1316_v42 = vpop.f32.mrb[20].mxu0 }
 0x11f   :  { %v1398_v43 = vpop.f32.mrb[20].mxu1  ;;  %v1317_v44 = vpop.f32.mrb[21].mxu0 }
 0x120   :  { %v788_v46 = vadd.f32 %v787_v40, %v1826_v41  ;;  %v1318_v47 = vadd.f32 %v1317_v44, %v1316_v42  ;;  %v1399_v49 = vpop.f32.mrb[21].mxu1  ;;  %v1319_v50 = vpop.f32.mrb[22].mxu0 }
 0x121   :  { %v1400_v51 = vadd.f32 %v1399_v49, %v1398_v43  ;;  %v1401_v52 = vpop.f32.mrb[22].mxu1  ;;  %v1320_v53 = vpop.f32.mrb[23].mxu0 }
 0x122   :  { %v615_v54 = vadd.f32 %v1318_v47, %v1787_v16  ;;  %v1321_v55 = vadd.f32 %v1320_v53, %v1319_v50  ;;  %v1402_v56 = vpop.f32.mrb[23].mxu1 }
 0x123   :  { %v1403_v57 = vadd.f32 %v1402_v56, %v1401_v52 }
 0x124   :  { %v1830_v58 = vadd.f32 %v1400_v51, %v615_v54  ;;  %v618_v59 = vadd.f32 %v1321_v55, %v1787_v16 }
 0x126   :  { %v789_v60 = vadd.f32 %v788_v46, %v1830_v58  ;;  %v1834_v61 = vadd.f32 %v1403_v57, %v618_v59  ;;  %v1322_v62 = vpop.f32.mrb[24].mxu0 }
 0x127   :  { %v1404_v0 = vpop.f32.mrb[24].mxu1  ;;  %v1323_v1 = vpop.f32.mrb[25].mxu0 }
 0x128   :  { %v790_v3 = vadd.f32 %v789_v60, %v1834_v61  ;;  %v1324_v4 = vadd.f32 %v1323_v1, %v1322_v62  ;;  %v1405_v5 = vpop.f32.mrb[25].mxu1  ;;  %v1325_v6 = vpop.f32.mrb[26].mxu0 }
 0x129   :  { %v1406_v7 = vadd.f32 %v1405_v5, %v1404_v0  ;;  %v1407_v8 = vpop.f32.mrb[26].mxu1  ;;  %v1326_v9 = vpop.f32.mrb[27].mxu0 }
 0x12a   :  { %v623_v10 = vadd.f32 %v1324_v4, %v1787_v16  ;;  %v1327_v11 = vadd.f32 %v1326_v9, %v1325_v6  ;;  %v1408_v12 = vpop.f32.mrb[27].mxu1 }
 0x12b   :  { %v1409_v13 = vadd.f32 %v1408_v12, %v1407_v8 }
 0x12c   :  { %v1838_v14 = vadd.f32 %v1406_v7, %v623_v10  ;;  %v626_v15 = vadd.f32 %v1327_v11, %v1787_v16 }
 0x12e   :  { %v791_v17 = vadd.f32 %v790_v3, %v1838_v14  ;;  %v1842_v19 = vadd.f32 %v1409_v13, %v626_v15  ;;  %v1328_v20 = vpop.f32.mrb[28].mxu0 }
 0x12f   :  { %v1410_v22 = vpop.f32.mrb[28].mxu1  ;;  %v1329_v23 = vpop.f32.mrb[29].mxu0 }
 0x130   :  { %v792_v24 = vadd.f32 %v791_v17, %v1842_v19  ;;  %v1330_v25 = vadd.f32 %v1329_v23, %v1328_v20  ;;  %v1411_v26 = vpop.f32.mrb[29].mxu1  ;;  %v1331_v27 = vpop.f32.mrb[30].mxu0 }
 0x131   :  { %v1412_v29 = vadd.f32 %v1411_v26, %v1410_v22  ;;  %v1413_v31 = vpop.f32.mrb[30].mxu1  ;;  %v1332_v32 = vpop.f32.mrb[31].mxu0 }
 0x132   :  { %v631_v33 = vadd.f32 %v1330_v25, %v1787_v16  ;;  %v1333_v34 = vadd.f32 %v1332_v32, %v1331_v27  ;;  %v1414_v35 = vpop.f32.mrb[31].mxu1 }
 0x133   :  { %v1415_v36 = vadd.f32 %v1414_v35, %v1413_v31 }
 0x134   :  { %v1846_v37 = vadd.f32 %v1412_v29, %v631_v33  ;;  %v634_v39 = vadd.f32 %v1333_v34, %v1787_v16 }
 0x136   :  { %v793_v40 = vadd.f32 %v792_v24, %v1846_v37  ;;  %v1850_v42 = vadd.f32 %v1415_v36, %v634_v39  ;;  %v1334_v43 = vpop.f32.mrb[32].mxu0 }
 0x137   :  { %v1416_v44 = vpop.f32.mrb[32].mxu1  ;;  %v1335_v46 = vpop.f32.mrb[33].mxu0 }
 0x138   :  { %v794_v47 = vadd.f32 %v793_v40, %v1850_v42  ;;  %v1336_v49 = vadd.f32 %v1335_v46, %v1334_v43  ;;  %v1417_v50 = vpop.f32.mrb[33].mxu1  ;;  %v1337_v51 = vpop.f32.mrb[34].mxu0 }
 0x139   :  { %v1418_v52 = vadd.f32 %v1417_v50, %v1416_v44  ;;  %v1419_v53 = vpop.f32.mrb[34].mxu1  ;;  %v1338_v54 = vpop.f32.mrb[35].mxu0 }
 0x13a   :  { %v639_v55 = vadd.f32 %v1336_v49, %v1787_v16  ;;  %v1339_v56 = vadd.f32 %v1338_v54, %v1337_v51  ;;  %v1420_v57 = vpop.f32.mrb[35].mxu1 }
 0x13b   :  { %v1421_v59 = vadd.f32 %v1420_v57, %v1419_v53 }
 0x13c   :  { %v759_v60 = vadd.f32 %v1418_v52, %v639_v55  ;;  %v642_v62 = vadd.f32 %v1339_v56, %v1787_v16 }
 0x13e   :  { %v795_v0 = vadd.f32 %v794_v47, %v759_v60  ;;  %v762_v1 = vadd.f32 %v1421_v59, %v642_v62  ;;  %v1340_v3 = vpop.f32.mrb[36].mxu0 }
 0x13f   :  { %v1422_v4 = vpop.f32.mrb[36].mxu1  ;;  %v1341_v5 = vpop.f32.mrb[37].mxu0 }
 0x140   :  { %v796_v6 = vadd.f32 %v795_v0, %v762_v1  ;;  %v1342_v7 = vadd.f32 %v1341_v5, %v1340_v3  ;;  %v1423_v8 = vpop.f32.mrb[37].mxu1  ;;  %v1343_v9 = vpop.f32.mrb[38].mxu0 }
 0x141   :  { %v1424_v10 = vadd.f32 %v1423_v8, %v1422_v4  ;;  %v1425_v11 = vpop.f32.mrb[38].mxu1  ;;  %v1344_v12 = vpop.f32.mrb[39].mxu0 }
 0x142   :  { %v647_v13 = vadd.f32 %v1342_v7, %v1787_v16  ;;  %v1345_v15 = vadd.f32 %v1344_v12, %v1343_v9  ;;  %v1426_v17 = vpop.f32.mrb[39].mxu1 }
 0x143   :  { %v1427_v20 = vadd.f32 %v1426_v17, %v1425_v11 }
 0x144   :  { %v767_v22 = vadd.f32 %v1424_v10, %v647_v13  ;;  %v650_v23 = vadd.f32 %v1345_v15, %v1787_v16 }
 0x146   :  { %v797_v24 = vadd.f32 %v796_v6, %v767_v22  ;;  %v770_v25 = vadd.f32 %v1427_v20, %v650_v23  ;;  %v1346_v26 = vpop.f32.mrb[40].mxu0 }
 0x147   :  { %v1428_v27 = vpop.f32.mrb[40].mxu1  ;;  %v1347_v29 = vpop.f32.mrb[41].mxu0 }
 0x148   :  { %v798_v31 = vadd.f32 %v797_v24, %v770_v25  ;;  %v1348_v32 = vadd.f32 %v1347_v29, %v1346_v26  ;;  %v1429_v33 = vpop.f32.mrb[41].mxu1  ;;  %v1349_v34 = vpop.f32.mrb[42].mxu0 }
 0x149   :  { %v1430_v35 = vadd.f32 %v1429_v33, %v1428_v27  ;;  %v1431_v36 = vpop.f32.mrb[42].mxu1  ;;  %v1350_v39 = vpop.f32.mrb[43].mxu0 }
 0x14a   :  { %v655_v40 = vadd.f32 %v1348_v32, %v1787_v16  ;;  %v1432_v43 = vpop.f32.mrb[43].mxu1 }
 0x14c   :  { %v775_v44 = vadd.f32 %v1430_v35, %v655_v40 }
 0x14e   :  { %v800_v46 = vsel %vm799_vm0, %v775_v44, 0.0 }
 0x14f   :  { %v801_v47 = vadd.f32 %v800_v46, %v798_v31 }
 0x151   :  { %v802_v49 = vrot.slane %v801_v47, 4 }
 0x153   :  { %v803_v50 = vadd.f32 %v802_v49, %v801_v47 }
 0x155   :  { %v804_v51 = vrot.slane %v803_v50, 2 }
 0x157   :  { %v805_v52 = vadd.f32 %v804_v51, %v803_v50 }
 0x159   :  { %v806_v53 = vrot.slane %v805_v52, 1 }
 0x15b   :  { %v807_v54 = vadd.f32 %v806_v53, %v805_v52 }
 0x15d   :  { %v809_v55 = vmul.f32 0.0061728396, %v807_v54 }
 0x15f   :  { %v1860_v56 = vsub.f32 %v1790_v28, %v809_v55  ;;  %v1863_v57 = vsub.f32 %v1793_v30, %v809_v55  ;;  %v1866_v16 = vsub.f32 %v1798_v45, %v809_v55  ;;  %v1869_v59 = vsub.f32 %v1802_v48, %v809_v55 }
 0x160   :  { %v1872_v62 = vsub.f32 %v1806_v63, %v809_v55  ;;  %v1875_v0 = vsub.f32 %v1810_v2, %v809_v55  ;;  %v1878_v3 = vsub.f32 %v1814_v18, %v809_v55  ;;  %v1881_v28 = vsub.f32 %v1818_v21, %v809_v55 }
 0x161   :  { %v1884_v30 = vsub.f32 %v1822_v38, %v809_v55  ;;  %v1887_v45 = vsub.f32 %v1826_v41, %v809_v55  ;;  %v1890_v48 = vsub.f32 %v1830_v58, %v809_v55  ;;  %v1893_v63 = vsub.f32 %v1834_v61, %v809_v55 }
 0x162   :  { %v1896_v2 = vsub.f32 %v1838_v14, %v809_v55  ;;  %v1899_v18 = vsub.f32 %v1842_v19, %v809_v55  ;;  %v1902_v21 = vsub.f32 %v1846_v37, %v809_v55  ;;  %v1905_v38 = vsub.f32 %v1850_v42, %v809_v55 }
 0x163   :  { %v1907_v41 = vsub.f32 %v759_v60, %v809_v55  ;;  %v1909_v4 = vsub.f32 %v762_v1, %v809_v55  ;;  %v1911_v58 = vsub.f32 %v767_v22, %v809_v55  ;;  %v1913_v61 = vsub.f32 %v770_v25, %v809_v55 }
 0x164   :  { %v1915_v5 = vsub.f32 %v775_v44, %v809_v55  ;;  %v831_v14 = vmul.f32 %v1860_v56, %v1860_v56  ;;  %v832_v19 = vmul.f32 %v1863_v57, %v1863_v57  ;;  %v833_v37 = vmul.f32 %v1866_v16, %v1866_v16 }
 0x165   :  { %v834_v60 = vmul.f32 %v1869_v59, %v1869_v59  ;;  %v835_v6 = vmul.f32 %v1872_v62, %v1872_v62  ;;  %v836_v8 = vmul.f32 %v1875_v0, %v1875_v0  ;;  %v837_v10 = vmul.f32 %v1878_v3, %v1878_v3 }
 0x166   :  { %v852_v42 = vadd.f32 %v832_v19, %v831_v14  ;;  %v838_v12 = vmul.f32 %v1881_v28, %v1881_v28  ;;  %v839_v15 = vmul.f32 %v1884_v30, %v1884_v30  ;;  %v840_v20 = vmul.f32 %v1887_v45, %v1887_v45 }
 0x167   :  { %v841_v23 = vmul.f32 %v1890_v48, %v1890_v48  ;;  %v842_v25 = vmul.f32 %v1893_v63, %v1893_v63  ;;  %v843_v27 = vmul.f32 %v1896_v2, %v1896_v2  ;;  %v844_v31 = vmul.f32 %v1899_v18, %v1899_v18 }
 0x168   :  { %v853_v1 = vadd.f32 %v852_v42, %v833_v37  ;;  %v845_v33 = vmul.f32 %v1902_v21, %v1902_v21  ;;  %v846_v35 = vmul.f32 %v1905_v38, %v1905_v38  ;;  %v847_v39 = vmul.f32 %v1907_v41, %v1907_v41 }
 0x169   :  { %v848_v43 = vmul.f32 %v1909_v4, %v1909_v4  ;;  %v849_v46 = vmul.f32 %v1911_v58, %v1911_v58  ;;  %v851_v49 = vmul.f32 %v1915_v5, %v1915_v5  ;;  %v850_v50 = vmul.f32 %v1913_v61, %v1913_v61 }
 0x16a   :  { %v854_v7 = vadd.f32 %v853_v1, %v834_v60 }
 0x16b   :  { %v871_v53 = vsel %vm799_vm0, %v851_v49, 0.0 }
 0x16c   :  { %v855_v9 = vadd.f32 %v854_v7, %v835_v6 }
 0x16e   :  { %v856_v11 = vadd.f32 %v855_v9, %v836_v8 }
 0x170   :  { %v857_v13 = vadd.f32 %v856_v11, %v837_v10 }
 0x172   :  { %v858_v17 = vadd.f32 %v857_v13, %v838_v12 }
 0x174   :  { %v859_v22 = vadd.f32 %v858_v17, %v839_v15 }
 0x176   :  { %v860_v24 = vadd.f32 %v859_v22, %v840_v20 }
 0x178   :  { %v861_v26 = vadd.f32 %v860_v24, %v841_v23 }
 0x17a   :  { %v862_v29 = vadd.f32 %v861_v26, %v842_v25 }
 0x17c   :  { %v863_v32 = vadd.f32 %v862_v29, %v843_v27 }
 0x17e   :  { %v864_v34 = vadd.f32 %v863_v32, %v844_v31 }
 0x180   :  { %v865_v36 = vadd.f32 %v864_v34, %v845_v33 }
 0x182   :  { %v866_v40 = vadd.f32 %v865_v36, %v846_v35 }
 0x184   :  { %v867_v44 = vadd.f32 %v866_v40, %v847_v39 }
 0x186   :  { %v868_v47 = vadd.f32 %v867_v44, %v848_v43 }
 0x188   :  { %v869_v51 = vadd.f32 %v868_v47, %v849_v46 }
 0x18a   :  { %v870_v52 = vadd.f32 %v869_v51, %v850_v50 }
 0x18c   :  { %v872_v54 = vadd.f32 %v871_v53, %v870_v52 }
 0x18e   :  { %v873_v55 = vrot.slane %v872_v54, 4 }
 0x190   :  { %v874_v14 = vadd.f32 %v873_v55, %v872_v54 }
 0x192   :  { %v875_v19 = vrot.slane %v874_v14, 2 }
 0x194   :  { %v876_v37 = vadd.f32 %v875_v19, %v874_v14 }
 0x196   :  { %v877_v42 = vrot.slane %v876_v37, 1 }
 0x198   :  { %v878_v60 = vadd.f32 %v877_v42, %v876_v37 }
 0x19a   :  { %v879_v1 = vmul.f32 0.0061728396, %v878_v60 }
 0x19c   :  { %v880_v6 = vadd.f32 1e-05, %v879_v1 }
 0x19e   :  { %1530 = vrsqrt.f32 %v880_v6 }
 0x1a8   :  { %v1531_v7 = vpop.eup %1530 }
 0x1a9   :  { %v882_v8 = vmul.f32 %v1531_v7, %v1860_v56  ;;  %v883_v9 = vmul.f32 %v1531_v7, %v1863_v57  ;;  %v884_v10 = vmul.f32 %v1531_v7, %v1866_v16  ;;  %v885_v11 = vmul.f32 %v1531_v7, %v1869_v59  ;;  %v1167_v16 = vld [vmem:[%s2023_s3] ss:$0 sm:$0xff] }
 0x1aa   :  { %v886_v12 = vmul.f32 %v1531_v7, %v1872_v62  ;;  %v887_v13 = vmul.f32 %v1531_v7, %v1875_v0  ;;  %v888_v15 = vmul.f32 %v1531_v7, %v1878_v3  ;;  %v889_v17 = vmul.f32 %v1531_v7, %v1881_v28 }
 0x1ab   :  { %v890_v20 = vmul.f32 %v1531_v7, %v1884_v30  ;;  %v891_v22 = vmul.f32 %v1531_v7, %v1887_v45  ;;  %v892_v56 = vmul.f32 %v1531_v7, %v1890_v48  ;;  %v893_v57 = vmul.f32 %v1531_v7, %v1893_v63 }
 0x1ac   :  { %v894_v59 = vmul.f32 %v1531_v7, %v1896_v2  ;;  %v895_v62 = vmul.f32 %v1531_v7, %v1899_v18  ;;  %v896_v0 = vmul.f32 %v1531_v7, %v1902_v21  ;;  %v897_v3 = vmul.f32 %v1531_v7, %v1905_v38 }
 0x1ad   :  { %v898_v28 = vmul.f32 %v1531_v7, %v1907_v41  ;;  %v899_v30 = vmul.f32 %v1531_v7, %v1909_v4  ;;  %v900_v45 = vmul.f32 %v1531_v7, %v1911_v58  ;;  %v901_v48 = vmul.f32 %v1531_v7, %v1913_v61  ;;  %v1168_v41 = vld [vmem:[%s2024_s4] ss:$0 sm:$0xff] }
 0x1ae   :  { %v902_v63 = vmul.f32 %v1531_v7, %v1915_v5  ;;  %v910_v23 = vmul.f32 %v1167_v16, %v882_v8  ;;  %v911_v24 = vmul.f32 %v1167_v16, %v883_v9  ;;  %v912_v25 = vmul.f32 %v1167_v16, %v884_v10 }
 0x1af   :  { %v913_v2 = vmul.f32 %v1167_v16, %v885_v11  ;;  %v914_v26 = vmul.f32 %v1167_v16, %v886_v12  ;;  %v915_v18 = vmul.f32 %v1167_v16, %v887_v13  ;;  %v916_v27 = vmul.f32 %v1167_v16, %v888_v15 }
 0x1b0   :  { %v917_v21 = vmul.f32 %v1167_v16, %v889_v17  ;;  %v918_v29 = vmul.f32 %v1167_v16, %v890_v20  ;;  %v919_v38 = vmul.f32 %v1167_v16, %v891_v22  ;;  %v920_v31 = vmul.f32 %v1167_v16, %v892_v56 }
 0x1b1   :  { %v921_v4 = vmul.f32 %v1167_v16, %v893_v57  ;;  %v922_v58 = vmul.f32 %v1167_v16, %v894_v59  ;;  %v923_v61 = vmul.f32 %v1167_v16, %v895_v62  ;;  %v924_v32 = vmul.f32 %v1167_v16, %v896_v0 }
 0x1b2   :  { %v925_v5 = vmul.f32 %v1167_v16, %v897_v3  ;;  %v926_v33 = vmul.f32 %v1167_v16, %v898_v28  ;;  %v927_v34 = vmul.f32 %v1167_v16, %v899_v30  ;;  %v928_v35 = vmul.f32 %v1167_v16, %v900_v45 }
 0x1b3   :  { %v929_v36 = vmul.f32 %v1167_v16, %v901_v48  ;;  %v930_v39 = vmul.f32 %v1167_v16, %v902_v63  ;;  %v938_v40 = vadd.f32 %v1168_v41, %v910_v23  ;;  %v939_v43 = vadd.f32 %v1168_v41, %v911_v24 }
 0x1b4   :  { %v940_v44 = vadd.f32 %v1168_v41, %v912_v25  ;;  %v941_v46 = vadd.f32 %v1168_v41, %v913_v2  ;;  %v942_v47 = vadd.f32 %v1168_v41, %v914_v26  ;;  %v943_v49 = vadd.f32 %v1168_v41, %v915_v18 }
 0x1b5   :  { %v944_v50 = vadd.f32 %v1168_v41, %v916_v27  ;;  %v945_v51 = vadd.f32 %v1168_v41, %v917_v21  ;;  %v946_v52 = vadd.f32 %v1168_v41, %v918_v29  ;;  %v947_v53 = vadd.f32 %v1168_v41, %v919_v38 }
 0x1b6   :  { %v948_v54 = vadd.f32 %v1168_v41, %v920_v31  ;;  %v949_v55 = vadd.f32 %v1168_v41, %v921_v4  ;;  %v950_v14 = vadd.f32 %v1168_v41, %v922_v58  ;;  %v951_v19 = vadd.f32 %v1168_v41, %v923_v61 }
 0x1b7   :  { %v952_v37 = vadd.f32 %v1168_v41, %v924_v32  ;;  %v953_v42 = vadd.f32 %v1168_v41, %v925_v5  ;;  %v954_v60 = vadd.f32 %v1168_v41, %v926_v33  ;;  %v955_v1 = vadd.f32 %v1168_v41, %v927_v34 }
 0x1b8   :  { %v956_v6 = vadd.f32 %v1168_v41, %v928_v35  ;;  %v957_v7 = vadd.f32 %v1168_v41, %v929_v36  ;;  %v958_v8 = vadd.f32 %v1168_v41, %v930_v39  ;;  %v959_v9 = vmax.f32 %v938_v40, 0.0 }
 0x1b9   :  { %v960_v10 = vmax.f32 %v939_v43, 0.0  ;;  %v961_v11 = vmax.f32 %v940_v44, 0.0  ;;  %v962_v12 = vmax.f32 %v941_v46, 0.0  ;;  %v963_v13 = vmax.f32 %v942_v47, 0.0 }
 0x1ba   :  { %v964_v15 = vmax.f32 %v943_v49, 0.0  ;;  %v965_v17 = vmax.f32 %v944_v50, 0.0  ;;  %v966_v20 = vmax.f32 %v945_v51, 0.0  ;;  %v967_v22 = vmax.f32 %v946_v52, 0.0 }
 0x1bb   :  { %v968_v56 = vmax.f32 %v947_v53, 0.0  ;;  %v969_v57 = vmax.f32 %v948_v54, 0.0  ;;  %v970_v16 = vmax.f32 %v949_v55, 0.0  ;;  %v971_v59 = vmax.f32 %v950_v14, 0.0 }
 0x1bc   :  { %v972_v62 = vmax.f32 %v951_v19, 0.0  ;;  %v973_v0 = vmax.f32 %v952_v37, 0.0  ;;  %v974_v3 = vmax.f32 %v953_v42, 0.0  ;;  %v975_v28 = vmax.f32 %v954_v60, 0.0 }
 0x1bd   :  { %v976_v30 = vmax.f32 %v955_v1, 0.0  ;;  %v977_v45 = vmax.f32 %v956_v6, 0.0  ;;  %v978_v48 = vmax.f32 %v957_v7, 0.0  ;;  %v979_v63 = vmax.f32 %v958_v8, 0.0 }
 0x1be   :  { %v1214_v23 = vpack.c.bf16 %v960_v10, %v959_v9  ;;  %v1219_v24 = vpack.c.bf16 %v962_v12, %v961_v11  ;;  %v1224_v25 = vpack.c.bf16 %v964_v15, %v963_v13  ;;  %v1229_v2 = vpack.c.bf16 %v966_v20, %v965_v17 }
 0x1bf   :  { %v1210_v26 = vpack.c.bf16 %v979_v63, %v979_v63  ;;  %v1234_v18 = vpack.c.bf16 %v968_v56, %v967_v22  ;;  %v1239_v27 = vpack.c.bf16 %v970_v16, %v969_v57  ;;  %v1244_v21 = vpack.c.bf16 %v972_v62, %v971_v59 }
 0x1c0   :  { %1215 = vst [vmem:[%s2025_s5] sm:$0xff] %v1214_v23   ;;  %1261 = vst [vmem:[%s2025_s5 + $0x8] sm:$0xff] %v1219_v24   ;;  %v1249_v29 = vpack.c.bf16 %v974_v3, %v973_v0  ;;  %v1254_v38 = vpack.c.bf16 %v976_v30, %v975_v28  ;;  %v1259_v31 = vpack.c.bf16 %v978_v48, %v977_v45 }
 0x1c1   :  { %1262 = vst [vmem:[%s2025_s5 + $0x10] sm:$0xff] %v1224_v25   ;;  %1263 = vst [vmem:[%s2025_s5 + $0x18] sm:$0xff] %v1229_v2  }
 0x1c2   :  { %1264 = vst [vmem:[%s2025_s5 + $0x20] sm:$0xff] %v1234_v18   ;;  %1265 = vst [vmem:[%s2025_s5 + $0x28] sm:$0xff] %v1239_v27  }
 0x1c3   :  { %1266 = vst [vmem:[%s2025_s5 + $0x30] sm:$0xff] %v1244_v21   ;;  %1085 = vst [vmem:[%s2025_s5 + $0x50] sm:$0x1] %v1210_v26 }
 0x1c4   :  { %1267 = vst [vmem:[%s2025_s5 + $0x38] sm:$0xff] %v1249_v29   ;;  %1268 = vst [vmem:[%s2025_s5 + $0x40] sm:$0xff] %v1254_v38  }
 0x1c5   :  { %1269 = vst [vmem:[%s2025_s5 + $0x48] sm:$0xff] %v1259_v31  }

// kernel: dueling_qnet_forward.6
= control target key start
LH: loop header
LB: loop body
LE: loop exit
PB: predicated region body
PF: predicated region fallthrough
CT: control target
= control target key end

     0   :  { %v1918_v24 = vmov 0.0   ;;  %vm1919_vm0 = vmmov 0   ;;  %vm646_vm1 = vcmask 523264   ;;  %vm1059_vm2 = vcmask 1041408   ;;  %s2547_s1 = inlined_call_operand.vmem [shape: bf16[576,128], index: 1, kind: input, shape index: {}]   ;;  %s2548_s0 = inlined_call_operand.vmem [shape: bf16[162,576], index: 0, kind: input, shape index: {}]   ;;  %s2549_s2 = inlined_call_operand.vmem [shape: f32[1,128], index: 2, kind: input, shape index: {}]   ;;  %s2550_s3 = inlined_call_operand.vmem [shape: f32[1,128], index: 3, kind: input, shape index: {}]   ;;  %s2551_s4 = inlined_call_operand.vmem [shape: f32[1,128], index: 4, kind: input, shape index: {}]   ;;  %s2552_s5 = inlined_call_operand.vmem [shape: bf16[162,128], index: 5, kind: output, shape index: {}]  }
   0x1   :  { %v1805_v0 = vld [vmem:[%s2547_s1 + $0x40] sm:$0xff]   ;;  %v1807_v2 = vld [vmem:[%s2547_s1 + $0x48] sm:$0xff]   ;;  %v1809_v4 = vld [vmem:[%s2547_s1 + $0x50] sm:$0xff]  }
   0x2   :  { %v1806_v1 = vld [vmem:[%s2547_s1] sm:$0xff]   ;;  %1556 = vmatprep.subr.bf16.mxu0 %v1805_v0  ;;  %1787 = vmatprep.subr.bf16.mxu1 %v1805_v0  ;;  %v1808_v3 = vld [vmem:[%s2547_s1 + $0x8] sm:$0xff]   ;;  %v1810_v5 = vld [vmem:[%s2547_s1 + $0x10] sm:$0xff]  }
   0x3   :  { %1557 = vmatpush3.bf16.msra.mxu0 %v1806_v1  ;;  %1795 = vmatpush3.bf16.msra.mxu1 %v1806_v1  ;;  %v1811_v6 = vld [vmem:[%s2547_s1 + $0x58] sm:$0xff]   ;;  %v1813_v8 = vld [vmem:[%s2547_s1 + $0x60] sm:$0xff]   ;;  %v1815_v10 = vld [vmem:[%s2547_s1 + $0x68] sm:$0xff]  }
   0x4   :  { %1558 = vmatprep.subr.bf16.mxu0 %v1807_v2  ;;  %1788 = vmatprep.subr.bf16.mxu1 %v1807_v2  ;;  %v1812_v7 = vld [vmem:[%s2547_s1 + $0x18] sm:$0xff]   ;;  %v1814_v9 = vld [vmem:[%s2547_s1 + $0x20] sm:$0xff]   ;;  %v1826_v12 = vld [vmem:[%s2548_s0 + $0xf4] ss:$20 sps:$4 sm:$0xff]  }
   0x5   :  { %v1823_v11 = vld [vmem:[%s2548_s0 + $0x4] ss:$20 sps:$4 sm:$0xff]   ;;  %v1816_v13 = vld [vmem:[%s2547_s1 + $0x28] sm:$0xff]   ;;  %v1817_v14 = vld [vmem:[%s2547_s1 + $0x70] sm:$0xff]   ;;  %760 = vmatprep.mubr.bf16.mxu1 %v1826_v12 }
   0x6   :  { %712 = vmatprep.mubr.bf16.mxu0 %v1823_v11  ;;  %v1818_v15 = vld [vmem:[%s2547_s1 + $0x30] sm:$0xff]   ;;  %v1819_v16 = vld [vmem:[%s2547_s1 + $0x78] sm:$0xff]   ;;  %v1828_v18 = vld [vmem:[%s2547_s1 + $0xc0] sm:$0xff]  }
   0x7   :  { %1559 = vmatpush3.bf16.msra.mxu0 %v1808_v3  ;;  %1796 = vmatpush3.bf16.msra.mxu1 %v1808_v3  ;;  %v1820_v17 = vld [vmem:[%s2547_s1 + $0x38] sm:$0xff]   ;;  %v1821_v19 = vld [vmem:[%s2548_s0] ss:$20 sps:$4 sm:$0xff]   ;;  %v1824_v20 = vld [vmem:[%s2548_s0 + $0xf0] ss:$20 sps:$4 sm:$0xff]  }
   0x8   :  { %1560 = vmatprep.subr.bf16.mxu0 %v1809_v4  ;;  %1789 = vmatprep.subr.bf16.mxu1 %v1809_v4  ;;  %v1827_v21 = vld [vmem:[%s2547_s1 + $0x100] sm:$0xff]   ;;  %v1832_v25 = vld [vmem:[%s2548_s0 + $0x11c] ss:$20 sps:$4 sm:$0xff]   ;;  %v1836_v26 = vld [vmem:[%s2547_s1 + $0xc8] sm:$0xff]  }
   0x9   :  { %v1829_v22 = vld [vmem:[%s2547_s1 + $0x80] sm:$0xff]   ;;  %v1837_v27 = vld [vmem:[%s2547_s1 + $0x88] sm:$0xff]   ;;  %v1838_v30 = vld [vmem:[%s2547_s1 + $0xd0] sm:$0xff]  }
   0xa   :  { %v1830_v23 = vld [vmem:[%s2548_s0 + $0x2c] ss:$20 sps:$4 sm:$0xff]   ;;  %v1834_v29 = vld [vmem:[%s2548_s0 + $0x28] ss:$20 sps:$4 sm:$0xff]   ;;  %v1840_v32 = vld [vmem:[%s2547_s1 + $0x90] sm:$0xff]  }
   0xb   :  { %1561 = vmatpush3.bf16.msra.mxu0 %v1810_v5  ;;  %1797 = vmatpush3.bf16.msra.mxu1 %v1810_v5  ;;  %v1839_v28 = vld [vmem:[%s2547_s1 + $0x108] sm:$0xff]   ;;  %v1843_v34 = vld [vmem:[%s2548_s0 + $0x144] ss:$20 sps:$4 sm:$0xff]   ;;  %v1857_v36 = vld [vmem:[%s2547_s1 + $0x110] sm:$0xff]  }
   0xc   :  { %1562 = vmatprep.subr.bf16.mxu0 %v1811_v6  ;;  %1790 = vmatprep.subr.bf16.mxu1 %v1811_v6  ;;  %v1835_v31 = vld [vmem:[%s2548_s0 + $0x118] ss:$20 sps:$4 sm:$0xff]   ;;  %v1841_v33 = vld [vmem:[%s2548_s0 + $0x54] ss:$20 sps:$4 sm:$0xff]   ;;  %v1845_v38 = vld [vmem:[%s2548_s0 + $0x50] ss:$20 sps:$4 sm:$0xff]  }
   0xd   :  { %v1847_v35 = vld [vmem:[%s2547_s1 + $0xd8] sm:$0xff]   ;;  %v1846_v39 = vld [vmem:[%s2548_s0 + $0x140] ss:$20 sps:$4 sm:$0xff]   ;;  %v1858_v45 = vld [vmem:[%s2547_s1 + $0xe8] sm:$0xff]  }
   0xe   :  { %v1848_v37 = vld [vmem:[%s2547_s1 + $0x98] sm:$0xff]   ;;  %v1853_v40 = vld [vmem:[%s2547_s1 + $0xe0] sm:$0xff]   ;;  %v1859_v46 = vld [vmem:[%s2547_s1 + $0xa8] sm:$0xff]  }
   0xf   :  { %1563 = vmatpush3.bf16.msra.mxu0 %v1812_v7  ;;  %1798 = vmatpush3.bf16.msra.mxu1 %v1812_v7  ;;  %v1849_v41 = vld [vmem:[%s2548_s0 + $0x7c] ss:$20 sps:$4 sm:$0xff]   ;;  %v1851_v42 = vld [vmem:[%s2548_s0 + $0x16c] ss:$20 sps:$4 sm:$0xff]   ;;  %v1860_v51 = vld [vmem:[%s2548_s0 + $0xa4] ss:$20 sps:$4 sm:$0xff]  }
  0x10   :  { %1564 = vmatprep.subr.bf16.mxu0 %v1813_v8  ;;  %1791 = vmatprep.subr.bf16.mxu1 %v1813_v8  ;;  %v1856_v43 = vld [vmem:[%s2547_s1 + $0xa0] sm:$0xff]   ;;  %v1869_v44 = vld [vmem:[%s2547_s1 + $0x118] sm:$0xff]   ;;  %v81_v47 = vld [vmem:[%s2548_s0 + $0x190] sm:$0x11] }
  0x11   :  { %v1865_v48 = vld [vmem:[%s2547_s1 + $0xf0] sm:$0xff]   ;;  %v1854_v49 = vld [vmem:[%s2548_s0 + $0x78] ss:$20 sps:$4 sm:$0xff]   ;;  %v1855_v50 = vld [vmem:[%s2548_s0 + $0x168] ss:$20 sps:$4 sm:$0xff]   ;;  %v1402_v52 = vcombine.high %v81_v47, %v81_v47  ;;  %v1401_v57 = vcombine.low %v81_v47, %v81_v47 }
  0x12   :  { %v1866_v53 = vld [vmem:[%s2547_s1 + $0xb0] sm:$0xff]   ;;  %v1867_v54 = vld [vmem:[%s2547_s1 + $0xf8] sm:$0xff]   ;;  %v1870_v58 = vld [vmem:[%s2548_s0 + $0xcc] ss:$20 sps:$4 sm:$0xff]  }
  0x13   :  { %1565 = vmatpush3.bf16.msra.mxu0 %v1814_v9  ;;  %1799 = vmatpush3.bf16.msra.mxu1 %v1814_v9  ;;  %v1868_v55 = vld [vmem:[%s2547_s1 + $0xb8] sm:$0xff]   ;;  %v1863_v56 = vld [vmem:[%s2548_s0 + $0xa0] ss:$20 sps:$4 sm:$0xff]   ;;  %v1878_v63 = vld [vmem:[%s2548_s0 + $0x30] ss:$20 sps:$4 sm:$0xff]  }
  0x14   :  { %1566 = vmatprep.subr.bf16.mxu0 %v1815_v10  ;;  %1792 = vmatprep.subr.bf16.mxu1 %v1815_v10  ;;  %v1874_v59 = vld [vmem:[%s2548_s0 + $0xc] ss:$20 sps:$4 sm:$0xff]   ;;  %v1872_v60 = vld [vmem:[%s2548_s0 + $0x8] ss:$20 sps:$4 sm:$0xff]   ;;  %v1879_v0 = vld [vmem:[%s2548_s0 + $0x10] ss:$20 sps:$4 sm:$0xff]  }
  0x15   :  { %v1875_v61 = vld [vmem:[%s2548_s0 + $0xc8] ss:$20 sps:$4 sm:$0xff]   ;;  %v1882_v2 = vld [vmem:[%s2548_s0 + $0x58] ss:$20 sps:$4 sm:$0xff]   ;;  %v1886_v5 = vld [vmem:[%s2548_s0 + $0x80] ss:$20 sps:$4 sm:$0xff]  }
  0x16   :  { %v1876_v62 = vld [vmem:[%s2548_s0 + $0x34] ss:$20 sps:$4 sm:$0xff]   ;;  %v1880_v1 = vld [vmem:[%s2548_s0 + $0x5c] ss:$20 sps:$4 sm:$0xff]   ;;  %v1883_v3 = vld [vmem:[%s2548_s0 + $0x38] ss:$20 sps:$4 sm:$0xff]  }
  0x17   :  { %1567 = vmatpush3.bf16.msra.mxu0 %v1816_v13  ;;  %1800 = vmatpush3.bf16.msra.mxu1 %v1816_v13  ;;  %v1884_v4 = vld [vmem:[%s2548_s0 + $0x84] ss:$20 sps:$4 sm:$0xff]   ;;  %v1887_v6 = vld [vmem:[%s2548_s0 + $0x60] ss:$20 sps:$4 sm:$0xff]   ;;  %v1890_v8 = vld [vmem:[%s2548_s0 + $0xa8] ss:$20 sps:$4 sm:$0xff]  }
  0x18   :  { %1568 = vmatprep.subr.bf16.mxu0 %v1817_v14  ;;  %1793 = vmatprep.subr.bf16.mxu1 %v1817_v14  ;;  %v1888_v7 = vld [vmem:[%s2548_s0 + $0xac] ss:$20 sps:$4 sm:$0xff]   ;;  %v1891_v9 = vld [vmem:[%s2548_s0 + $0x88] ss:$20 sps:$4 sm:$0xff]   ;;  %v1894_v11 = vld [vmem:[%s2548_s0 + $0xd0] ss:$20 sps:$4 sm:$0xff]  }
  0x19   :  { %v1892_v10 = vld [vmem:[%s2548_s0 + $0xd4] ss:$20 sps:$4 sm:$0xff]   ;;  %v1895_v12 = vld [vmem:[%s2548_s0 + $0xb0] ss:$20 sps:$4 sm:$0xff]   ;;  %v1898_v14 = vld [vmem:[%s2548_s0 + $0xf8] ss:$20 sps:$4 sm:$0xff]  }
  0x1a   :  { %v1896_v13 = vld [vmem:[%s2548_s0 + $0xfc] ss:$20 sps:$4 sm:$0xff]  }
  0x1b   :  { %1569 = vmatpush3.bf16.msra.mxu0 %v1818_v15  ;;  %1801 = vmatpush3.bf16.msra.mxu1 %v1818_v15  ;;  %v1899_v15 = vld [vmem:[%s2548_s0 + $0xd8] ss:$20 sps:$4 sm:$0xff]  }
  0x1c   :  { %1570 = vmatprep.subr.bf16.mxu0 %v1819_v16  ;;  %1794 = vmatprep.subr.bf16.mxu1 %v1819_v16  ;;  %v1900_v16 = vld [vmem:[%s2548_s0 + $0x124] ss:$20 sps:$4 sm:$0xff]  }
  0x1f   :  { %1571 = vmatpush3.bf16.msra.mxu0 %v1820_v17  ;;  %1802 = vmatpush3.bf16.msra.mxu1 %v1820_v17  ;;  %v1902_v17 = vld [vmem:[%s2548_s0 + $0x120] ss:$20 sps:$4 sm:$0xff]  }
  0x20   :  { %1735 = vmatprep.subr.bf16.mxu0 %v1918_v24  ;;  %1638 = vmatprep.subr.bf16.mxu1 %v1828_v18  ;;  %v1903_v18 = vld [vmem:[%s2548_s0 + $0x100] ss:$20 sps:$4 sm:$0xff]  }
  0x22   :  { %713 = vmatmul.mubr.bf16.vlgmr.msra.gmra.mrb[0].mxu0 %v1821_v19  ;;  %761 = vmatmul.mubr.bf16.vlgmr.msra.gmra.mrb[0].mxu1 %v1824_v20  ;;  %v1904_v19 = vld [vmem:[%s2548_s0 + $0x14c] ss:$20 sps:$4 sm:$0xff]   ;;  %v1906_v20 = vld [vmem:[%s2548_s0 + $0x148] ss:$20 sps:$4 sm:$0xff]  }
  0x23   :  { %1736 = vmatpush3.bf16.msra.mxu0 %v1827_v21  ;;  %1639 = vmatpush3.bf16.msra.mxu1 %v1829_v22  ;;  %v1907_v21 = vld [vmem:[%s2548_s0 + $0x128] ss:$20 sps:$4 sm:$0xff]  }
  0x24   :  { %720 = vmatprep.mubr.bf16.mxu0 %v1830_v23  ;;  %768 = vmatprep.mubr.bf16.mxu1 %v1832_v25  ;;  %v1908_v22 = vld [vmem:[%s2548_s0 + $0x174] ss:$20 sps:$4 sm:$0xff]   ;;  %v82_v23 = vld [vmem:[%s2548_s0 + $0x198] sm:$0x11]  ;;  %v1910_v25 = vld [vmem:[%s2548_s0 + $0x170] ss:$20 sps:$4 sm:$0xff]  }
  0x25   :  { %1640 = vmatprep.subr.bf16.mxu1 %v1836_v26  ;;  %1737 = vmatprep.subr.bf16.mxu0 %v1918_v24  ;;  %v1911_v26 = vld [vmem:[%s2548_s0 + $0x150] ss:$20 sps:$4 sm:$0xff]  }
  0x27   :  { %1641 = vmatpush3.bf16.msra.mxu1 %v1837_v27  ;;  %1738 = vmatpush3.bf16.msra.mxu0 %v1839_v28  ;;  %v1404_v27 = vcombine.high %v82_v23, %v82_v23  ;;  %v1403_v28 = vcombine.low %v82_v23, %v82_v23 }
  0x28   :  { %1642 = vmatprep.subr.bf16.mxu1 %v1838_v30  ;;  %1739 = vmatprep.subr.bf16.mxu0 %v1918_v24  ;;  %v1915_v30 = vld [vmem:[%s2548_s0 + $0x1a0] ss:$0 sps:$4 sm:$0x11]  }
  0x2a   :  { %721 = vmatmul.mubr.bf16.gmra.mrb[4].mxu0 %v1834_v29  ;;  %769 = vmatmul.mubr.bf16.gmra.mrb[4].mxu1 %v1835_v31  ;;  %v1914_v29 = vld [vmem:[%s2548_s0 + $0x178] ss:$20 sps:$4 sm:$0xff]  }
  0x2b   :  { %1643 = vmatpush3.bf16.msra.mxu1 %v1840_v32  ;;  %728 = vmatprep.mubr.bf16.mxu0 %v1841_v33 }
  0x2c   :  { %776 = vmatprep.mubr.bf16.mxu1 %v1843_v34  ;;  %1644 = vmatprep.subr.bf16.mxu1 %v1847_v35 }
  0x2d   :  { %1740 = vmatpush3.bf16.msra.mxu0 %v1857_v36 }
  0x2e   :  { %1741 = vmatprep.subr.bf16.mxu0 %v1918_v24 }
  0x2f   :  { %1645 = vmatpush3.bf16.msra.mxu1 %v1848_v37 }
  0x30   :  { %1646 = vmatprep.subr.bf16.mxu1 %v1853_v40 }
  0x31   :  { %1742 = vmatpush3.bf16.msra.mxu0 %v1869_v44 }
  0x32   :  { %729 = vmatmul.mubr.bf16.gmra.mrb[8].mxu0 %v1845_v38  ;;  %777 = vmatmul.mubr.bf16.gmra.mrb[8].mxu1 %v1846_v39 }
  0x33   :  { %736 = vmatprep.mubr.bf16.mxu0 %v1849_v41  ;;  %784 = vmatprep.mubr.bf16.mxu1 %v1851_v42 }
  0x34   :  { %1647 = vmatpush3.bf16.msra.mxu1 %v1856_v43 }
  0x35   :  { %1648 = vmatprep.subr.bf16.mxu1 %v1858_v45 }
  0x38   :  { %1649 = vmatpush3.bf16.msra.mxu1 %v1859_v46 }
  0x39   :  { %1650 = vmatprep.subr.bf16.mxu1 %v1865_v48 }
  0x3a   :  { %737 = vmatmul.mubr.bf16.gmra.mrb[12].mxu0 %v1854_v49  ;;  %785 = vmatmul.mubr.bf16.gmra.mrb[12].mxu1 %v1855_v50 }
  0x3b   :  { %744 = vmatprep.mubr.bf16.mxu0 %v1860_v51  ;;  %792 = vmatprep.mubr.bf16.mxu1 %v1402_v52 }
  0x3c   :  { %1651 = vmatpush3.bf16.msra.mxu1 %v1866_v53 }
  0x3d   :  { %1652 = vmatprep.subr.bf16.mxu1 %v1867_v54 }
  0x40   :  { %1653 = vmatpush3.bf16.msra.mxu1 %v1868_v55 }
  0x42   :  { %745 = vmatmul.mubr.bf16.gmra.mrb[16].mxu0 %v1863_v56  ;;  %793 = vmatmul.mubr.bf16.gmra.mrb[16].mxu1 %v1401_v57 }
  0x43   :  { %752 = vmatprep.mubr.bf16.mxu0 %v1870_v58  ;;  %832 = vmatprep.mubr.bf16.mxu1 %v1874_v59 }
  0x4a   :  { %753 = vmatmul.mubr.bf16.gmra.mrb[20].mxu0 %v1875_v61  ;;  %833 = vmatmul.mubr.bf16.vlgmr.msra.gmra.mrb[20].mxu1 %v1872_v60 }
  0x4b   :  { %840 = vmatprep.mubr.bf16.mxu1 %v1876_v62  ;;  %1743 = vmatprep.mubr.msk.bf16.mxu0 %vm1919_vm0, %v1918_v24 }
  0x52   :  { %841 = vmatmul.mubr.bf16.gmra.mrb[24].mxu1 %v1878_v63  ;;  %1744 = vmatmul.mubr.msk.bf16.vlgmr.msra.gmra.mrb[24].mxu0 %vm646_vm1, %v1879_v0 }
  0x53   :  { %848 = vmatprep.mubr.bf16.mxu1 %v1880_v1  ;;  %1747 = vmatprep.mubr.msk.bf16.mxu0 %vm1919_vm0, %v1918_v24 }
  0x5a   :  { %849 = vmatmul.mubr.bf16.gmra.mrb[28].mxu1 %v1882_v2  ;;  %1748 = vmatmul.mubr.msk.bf16.gmra.mrb[28].mxu0 %vm646_vm1, %v1883_v3 }
  0x5b   :  { %856 = vmatprep.mubr.bf16.mxu1 %v1884_v4  ;;  %1751 = vmatprep.mubr.msk.bf16.mxu0 %vm1919_vm0, %v1918_v24 }
  0x62   :  { %857 = vmatmul.mubr.bf16.gmra.mrb[32].mxu1 %v1886_v5  ;;  %1752 = vmatmul.mubr.msk.bf16.gmra.mrb[32].mxu0 %vm646_vm1, %v1887_v6 }
  0x63   :  { %864 = vmatprep.mubr.bf16.mxu1 %v1888_v7  ;;  %1755 = vmatprep.mubr.msk.bf16.mxu0 %vm1919_vm0, %v1918_v24 }
  0x6a   :  { %865 = vmatmul.mubr.bf16.gmra.mrb[36].mxu1 %v1890_v8  ;;  %1756 = vmatmul.mubr.msk.bf16.gmra.mrb[36].mxu0 %vm646_vm1, %v1891_v9 }
  0x6b   :  { %872 = vmatprep.mubr.bf16.mxu1 %v1892_v10  ;;  %1759 = vmatprep.mubr.msk.bf16.mxu0 %vm1919_vm0, %v1918_v24 }
  0x72   :  { %873 = vmatmul.mubr.bf16.gmra.mrb[40].mxu1 %v1894_v11  ;;  %1760 = vmatmul.mubr.msk.bf16.gmra.mrb[40].mxu0 %vm646_vm1, %v1895_v12 }
  0x73   :  { %880 = vmatprep.mubr.bf16.mxu1 %v1896_v13  ;;  %1763 = vmatprep.mubr.msk.bf16.mxu0 %vm1919_vm0, %v1918_v24 }
  0x7a   :  { %881 = vmatmul.mubr.bf16.gmra.mrb[44].mxu1 %v1898_v14  ;;  %1764 = vmatmul.mubr.msk.bf16.gmra.mrb[44].mxu0 %vm646_vm1, %v1899_v15 }
  0x7b   :  { %888 = vmatprep.mubr.bf16.mxu1 %v1900_v16  ;;  %1767 = vmatprep.mubr.msk.bf16.mxu0 %vm1919_vm0, %v1918_v24 }
  0x82   :  { %889 = vmatmul.mubr.bf16.gmra.mrb[48].mxu1 %v1902_v17  ;;  %1768 = vmatmul.mubr.msk.bf16.gmra.mrb[48].mxu0 %vm646_vm1, %v1903_v18 }
  0x83   :  { %896 = vmatprep.mubr.bf16.mxu1 %v1904_v19  ;;  %1771 = vmatprep.mubr.msk.bf16.mxu0 %vm1919_vm0, %v1918_v24 }
  0x8a   :  { %897 = vmatmul.mubr.bf16.gmra.mrb[52].mxu1 %v1906_v20  ;;  %1772 = vmatmul.mubr.msk.bf16.gmra.mrb[52].mxu0 %vm646_vm1, %v1907_v21 }
  0x8b   :  { %904 = vmatprep.mubr.bf16.mxu1 %v1908_v22  ;;  %1775 = vmatprep.mubr.msk.bf16.mxu0 %vm1919_vm0, %v1918_v24 }
  0x92   :  { %905 = vmatmul.mubr.bf16.gmra.mrb[56].mxu1 %v1910_v25  ;;  %1776 = vmatmul.mubr.msk.bf16.gmra.mrb[56].mxu0 %vm646_vm1, %v1911_v26  ;;  %v2291_v26 = vld [vmem:[%s2549_s2] ss:$0 sm:$0xff] }
  0x93   :  { %912 = vmatprep.mubr.bf16.mxu1 %v1404_v27  ;;  %1779 = vmatprep.mubr.msk.bf16.mxu0 %vm1919_vm0, %v1918_v24 }
  0x9a   :  { %913 = vmatmul.mubr.bf16.gmra.mrb[60].mxu1 %v1403_v28  ;;  %1780 = vmatmul.mubr.msk.bf16.gmra.mrb[60].mxu0 %vm646_vm1, %v1914_v29 }
  0x9b   :  { %1783 = vmatprep.mubr.msk.bf16.mxu0 %vm1919_vm0, %v1918_v24 }
  0xa2   :  { %1784 = vmatmul.mubr.msk.bf16.gmra.mrb[64].mxu0 %vm646_vm1, %v1915_v30 }
  0xf5   :  { %v1572_v31 = vpop.f32.mrb[0].mxu0  ;;  %v1608_v32 = vpop.f32.mrb[0].mxu1 }
  0xf6   :  { %v1573_v33 = vpop.f32.mrb[1].mxu0  ;;  %v1609_v34 = vpop.f32.mrb[1].mxu1 }
  0xf7   :  { %v1574_v35 = vadd.f32 %v1573_v33, %v1572_v31  ;;  %v1575_v36 = vpop.f32.mrb[2].mxu0  ;;  %v2254_v37 = vadd.f32 %v1609_v34, %v1608_v32  ;;  %v1611_v38 = vpop.f32.mrb[2].mxu1 }
  0xf8   :  { %v1576_v39 = vpop.f32.mrb[3].mxu0  ;;  %v1612_v40 = vpop.f32.mrb[3].mxu1 }
  0xf9   :  { %v1577_v41 = vadd.f32 %v1576_v39, %v1575_v36  ;;  %v2256_v42 = vadd.f32 %v1612_v40, %v1611_v38  ;;  %v715_v31 = vadd.f32 %v1574_v35, %v2291_v26 }
  0xfb   :  { %v718_v40 = vadd.f32 %v1577_v41, %v2291_v26 }
  0xfd   :  { %v1578_v24 = vpop.f32.mrb[4].mxu0  ;;  %v1614_v43 = vpop.f32.mrb[4].mxu1 }
  0xfe   :  { %v1579_v44 = vpop.f32.mrb[5].mxu0  ;;  %v1615_v45 = vpop.f32.mrb[5].mxu1 }
  0xff   :  { %v2258_v46 = vadd.f32 %v1579_v44, %v1578_v24  ;;  %v1581_v47 = vpop.f32.mrb[6].mxu0  ;;  %v2260_v48 = vadd.f32 %v1615_v45, %v1614_v43  ;;  %v1617_v49 = vpop.f32.mrb[6].mxu1 }
 0x100   :  { %v1582_v50 = vpop.f32.mrb[7].mxu0  ;;  %v1618_v51 = vpop.f32.mrb[7].mxu1 }
 0x101   :  { %v2262_v52 = vadd.f32 %v1582_v50, %v1581_v47  ;;  %v2264_v53 = vadd.f32 %v1618_v51, %v1617_v49 }
 0x105   :  { %v1584_v54 = vpop.f32.mrb[8].mxu0  ;;  %v1620_v55 = vpop.f32.mrb[8].mxu1 }
 0x106   :  { %v1585_v56 = vpop.f32.mrb[9].mxu0  ;;  %v1621_v57 = vpop.f32.mrb[9].mxu1 }
 0x107   :  { %v2266_v58 = vadd.f32 %v1585_v56, %v1584_v54  ;;  %v1587_v59 = vpop.f32.mrb[10].mxu0  ;;  %v2268_v60 = vadd.f32 %v1621_v57, %v1620_v55  ;;  %v1623_v61 = vpop.f32.mrb[10].mxu1  ;;  %v723_v54 = vadd.f32 %v2258_v46, %v2291_v26 }
 0x108   :  { %v1588_v62 = vpop.f32.mrb[11].mxu0  ;;  %v1624_v63 = vpop.f32.mrb[11].mxu1 }
 0x109   :  { %v2270_v0 = vadd.f32 %v1588_v62, %v1587_v59  ;;  %v2272_v1 = vadd.f32 %v1624_v63, %v1623_v61  ;;  %v726_v62 = vadd.f32 %v2262_v52, %v2291_v26 }
 0x10d   :  { %v1590_v2 = vpop.f32.mrb[12].mxu0  ;;  %v1626_v3 = vpop.f32.mrb[12].mxu1 }
 0x10e   :  { %v1591_v4 = vpop.f32.mrb[13].mxu0  ;;  %v1627_v5 = vpop.f32.mrb[13].mxu1 }
 0x10f   :  { %v2274_v6 = vadd.f32 %v1591_v4, %v1590_v2  ;;  %v1593_v7 = vpop.f32.mrb[14].mxu0  ;;  %v2276_v8 = vadd.f32 %v1627_v5, %v1626_v3  ;;  %v1629_v9 = vpop.f32.mrb[14].mxu1 }
 0x110   :  { %v1594_v10 = vpop.f32.mrb[15].mxu0  ;;  %v1630_v11 = vpop.f32.mrb[15].mxu1 }
 0x111   :  { %v2278_v12 = vadd.f32 %v1594_v10, %v1593_v7  ;;  %v2280_v13 = vadd.f32 %v1630_v11, %v1629_v9  ;;  %v731_v11 = vadd.f32 %v2266_v58, %v2291_v26 }
 0x115   :  { %v1596_v14 = vpop.f32.mrb[16].mxu0  ;;  %v1632_v15 = vpop.f32.mrb[16].mxu1 }
 0x116   :  { %v1597_v16 = vpop.f32.mrb[17].mxu0  ;;  %v1633_v17 = vpop.f32.mrb[17].mxu1 }
 0x117   :  { %v2282_v18 = vadd.f32 %v1597_v16, %v1596_v14  ;;  %v1599_v19 = vpop.f32.mrb[18].mxu0  ;;  %v2284_v20 = vadd.f32 %v1633_v17, %v1632_v15  ;;  %v1635_v21 = vpop.f32.mrb[18].mxu1 }
 0x118   :  { %v1600_v22 = vpop.f32.mrb[19].mxu0  ;;  %v1636_v23 = vpop.f32.mrb[19].mxu1 }
 0x119   :  { %v2286_v25 = vadd.f32 %v1600_v22, %v1599_v19  ;;  %v734_v22 = vadd.f32 %v2270_v0, %v2291_v26 }
 0x11d   :  { %v1602_v27 = vpop.f32.mrb[20].mxu0  ;;  %v1654_v28 = vpop.f32.mrb[20].mxu1 }
 0x11e   :  { %v1603_v29 = vpop.f32.mrb[21].mxu0  ;;  %v1655_v30 = vpop.f32.mrb[21].mxu1 }
 0x11f   :  { %v2294_v32 = vadd.f32 %v1603_v29, %v1602_v27  ;;  %v1656_v33 = vadd.f32 %v1655_v30, %v1654_v28  ;;  %v1605_v34 = vpop.f32.mrb[22].mxu0  ;;  %v1657_v36 = vpop.f32.mrb[22].mxu1 }
 0x120   :  { %v1606_v38 = vpop.f32.mrb[23].mxu0  ;;  %v1658_v39 = vpop.f32.mrb[23].mxu1 }
 0x121   :  { %v2297_v24 = vadd.f32 %v1606_v38, %v1605_v34  ;;  %v1659_v43 = vadd.f32 %v1658_v39, %v1657_v36  ;;  %v835_v44 = vadd.f32 %v1656_v33, %v715_v31  ;;  %v739_v36 = vadd.f32 %v2274_v6, %v2291_v26 }
 0x123   :  { %v838_v45 = vadd.f32 %v1659_v43, %v718_v40 }
 0x125   :  { %v1660_v47 = vpop.f32.mrb[24].mxu1  ;;  %v954_v49 = vpop.f32.mrb[24].mxu0 }
 0x126   :  { %v2299_v50 = vadd.f32 %v954_v49, %v835_v44  ;;  %v1661_v51 = vpop.f32.mrb[25].mxu1  ;;  %v1745_v35 = vpop.f32.mrb[25].mxu0 }
 0x127   :  { %v1662_v55 = vadd.f32 %v1661_v51, %v1660_v47  ;;  %v1663_v56 = vpop.f32.mrb[26].mxu1  ;;  %v957_v57 = vpop.f32.mrb[26].mxu0  ;;  %v742_v47 = vadd.f32 %v2278_v12, %v2291_v26 }
 0x128   :  { %v2303_v59 = vadd.f32 %v957_v57, %v838_v45  ;;  %v1664_v41 = vpop.f32.mrb[27].mxu1  ;;  %v1746_v61 = vpop.f32.mrb[27].mxu0 }
 0x129   :  { %v1665_v63 = vadd.f32 %v1664_v41, %v1663_v56  ;;  %v843_v2 = vadd.f32 %v1662_v55, %v723_v54  ;;  %v747_v61 = vadd.f32 %v2282_v18, %v2291_v26 }
 0x12a   :  { %v1040_v3 = vadd.f32 %v2303_v59, %v2299_v50 }
 0x12b   :  { %v846_v4 = vadd.f32 %v1665_v63, %v726_v62 }
 0x12d   :  { %v1666_v5 = vpop.f32.mrb[28].mxu1  ;;  %v962_v7 = vpop.f32.mrb[28].mxu0 }
 0x12e   :  { %v2309_v9 = vadd.f32 %v962_v7, %v843_v2  ;;  %v1667_v46 = vpop.f32.mrb[29].mxu1  ;;  %v1749_v10 = vpop.f32.mrb[29].mxu0  ;;  %v750_v7 = vadd.f32 %v2286_v25, %v2291_v26 }
 0x12f   :  { %v1668_v14 = vadd.f32 %v1667_v46, %v1666_v5  ;;  %v1669_v15 = vpop.f32.mrb[30].mxu1  ;;  %v965_v16 = vpop.f32.mrb[30].mxu0 }
 0x130   :  { %v1041_v52 = vadd.f32 %v1040_v3, %v2309_v9  ;;  %v2314_v17 = vadd.f32 %v965_v16, %v846_v4  ;;  %v1670_v19 = vpop.f32.mrb[31].mxu1  ;;  %v1750_v21 = vpop.f32.mrb[31].mxu0 }
 0x131   :  { %v1671_v23 = vadd.f32 %v1670_v19, %v1669_v15  ;;  %v851_v27 = vadd.f32 %v1668_v14, %v731_v11  ;;  %v755_v21 = vadd.f32 %v2294_v32, %v2291_v26 }
 0x132   :  { %v1042_v28 = vadd.f32 %v1041_v52, %v2314_v17 }
 0x133   :  { %v854_v29 = vadd.f32 %v1671_v23, %v734_v22 }
 0x135   :  { %v1672_v30 = vpop.f32.mrb[32].mxu1  ;;  %v970_v31 = vpop.f32.mrb[32].mxu0 }
 0x136   :  { %v2319_v58 = vadd.f32 %v970_v31, %v851_v27  ;;  %v1673_v33 = vpop.f32.mrb[33].mxu1  ;;  %v1753_v34 = vpop.f32.mrb[33].mxu0  ;;  %v758_v31 = vadd.f32 %v2297_v24, %v2291_v26 }
 0x137   :  { %v1674_v38 = vadd.f32 %v1673_v33, %v1672_v30  ;;  %v1675_v39 = vpop.f32.mrb[34].mxu1  ;;  %v973_v40 = vpop.f32.mrb[34].mxu0 }
 0x138   :  { %v1043_v43 = vadd.f32 %v1042_v28, %v2319_v58  ;;  %v2324_v0 = vadd.f32 %v973_v40, %v854_v29  ;;  %v1676_v44 = vpop.f32.mrb[35].mxu1  ;;  %v1754_v45 = vpop.f32.mrb[35].mxu0 }
 0x139   :  { %v1677_v49 = vadd.f32 %v1676_v44, %v1675_v39  ;;  %v859_v51 = vadd.f32 %v1674_v38, %v739_v36  ;;  %v763_v45 = vadd.f32 %v2254_v37, %v2291_v26 }
 0x13a   :  { %v1044_v35 = vadd.f32 %v1043_v43, %v2324_v0 }
 0x13b   :  { %v862_v54 = vadd.f32 %v1677_v49, %v742_v47 }
 0x13d   :  { %v1678_v55 = vpop.f32.mrb[36].mxu1  ;;  %v978_v56 = vpop.f32.mrb[36].mxu0 }
 0x13e   :  { %v2329_v6 = vadd.f32 %v978_v56, %v859_v51  ;;  %v1679_v57 = vpop.f32.mrb[37].mxu1  ;;  %v1757_v41 = vpop.f32.mrb[37].mxu0  ;;  %v766_v56 = vadd.f32 %v2256_v42, %v2291_v26 }
 0x13f   :  { %v1680_v62 = vadd.f32 %v1679_v57, %v1678_v55  ;;  %v1681_v63 = vpop.f32.mrb[38].mxu1  ;;  %v981_v2 = vpop.f32.mrb[38].mxu0 }
 0x140   :  { %v1045_v3 = vadd.f32 %v1044_v35, %v2329_v6  ;;  %v2334_v12 = vadd.f32 %v981_v2, %v862_v54  ;;  %v1682_v4 = vpop.f32.mrb[39].mxu1  ;;  %v1758_v5 = vpop.f32.mrb[39].mxu0 }
 0x141   :  { %v1683_v46 = vadd.f32 %v1682_v4, %v1681_v63  ;;  %v867_v10 = vadd.f32 %v1680_v62, %v747_v61  ;;  %v771_v5 = vadd.f32 %v2260_v48, %v2291_v26 }
 0x142   :  { %v1046_v11 = vadd.f32 %v1045_v3, %v2334_v12 }
 0x143   :  { %v870_v14 = vadd.f32 %v1683_v46, %v750_v7 }
 0x145   :  { %v1684_v15 = vpop.f32.mrb[40].mxu1  ;;  %v986_v16 = vpop.f32.mrb[40].mxu0 }
 0x146   :  { %v2339_v18 = vadd.f32 %v986_v16, %v867_v10  ;;  %v1685_v52 = vpop.f32.mrb[41].mxu1  ;;  %v1761_v19 = vpop.f32.mrb[41].mxu0  ;;  %v774_v16 = vadd.f32 %v2264_v53, %v2291_v26 }
 0x147   :  { %v1686_v22 = vadd.f32 %v1685_v52, %v1684_v15  ;;  %v1687_v23 = vpop.f32.mrb[42].mxu1  ;;  %v989_v27 = vpop.f32.mrb[42].mxu0 }
 0x148   :  { %v1047_v28 = vadd.f32 %v1046_v11, %v2339_v18  ;;  %v2344_v25 = vadd.f32 %v989_v27, %v870_v14  ;;  %v1688_v29 = vpop.f32.mrb[43].mxu1  ;;  %v1762_v30 = vpop.f32.mrb[43].mxu0 }
 0x149   :  { %v1689_v33 = vadd.f32 %v1688_v29, %v1687_v23  ;;  %v875_v34 = vadd.f32 %v1686_v22, %v755_v21  ;;  %v779_v30 = vadd.f32 %v2268_v60, %v2291_v26 }
 0x14a   :  { %v1048_v36 = vadd.f32 %v1047_v28, %v2344_v25 }
 0x14b   :  { %v878_v38 = vadd.f32 %v1689_v33, %v758_v31 }
 0x14d   :  { %v1690_v39 = vpop.f32.mrb[44].mxu1  ;;  %v994_v40 = vpop.f32.mrb[44].mxu0 }
 0x14e   :  { %v2349_v32 = vadd.f32 %v994_v40, %v875_v34  ;;  %v1691_v43 = vpop.f32.mrb[45].mxu1  ;;  %v1765_v44 = vpop.f32.mrb[45].mxu0  ;;  %v782_v40 = vadd.f32 %v2272_v1, %v2291_v26 }
 0x14f   :  { %v1692_v47 = vadd.f32 %v1691_v43, %v1690_v39  ;;  %v1693_v49 = vpop.f32.mrb[46].mxu1  ;;  %v997_v51 = vpop.f32.mrb[46].mxu0 }
 0x150   :  { %v1049_v35 = vadd.f32 %v1048_v36, %v2349_v32  ;;  %v2354_v24 = vadd.f32 %v997_v51, %v878_v38  ;;  %v1694_v54 = vpop.f32.mrb[47].mxu1  ;;  %v1766_v55 = vpop.f32.mrb[47].mxu0 }
 0x151   :  { %v1695_v57 = vadd.f32 %v1694_v54, %v1693_v49  ;;  %v883_v41 = vadd.f32 %v1692_v47, %v763_v45  ;;  %v787_v55 = vadd.f32 %v2276_v8, %v2291_v26  ;;  %v795_v8 = vadd.f32 %v2284_v20, %v2291_v26 }
 0x152   :  { %v1050_v61 = vadd.f32 %v1049_v35, %v2354_v24 }
 0x153   :  { %v886_v62 = vadd.f32 %v1695_v57, %v766_v56 }
 0x155   :  { %v1696_v63 = vpop.f32.mrb[48].mxu1  ;;  %v1002_v2 = vpop.f32.mrb[48].mxu0 }
 0x156   :  { %v2359_v37 = vadd.f32 %v1002_v2, %v883_v41  ;;  %v1697_v3 = vpop.f32.mrb[49].mxu1  ;;  %v1769_v4 = vpop.f32.mrb[49].mxu0  ;;  %v790_v2 = vadd.f32 %v2280_v13, %v2291_v26 }
 0x157   :  { %v1698_v7 = vadd.f32 %v1697_v3, %v1696_v63  ;;  %v1699_v46 = vpop.f32.mrb[50].mxu1  ;;  %v1005_v10 = vpop.f32.mrb[50].mxu0 }
 0x158   :  { %v1051_v11 = vadd.f32 %v1050_v61, %v2359_v37  ;;  %v2364_v42 = vadd.f32 %v1005_v10, %v886_v62  ;;  %v1700_v14 = vpop.f32.mrb[51].mxu1  ;;  %v1770_v15 = vpop.f32.mrb[51].mxu0 }
 0x159   :  { %v1701_v52 = vadd.f32 %v1700_v14, %v1699_v46  ;;  %v891_v19 = vadd.f32 %v1698_v7, %v771_v5 }
 0x15a   :  { %v1052_v21 = vadd.f32 %v1051_v11, %v2364_v42 }
 0x15b   :  { %v894_v22 = vadd.f32 %v1701_v52, %v774_v16 }
 0x15d   :  { %v1702_v23 = vpop.f32.mrb[52].mxu1  ;;  %v1010_v27 = vpop.f32.mrb[52].mxu0 }
 0x15e   :  { %v2369_v48 = vadd.f32 %v1010_v27, %v891_v19  ;;  %v1703_v28 = vpop.f32.mrb[53].mxu1  ;;  %v1773_v29 = vpop.f32.mrb[53].mxu0 }
 0x15f   :  { %v1704_v31 = vadd.f32 %v1703_v28, %v1702_v23  ;;  %v1705_v33 = vpop.f32.mrb[54].mxu1  ;;  %v1013_v34 = vpop.f32.mrb[54].mxu0 }
 0x160   :  { %v1053_v36 = vadd.f32 %v1052_v21, %v2369_v48  ;;  %v2374_v53 = vadd.f32 %v1013_v34, %v894_v22  ;;  %v1706_v38 = vpop.f32.mrb[55].mxu1  ;;  %v1774_v39 = vpop.f32.mrb[55].mxu0 }
 0x161   :  { %v1707_v43 = vadd.f32 %v1706_v38, %v1705_v33  ;;  %v899_v44 = vadd.f32 %v1704_v31, %v779_v30 }
 0x162   :  { %v1054_v45 = vadd.f32 %v1053_v36, %v2374_v53 }
 0x163   :  { %v902_v47 = vadd.f32 %v1707_v43, %v782_v40 }
 0x165   :  { %v1708_v49 = vpop.f32.mrb[56].mxu1  ;;  %v1018_v51 = vpop.f32.mrb[56].mxu0 }
 0x166   :  { %v1019_v60 = vadd.f32 %v1018_v51, %v899_v44  ;;  %v1709_v35 = vpop.f32.mrb[57].mxu1  ;;  %v1777_v54 = vpop.f32.mrb[57].mxu0 }
 0x167   :  { %v1710_v56 = vadd.f32 %v1709_v35, %v1708_v49  ;;  %v1711_v57 = vpop.f32.mrb[58].mxu1  ;;  %v1021_v41 = vpop.f32.mrb[58].mxu0 }
 0x168   :  { %v1055_v61 = vadd.f32 %v1054_v45, %v1019_v60  ;;  %v1022_v62 = vadd.f32 %v1021_v41, %v902_v47  ;;  %v1712_v63 = vpop.f32.mrb[59].mxu1  ;;  %v1778_v1 = vpop.f32.mrb[59].mxu0 }
 0x169   :  { %v1713_v3 = vadd.f32 %v1712_v63, %v1711_v57  ;;  %v907_v4 = vadd.f32 %v1710_v56, %v787_v55 }
 0x16a   :  { %v1056_v5 = vadd.f32 %v1055_v61, %v1022_v62 }
 0x16b   :  { %v910_v7 = vadd.f32 %v1713_v3, %v790_v2 }
 0x16d   :  { %v1714_v46 = vpop.f32.mrb[60].mxu1  ;;  %v1026_v10 = vpop.f32.mrb[60].mxu0 }
 0x16e   :  { %v1027_v11 = vadd.f32 %v1026_v10, %v907_v4  ;;  %v1715_v14 = vpop.f32.mrb[61].mxu1  ;;  %v1781_v15 = vpop.f32.mrb[61].mxu0 }
 0x16f   :  { %v1716_v16 = vadd.f32 %v1715_v14, %v1714_v46  ;;  %v1029_v52 = vpop.f32.mrb[62].mxu0  ;;  %v1717_v19 = vpop.f32.mrb[62].mxu1 }
 0x170   :  { %v1057_v21 = vadd.f32 %v1056_v5, %v1027_v11  ;;  %v1030_v22 = vadd.f32 %v1029_v52, %v910_v7  ;;  %v1782_v23 = vpop.f32.mrb[63].mxu0  ;;  %v1718_v27 = vpop.f32.mrb[63].mxu1 }
 0x171   :  { %v915_v13 = vadd.f32 %v1716_v16, %v795_v8 }
 0x172   :  { %v1058_v28 = vadd.f32 %v1057_v21, %v1030_v22 }
 0x175   :  { %v1034_v29 = vpop.f32.mrb[64].mxu0 }
 0x176   :  { %v1035_v30 = vadd.f32 %v1034_v29, %v915_v13  ;;  %v1785_v31 = vpop.f32.mrb[65].mxu0 }
 0x177   :  { %v1037_v33 = vpop.f32.mrb[66].mxu0 }
 0x178   :  { %v1060_v34 = vsel %vm1059_vm2, %v1035_v30, 0.0  ;;  %v1786_v36 = vpop.f32.mrb[67].mxu0 }
 0x179   :  { %v1061_v38 = vadd.f32 %v1060_v34, %v1058_v28 }
 0x17b   :  { %v1062_v39 = vrot.slane %v1061_v38, 4 }
 0x17d   :  { %v1063_v20 = vadd.f32 %v1062_v39, %v1061_v38 }
 0x17f   :  { %v1064_v26 = vrot.slane %v1063_v20, 2 }
 0x181   :  { %v1065_v40 = vadd.f32 %v1064_v26, %v1063_v20 }
 0x183   :  { %v1066_v43 = vrot.slane %v1065_v40, 1 }
 0x185   :  { %v1067_v44 = vadd.f32 %v1066_v43, %v1065_v40 }
 0x187   :  { %v1069_v45 = vmul.f32 0.0061728396, %v1067_v44 }
 0x189   :  { %v2387_v47 = vsub.f32 %v2299_v50, %v1069_v45  ;;  %v2390_v49 = vsub.f32 %v2303_v59, %v1069_v45  ;;  %v2393_v51 = vsub.f32 %v2309_v9, %v1069_v45  ;;  %v2396_v35 = vsub.f32 %v2314_v17, %v1069_v45 }
 0x18a   :  { %v2399_v54 = vsub.f32 %v2319_v58, %v1069_v45  ;;  %v2402_v55 = vsub.f32 %v2324_v0, %v1069_v45  ;;  %v2405_v56 = vsub.f32 %v2329_v6, %v1069_v45  ;;  %v2408_v50 = vsub.f32 %v2334_v12, %v1069_v45 }
 0x18b   :  { %v2411_v59 = vsub.f32 %v2339_v18, %v1069_v45  ;;  %v2414_v9 = vsub.f32 %v2344_v25, %v1069_v45  ;;  %v2417_v17 = vsub.f32 %v2349_v32, %v1069_v45  ;;  %v2420_v58 = vsub.f32 %v2354_v24, %v1069_v45 }
 0x18c   :  { %v2423_v0 = vsub.f32 %v2359_v37, %v1069_v45  ;;  %v2426_v6 = vsub.f32 %v2364_v42, %v1069_v45  ;;  %v2429_v12 = vsub.f32 %v2369_v48, %v1069_v45  ;;  %v2432_v18 = vsub.f32 %v2374_v53, %v1069_v45 }
 0x18d   :  { %v2434_v25 = vsub.f32 %v1019_v60, %v1069_v45  ;;  %v2436_v57 = vsub.f32 %v1022_v62, %v1069_v45  ;;  %v2438_v32 = vsub.f32 %v1027_v11, %v1069_v45  ;;  %v2440_v24 = vsub.f32 %v1030_v22, %v1069_v45 }
 0x18e   :  { %v2442_v41 = vsub.f32 %v1035_v30, %v1069_v45  ;;  %v1091_v37 = vmul.f32 %v2387_v47, %v2387_v47  ;;  %v1092_v42 = vmul.f32 %v2390_v49, %v2390_v49  ;;  %v1093_v48 = vmul.f32 %v2393_v51, %v2393_v51 }
 0x18f   :  { %v1094_v60 = vmul.f32 %v2396_v35, %v2396_v35  ;;  %v1095_v62 = vmul.f32 %v2399_v54, %v2399_v54  ;;  %v1096_v1 = vmul.f32 %v2402_v55, %v2402_v55  ;;  %v1097_v3 = vmul.f32 %v2405_v56, %v2405_v56 }
 0x190   :  { %v1112_v53 = vadd.f32 %v1092_v42, %v1091_v37  ;;  %v1098_v5 = vmul.f32 %v2408_v50, %v2408_v50  ;;  %v1099_v46 = vmul.f32 %v2411_v59, %v2411_v59  ;;  %v1100_v11 = vmul.f32 %v2414_v9, %v2414_v9 }
 0x191   :  { %v1101_v15 = vmul.f32 %v2417_v17, %v2417_v17  ;;  %v1102_v16 = vmul.f32 %v2420_v58, %v2420_v58  ;;  %v1103_v19 = vmul.f32 %v2423_v0, %v2423_v0  ;;  %v1104_v22 = vmul.f32 %v2426_v6, %v2426_v6 }
 0x192   :  { %v1113_v61 = vadd.f32 %v1112_v53, %v1093_v48  ;;  %v1105_v27 = vmul.f32 %v2429_v12, %v2429_v12  ;;  %v1106_v28 = vmul.f32 %v2432_v18, %v2432_v18  ;;  %v1107_v30 = vmul.f32 %v2434_v25, %v2434_v25 }
 0x193   :  { %v1108_v33 = vmul.f32 %v2436_v57, %v2436_v57  ;;  %v1109_v36 = vmul.f32 %v2438_v32, %v2438_v32  ;;  %v1111_v39 = vmul.f32 %v2442_v41, %v2442_v41  ;;  %v1110_v20 = vmul.f32 %v2440_v24, %v2440_v24 }
 0x194   :  { %v1114_v63 = vadd.f32 %v1113_v61, %v1094_v60 }
 0x195   :  { %v1131_v43 = vsel %vm1059_vm2, %v1111_v39, 0.0 }
 0x196   :  { %v1115_v2 = vadd.f32 %v1114_v63, %v1095_v62 }
 0x198   :  { %v1116_v4 = vadd.f32 %v1115_v2, %v1096_v1 }
 0x19a   :  { %v1117_v7 = vadd.f32 %v1116_v4, %v1097_v3 }
 0x19c   :  { %v1118_v10 = vadd.f32 %v1117_v7, %v1098_v5 }
 0x19e   :  { %v1119_v14 = vadd.f32 %v1118_v10, %v1099_v46 }
 0x1a0   :  { %v1120_v8 = vadd.f32 %v1119_v14, %v1100_v11 }
 0x1a2   :  { %v1121_v52 = vadd.f32 %v1120_v8, %v1101_v15 }
 0x1a4   :  { %v1122_v21 = vadd.f32 %v1121_v52, %v1102_v16 }
 0x1a6   :  { %v1123_v23 = vadd.f32 %v1122_v21, %v1103_v19 }
 0x1a8   :  { %v1124_v13 = vadd.f32 %v1123_v23, %v1104_v22 }
 0x1aa   :  { %v1125_v29 = vadd.f32 %v1124_v13, %v1105_v27 }
 0x1ac   :  { %v1126_v31 = vadd.f32 %v1125_v29, %v1106_v28 }
 0x1ae   :  { %v1127_v34 = vadd.f32 %v1126_v31, %v1107_v30 }
 0x1b0   :  { %v1128_v38 = vadd.f32 %v1127_v34, %v1108_v33 }
 0x1b2   :  { %v1129_v26 = vadd.f32 %v1128_v38, %v1109_v36 }
 0x1b4   :  { %v1130_v40 = vadd.f32 %v1129_v26, %v1110_v20 }
 0x1b6   :  { %v1132_v44 = vadd.f32 %v1131_v43, %v1130_v40 }
 0x1b8   :  { %v1133_v45 = vrot.slane %v1132_v44, 4 }
 0x1ba   :  { %v1134_v37 = vadd.f32 %v1133_v45, %v1132_v44 }
 0x1bc   :  { %v1135_v42 = vrot.slane %v1134_v37, 2 }
 0x1be   :  { %v1136_v48 = vadd.f32 %v1135_v42, %v1134_v37 }
 0x1c0   :  { %v1137_v53 = vrot.slane %v1136_v48, 1 }
 0x1c2   :  { %v1138_v60 = vadd.f32 %v1137_v53, %v1136_v48 }
 0x1c4   :  { %v1139_v61 = vmul.f32 0.0061728396, %v1138_v60 }
 0x1c6   :  { %v1140_v62 = vadd.f32 1e-05, %v1139_v61 }
 0x1c8   :  { %1916 = vrsqrt.f32 %v1140_v62 }
 0x1d2   :  { %v1917_v63 = vpop.eup %1916 }
 0x1d3   :  { %v1142_v1 = vmul.f32 %v1917_v63, %v2387_v47  ;;  %v1143_v2 = vmul.f32 %v1917_v63, %v2390_v49  ;;  %v1144_v3 = vmul.f32 %v1917_v63, %v2393_v51  ;;  %v1145_v4 = vmul.f32 %v1917_v63, %v2396_v35  ;;  %v1453_v51 = vld [vmem:[%s2550_s3] ss:$0 sm:$0xff] }
 0x1d4   :  { %v1146_v5 = vmul.f32 %v1917_v63, %v2399_v54  ;;  %v1147_v7 = vmul.f32 %v1917_v63, %v2402_v55  ;;  %v1148_v46 = vmul.f32 %v1917_v63, %v2405_v56  ;;  %v1149_v10 = vmul.f32 %v1917_v63, %v2408_v50 }
 0x1d5   :  { %v1150_v11 = vmul.f32 %v1917_v63, %v2411_v59  ;;  %v1151_v14 = vmul.f32 %v1917_v63, %v2414_v9  ;;  %v1152_v47 = vmul.f32 %v1917_v63, %v2417_v17  ;;  %v1153_v49 = vmul.f32 %v1917_v63, %v2420_v58 }
 0x1d6   :  { %v1154_v35 = vmul.f32 %v1917_v63, %v2423_v0  ;;  %v1155_v54 = vmul.f32 %v1917_v63, %v2426_v6  ;;  %v1156_v55 = vmul.f32 %v1917_v63, %v2429_v12  ;;  %v1157_v56 = vmul.f32 %v1917_v63, %v2432_v18 }
 0x1d7   :  { %v1158_v50 = vmul.f32 %v1917_v63, %v2434_v25  ;;  %v1159_v59 = vmul.f32 %v1917_v63, %v2436_v57  ;;  %v1160_v9 = vmul.f32 %v1917_v63, %v2438_v32  ;;  %v1161_v17 = vmul.f32 %v1917_v63, %v2440_v24  ;;  %v1454_v25 = vld [vmem:[%s2551_s4] ss:$0 sm:$0xff] }
 0x1d8   :  { %v1162_v58 = vmul.f32 %v1917_v63, %v2442_v41  ;;  %v1170_v15 = vmul.f32 %v1453_v51, %v1142_v1  ;;  %v1171_v8 = vmul.f32 %v1453_v51, %v1143_v2  ;;  %v1172_v16 = vmul.f32 %v1453_v51, %v1144_v3 }
 0x1d9   :  { %v1173_v0 = vmul.f32 %v1453_v51, %v1145_v4  ;;  %v1174_v52 = vmul.f32 %v1453_v51, %v1146_v5  ;;  %v1175_v6 = vmul.f32 %v1453_v51, %v1147_v7  ;;  %v1176_v19 = vmul.f32 %v1453_v51, %v1148_v46 }
 0x1da   :  { %v1177_v12 = vmul.f32 %v1453_v51, %v1149_v10  ;;  %v1178_v21 = vmul.f32 %v1453_v51, %v1150_v11  ;;  %v1179_v18 = vmul.f32 %v1453_v51, %v1151_v14  ;;  %v1180_v22 = vmul.f32 %v1453_v51, %v1152_v47 }
 0x1db   :  { %v1181_v57 = vmul.f32 %v1453_v51, %v1153_v49  ;;  %v1182_v32 = vmul.f32 %v1453_v51, %v1154_v35  ;;  %v1183_v24 = vmul.f32 %v1453_v51, %v1155_v54  ;;  %v1184_v23 = vmul.f32 %v1453_v51, %v1156_v55 }
 0x1dc   :  { %v1185_v41 = vmul.f32 %v1453_v51, %v1157_v56  ;;  %v1186_v27 = vmul.f32 %v1453_v51, %v1158_v50  ;;  %v1187_v13 = vmul.f32 %v1453_v51, %v1159_v59  ;;  %v1188_v28 = vmul.f32 %v1453_v51, %v1160_v9 }
 0x1dd   :  { %v1189_v29 = vmul.f32 %v1453_v51, %v1161_v17  ;;  %v1190_v30 = vmul.f32 %v1453_v51, %v1162_v58  ;;  %v1198_v31 = vadd.f32 %v1454_v25, %v1170_v15  ;;  %v1199_v33 = vadd.f32 %v1454_v25, %v1171_v8 }
 0x1de   :  { %v1200_v34 = vadd.f32 %v1454_v25, %v1172_v16  ;;  %v1201_v36 = vadd.f32 %v1454_v25, %v1173_v0  ;;  %v1202_v38 = vadd.f32 %v1454_v25, %v1174_v52  ;;  %v1203_v39 = vadd.f32 %v1454_v25, %v1175_v6 }
 0x1df   :  { %v1204_v20 = vadd.f32 %v1454_v25, %v1176_v19  ;;  %v1205_v26 = vadd.f32 %v1454_v25, %v1177_v12  ;;  %v1206_v40 = vadd.f32 %v1454_v25, %v1178_v21  ;;  %v1207_v43 = vadd.f32 %v1454_v25, %v1179_v18 }
 0x1e0   :  { %v1208_v44 = vadd.f32 %v1454_v25, %v1180_v22  ;;  %v1209_v45 = vadd.f32 %v1454_v25, %v1181_v57  ;;  %v1210_v37 = vadd.f32 %v1454_v25, %v1182_v32  ;;  %v1211_v42 = vadd.f32 %v1454_v25, %v1183_v24 }
 0x1e1   :  { %v1212_v48 = vadd.f32 %v1454_v25, %v1184_v23  ;;  %v1213_v53 = vadd.f32 %v1454_v25, %v1185_v41  ;;  %v1214_v60 = vadd.f32 %v1454_v25, %v1186_v27  ;;  %v1215_v61 = vadd.f32 %v1454_v25, %v1187_v13 }
 0x1e2   :  { %v1216_v62 = vadd.f32 %v1454_v25, %v1188_v28  ;;  %v1217_v63 = vadd.f32 %v1454_v25, %v1189_v29  ;;  %v1218_v1 = vadd.f32 %v1454_v25, %v1190_v30  ;;  %v1219_v2 = vmax.f32 %v1198_v31, 0.0 }
 0x1e3   :  { %v1220_v3 = vmax.f32 %v1199_v33, 0.0  ;;  %v1221_v4 = vmax.f32 %v1200_v34, 0.0  ;;  %v1222_v5 = vmax.f32 %v1201_v36, 0.0  ;;  %v1223_v7 = vmax.f32 %v1202_v38, 0.0 }
 0x1e4   :  { %v1224_v46 = vmax.f32 %v1203_v39, 0.0  ;;  %v1225_v10 = vmax.f32 %v1204_v20, 0.0  ;;  %v1226_v11 = vmax.f32 %v1205_v26, 0.0  ;;  %v1227_v14 = vmax.f32 %v1206_v40, 0.0 }
 0x1e5   :  { %v1228_v47 = vmax.f32 %v1207_v43, 0.0  ;;  %v1229_v49 = vmax.f32 %v1208_v44, 0.0  ;;  %v1230_v51 = vmax.f32 %v1209_v45, 0.0  ;;  %v1231_v35 = vmax.f32 %v1210_v37, 0.0 }
 0x1e6   :  { %v1232_v54 = vmax.f32 %v1211_v42, 0.0  ;;  %v1233_v55 = vmax.f32 %v1212_v48, 0.0  ;;  %v1234_v56 = vmax.f32 %v1213_v53, 0.0  ;;  %v1235_v50 = vmax.f32 %v1214_v60, 0.0 }
 0x1e7   :  { %v1236_v59 = vmax.f32 %v1215_v61, 0.0  ;;  %v1237_v9 = vmax.f32 %v1216_v62, 0.0  ;;  %v1238_v17 = vmax.f32 %v1217_v63, 0.0  ;;  %v1239_v58 = vmax.f32 %v1218_v1, 0.0 }
 0x1e8   :  { %v1500_v15 = vpack.c.bf16 %v1220_v3, %v1219_v2  ;;  %v1505_v8 = vpack.c.bf16 %v1222_v5, %v1221_v4  ;;  %v1510_v16 = vpack.c.bf16 %v1224_v46, %v1223_v7  ;;  %v1515_v0 = vpack.c.bf16 %v1226_v11, %v1225_v10 }
 0x1e9   :  { %v1496_v52 = vpack.c.bf16 %v1239_v58, %v1239_v58  ;;  %v1520_v6 = vpack.c.bf16 %v1228_v47, %v1227_v14  ;;  %v1525_v19 = vpack.c.bf16 %v1230_v51, %v1229_v49  ;;  %v1530_v12 = vpack.c.bf16 %v1232_v54, %v1231_v35 }
 0x1ea   :  { %1501 = vst [vmem:[%s2552_s5] sm:$0xff] %v1500_v15   ;;  %1547 = vst [vmem:[%s2552_s5 + $0x8] sm:$0xff] %v1505_v8   ;;  %v1535_v21 = vpack.c.bf16 %v1234_v56, %v1233_v55  ;;  %v1540_v18 = vpack.c.bf16 %v1236_v59, %v1235_v50  ;;  %v1545_v22 = vpack.c.bf16 %v1238_v17, %v1237_v9 }
 0x1eb   :  { %1548 = vst [vmem:[%s2552_s5 + $0x10] sm:$0xff] %v1510_v16   ;;  %1549 = vst [vmem:[%s2552_s5 + $0x18] sm:$0xff] %v1515_v0  }
 0x1ec   :  { %1550 = vst [vmem:[%s2552_s5 + $0x20] sm:$0xff] %v1520_v6   ;;  %1551 = vst [vmem:[%s2552_s5 + $0x28] sm:$0xff] %v1525_v19  }
 0x1ed   :  { %1552 = vst [vmem:[%s2552_s5 + $0x30] sm:$0xff] %v1530_v12   ;;  %1345 = vst [vmem:[%s2552_s5 + $0x50] sm:$0x1] %v1496_v52 }
 0x1ee   :  { %1553 = vst [vmem:[%s2552_s5 + $0x38] sm:$0xff] %v1535_v21   ;;  %1554 = vst [vmem:[%s2552_s5 + $0x40] sm:$0xff] %v1540_v18  }
 0x1ef   :  { %1555 = vst [vmem:[%s2552_s5 + $0x48] sm:$0xff] %v1545_v22  }

// kernel: dueling_qnet_forward.7
= control target key start
LH: loop header
LB: loop body
LE: loop exit
PB: predicated region body
PF: predicated region fallthrough
CT: control target
= control target key end

     0   :  { %s6453_s0 = inlined_call_operand.vmem [shape: bf16[2,10368], index: 0, kind: input, shape index: {}]   ;;  %s6454_s1 = inlined_call_operand.vmem [shape: s8[10368,1024], index: 1, kind: input, shape index: {}]   ;;  %s6455_s2 = inlined_call_operand.vmem [shape: f32[1,1024], index: 2, kind: input, shape index: {}]   ;;  %s6456_s3 = inlined_call_operand.vmem [shape: f32[1,1024], index: 3, kind: input, shape index: {}]   ;;  %s6457_s4 = inlined_call_operand.vmem [shape: f32[2,512,128], index: 4, kind: input, shape index: {}]   ;;  %s6458_s5 = inlined_call_operand.vmem [shape: f32[2,1,128], index: 5, kind: input, shape index: {}]   ;;  %s6459_s6 = inlined_call_operand.vmem [shape: f32[2,2,128], index: 6, kind: output, shape index: {}]  }
   0x1   :  { %6460 = sst [smem:[#allocation4_spill]] %s6453_s0 }
   0x2   :  { %s4776_s21 = smov 0   ;;  %s4778_s22 = smov 0  }
   0x3   :  { %s4780_s23 = smov 0   ;;  %s4782_s24 = smov 0  }
   0x4   :  { %s4784_s25 = smov 0   ;;  %s4786_s26 = smov 0  }
   0x5   :  { %s4788_s27 = smov 0  }
   0x6 LB: > { %s25_s28 = sadd.s32 1, %s4727_s25  ;;  %s28_s29 = sadd.s32 1, %s4731_s26  ;;  %s4735_s27 = sphi %s4788_s27, %s16_s27   ;;  %s4731_s26 = sphi %s4786_s26, %s6468_s26   ;;  %s4727_s25 = sphi %s4784_s25, %s6467_s25   ;;  %s4723_s24 = sphi %s4782_s24, %s6466_s24   ;;  %s4719_s23 = sphi %s4780_s23, %s6465_s23   ;;  %s4715_s22 = sphi %s4778_s22, %s6464_s22   ;;  %s4711_s21 = sphi %s4776_s21, %s6463_s21  }
   0x7   : > { %p26_p0 = scmp.ge.s32.totalorder %s25_s28, 3  ;;  %p70_p1 = scmp.ne.s32.totalorder %s4715_s22, %s4711_s21 }
   0x8   : > { %p71_p2 = scmp.eq.s32.totalorder %s4735_s27, 0  ;;  %s63_s9 = sadd.s32 1, %s4715_s22 }
   0x9   : > { %s6470_s28 = smov (%p26_p0, %s25_s28), 0  ;;  %s6472_s29 = smov (!%p26_p0, %s28_s29), %s4731_s26 }
   0xa   : > { %p72_p3 = por %p71_p2, %p70_p1  ;;  %p30_p4 = scmp.ge.s32.totalorder %s6472_s29, 2 }
   0xb   : > { %s58_s30 = ssub.s32 %s4727_s25, %s6470_s28  ;;  %p4360_p6 = scmp.ge.s32.totalorder %s4735_s27, 6 }
   0xc   : > { %s6474_s29 = smov (%p30_p4, %s6472_s29), 0 }
   0xd   : > { %s59_s7 = ssub.s32 %s4731_s26, %s6474_s29  ;;  %226 = sbr.rel (%p4360_p6) target bundleno = 244 (0xf4), region = 16 }
   0xe   : > { %s60_s8 = sor.u32 %s59_s7, %s58_s30 }
   0xf   : > { %p61_p5 = scmp.eq.s32.totalorder %s60_s8, 0 }
  0x11   : > { %s4827_s10 = scalar_select %p61_p5, %s4715_s22, %s63_s9  }
  0x14   : > { %237 = sbr.rel (!%p72_p3) target bundleno = 244 (0xf4), region = 24  ;;  %s239_s11 = sand.u32 (%p72_p3), 1, %s4715_s22  }
  0x15   : > { %s4616_s12 = smul.u32 (%p72_p3), 3456, %s239_s11  ;;  %s4361_s13 = sshll.u32 (%p72_p3), %s4731_s26, 2 }
  0x16   : > { %s4376_s14 = smul.u32 (%p72_p3), 864, %s4727_s25 }
  0x17   : > { %s4841_s20 = scalar_lea.vmem (%p72_p3), [#allocation3], %s4616_s12 }
  0x18   : > { %s245_s15 = sadd.s32 (%p72_p3), %s4376_s14, %s4361_s13 }
  0x19   : > { %s4363_s16 = sshll.u32 (%p72_p3), %s245_s15, 3 }
  0x1a   : > { %s4836_s19 = scalar_lea.vmem (%p72_p3), %s6454_s1, %s4363_s16 }
  0x1b   : > { %v260_v0 = vld [vmem:[%s4836_s19] sm:$0xff]  ;;  %v262_v1 = vld [vmem:[%s4836_s19 + $0x8] sm:$0xff]  ;;  %v264_v2 = vld [vmem:[%s4836_s19 + $0x10] sm:$0xff] }
  0x1c   : > { %261 = vst [vmem:[%s4841_s20] sm:$0xff] %v260_v0  ;;  %263 = vst [vmem:[%s4841_s20 + $0x8] sm:$0xff] %v262_v1  ;;  %v266_v3 = vld [vmem:[%s4836_s19 + $0x18] sm:$0xff]  ;;  %v268_v4 = vld [vmem:[%s4836_s19 + $0x40] sm:$0xff] }
  0x1d   : > { %265 = vst [vmem:[%s4841_s20 + $0x10] sm:$0xff] %v264_v2  ;;  %v270_v5 = vld [vmem:[%s4836_s19 + $0x48] sm:$0xff]  ;;  %267 = vst [vmem:[%s4841_s20 + $0x18] sm:$0xff] %v266_v3  ;;  %v272_v6 = vld [vmem:[%s4836_s19 + $0x50] sm:$0xff] }
  0x1e   : > { %269 = vst [vmem:[%s4841_s20 + $0x20] sm:$0xff] %v268_v4  ;;  %271 = vst [vmem:[%s4841_s20 + $0x28] sm:$0xff] %v270_v5  ;;  %v274_v7 = vld [vmem:[%s4836_s19 + $0x58] sm:$0xff]  ;;  %v276_v8 = vld [vmem:[%s4836_s19 + $0x80] sm:$0xff] }
  0x1f   : > { %273 = vst [vmem:[%s4841_s20 + $0x30] sm:$0xff] %v272_v6  ;;  %275 = vst [vmem:[%s4841_s20 + $0x38] sm:$0xff] %v274_v7  ;;  %v278_v9 = vld [vmem:[%s4836_s19 + $0x88] sm:$0xff]  ;;  %v280_v10 = vld [vmem:[%s4836_s19 + $0x90] sm:$0xff] }
  0x20   : > { %277 = vst [vmem:[%s4841_s20 + $0x40] sm:$0xff] %v276_v8  ;;  %v282_v11 = vld [vmem:[%s4836_s19 + $0x98] sm:$0xff]  ;;  %279 = vst [vmem:[%s4841_s20 + $0x48] sm:$0xff] %v278_v9  ;;  %v284_v12 = vld [vmem:[%s4836_s19 + $0xc0] sm:$0xff] }
  0x21   : > { %281 = vst [vmem:[%s4841_s20 + $0x50] sm:$0xff] %v280_v10  ;;  %283 = vst [vmem:[%s4841_s20 + $0x58] sm:$0xff] %v282_v11  ;;  %v286_v13 = vld [vmem:[%s4836_s19 + $0xc8] sm:$0xff]  ;;  %v288_v14 = vld [vmem:[%s4836_s19 + $0xd0] sm:$0xff] }
  0x22   : > { %285 = vst [vmem:[%s4841_s20 + $0x60] sm:$0xff] %v284_v12  ;;  %287 = vst [vmem:[%s4841_s20 + $0x68] sm:$0xff] %v286_v13  ;;  %v290_v15 = vld [vmem:[%s4836_s19 + $0xd8] sm:$0xff]  ;;  %v292_v16 = vld [vmem:[%s4836_s19 + $0x100] sm:$0xff] }
  0x23   : > { %289 = vst [vmem:[%s4841_s20 + $0x70] sm:$0xff] %v288_v14  ;;  %v294_v17 = vld [vmem:[%s4836_s19 + $0x108] sm:$0xff]  ;;  %291 = vst [vmem:[%s4841_s20 + $0x78] sm:$0xff] %v290_v15  ;;  %v296_v18 = vld [vmem:[%s4836_s19 + $0x110] sm:$0xff] }
  0x24   : > { %293 = vst [vmem:[%s4841_s20 + $0x80] sm:$0xff] %v292_v16  ;;  %295 = vst [vmem:[%s4841_s20 + $0x88] sm:$0xff] %v294_v17  ;;  %v298_v19 = vld [vmem:[%s4836_s19 + $0x118] sm:$0xff]  ;;  %v300_v20 = vld [vmem:[%s4836_s19 + $0x140] sm:$0xff] }
  0x25   : > { %297 = vst [vmem:[%s4841_s20 + $0x90] sm:$0xff] %v296_v18  ;;  %299 = vst [vmem:[%s4841_s20 + $0x98] sm:$0xff] %v298_v19  ;;  %v302_v21 = vld [vmem:[%s4836_s19 + $0x148] sm:$0xff]  ;;  %v304_v22 = vld [vmem:[%s4836_s19 + $0x150] sm:$0xff] }
  0x26   : > { %301 = vst [vmem:[%s4841_s20 + $0xa0] sm:$0xff] %v300_v20  ;;  %v306_v23 = vld [vmem:[%s4836_s19 + $0x158] sm:$0xff]  ;;  %303 = vst [vmem:[%s4841_s20 + $0xa8] sm:$0xff] %v302_v21  ;;  %v308_v24 = vld [vmem:[%s4836_s19 + $0x180] sm:$0xff] }
  0x27   : > { %305 = vst [vmem:[%s4841_s20 + $0xb0] sm:$0xff] %v304_v22  ;;  %307 = vst [vmem:[%s4841_s20 + $0xb8] sm:$0xff] %v306_v23  ;;  %v310_v25 = vld [vmem:[%s4836_s19 + $0x188] sm:$0xff]  ;;  %v312_v26 = vld [vmem:[%s4836_s19 + $0x190] sm:$0xff] }
  0x28   : > { %309 = vst [vmem:[%s4841_s20 + $0xc0] sm:$0xff] %v308_v24  ;;  %311 = vst [vmem:[%s4841_s20 + $0xc8] sm:$0xff] %v310_v25  ;;  %v314_v27 = vld [vmem:[%s4836_s19 + $0x198] sm:$0xff]  ;;  %v316_v28 = vld [vmem:[%s4836_s19 + $0x1c0] sm:$0xff] }
  0x29   : > { %313 = vst [vmem:[%s4841_s20 + $0xd0] sm:$0xff] %v312_v26  ;;  %v318_v29 = vld [vmem:[%s4836_s19 + $0x1c8] sm:$0xff]  ;;  %315 = vst [vmem:[%s4841_s20 + $0xd8] sm:$0xff] %v314_v27  ;;  %v320_v30 = vld [vmem:[%s4836_s19 + $0x1d0] sm:$0xff] }
  0x2a   : > { %317 = vst [vmem:[%s4841_s20 + $0xe0] sm:$0xff] %v316_v28  ;;  %319 = vst [vmem:[%s4841_s20 + $0xe8] sm:$0xff] %v318_v29  ;;  %v322_v31 = vld [vmem:[%s4836_s19 + $0x1d8] sm:$0xff]  ;;  %v324_v32 = vld [vmem:[%s4836_s19 + $0x200] sm:$0xff] }
  0x2b   : > { %321 = vst [vmem:[%s4841_s20 + $0xf0] sm:$0xff] %v320_v30  ;;  %323 = vst [vmem:[%s4841_s20 + $0xf8] sm:$0xff] %v322_v31  ;;  %v326_v33 = vld [vmem:[%s4836_s19 + $0x208] sm:$0xff]  ;;  %v328_v34 = vld [vmem:[%s4836_s19 + $0x210] sm:$0xff] }
  0x2c   : > { %325 = vst [vmem:[%s4841_s20 + $0x100] sm:$0xff] %v324_v32  ;;  %v330_v35 = vld [vmem:[%s4836_s19 + $0x218] sm:$0xff]  ;;  %327 = vst [vmem:[%s4841_s20 + $0x108] sm:$0xff] %v326_v33  ;;  %v332_v36 = vld [vmem:[%s4836_s19 + $0x240] sm:$0xff] }
  0x2d   : > { %329 = vst [vmem:[%s4841_s20 + $0x110] sm:$0xff] %v328_v34  ;;  %331 = vst [vmem:[%s4841_s20 + $0x118] sm:$0xff] %v330_v35  ;;  %v334_v37 = vld [vmem:[%s4836_s19 + $0x248] sm:$0xff]  ;;  %v336_v38 = vld [vmem:[%s4836_s19 + $0x250] sm:$0xff] }
  0x2e   : > { %333 = vst [vmem:[%s4841_s20 + $0x120] sm:$0xff] %v332_v36  ;;  %335 = vst [vmem:[%s4841_s20 + $0x128] sm:$0xff] %v334_v37  ;;  %v338_v39 = vld [vmem:[%s4836_s19 + $0x258] sm:$0xff]  ;;  %v340_v40 = vld [vmem:[%s4836_s19 + $0x280] sm:$0xff] }
  0x2f   : > { %337 = vst [vmem:[%s4841_s20 + $0x130] sm:$0xff] %v336_v38  ;;  %v342_v41 = vld [vmem:[%s4836_s19 + $0x288] sm:$0xff]  ;;  %339 = vst [vmem:[%s4841_s20 + $0x138] sm:$0xff] %v338_v39  ;;  %v344_v42 = vld [vmem:[%s4836_s19 + $0x290] sm:$0xff] }
  0x30   : > { %341 = vst [vmem:[%s4841_s20 + $0x140] sm:$0xff] %v340_v40  ;;  %343 = vst [vmem:[%s4841_s20 + $0x148] sm:$0xff] %v342_v41  ;;  %v346_v43 = vld [vmem:[%s4836_s19 + $0x298] sm:$0xff]  ;;  %v348_v44 = vld [vmem:[%s4836_s19 + $0x2c0] sm:$0xff] }
  0x31   : > { %345 = vst [vmem:[%s4841_s20 + $0x150] sm:$0xff] %v344_v42  ;;  %347 = vst [vmem:[%s4841_s20 + $0x158] sm:$0xff] %v346_v43  ;;  %v350_v45 = vld [vmem:[%s4836_s19 + $0x2c8] sm:$0xff]  ;;  %v352_v46 = vld [vmem:[%s4836_s19 + $0x2d0] sm:$0xff] }
  0x32   : > { %349 = vst [vmem:[%s4841_s20 + $0x160] sm:$0xff] %v348_v44  ;;  %v354_v47 = vld [vmem:[%s4836_s19 + $0x2d8] sm:$0xff]  ;;  %351 = vst [vmem:[%s4841_s20 + $0x168] sm:$0xff] %v350_v45  ;;  %v356_v48 = vld [vmem:[%s4836_s19 + $0x300] sm:$0xff] }
  0x33   : > { %353 = vst [vmem:[%s4841_s20 + $0x170] sm:$0xff] %v352_v46  ;;  %355 = vst [vmem:[%s4841_s20 + $0x178] sm:$0xff] %v354_v47  ;;  %v358_v49 = vld [vmem:[%s4836_s19 + $0x308] sm:$0xff]  ;;  %v360_v50 = vld [vmem:[%s4836_s19 + $0x310] sm:$0xff] }
  0x34   : > { %357 = vst [vmem:[%s4841_s20 + $0x180] sm:$0xff] %v356_v48  ;;  %359 = vst [vmem:[%s4841_s20 + $0x188] sm:$0xff] %v358_v49  ;;  %v362_v51 = vld [vmem:[%s4836_s19 + $0x318] sm:$0xff]  ;;  %v364_v52 = vld [vmem:[%s4836_s19 + $0x340] sm:$0xff] }
  0x35   : > { %361 = vst [vmem:[%s4841_s20 + $0x190] sm:$0xff] %v360_v50  ;;  %v366_v53 = vld [vmem:[%s4836_s19 + $0x348] sm:$0xff]  ;;  %363 = vst [vmem:[%s4841_s20 + $0x198] sm:$0xff] %v362_v51  ;;  %v368_v54 = vld [vmem:[%s4836_s19 + $0x350] sm:$0xff] }
  0x36   : > { %365 = vst [vmem:[%s4841_s20 + $0x1a0] sm:$0xff] %v364_v52  ;;  %367 = vst [vmem:[%s4841_s20 + $0x1a8] sm:$0xff] %v366_v53  ;;  %v370_v55 = vld [vmem:[%s4836_s19 + $0x358] sm:$0xff]  ;;  %v372_v56 = vld [vmem:[%s4836_s19 + $0x380] sm:$0xff] }
  0x37   : > { %369 = vst [vmem:[%s4841_s20 + $0x1b0] sm:$0xff] %v368_v54  ;;  %371 = vst [vmem:[%s4841_s20 + $0x1b8] sm:$0xff] %v370_v55  ;;  %v374_v57 = vld [vmem:[%s4836_s19 + $0x388] sm:$0xff]  ;;  %v376_v58 = vld [vmem:[%s4836_s19 + $0x390] sm:$0xff] }
  0x38   : > { %373 = vst [vmem:[%s4841_s20 + $0x1c0] sm:$0xff] %v372_v56  ;;  %v378_v59 = vld [vmem:[%s4836_s19 + $0x398] sm:$0xff]  ;;  %375 = vst [vmem:[%s4841_s20 + $0x1c8] sm:$0xff] %v374_v57  ;;  %v380_v60 = vld [vmem:[%s4836_s19 + $0x3c0] sm:$0xff] }
  0x39   : > { %377 = vst [vmem:[%s4841_s20 + $0x1d0] sm:$0xff] %v376_v58  ;;  %379 = vst [vmem:[%s4841_s20 + $0x1d8] sm:$0xff] %v378_v59  ;;  %v382_v61 = vld [vmem:[%s4836_s19 + $0x3c8] sm:$0xff]  ;;  %v384_v62 = vld [vmem:[%s4836_s19 + $0x3d0] sm:$0xff] }
  0x3a   : > { %381 = vst [vmem:[%s4841_s20 + $0x1e0] sm:$0xff] %v380_v60  ;;  %383 = vst [vmem:[%s4841_s20 + $0x1e8] sm:$0xff] %v382_v61  ;;  %v386_v63 = vld [vmem:[%s4836_s19 + $0x3d8] sm:$0xff]  ;;  %v388_v0 = vld [vmem:[%s4836_s19 + $0x400] sm:$0xff] }
  0x3b   : > { %385 = vst [vmem:[%s4841_s20 + $0x1f0] sm:$0xff] %v384_v62  ;;  %v390_v1 = vld [vmem:[%s4836_s19 + $0x408] sm:$0xff]  ;;  %387 = vst [vmem:[%s4841_s20 + $0x1f8] sm:$0xff] %v386_v63  ;;  %v392_v2 = vld [vmem:[%s4836_s19 + $0x410] sm:$0xff] }
  0x3c   : > { %389 = vst [vmem:[%s4841_s20 + $0x200] sm:$0xff] %v388_v0  ;;  %391 = vst [vmem:[%s4841_s20 + $0x208] sm:$0xff] %v390_v1  ;;  %v394_v3 = vld [vmem:[%s4836_s19 + $0x418] sm:$0xff]  ;;  %v396_v4 = vld [vmem:[%s4836_s19 + $0x440] sm:$0xff] }
  0x3d   : > { %393 = vst [vmem:[%s4841_s20 + $0x210] sm:$0xff] %v392_v2  ;;  %395 = vst [vmem:[%s4841_s20 + $0x218] sm:$0xff] %v394_v3  ;;  %v398_v5 = vld [vmem:[%s4836_s19 + $0x448] sm:$0xff]  ;;  %v400_v6 = vld [vmem:[%s4836_s19 + $0x450] sm:$0xff] }
  0x3e   : > { %397 = vst [vmem:[%s4841_s20 + $0x220] sm:$0xff] %v396_v4  ;;  %v402_v7 = vld [vmem:[%s4836_s19 + $0x458] sm:$0xff]  ;;  %399 = vst [vmem:[%s4841_s20 + $0x228] sm:$0xff] %v398_v5  ;;  %v404_v8 = vld [vmem:[%s4836_s19 + $0x480] sm:$0xff] }
  0x3f   : > { %401 = vst [vmem:[%s4841_s20 + $0x230] sm:$0xff] %v400_v6  ;;  %403 = vst [vmem:[%s4841_s20 + $0x238] sm:$0xff] %v402_v7  ;;  %v406_v9 = vld [vmem:[%s4836_s19 + $0x488] sm:$0xff]  ;;  %v408_v10 = vld [vmem:[%s4836_s19 + $0x490] sm:$0xff] }
  0x40   : > { %405 = vst [vmem:[%s4841_s20 + $0x240] sm:$0xff] %v404_v8  ;;  %407 = vst [vmem:[%s4841_s20 + $0x248] sm:$0xff] %v406_v9  ;;  %v410_v11 = vld [vmem:[%s4836_s19 + $0x498] sm:$0xff]  ;;  %v412_v12 = vld [vmem:[%s4836_s19 + $0x4c0] sm:$0xff] }
  0x41   : > { %409 = vst [vmem:[%s4841_s20 + $0x250] sm:$0xff] %v408_v10  ;;  %v414_v13 = vld [vmem:[%s4836_s19 + $0x4c8] sm:$0xff]  ;;  %411 = vst [vmem:[%s4841_s20 + $0x258] sm:$0xff] %v410_v11  ;;  %v416_v14 = vld [vmem:[%s4836_s19 + $0x4d0] sm:$0xff] }
  0x42   : > { %413 = vst [vmem:[%s4841_s20 + $0x260] sm:$0xff] %v412_v12  ;;  %415 = vst [vmem:[%s4841_s20 + $0x268] sm:$0xff] %v414_v13  ;;  %v418_v15 = vld [vmem:[%s4836_s19 + $0x4d8] sm:$0xff]  ;;  %v420_v16 = vld [vmem:[%s4836_s19 + $0x500] sm:$0xff] }
  0x43   : > { %417 = vst [vmem:[%s4841_s20 + $0x270] sm:$0xff] %v416_v14  ;;  %419 = vst [vmem:[%s4841_s20 + $0x278] sm:$0xff] %v418_v15  ;;  %v422_v17 = vld [vmem:[%s4836_s19 + $0x508] sm:$0xff]  ;;  %v424_v18 = vld [vmem:[%s4836_s19 + $0x510] sm:$0xff] }
  0x44   : > { %421 = vst [vmem:[%s4841_s20 + $0x280] sm:$0xff] %v420_v16  ;;  %v426_v19 = vld [vmem:[%s4836_s19 + $0x518] sm:$0xff]  ;;  %423 = vst [vmem:[%s4841_s20 + $0x288] sm:$0xff] %v422_v17  ;;  %v428_v20 = vld [vmem:[%s4836_s19 + $0x540] sm:$0xff] }
  0x45   : > { %425 = vst [vmem:[%s4841_s20 + $0x290] sm:$0xff] %v424_v18  ;;  %427 = vst [vmem:[%s4841_s20 + $0x298] sm:$0xff] %v426_v19  ;;  %v430_v21 = vld [vmem:[%s4836_s19 + $0x548] sm:$0xff]  ;;  %v432_v22 = vld [vmem:[%s4836_s19 + $0x550] sm:$0xff] }
  0x46   : > { %429 = vst [vmem:[%s4841_s20 + $0x2a0] sm:$0xff] %v428_v20  ;;  %431 = vst [vmem:[%s4841_s20 + $0x2a8] sm:$0xff] %v430_v21  ;;  %v434_v23 = vld [vmem:[%s4836_s19 + $0x558] sm:$0xff]  ;;  %v436_v24 = vld [vmem:[%s4836_s19 + $0x580] sm:$0xff] }
  0x47   : > { %433 = vst [vmem:[%s4841_s20 + $0x2b0] sm:$0xff] %v432_v22  ;;  %v438_v25 = vld [vmem:[%s4836_s19 + $0x588] sm:$0xff]  ;;  %435 = vst [vmem:[%s4841_s20 + $0x2b8] sm:$0xff] %v434_v23  ;;  %v440_v26 = vld [vmem:[%s4836_s19 + $0x590] sm:$0xff] }
  0x48   : > { %437 = vst [vmem:[%s4841_s20 + $0x2c0] sm:$0xff] %v436_v24  ;;  %439 = vst [vmem:[%s4841_s20 + $0x2c8] sm:$0xff] %v438_v25  ;;  %v442_v27 = vld [vmem:[%s4836_s19 + $0x598] sm:$0xff]  ;;  %v444_v28 = vld [vmem:[%s4836_s19 + $0x5c0] sm:$0xff] }
  0x49   : > { %441 = vst [vmem:[%s4841_s20 + $0x2d0] sm:$0xff] %v440_v26  ;;  %443 = vst [vmem:[%s4841_s20 + $0x2d8] sm:$0xff] %v442_v27  ;;  %v446_v29 = vld [vmem:[%s4836_s19 + $0x5c8] sm:$0xff]  ;;  %v448_v30 = vld [vmem:[%s4836_s19 + $0x5d0] sm:$0xff] }
  0x4a   : > { %445 = vst [vmem:[%s4841_s20 + $0x2e0] sm:$0xff] %v444_v28  ;;  %v450_v31 = vld [vmem:[%s4836_s19 + $0x5d8] sm:$0xff]  ;;  %447 = vst [vmem:[%s4841_s20 + $0x2e8] sm:$0xff] %v446_v29  ;;  %v452_v32 = vld [vmem:[%s4836_s19 + $0x600] sm:$0xff] }
  0x4b   : > { %449 = vst [vmem:[%s4841_s20 + $0x2f0] sm:$0xff] %v448_v30  ;;  %451 = vst [vmem:[%s4841_s20 + $0x2f8] sm:$0xff] %v450_v31  ;;  %v454_v33 = vld [vmem:[%s4836_s19 + $0x608] sm:$0xff]  ;;  %v456_v34 = vld [vmem:[%s4836_s19 + $0x610] sm:$0xff] }
  0x4c   : > { %453 = vst [vmem:[%s4841_s20 + $0x300] sm:$0xff] %v452_v32  ;;  %455 = vst [vmem:[%s4841_s20 + $0x308] sm:$0xff] %v454_v33  ;;  %v458_v35 = vld [vmem:[%s4836_s19 + $0x618] sm:$0xff]  ;;  %v460_v36 = vld [vmem:[%s4836_s19 + $0x640] sm:$0xff] }
  0x4d   : > { %457 = vst [vmem:[%s4841_s20 + $0x310] sm:$0xff] %v456_v34  ;;  %v462_v37 = vld [vmem:[%s4836_s19 + $0x648] sm:$0xff]  ;;  %459 = vst [vmem:[%s4841_s20 + $0x318] sm:$0xff] %v458_v35  ;;  %v464_v38 = vld [vmem:[%s4836_s19 + $0x650] sm:$0xff] }
  0x4e   : > { %461 = vst [vmem:[%s4841_s20 + $0x320] sm:$0xff] %v460_v36  ;;  %463 = vst [vmem:[%s4841_s20 + $0x328] sm:$0xff] %v462_v37  ;;  %v466_v39 = vld [vmem:[%s4836_s19 + $0x658] sm:$0xff]  ;;  %v468_v40 = vld [vmem:[%s4836_s19 + $0x680] sm:$0xff] }
  0x4f   : > { %465 = vst [vmem:[%s4841_s20 + $0x330] sm:$0xff] %v464_v38  ;;  %467 = vst [vmem:[%s4841_s20 + $0x338] sm:$0xff] %v466_v39  ;;  %v470_v41 = vld [vmem:[%s4836_s19 + $0x688] sm:$0xff]  ;;  %v472_v42 = vld [vmem:[%s4836_s19 + $0x690] sm:$0xff] }
  0x50   : > { %469 = vst [vmem:[%s4841_s20 + $0x340] sm:$0xff] %v468_v40  ;;  %v474_v43 = vld [vmem:[%s4836_s19 + $0x698] sm:$0xff]  ;;  %471 = vst [vmem:[%s4841_s20 + $0x348] sm:$0xff] %v470_v41  ;;  %v476_v44 = vld [vmem:[%s4836_s19 + $0x6c0] sm:$0xff] }
  0x51   : > { %473 = vst [vmem:[%s4841_s20 + $0x350] sm:$0xff] %v472_v42  ;;  %475 = vst [vmem:[%s4841_s20 + $0x358] sm:$0xff] %v474_v43  ;;  %v478_v45 = vld [vmem:[%s4836_s19 + $0x6c8] sm:$0xff]  ;;  %v480_v46 = vld [vmem:[%s4836_s19 + $0x6d0] sm:$0xff] }
  0x52   : > { %477 = vst [vmem:[%s4841_s20 + $0x360] sm:$0xff] %v476_v44  ;;  %479 = vst [vmem:[%s4841_s20 + $0x368] sm:$0xff] %v478_v45  ;;  %v482_v47 = vld [vmem:[%s4836_s19 + $0x6d8] sm:$0xff]  ;;  %v484_v48 = vld [vmem:[%s4836_s19 + $0x700] sm:$0xff] }
  0x53   : > { %481 = vst [vmem:[%s4841_s20 + $0x370] sm:$0xff] %v480_v46  ;;  %v486_v49 = vld [vmem:[%s4836_s19 + $0x708] sm:$0xff]  ;;  %483 = vst [vmem:[%s4841_s20 + $0x378] sm:$0xff] %v482_v47  ;;  %v488_v50 = vld [vmem:[%s4836_s19 + $0x710] sm:$0xff] }
  0x54   : > { %485 = vst [vmem:[%s4841_s20 + $0x380] sm:$0xff] %v484_v48  ;;  %487 = vst [vmem:[%s4841_s20 + $0x388] sm:$0xff] %v486_v49  ;;  %v490_v51 = vld [vmem:[%s4836_s19 + $0x718] sm:$0xff]  ;;  %v492_v52 = vld [vmem:[%s4836_s19 + $0x740] sm:$0xff] }
  0x55   : > { %489 = vst [vmem:[%s4841_s20 + $0x390] sm:$0xff] %v488_v50  ;;  %491 = vst [vmem:[%s4841_s20 + $0x398] sm:$0xff] %v490_v51  ;;  %v494_v53 = vld [vmem:[%s4836_s19 + $0x748] sm:$0xff]  ;;  %v496_v54 = vld [vmem:[%s4836_s19 + $0x750] sm:$0xff] }
  0x56   : > { %493 = vst [vmem:[%s4841_s20 + $0x3a0] sm:$0xff] %v492_v52  ;;  %v498_v55 = vld [vmem:[%s4836_s19 + $0x758] sm:$0xff]  ;;  %495 = vst [vmem:[%s4841_s20 + $0x3a8] sm:$0xff] %v494_v53  ;;  %v500_v56 = vld [vmem:[%s4836_s19 + $0x780] sm:$0xff] }
  0x57   : > { %497 = vst [vmem:[%s4841_s20 + $0x3b0] sm:$0xff] %v496_v54  ;;  %499 = vst [vmem:[%s4841_s20 + $0x3b8] sm:$0xff] %v498_v55  ;;  %v502_v57 = vld [vmem:[%s4836_s19 + $0x788] sm:$0xff]  ;;  %v504_v58 = vld [vmem:[%s4836_s19 + $0x790] sm:$0xff] }
  0x58   : > { %501 = vst [vmem:[%s4841_s20 + $0x3c0] sm:$0xff] %v500_v56  ;;  %503 = vst [vmem:[%s4841_s20 + $0x3c8] sm:$0xff] %v502_v57  ;;  %v506_v59 = vld [vmem:[%s4836_s19 + $0x798] sm:$0xff]  ;;  %v508_v60 = vld [vmem:[%s4836_s19 + $0x7c0] sm:$0xff] }
  0x59   : > { %505 = vst [vmem:[%s4841_s20 + $0x3d0] sm:$0xff] %v504_v58  ;;  %v510_v61 = vld [vmem:[%s4836_s19 + $0x7c8] sm:$0xff]  ;;  %507 = vst [vmem:[%s4841_s20 + $0x3d8] sm:$0xff] %v506_v59  ;;  %v512_v62 = vld [vmem:[%s4836_s19 + $0x7d0] sm:$0xff] }
  0x5a   : > { %509 = vst [vmem:[%s4841_s20 + $0x3e0] sm:$0xff] %v508_v60  ;;  %511 = vst [vmem:[%s4841_s20 + $0x3e8] sm:$0xff] %v510_v61  ;;  %v514_v63 = vld [vmem:[%s4836_s19 + $0x7d8] sm:$0xff]  ;;  %v516_v0 = vld [vmem:[%s4836_s19 + $0x800] sm:$0xff] }
  0x5b   : > { %513 = vst [vmem:[%s4841_s20 + $0x3f0] sm:$0xff] %v512_v62  ;;  %515 = vst [vmem:[%s4841_s20 + $0x3f8] sm:$0xff] %v514_v63  ;;  %v518_v1 = vld [vmem:[%s4836_s19 + $0x808] sm:$0xff]  ;;  %v520_v2 = vld [vmem:[%s4836_s19 + $0x810] sm:$0xff] }
  0x5c   : > { %517 = vst [vmem:[%s4841_s20 + $0x400] sm:$0xff] %v516_v0  ;;  %v522_v3 = vld [vmem:[%s4836_s19 + $0x818] sm:$0xff]  ;;  %519 = vst [vmem:[%s4841_s20 + $0x408] sm:$0xff] %v518_v1  ;;  %v524_v4 = vld [vmem:[%s4836_s19 + $0x840] sm:$0xff] }
  0x5d   : > { %521 = vst [vmem:[%s4841_s20 + $0x410] sm:$0xff] %v520_v2  ;;  %523 = vst [vmem:[%s4841_s20 + $0x418] sm:$0xff] %v522_v3  ;;  %v526_v5 = vld [vmem:[%s4836_s19 + $0x848] sm:$0xff]  ;;  %v528_v6 = vld [vmem:[%s4836_s19 + $0x850] sm:$0xff] }
  0x5e   : > { %525 = vst [vmem:[%s4841_s20 + $0x420] sm:$0xff] %v524_v4  ;;  %527 = vst [vmem:[%s4841_s20 + $0x428] sm:$0xff] %v526_v5  ;;  %v530_v7 = vld [vmem:[%s4836_s19 + $0x858] sm:$0xff]  ;;  %v532_v8 = vld [vmem:[%s4836_s19 + $0x880] sm:$0xff] }
  0x5f   : > { %529 = vst [vmem:[%s4841_s20 + $0x430] sm:$0xff] %v528_v6  ;;  %v534_v9 = vld [vmem:[%s4836_s19 + $0x888] sm:$0xff]  ;;  %531 = vst [vmem:[%s4841_s20 + $0x438] sm:$0xff] %v530_v7  ;;  %v536_v10 = vld [vmem:[%s4836_s19 + $0x890] sm:$0xff] }
  0x60   : > { %533 = vst [vmem:[%s4841_s20 + $0x440] sm:$0xff] %v532_v8  ;;  %535 = vst [vmem:[%s4841_s20 + $0x448] sm:$0xff] %v534_v9  ;;  %v538_v11 = vld [vmem:[%s4836_s19 + $0x898] sm:$0xff]  ;;  %v540_v12 = vld [vmem:[%s4836_s19 + $0x8c0] sm:$0xff] }
  0x61   : > { %537 = vst [vmem:[%s4841_s20 + $0x450] sm:$0xff] %v536_v10  ;;  %539 = vst [vmem:[%s4841_s20 + $0x458] sm:$0xff] %v538_v11  ;;  %v542_v13 = vld [vmem:[%s4836_s19 + $0x8c8] sm:$0xff]  ;;  %v544_v14 = vld [vmem:[%s4836_s19 + $0x8d0] sm:$0xff] }
  0x62   : > { %541 = vst [vmem:[%s4841_s20 + $0x460] sm:$0xff] %v540_v12  ;;  %v546_v15 = vld [vmem:[%s4836_s19 + $0x8d8] sm:$0xff]  ;;  %543 = vst [vmem:[%s4841_s20 + $0x468] sm:$0xff] %v542_v13  ;;  %v548_v16 = vld [vmem:[%s4836_s19 + $0x900] sm:$0xff] }
  0x63   : > { %545 = vst [vmem:[%s4841_s20 + $0x470] sm:$0xff] %v544_v14  ;;  %547 = vst [vmem:[%s4841_s20 + $0x478] sm:$0xff] %v546_v15  ;;  %v550_v17 = vld [vmem:[%s4836_s19 + $0x908] sm:$0xff]  ;;  %v552_v18 = vld [vmem:[%s4836_s19 + $0x910] sm:$0xff] }
  0x64   : > { %549 = vst [vmem:[%s4841_s20 + $0x480] sm:$0xff] %v548_v16  ;;  %551 = vst [vmem:[%s4841_s20 + $0x488] sm:$0xff] %v550_v17  ;;  %v554_v19 = vld [vmem:[%s4836_s19 + $0x918] sm:$0xff]  ;;  %v556_v20 = vld [vmem:[%s4836_s19 + $0x940] sm:$0xff] }
  0x65   : > { %553 = vst [vmem:[%s4841_s20 + $0x490] sm:$0xff] %v552_v18  ;;  %v558_v21 = vld [vmem:[%s4836_s19 + $0x948] sm:$0xff]  ;;  %555 = vst [vmem:[%s4841_s20 + $0x498] sm:$0xff] %v554_v19  ;;  %v560_v22 = vld [vmem:[%s4836_s19 + $0x950] sm:$0xff] }
  0x66   : > { %557 = vst [vmem:[%s4841_s20 + $0x4a0] sm:$0xff] %v556_v20  ;;  %559 = vst [vmem:[%s4841_s20 + $0x4a8] sm:$0xff] %v558_v21  ;;  %v562_v23 = vld [vmem:[%s4836_s19 + $0x958] sm:$0xff]  ;;  %v564_v24 = vld [vmem:[%s4836_s19 + $0x980] sm:$0xff] }
  0x67   : > { %561 = vst [vmem:[%s4841_s20 + $0x4b0] sm:$0xff] %v560_v22  ;;  %563 = vst [vmem:[%s4841_s20 + $0x4b8] sm:$0xff] %v562_v23  ;;  %v566_v25 = vld [vmem:[%s4836_s19 + $0x988] sm:$0xff]  ;;  %v568_v26 = vld [vmem:[%s4836_s19 + $0x990] sm:$0xff] }
  0x68   : > { %565 = vst [vmem:[%s4841_s20 + $0x4c0] sm:$0xff] %v564_v24  ;;  %v570_v27 = vld [vmem:[%s4836_s19 + $0x998] sm:$0xff]  ;;  %567 = vst [vmem:[%s4841_s20 + $0x4c8] sm:$0xff] %v566_v25  ;;  %v572_v28 = vld [vmem:[%s4836_s19 + $0x9c0] sm:$0xff] }
  0x69   : > { %569 = vst [vmem:[%s4841_s20 + $0x4d0] sm:$0xff] %v568_v26  ;;  %571 = vst [vmem:[%s4841_s20 + $0x4d8] sm:$0xff] %v570_v27  ;;  %v574_v29 = vld [vmem:[%s4836_s19 + $0x9c8] sm:$0xff]  ;;  %v576_v30 = vld [vmem:[%s4836_s19 + $0x9d0] sm:$0xff] }
  0x6a   : > { %573 = vst [vmem:[%s4841_s20 + $0x4e0] sm:$0xff] %v572_v28  ;;  %575 = vst [vmem:[%s4841_s20 + $0x4e8] sm:$0xff] %v574_v29  ;;  %v578_v31 = vld [vmem:[%s4836_s19 + $0x9d8] sm:$0xff]  ;;  %v580_v32 = vld [vmem:[%s4836_s19 + $0xa00] sm:$0xff] }
  0x6b   : > { %577 = vst [vmem:[%s4841_s20 + $0x4f0] sm:$0xff] %v576_v30  ;;  %v582_v33 = vld [vmem:[%s4836_s19 + $0xa08] sm:$0xff]  ;;  %579 = vst [vmem:[%s4841_s20 + $0x4f8] sm:$0xff] %v578_v31  ;;  %v584_v34 = vld [vmem:[%s4836_s19 + $0xa10] sm:$0xff] }
  0x6c   : > { %581 = vst [vmem:[%s4841_s20 + $0x500] sm:$0xff] %v580_v32  ;;  %583 = vst [vmem:[%s4841_s20 + $0x508] sm:$0xff] %v582_v33  ;;  %v586_v35 = vld [vmem:[%s4836_s19 + $0xa18] sm:$0xff]  ;;  %v588_v36 = vld [vmem:[%s4836_s19 + $0xa40] sm:$0xff] }
  0x6d   : > { %585 = vst [vmem:[%s4841_s20 + $0x510] sm:$0xff] %v584_v34  ;;  %587 = vst [vmem:[%s4841_s20 + $0x518] sm:$0xff] %v586_v35  ;;  %v590_v37 = vld [vmem:[%s4836_s19 + $0xa48] sm:$0xff]  ;;  %v592_v38 = vld [vmem:[%s4836_s19 + $0xa50] sm:$0xff] }
  0x6e   : > { %589 = vst [vmem:[%s4841_s20 + $0x520] sm:$0xff] %v588_v36  ;;  %v594_v39 = vld [vmem:[%s4836_s19 + $0xa58] sm:$0xff]  ;;  %591 = vst [vmem:[%s4841_s20 + $0x528] sm:$0xff] %v590_v37  ;;  %v596_v40 = vld [vmem:[%s4836_s19 + $0xa80] sm:$0xff] }
  0x6f   : > { %593 = vst [vmem:[%s4841_s20 + $0x530] sm:$0xff] %v592_v38  ;;  %595 = vst [vmem:[%s4841_s20 + $0x538] sm:$0xff] %v594_v39  ;;  %v598_v41 = vld [vmem:[%s4836_s19 + $0xa88] sm:$0xff]  ;;  %v600_v42 = vld [vmem:[%s4836_s19 + $0xa90] sm:$0xff] }
  0x70   : > { %597 = vst [vmem:[%s4841_s20 + $0x540] sm:$0xff] %v596_v40  ;;  %599 = vst [vmem:[%s4841_s20 + $0x548] sm:$0xff] %v598_v41  ;;  %v602_v43 = vld [vmem:[%s4836_s19 + $0xa98] sm:$0xff]  ;;  %v604_v44 = vld [vmem:[%s4836_s19 + $0xac0] sm:$0xff] }
  0x71   : > { %601 = vst [vmem:[%s4841_s20 + $0x550] sm:$0xff] %v600_v42  ;;  %v606_v45 = vld [vmem:[%s4836_s19 + $0xac8] sm:$0xff]  ;;  %603 = vst [vmem:[%s4841_s20 + $0x558] sm:$0xff] %v602_v43  ;;  %v608_v46 = vld [vmem:[%s4836_s19 + $0xad0] sm:$0xff] }
  0x72   : > { %605 = vst [vmem:[%s4841_s20 + $0x560] sm:$0xff] %v604_v44  ;;  %607 = vst [vmem:[%s4841_s20 + $0x568] sm:$0xff] %v606_v45  ;;  %v610_v47 = vld [vmem:[%s4836_s19 + $0xad8] sm:$0xff]  ;;  %v612_v48 = vld [vmem:[%s4836_s19 + $0xb00] sm:$0xff] }
  0x73   : > { %609 = vst [vmem:[%s4841_s20 + $0x570] sm:$0xff] %v608_v46  ;;  %611 = vst [vmem:[%s4841_s20 + $0x578] sm:$0xff] %v610_v47  ;;  %v614_v49 = vld [vmem:[%s4836_s19 + $0xb08] sm:$0xff]  ;;  %v616_v50 = vld [vmem:[%s4836_s19 + $0xb10] sm:$0xff] }
  0x74   : > { %613 = vst [vmem:[%s4841_s20 + $0x580] sm:$0xff] %v612_v48  ;;  %v618_v51 = vld [vmem:[%s4836_s19 + $0xb18] sm:$0xff]  ;;  %615 = vst [vmem:[%s4841_s20 + $0x588] sm:$0xff] %v614_v49  ;;  %v620_v52 = vld [vmem:[%s4836_s19 + $0xb40] sm:$0xff] }
  0x75   : > { %617 = vst [vmem:[%s4841_s20 + $0x590] sm:$0xff] %v616_v50  ;;  %619 = vst [vmem:[%s4841_s20 + $0x598] sm:$0xff] %v618_v51  ;;  %v622_v53 = vld [vmem:[%s4836_s19 + $0xb48] sm:$0xff]  ;;  %v624_v54 = vld [vmem:[%s4836_s19 + $0xb50] sm:$0xff] }
  0x76   : > { %621 = vst [vmem:[%s4841_s20 + $0x5a0] sm:$0xff] %v620_v52  ;;  %623 = vst [vmem:[%s4841_s20 + $0x5a8] sm:$0xff] %v622_v53  ;;  %v626_v55 = vld [vmem:[%s4836_s19 + $0xb58] sm:$0xff]  ;;  %v628_v56 = vld [vmem:[%s4836_s19 + $0xb80] sm:$0xff] }
  0x77   : > { %625 = vst [vmem:[%s4841_s20 + $0x5b0] sm:$0xff] %v624_v54  ;;  %v630_v57 = vld [vmem:[%s4836_s19 + $0xb88] sm:$0xff]  ;;  %627 = vst [vmem:[%s4841_s20 + $0x5b8] sm:$0xff] %v626_v55  ;;  %v632_v58 = vld [vmem:[%s4836_s19 + $0xb90] sm:$0xff] }
  0x78   : > { %629 = vst [vmem:[%s4841_s20 + $0x5c0] sm:$0xff] %v628_v56  ;;  %631 = vst [vmem:[%s4841_s20 + $0x5c8] sm:$0xff] %v630_v57  ;;  %v634_v59 = vld [vmem:[%s4836_s19 + $0xb98] sm:$0xff]  ;;  %v636_v60 = vld [vmem:[%s4836_s19 + $0xbc0] sm:$0xff] }
  0x79   : > { %633 = vst [vmem:[%s4841_s20 + $0x5d0] sm:$0xff] %v632_v58  ;;  %635 = vst [vmem:[%s4841_s20 + $0x5d8] sm:$0xff] %v634_v59  ;;  %v638_v61 = vld [vmem:[%s4836_s19 + $0xbc8] sm:$0xff]  ;;  %v640_v62 = vld [vmem:[%s4836_s19 + $0xbd0] sm:$0xff] }
  0x7a   : > { %637 = vst [vmem:[%s4841_s20 + $0x5e0] sm:$0xff] %v636_v60  ;;  %v642_v63 = vld [vmem:[%s4836_s19 + $0xbd8] sm:$0xff]  ;;  %639 = vst [vmem:[%s4841_s20 + $0x5e8] sm:$0xff] %v638_v61  ;;  %v644_v0 = vld [vmem:[%s4836_s19 + $0xc00] sm:$0xff] }
  0x7b   : > { %641 = vst [vmem:[%s4841_s20 + $0x5f0] sm:$0xff] %v640_v62  ;;  %643 = vst [vmem:[%s4841_s20 + $0x5f8] sm:$0xff] %v642_v63  ;;  %v646_v1 = vld [vmem:[%s4836_s19 + $0xc08] sm:$0xff]  ;;  %v648_v2 = vld [vmem:[%s4836_s19 + $0xc10] sm:$0xff] }
  0x7c   : > { %645 = vst [vmem:[%s4841_s20 + $0x600] sm:$0xff] %v644_v0  ;;  %647 = vst [vmem:[%s4841_s20 + $0x608] sm:$0xff] %v646_v1  ;;  %v650_v3 = vld [vmem:[%s4836_s19 + $0xc18] sm:$0xff]  ;;  %v652_v4 = vld [vmem:[%s4836_s19 + $0xc40] sm:$0xff] }
  0x7d   : > { %649 = vst [vmem:[%s4841_s20 + $0x610] sm:$0xff] %v648_v2  ;;  %v654_v5 = vld [vmem:[%s4836_s19 + $0xc48] sm:$0xff]  ;;  %651 = vst [vmem:[%s4841_s20 + $0x618] sm:$0xff] %v650_v3  ;;  %v656_v6 = vld [vmem:[%s4836_s19 + $0xc50] sm:$0xff] }
  0x7e   : > { %653 = vst [vmem:[%s4841_s20 + $0x620] sm:$0xff] %v652_v4  ;;  %655 = vst [vmem:[%s4841_s20 + $0x628] sm:$0xff] %v654_v5  ;;  %v658_v7 = vld [vmem:[%s4836_s19 + $0xc58] sm:$0xff]  ;;  %v660_v8 = vld [vmem:[%s4836_s19 + $0xc80] sm:$0xff] }
  0x7f   : > { %657 = vst [vmem:[%s4841_s20 + $0x630] sm:$0xff] %v656_v6  ;;  %659 = vst [vmem:[%s4841_s20 + $0x638] sm:$0xff] %v658_v7  ;;  %v662_v9 = vld [vmem:[%s4836_s19 + $0xc88] sm:$0xff]  ;;  %v664_v10 = vld [vmem:[%s4836_s19 + $0xc90] sm:$0xff] }
  0x80   : > { %661 = vst [vmem:[%s4841_s20 + $0x640] sm:$0xff] %v660_v8  ;;  %v666_v11 = vld [vmem:[%s4836_s19 + $0xc98] sm:$0xff]  ;;  %663 = vst [vmem:[%s4841_s20 + $0x648] sm:$0xff] %v662_v9  ;;  %v668_v12 = vld [vmem:[%s4836_s19 + $0xcc0] sm:$0xff] }
  0x81   : > { %665 = vst [vmem:[%s4841_s20 + $0x650] sm:$0xff] %v664_v10  ;;  %667 = vst [vmem:[%s4841_s20 + $0x658] sm:$0xff] %v666_v11  ;;  %v670_v13 = vld [vmem:[%s4836_s19 + $0xcc8] sm:$0xff]  ;;  %v672_v14 = vld [vmem:[%s4836_s19 + $0xcd0] sm:$0xff] }
  0x82   : > { %669 = vst [vmem:[%s4841_s20 + $0x660] sm:$0xff] %v668_v12  ;;  %671 = vst [vmem:[%s4841_s20 + $0x668] sm:$0xff] %v670_v13  ;;  %v674_v15 = vld [vmem:[%s4836_s19 + $0xcd8] sm:$0xff]  ;;  %v676_v16 = vld [vmem:[%s4836_s19 + $0xd00] sm:$0xff] }
  0x83   : > { %673 = vst [vmem:[%s4841_s20 + $0x670] sm:$0xff] %v672_v14  ;;  %v678_v17 = vld [vmem:[%s4836_s19 + $0xd08] sm:$0xff]  ;;  %675 = vst [vmem:[%s4841_s20 + $0x678] sm:$0xff] %v674_v15  ;;  %v680_v18 = vld [vmem:[%s4836_s19 + $0xd10] sm:$0xff] }
  0x84   : > { %677 = vst [vmem:[%s4841_s20 + $0x680] sm:$0xff] %v676_v16  ;;  %679 = vst [vmem:[%s4841_s20 + $0x688] sm:$0xff] %v678_v17  ;;  %v682_v19 = vld [vmem:[%s4836_s19 + $0xd18] sm:$0xff]  ;;  %v684_v20 = vld [vmem:[%s4836_s19 + $0xd40] sm:$0xff] }
  0x85   : > { %681 = vst [vmem:[%s4841_s20 + $0x690] sm:$0xff] %v680_v18  ;;  %683 = vst [vmem:[%s4841_s20 + $0x698] sm:$0xff] %v682_v19  ;;  %v686_v21 = vld [vmem:[%s4836_s19 + $0xd48] sm:$0xff]  ;;  %v688_v22 = vld [vmem:[%s4836_s19 + $0xd50] sm:$0xff] }
  0x86   : > { %685 = vst [vmem:[%s4841_s20 + $0x6a0] sm:$0xff] %v684_v20  ;;  %v690_v23 = vld [vmem:[%s4836_s19 + $0xd58] sm:$0xff]  ;;  %687 = vst [vmem:[%s4841_s20 + $0x6a8] sm:$0xff] %v686_v21  ;;  %v692_v24 = vld [vmem:[%s4836_s19 + $0xd80] sm:$0xff] }
  0x87   : > { %689 = vst [vmem:[%s4841_s20 + $0x6b0] sm:$0xff] %v688_v22  ;;  %691 = vst [vmem:[%s4841_s20 + $0x6b8] sm:$0xff] %v690_v23  ;;  %v694_v25 = vld [vmem:[%s4836_s19 + $0xd88] sm:$0xff]  ;;  %v696_v26 = vld [vmem:[%s4836_s19 + $0xd90] sm:$0xff] }
  0x88   : > { %693 = vst [vmem:[%s4841_s20 + $0x6c0] sm:$0xff] %v692_v24  ;;  %695 = vst [vmem:[%s4841_s20 + $0x6c8] sm:$0xff] %v694_v25  ;;  %v698_v27 = vld [vmem:[%s4836_s19 + $0xd98] sm:$0xff]  ;;  %v700_v28 = vld [vmem:[%s4836_s19 + $0xdc0] sm:$0xff] }
  0x89   : > { %697 = vst [vmem:[%s4841_s20 + $0x6d0] sm:$0xff] %v696_v26  ;;  %v702_v29 = vld [vmem:[%s4836_s19 + $0xdc8] sm:$0xff]  ;;  %699 = vst [vmem:[%s4841_s20 + $0x6d8] sm:$0xff] %v698_v27  ;;  %v704_v30 = vld [vmem:[%s4836_s19 + $0xdd0] sm:$0xff] }
  0x8a   : > { %701 = vst [vmem:[%s4841_s20 + $0x6e0] sm:$0xff] %v700_v28  ;;  %703 = vst [vmem:[%s4841_s20 + $0x6e8] sm:$0xff] %v702_v29  ;;  %v706_v31 = vld [vmem:[%s4836_s19 + $0xdd8] sm:$0xff]  ;;  %v708_v32 = vld [vmem:[%s4836_s19 + $0xe00] sm:$0xff] }
  0x8b   : > { %705 = vst [vmem:[%s4841_s20 + $0x6f0] sm:$0xff] %v704_v30  ;;  %707 = vst [vmem:[%s4841_s20 + $0x6f8] sm:$0xff] %v706_v31  ;;  %v710_v33 = vld [vmem:[%s4836_s19 + $0xe08] sm:$0xff]  ;;  %v712_v34 = vld [vmem:[%s4836_s19 + $0xe10] sm:$0xff] }
  0x8c   : > { %709 = vst [vmem:[%s4841_s20 + $0x700] sm:$0xff] %v708_v32  ;;  %v714_v35 = vld [vmem:[%s4836_s19 + $0xe18] sm:$0xff]  ;;  %711 = vst [vmem:[%s4841_s20 + $0x708] sm:$0xff] %v710_v33  ;;  %v716_v36 = vld [vmem:[%s4836_s19 + $0xe40] sm:$0xff] }
  0x8d   : > { %713 = vst [vmem:[%s4841_s20 + $0x710] sm:$0xff] %v712_v34  ;;  %715 = vst [vmem:[%s4841_s20 + $0x718] sm:$0xff] %v714_v35  ;;  %v718_v37 = vld [vmem:[%s4836_s19 + $0xe48] sm:$0xff]  ;;  %v720_v38 = vld [vmem:[%s4836_s19 + $0xe50] sm:$0xff] }
  0x8e   : > { %717 = vst [vmem:[%s4841_s20 + $0x720] sm:$0xff] %v716_v36  ;;  %719 = vst [vmem:[%s4841_s20 + $0x728] sm:$0xff] %v718_v37  ;;  %v722_v39 = vld [vmem:[%s4836_s19 + $0xe58] sm:$0xff]  ;;  %v724_v40 = vld [vmem:[%s4836_s19 + $0xe80] sm:$0xff] }
  0x8f   : > { %721 = vst [vmem:[%s4841_s20 + $0x730] sm:$0xff] %v720_v38  ;;  %v726_v41 = vld [vmem:[%s4836_s19 + $0xe88] sm:$0xff]  ;;  %723 = vst [vmem:[%s4841_s20 + $0x738] sm:$0xff] %v722_v39  ;;  %v728_v42 = vld [vmem:[%s4836_s19 + $0xe90] sm:$0xff] }
  0x90   : > { %725 = vst [vmem:[%s4841_s20 + $0x740] sm:$0xff] %v724_v40  ;;  %727 = vst [vmem:[%s4841_s20 + $0x748] sm:$0xff] %v726_v41  ;;  %v730_v43 = vld [vmem:[%s4836_s19 + $0xe98] sm:$0xff]  ;;  %v732_v44 = vld [vmem:[%s4836_s19 + $0xec0] sm:$0xff] }
  0x91   : > { %729 = vst [vmem:[%s4841_s20 + $0x750] sm:$0xff] %v728_v42  ;;  %731 = vst [vmem:[%s4841_s20 + $0x758] sm:$0xff] %v730_v43  ;;  %v734_v45 = vld [vmem:[%s4836_s19 + $0xec8] sm:$0xff]  ;;  %v736_v46 = vld [vmem:[%s4836_s19 + $0xed0] sm:$0xff] }
  0x92   : > { %733 = vst [vmem:[%s4841_s20 + $0x760] sm:$0xff] %v732_v44  ;;  %v738_v47 = vld [vmem:[%s4836_s19 + $0xed8] sm:$0xff]  ;;  %735 = vst [vmem:[%s4841_s20 + $0x768] sm:$0xff] %v734_v45  ;;  %v740_v48 = vld [vmem:[%s4836_s19 + $0xf00] sm:$0xff] }
  0x93   : > { %737 = vst [vmem:[%s4841_s20 + $0x770] sm:$0xff] %v736_v46  ;;  %739 = vst [vmem:[%s4841_s20 + $0x778] sm:$0xff] %v738_v47  ;;  %v742_v49 = vld [vmem:[%s4836_s19 + $0xf08] sm:$0xff]  ;;  %v744_v50 = vld [vmem:[%s4836_s19 + $0xf10] sm:$0xff] }
  0x94   : > { %741 = vst [vmem:[%s4841_s20 + $0x780] sm:$0xff] %v740_v48  ;;  %743 = vst [vmem:[%s4841_s20 + $0x788] sm:$0xff] %v742_v49  ;;  %v746_v51 = vld [vmem:[%s4836_s19 + $0xf18] sm:$0xff]  ;;  %v748_v52 = vld [vmem:[%s4836_s19 + $0xf40] sm:$0xff] }
  0x95   : > { %745 = vst [vmem:[%s4841_s20 + $0x790] sm:$0xff] %v744_v50  ;;  %v750_v53 = vld [vmem:[%s4836_s19 + $0xf48] sm:$0xff]  ;;  %747 = vst [vmem:[%s4841_s20 + $0x798] sm:$0xff] %v746_v51  ;;  %v752_v54 = vld [vmem:[%s4836_s19 + $0xf50] sm:$0xff] }
  0x96   : > { %749 = vst [vmem:[%s4841_s20 + $0x7a0] sm:$0xff] %v748_v52  ;;  %751 = vst [vmem:[%s4841_s20 + $0x7a8] sm:$0xff] %v750_v53  ;;  %v754_v55 = vld [vmem:[%s4836_s19 + $0xf58] sm:$0xff]  ;;  %v756_v56 = vld [vmem:[%s4836_s19 + $0xf80] sm:$0xff] }
  0x97   : > { %753 = vst [vmem:[%s4841_s20 + $0x7b0] sm:$0xff] %v752_v54  ;;  %755 = vst [vmem:[%s4841_s20 + $0x7b8] sm:$0xff] %v754_v55  ;;  %v758_v57 = vld [vmem:[%s4836_s19 + $0xf88] sm:$0xff]  ;;  %v760_v58 = vld [vmem:[%s4836_s19 + $0xf90] sm:$0xff] }
  0x98   : > { %757 = vst [vmem:[%s4841_s20 + $0x7c0] sm:$0xff] %v756_v56  ;;  %v762_v59 = vld [vmem:[%s4836_s19 + $0xf98] sm:$0xff]  ;;  %759 = vst [vmem:[%s4841_s20 + $0x7c8] sm:$0xff] %v758_v57  ;;  %v764_v60 = vld [vmem:[%s4836_s19 + $0xfc0] sm:$0xff] }
  0x99   : > { %761 = vst [vmem:[%s4841_s20 + $0x7d0] sm:$0xff] %v760_v58  ;;  %763 = vst [vmem:[%s4841_s20 + $0x7d8] sm:$0xff] %v762_v59  ;;  %v766_v61 = vld [vmem:[%s4836_s19 + $0xfc8] sm:$0xff]  ;;  %v768_v62 = vld [vmem:[%s4836_s19 + $0xfd0] sm:$0xff] }
  0x9a   : > { %765 = vst [vmem:[%s4841_s20 + $0x7e0] sm:$0xff] %v764_v60  ;;  %767 = vst [vmem:[%s4841_s20 + $0x7e8] sm:$0xff] %v766_v61  ;;  %v770_v63 = vld [vmem:[%s4836_s19 + $0xfd8] sm:$0xff]  ;;  %v772_v0 = vld [vmem:[%s4836_s19 + $0x1000] sm:$0xff] }
  0x9b   : > { %769 = vst [vmem:[%s4841_s20 + $0x7f0] sm:$0xff] %v768_v62  ;;  %v774_v1 = vld [vmem:[%s4836_s19 + $0x1008] sm:$0xff]  ;;  %771 = vst [vmem:[%s4841_s20 + $0x7f8] sm:$0xff] %v770_v63  ;;  %v776_v2 = vld [vmem:[%s4836_s19 + $0x1010] sm:$0xff] }
  0x9c   : > { %773 = vst [vmem:[%s4841_s20 + $0x800] sm:$0xff] %v772_v0  ;;  %775 = vst [vmem:[%s4841_s20 + $0x808] sm:$0xff] %v774_v1  ;;  %v778_v3 = vld [vmem:[%s4836_s19 + $0x1018] sm:$0xff]  ;;  %v780_v4 = vld [vmem:[%s4836_s19 + $0x1040] sm:$0xff] }
  0x9d   : > { %777 = vst [vmem:[%s4841_s20 + $0x810] sm:$0xff] %v776_v2  ;;  %779 = vst [vmem:[%s4841_s20 + $0x818] sm:$0xff] %v778_v3  ;;  %v782_v5 = vld [vmem:[%s4836_s19 + $0x1048] sm:$0xff]  ;;  %v784_v6 = vld [vmem:[%s4836_s19 + $0x1050] sm:$0xff] }
  0x9e   : > { %781 = vst [vmem:[%s4841_s20 + $0x820] sm:$0xff] %v780_v4  ;;  %v786_v7 = vld [vmem:[%s4836_s19 + $0x1058] sm:$0xff]  ;;  %783 = vst [vmem:[%s4841_s20 + $0x828] sm:$0xff] %v782_v5  ;;  %v788_v8 = vld [vmem:[%s4836_s19 + $0x1080] sm:$0xff] }
  0x9f   : > { %785 = vst [vmem:[%s4841_s20 + $0x830] sm:$0xff] %v784_v6  ;;  %787 = vst [vmem:[%s4841_s20 + $0x838] sm:$0xff] %v786_v7  ;;  %v790_v9 = vld [vmem:[%s4836_s19 + $0x1088] sm:$0xff]  ;;  %v792_v10 = vld [vmem:[%s4836_s19 + $0x1090] sm:$0xff] }
  0xa0   : > { %789 = vst [vmem:[%s4841_s20 + $0x840] sm:$0xff] %v788_v8  ;;  %791 = vst [vmem:[%s4841_s20 + $0x848] sm:$0xff] %v790_v9  ;;  %v794_v11 = vld [vmem:[%s4836_s19 + $0x1098] sm:$0xff]  ;;  %v796_v12 = vld [vmem:[%s4836_s19 + $0x10c0] sm:$0xff] }
  0xa1   : > { %793 = vst [vmem:[%s4841_s20 + $0x850] sm:$0xff] %v792_v10  ;;  %v798_v13 = vld [vmem:[%s4836_s19 + $0x10c8] sm:$0xff]  ;;  %795 = vst [vmem:[%s4841_s20 + $0x858] sm:$0xff] %v794_v11  ;;  %v800_v14 = vld [vmem:[%s4836_s19 + $0x10d0] sm:$0xff] }
  0xa2   : > { %797 = vst [vmem:[%s4841_s20 + $0x860] sm:$0xff] %v796_v12  ;;  %799 = vst [vmem:[%s4841_s20 + $0x868] sm:$0xff] %v798_v13  ;;  %v802_v15 = vld [vmem:[%s4836_s19 + $0x10d8] sm:$0xff]  ;;  %v804_v16 = vld [vmem:[%s4836_s19 + $0x1100] sm:$0xff] }
  0xa3   : > { %801 = vst [vmem:[%s4841_s20 + $0x870] sm:$0xff] %v800_v14  ;;  %803 = vst [vmem:[%s4841_s20 + $0x878] sm:$0xff] %v802_v15  ;;  %v806_v17 = vld [vmem:[%s4836_s19 + $0x1108] sm:$0xff]  ;;  %v808_v18 = vld [vmem:[%s4836_s19 + $0x1110] sm:$0xff] }
  0xa4   : > { %805 = vst [vmem:[%s4841_s20 + $0x880] sm:$0xff] %v804_v16  ;;  %v810_v19 = vld [vmem:[%s4836_s19 + $0x1118] sm:$0xff]  ;;  %807 = vst [vmem:[%s4841_s20 + $0x888] sm:$0xff] %v806_v17  ;;  %v812_v20 = vld [vmem:[%s4836_s19 + $0x1140] sm:$0xff] }
  0xa5   : > { %809 = vst [vmem:[%s4841_s20 + $0x890] sm:$0xff] %v808_v18  ;;  %811 = vst [vmem:[%s4841_s20 + $0x898] sm:$0xff] %v810_v19  ;;  %v814_v21 = vld [vmem:[%s4836_s19 + $0x1148] sm:$0xff]  ;;  %v816_v22 = vld [vmem:[%s4836_s19 + $0x1150] sm:$0xff] }
  0xa6   : > { %813 = vst [vmem:[%s4841_s20 + $0x8a0] sm:$0xff] %v812_v20  ;;  %815 = vst [vmem:[%s4841_s20 + $0x8a8] sm:$0xff] %v814_v21  ;;  %v818_v23 = vld [vmem:[%s4836_s19 + $0x1158] sm:$0xff]  ;;  %v820_v24 = vld [vmem:[%s4836_s19 + $0x1180] sm:$0xff] }
  0xa7   : > { %817 = vst [vmem:[%s4841_s20 + $0x8b0] sm:$0xff] %v816_v22  ;;  %v822_v25 = vld [vmem:[%s4836_s19 + $0x1188] sm:$0xff]  ;;  %819 = vst [vmem:[%s4841_s20 + $0x8b8] sm:$0xff] %v818_v23  ;;  %v824_v26 = vld [vmem:[%s4836_s19 + $0x1190] sm:$0xff] }
  0xa8   : > { %821 = vst [vmem:[%s4841_s20 + $0x8c0] sm:$0xff] %v820_v24  ;;  %823 = vst [vmem:[%s4841_s20 + $0x8c8] sm:$0xff] %v822_v25  ;;  %v826_v27 = vld [vmem:[%s4836_s19 + $0x1198] sm:$0xff]  ;;  %v828_v28 = vld [vmem:[%s4836_s19 + $0x11c0] sm:$0xff] }
  0xa9   : > { %825 = vst [vmem:[%s4841_s20 + $0x8d0] sm:$0xff] %v824_v26  ;;  %827 = vst [vmem:[%s4841_s20 + $0x8d8] sm:$0xff] %v826_v27  ;;  %v830_v29 = vld [vmem:[%s4836_s19 + $0x11c8] sm:$0xff]  ;;  %v832_v30 = vld [vmem:[%s4836_s19 + $0x11d0] sm:$0xff] }
  0xaa   : > { %829 = vst [vmem:[%s4841_s20 + $0x8e0] sm:$0xff] %v828_v28  ;;  %v834_v31 = vld [vmem:[%s4836_s19 + $0x11d8] sm:$0xff]  ;;  %831 = vst [vmem:[%s4841_s20 + $0x8e8] sm:$0xff] %v830_v29  ;;  %v836_v32 = vld [vmem:[%s4836_s19 + $0x1200] sm:$0xff] }
  0xab   : > { %833 = vst [vmem:[%s4841_s20 + $0x8f0] sm:$0xff] %v832_v30  ;;  %835 = vst [vmem:[%s4841_s20 + $0x8f8] sm:$0xff] %v834_v31  ;;  %v838_v33 = vld [vmem:[%s4836_s19 + $0x1208] sm:$0xff]  ;;  %v840_v34 = vld [vmem:[%s4836_s19 + $0x1210] sm:$0xff] }
  0xac   : > { %837 = vst [vmem:[%s4841_s20 + $0x900] sm:$0xff] %v836_v32  ;;  %839 = vst [vmem:[%s4841_s20 + $0x908] sm:$0xff] %v838_v33  ;;  %v842_v35 = vld [vmem:[%s4836_s19 + $0x1218] sm:$0xff]  ;;  %v844_v36 = vld [vmem:[%s4836_s19 + $0x1240] sm:$0xff] }
  0xad   : > { %841 = vst [vmem:[%s4841_s20 + $0x910] sm:$0xff] %v840_v34  ;;  %v846_v37 = vld [vmem:[%s4836_s19 + $0x1248] sm:$0xff]  ;;  %843 = vst [vmem:[%s4841_s20 + $0x918] sm:$0xff] %v842_v35  ;;  %v848_v38 = vld [vmem:[%s4836_s19 + $0x1250] sm:$0xff] }
  0xae   : > { %845 = vst [vmem:[%s4841_s20 + $0x920] sm:$0xff] %v844_v36  ;;  %847 = vst [vmem:[%s4841_s20 + $0x928] sm:$0xff] %v846_v37  ;;  %v850_v39 = vld [vmem:[%s4836_s19 + $0x1258] sm:$0xff]  ;;  %v852_v40 = vld [vmem:[%s4836_s19 + $0x1280] sm:$0xff] }
  0xaf   : > { %849 = vst [vmem:[%s4841_s20 + $0x930] sm:$0xff] %v848_v38  ;;  %851 = vst [vmem:[%s4841_s20 + $0x938] sm:$0xff] %v850_v39  ;;  %v854_v41 = vld [vmem:[%s4836_s19 + $0x1288] sm:$0xff]  ;;  %v856_v42 = vld [vmem:[%s4836_s19 + $0x1290] sm:$0xff] }
  0xb0   : > { %853 = vst [vmem:[%s4841_s20 + $0x940] sm:$0xff] %v852_v40  ;;  %v858_v43 = vld [vmem:[%s4836_s19 + $0x1298] sm:$0xff]  ;;  %855 = vst [vmem:[%s4841_s20 + $0x948] sm:$0xff] %v854_v41  ;;  %v860_v44 = vld [vmem:[%s4836_s19 + $0x12c0] sm:$0xff] }
  0xb1   : > { %857 = vst [vmem:[%s4841_s20 + $0x950] sm:$0xff] %v856_v42  ;;  %859 = vst [vmem:[%s4841_s20 + $0x958] sm:$0xff] %v858_v43  ;;  %v862_v45 = vld [vmem:[%s4836_s19 + $0x12c8] sm:$0xff]  ;;  %v864_v46 = vld [vmem:[%s4836_s19 + $0x12d0] sm:$0xff] }
  0xb2   : > { %861 = vst [vmem:[%s4841_s20 + $0x960] sm:$0xff] %v860_v44  ;;  %863 = vst [vmem:[%s4841_s20 + $0x968] sm:$0xff] %v862_v45  ;;  %v866_v47 = vld [vmem:[%s4836_s19 + $0x12d8] sm:$0xff]  ;;  %v868_v48 = vld [vmem:[%s4836_s19 + $0x1300] sm:$0xff] }
  0xb3   : > { %865 = vst [vmem:[%s4841_s20 + $0x970] sm:$0xff] %v864_v46  ;;  %v870_v49 = vld [vmem:[%s4836_s19 + $0x1308] sm:$0xff]  ;;  %867 = vst [vmem:[%s4841_s20 + $0x978] sm:$0xff] %v866_v47  ;;  %v872_v50 = vld [vmem:[%s4836_s19 + $0x1310] sm:$0xff] }
  0xb4   : > { %869 = vst [vmem:[%s4841_s20 + $0x980] sm:$0xff] %v868_v48  ;;  %871 = vst [vmem:[%s4841_s20 + $0x988] sm:$0xff] %v870_v49  ;;  %v874_v51 = vld [vmem:[%s4836_s19 + $0x1318] sm:$0xff]  ;;  %v876_v52 = vld [vmem:[%s4836_s19 + $0x1340] sm:$0xff] }
  0xb5   : > { %873 = vst [vmem:[%s4841_s20 + $0x990] sm:$0xff] %v872_v50  ;;  %875 = vst [vmem:[%s4841_s20 + $0x998] sm:$0xff] %v874_v51  ;;  %v878_v53 = vld [vmem:[%s4836_s19 + $0x1348] sm:$0xff]  ;;  %v880_v54 = vld [vmem:[%s4836_s19 + $0x1350] sm:$0xff] }
  0xb6   : > { %877 = vst [vmem:[%s4841_s20 + $0x9a0] sm:$0xff] %v876_v52  ;;  %v882_v55 = vld [vmem:[%s4836_s19 + $0x1358] sm:$0xff]  ;;  %879 = vst [vmem:[%s4841_s20 + $0x9a8] sm:$0xff] %v878_v53  ;;  %v884_v56 = vld [vmem:[%s4836_s19 + $0x1380] sm:$0xff] }
  0xb7   : > { %881 = vst [vmem:[%s4841_s20 + $0x9b0] sm:$0xff] %v880_v54  ;;  %883 = vst [vmem:[%s4841_s20 + $0x9b8] sm:$0xff] %v882_v55  ;;  %v886_v57 = vld [vmem:[%s4836_s19 + $0x1388] sm:$0xff]  ;;  %v888_v58 = vld [vmem:[%s4836_s19 + $0x1390] sm:$0xff] }
  0xb8   : > { %885 = vst [vmem:[%s4841_s20 + $0x9c0] sm:$0xff] %v884_v56  ;;  %887 = vst [vmem:[%s4841_s20 + $0x9c8] sm:$0xff] %v886_v57  ;;  %v890_v59 = vld [vmem:[%s4836_s19 + $0x1398] sm:$0xff]  ;;  %v892_v60 = vld [vmem:[%s4836_s19 + $0x13c0] sm:$0xff] }
  0xb9   : > { %889 = vst [vmem:[%s4841_s20 + $0x9d0] sm:$0xff] %v888_v58  ;;  %v894_v61 = vld [vmem:[%s4836_s19 + $0x13c8] sm:$0xff]  ;;  %891 = vst [vmem:[%s4841_s20 + $0x9d8] sm:$0xff] %v890_v59  ;;  %v896_v62 = vld [vmem:[%s4836_s19 + $0x13d0] sm:$0xff] }
  0xba   : > { %893 = vst [vmem:[%s4841_s20 + $0x9e0] sm:$0xff] %v892_v60  ;;  %895 = vst [vmem:[%s4841_s20 + $0x9e8] sm:$0xff] %v894_v61  ;;  %v898_v63 = vld [vmem:[%s4836_s19 + $0x13d8] sm:$0xff]  ;;  %v900_v0 = vld [vmem:[%s4836_s19 + $0x1400] sm:$0xff] }
  0xbb   : > { %897 = vst [vmem:[%s4841_s20 + $0x9f0] sm:$0xff] %v896_v62  ;;  %899 = vst [vmem:[%s4841_s20 + $0x9f8] sm:$0xff] %v898_v63  ;;  %v902_v1 = vld [vmem:[%s4836_s19 + $0x1408] sm:$0xff]  ;;  %v904_v2 = vld [vmem:[%s4836_s19 + $0x1410] sm:$0xff] }
  0xbc   : > { %901 = vst [vmem:[%s4841_s20 + $0xa00] sm:$0xff] %v900_v0  ;;  %v906_v3 = vld [vmem:[%s4836_s19 + $0x1418] sm:$0xff]  ;;  %903 = vst [vmem:[%s4841_s20 + $0xa08] sm:$0xff] %v902_v1  ;;  %v908_v4 = vld [vmem:[%s4836_s19 + $0x1440] sm:$0xff] }
  0xbd   : > { %905 = vst [vmem:[%s4841_s20 + $0xa10] sm:$0xff] %v904_v2  ;;  %907 = vst [vmem:[%s4841_s20 + $0xa18] sm:$0xff] %v906_v3  ;;  %v910_v5 = vld [vmem:[%s4836_s19 + $0x1448] sm:$0xff]  ;;  %v912_v6 = vld [vmem:[%s4836_s19 + $0x1450] sm:$0xff] }
  0xbe   : > { %909 = vst [vmem:[%s4841_s20 + $0xa20] sm:$0xff] %v908_v4  ;;  %911 = vst [vmem:[%s4841_s20 + $0xa28] sm:$0xff] %v910_v5  ;;  %v914_v7 = vld [vmem:[%s4836_s19 + $0x1458] sm:$0xff]  ;;  %v916_v8 = vld [vmem:[%s4836_s19 + $0x1480] sm:$0xff] }
  0xbf   : > { %913 = vst [vmem:[%s4841_s20 + $0xa30] sm:$0xff] %v912_v6  ;;  %v918_v9 = vld [vmem:[%s4836_s19 + $0x1488] sm:$0xff]  ;;  %915 = vst [vmem:[%s4841_s20 + $0xa38] sm:$0xff] %v914_v7  ;;  %v920_v10 = vld [vmem:[%s4836_s19 + $0x1490] sm:$0xff] }
  0xc0   : > { %917 = vst [vmem:[%s4841_s20 + $0xa40] sm:$0xff] %v916_v8  ;;  %919 = vst [vmem:[%s4841_s20 + $0xa48] sm:$0xff] %v918_v9  ;;  %v922_v11 = vld [vmem:[%s4836_s19 + $0x1498] sm:$0xff]  ;;  %v924_v12 = vld [vmem:[%s4836_s19 + $0x14c0] sm:$0xff] }
  0xc1   : > { %921 = vst [vmem:[%s4841_s20 + $0xa50] sm:$0xff] %v920_v10  ;;  %923 = vst [vmem:[%s4841_s20 + $0xa58] sm:$0xff] %v922_v11  ;;  %v926_v13 = vld [vmem:[%s4836_s19 + $0x14c8] sm:$0xff]  ;;  %v928_v14 = vld [vmem:[%s4836_s19 + $0x14d0] sm:$0xff] }
  0xc2   : > { %925 = vst [vmem:[%s4841_s20 + $0xa60] sm:$0xff] %v924_v12  ;;  %v930_v15 = vld [vmem:[%s4836_s19 + $0x14d8] sm:$0xff]  ;;  %927 = vst [vmem:[%s4841_s20 + $0xa68] sm:$0xff] %v926_v13  ;;  %v932_v16 = vld [vmem:[%s4836_s19 + $0x1500] sm:$0xff] }
  0xc3   : > { %929 = vst [vmem:[%s4841_s20 + $0xa70] sm:$0xff] %v928_v14  ;;  %931 = vst [vmem:[%s4841_s20 + $0xa78] sm:$0xff] %v930_v15  ;;  %v934_v17 = vld [vmem:[%s4836_s19 + $0x1508] sm:$0xff]  ;;  %v936_v18 = vld [vmem:[%s4836_s19 + $0x1510] sm:$0xff] }
  0xc4   : > { %933 = vst [vmem:[%s4841_s20 + $0xa80] sm:$0xff] %v932_v16  ;;  %935 = vst [vmem:[%s4841_s20 + $0xa88] sm:$0xff] %v934_v17  ;;  %v938_v19 = vld [vmem:[%s4836_s19 + $0x1518] sm:$0xff]  ;;  %v940_v20 = vld [vmem:[%s4836_s19 + $0x1540] sm:$0xff] }
  0xc5   : > { %937 = vst [vmem:[%s4841_s20 + $0xa90] sm:$0xff] %v936_v18  ;;  %v942_v21 = vld [vmem:[%s4836_s19 + $0x1548] sm:$0xff]  ;;  %939 = vst [vmem:[%s4841_s20 + $0xa98] sm:$0xff] %v938_v19  ;;  %v944_v22 = vld [vmem:[%s4836_s19 + $0x1550] sm:$0xff] }
  0xc6   : > { %941 = vst [vmem:[%s4841_s20 + $0xaa0] sm:$0xff] %v940_v20  ;;  %943 = vst [vmem:[%s4841_s20 + $0xaa8] sm:$0xff] %v942_v21  ;;  %v946_v23 = vld [vmem:[%s4836_s19 + $0x1558] sm:$0xff]  ;;  %v948_v24 = vld [vmem:[%s4836_s19 + $0x1580] sm:$0xff] }
  0xc7   : > { %945 = vst [vmem:[%s4841_s20 + $0xab0] sm:$0xff] %v944_v22  ;;  %947 = vst [vmem:[%s4841_s20 + $0xab8] sm:$0xff] %v946_v23  ;;  %v950_v25 = vld [vmem:[%s4836_s19 + $0x1588] sm:$0xff]  ;;  %v952_v26 = vld [vmem:[%s4836_s19 + $0x1590] sm:$0xff] }
  0xc8   : > { %949 = vst [vmem:[%s4841_s20 + $0xac0] sm:$0xff] %v948_v24  ;;  %v954_v27 = vld [vmem:[%s4836_s19 + $0x1598] sm:$0xff]  ;;  %951 = vst [vmem:[%s4841_s20 + $0xac8] sm:$0xff] %v950_v25  ;;  %v956_v28 = vld [vmem:[%s4836_s19 + $0x15c0] sm:$0xff] }
  0xc9   : > { %953 = vst [vmem:[%s4841_s20 + $0xad0] sm:$0xff] %v952_v26  ;;  %955 = vst [vmem:[%s4841_s20 + $0xad8] sm:$0xff] %v954_v27  ;;  %v958_v29 = vld [vmem:[%s4836_s19 + $0x15c8] sm:$0xff]  ;;  %v960_v30 = vld [vmem:[%s4836_s19 + $0x15d0] sm:$0xff] }
  0xca   : > { %957 = vst [vmem:[%s4841_s20 + $0xae0] sm:$0xff] %v956_v28  ;;  %959 = vst [vmem:[%s4841_s20 + $0xae8] sm:$0xff] %v958_v29  ;;  %v962_v31 = vld [vmem:[%s4836_s19 + $0x15d8] sm:$0xff]  ;;  %v964_v32 = vld [vmem:[%s4836_s19 + $0x1600] sm:$0xff] }
  0xcb   : > { %961 = vst [vmem:[%s4841_s20 + $0xaf0] sm:$0xff] %v960_v30  ;;  %v966_v33 = vld [vmem:[%s4836_s19 + $0x1608] sm:$0xff]  ;;  %963 = vst [vmem:[%s4841_s20 + $0xaf8] sm:$0xff] %v962_v31  ;;  %v968_v34 = vld [vmem:[%s4836_s19 + $0x1610] sm:$0xff] }
  0xcc   : > { %965 = vst [vmem:[%s4841_s20 + $0xb00] sm:$0xff] %v964_v32  ;;  %967 = vst [vmem:[%s4841_s20 + $0xb08] sm:$0xff] %v966_v33  ;;  %v970_v35 = vld [vmem:[%s4836_s19 + $0x1618] sm:$0xff]  ;;  %v972_v36 = vld [vmem:[%s4836_s19 + $0x1640] sm:$0xff] }
  0xcd   : > { %969 = vst [vmem:[%s4841_s20 + $0xb10] sm:$0xff] %v968_v34  ;;  %971 = vst [vmem:[%s4841_s20 + $0xb18] sm:$0xff] %v970_v35  ;;  %v974_v37 = vld [vmem:[%s4836_s19 + $0x1648] sm:$0xff]  ;;  %v976_v38 = vld [vmem:[%s4836_s19 + $0x1650] sm:$0xff] }
  0xce   : > { %973 = vst [vmem:[%s4841_s20 + $0xb20] sm:$0xff] %v972_v36  ;;  %v978_v39 = vld [vmem:[%s4836_s19 + $0x1658] sm:$0xff]  ;;  %975 = vst [vmem:[%s4841_s20 + $0xb28] sm:$0xff] %v974_v37  ;;  %v980_v40 = vld [vmem:[%s4836_s19 + $0x1680] sm:$0xff] }
  0xcf   : > { %977 = vst [vmem:[%s4841_s20 + $0xb30] sm:$0xff] %v976_v38  ;;  %979 = vst [vmem:[%s4841_s20 + $0xb38] sm:$0xff] %v978_v39  ;;  %v982_v41 = vld [vmem:[%s4836_s19 + $0x1688] sm:$0xff]  ;;  %v984_v42 = vld [vmem:[%s4836_s19 + $0x1690] sm:$0xff] }
  0xd0   : > { %981 = vst [vmem:[%s4841_s20 + $0xb40] sm:$0xff] %v980_v40  ;;  %983 = vst [vmem:[%s4841_s20 + $0xb48] sm:$0xff] %v982_v41  ;;  %v986_v43 = vld [vmem:[%s4836_s19 + $0x1698] sm:$0xff]  ;;  %v988_v44 = vld [vmem:[%s4836_s19 + $0x16c0] sm:$0xff] }
  0xd1   : > { %985 = vst [vmem:[%s4841_s20 + $0xb50] sm:$0xff] %v984_v42  ;;  %v990_v45 = vld [vmem:[%s4836_s19 + $0x16c8] sm:$0xff]  ;;  %987 = vst [vmem:[%s4841_s20 + $0xb58] sm:$0xff] %v986_v43  ;;  %v992_v46 = vld [vmem:[%s4836_s19 + $0x16d0] sm:$0xff] }
  0xd2   : > { %989 = vst [vmem:[%s4841_s20 + $0xb60] sm:$0xff] %v988_v44  ;;  %991 = vst [vmem:[%s4841_s20 + $0xb68] sm:$0xff] %v990_v45  ;;  %v994_v47 = vld [vmem:[%s4836_s19 + $0x16d8] sm:$0xff]  ;;  %v996_v48 = vld [vmem:[%s4836_s19 + $0x1700] sm:$0xff] }
  0xd3   : > { %993 = vst [vmem:[%s4841_s20 + $0xb70] sm:$0xff] %v992_v46  ;;  %995 = vst [vmem:[%s4841_s20 + $0xb78] sm:$0xff] %v994_v47  ;;  %v998_v49 = vld [vmem:[%s4836_s19 + $0x1708] sm:$0xff]  ;;  %v1000_v50 = vld [vmem:[%s4836_s19 + $0x1710] sm:$0xff] }
  0xd4   : > { %997 = vst [vmem:[%s4841_s20 + $0xb80] sm:$0xff] %v996_v48  ;;  %v1002_v51 = vld [vmem:[%s4836_s19 + $0x1718] sm:$0xff]  ;;  %999 = vst [vmem:[%s4841_s20 + $0xb88] sm:$0xff] %v998_v49  ;;  %v1004_v52 = vld [vmem:[%s4836_s19 + $0x1740] sm:$0xff] }
  0xd5   : > { %1001 = vst [vmem:[%s4841_s20 + $0xb90] sm:$0xff] %v1000_v50  ;;  %1003 = vst [vmem:[%s4841_s20 + $0xb98] sm:$0xff] %v1002_v51  ;;  %v1006_v53 = vld [vmem:[%s4836_s19 + $0x1748] sm:$0xff]  ;;  %v1008_v54 = vld [vmem:[%s4836_s19 + $0x1750] sm:$0xff] }
  0xd6   : > { %1005 = vst [vmem:[%s4841_s20 + $0xba0] sm:$0xff] %v1004_v52  ;;  %1007 = vst [vmem:[%s4841_s20 + $0xba8] sm:$0xff] %v1006_v53  ;;  %v1010_v55 = vld [vmem:[%s4836_s19 + $0x1758] sm:$0xff]  ;;  %v1012_v56 = vld [vmem:[%s4836_s19 + $0x1780] sm:$0xff] }
  0xd7   : > { %1009 = vst [vmem:[%s4841_s20 + $0xbb0] sm:$0xff] %v1008_v54  ;;  %v1014_v57 = vld [vmem:[%s4836_s19 + $0x1788] sm:$0xff]  ;;  %1011 = vst [vmem:[%s4841_s20 + $0xbb8] sm:$0xff] %v1010_v55  ;;  %v1016_v58 = vld [vmem:[%s4836_s19 + $0x1790] sm:$0xff] }
  0xd8   : > { %1013 = vst [vmem:[%s4841_s20 + $0xbc0] sm:$0xff] %v1012_v56  ;;  %1015 = vst [vmem:[%s4841_s20 + $0xbc8] sm:$0xff] %v1014_v57  ;;  %v1018_v59 = vld [vmem:[%s4836_s19 + $0x1798] sm:$0xff]  ;;  %v1020_v60 = vld [vmem:[%s4836_s19 + $0x17c0] sm:$0xff] }
  0xd9   : > { %1017 = vst [vmem:[%s4841_s20 + $0xbd0] sm:$0xff] %v1016_v58  ;;  %1019 = vst [vmem:[%s4841_s20 + $0xbd8] sm:$0xff] %v1018_v59  ;;  %v1022_v61 = vld [vmem:[%s4836_s19 + $0x17c8] sm:$0xff]  ;;  %v1024_v62 = vld [vmem:[%s4836_s19 + $0x17d0] sm:$0xff] }
  0xda   : > { %1021 = vst [vmem:[%s4841_s20 + $0xbe0] sm:$0xff] %v1020_v60  ;;  %v1026_v63 = vld [vmem:[%s4836_s19 + $0x17d8] sm:$0xff]  ;;  %1023 = vst [vmem:[%s4841_s20 + $0xbe8] sm:$0xff] %v1022_v61  ;;  %v1028_v0 = vld [vmem:[%s4836_s19 + $0x1800] sm:$0xff] }
  0xdb   : > { %1025 = vst [vmem:[%s4841_s20 + $0xbf0] sm:$0xff] %v1024_v62  ;;  %1027 = vst [vmem:[%s4841_s20 + $0xbf8] sm:$0xff] %v1026_v63  ;;  %v1030_v1 = vld [vmem:[%s4836_s19 + $0x1808] sm:$0xff]  ;;  %v1032_v2 = vld [vmem:[%s4836_s19 + $0x1810] sm:$0xff] }
  0xdc   : > { %1029 = vst [vmem:[%s4841_s20 + $0xc00] sm:$0xff] %v1028_v0  ;;  %1031 = vst [vmem:[%s4841_s20 + $0xc08] sm:$0xff] %v1030_v1  ;;  %v1034_v3 = vld [vmem:[%s4836_s19 + $0x1818] sm:$0xff]  ;;  %v1036_v4 = vld [vmem:[%s4836_s19 + $0x1840] sm:$0xff] }
  0xdd   : > { %1033 = vst [vmem:[%s4841_s20 + $0xc10] sm:$0xff] %v1032_v2  ;;  %v1038_v5 = vld [vmem:[%s4836_s19 + $0x1848] sm:$0xff]  ;;  %1035 = vst [vmem:[%s4841_s20 + $0xc18] sm:$0xff] %v1034_v3  ;;  %v1040_v6 = vld [vmem:[%s4836_s19 + $0x1850] sm:$0xff] }
  0xde   : > { %1037 = vst [vmem:[%s4841_s20 + $0xc20] sm:$0xff] %v1036_v4  ;;  %1039 = vst [vmem:[%s4841_s20 + $0xc28] sm:$0xff] %v1038_v5  ;;  %v1042_v7 = vld [vmem:[%s4836_s19 + $0x1858] sm:$0xff]  ;;  %v1044_v8 = vld [vmem:[%s4836_s19 + $0x1880] sm:$0xff] }
  0xdf   : > { %1041 = vst [vmem:[%s4841_s20 + $0xc30] sm:$0xff] %v1040_v6  ;;  %1043 = vst [vmem:[%s4841_s20 + $0xc38] sm:$0xff] %v1042_v7  ;;  %v1046_v9 = vld [vmem:[%s4836_s19 + $0x1888] sm:$0xff]  ;;  %v1048_v10 = vld [vmem:[%s4836_s19 + $0x1890] sm:$0xff] }
  0xe0   : > { %1045 = vst [vmem:[%s4841_s20 + $0xc40] sm:$0xff] %v1044_v8  ;;  %v1050_v11 = vld [vmem:[%s4836_s19 + $0x1898] sm:$0xff]  ;;  %1047 = vst [vmem:[%s4841_s20 + $0xc48] sm:$0xff] %v1046_v9  ;;  %v1052_v12 = vld [vmem:[%s4836_s19 + $0x18c0] sm:$0xff] }
  0xe1   : > { %1049 = vst [vmem:[%s4841_s20 + $0xc50] sm:$0xff] %v1048_v10  ;;  %1051 = vst [vmem:[%s4841_s20 + $0xc58] sm:$0xff] %v1050_v11  ;;  %v1054_v13 = vld [vmem:[%s4836_s19 + $0x18c8] sm:$0xff]  ;;  %v1056_v14 = vld [vmem:[%s4836_s19 + $0x18d0] sm:$0xff] }
  0xe2   : > { %1053 = vst [vmem:[%s4841_s20 + $0xc60] sm:$0xff] %v1052_v12  ;;  %1055 = vst [vmem:[%s4841_s20 + $0xc68] sm:$0xff] %v1054_v13  ;;  %v1058_v15 = vld [vmem:[%s4836_s19 + $0x18d8] sm:$0xff]  ;;  %v1060_v16 = vld [vmem:[%s4836_s19 + $0x1900] sm:$0xff] }
  0xe3   : > { %1057 = vst [vmem:[%s4841_s20 + $0xc70] sm:$0xff] %v1056_v14  ;;  %v1062_v17 = vld [vmem:[%s4836_s19 + $0x1908] sm:$0xff]  ;;  %1059 = vst [vmem:[%s4841_s20 + $0xc78] sm:$0xff] %v1058_v15  ;;  %v1064_v18 = vld [vmem:[%s4836_s19 + $0x1910] sm:$0xff] }
  0xe4   : > { %1061 = vst [vmem:[%s4841_s20 + $0xc80] sm:$0xff] %v1060_v16  ;;  %1063 = vst [vmem:[%s4841_s20 + $0xc88] sm:$0xff] %v1062_v17  ;;  %v1066_v19 = vld [vmem:[%s4836_s19 + $0x1918] sm:$0xff]  ;;  %v1068_v20 = vld [vmem:[%s4836_s19 + $0x1940] sm:$0xff] }
  0xe5   : > { %1065 = vst [vmem:[%s4841_s20 + $0xc90] sm:$0xff] %v1064_v18  ;;  %1067 = vst [vmem:[%s4841_s20 + $0xc98] sm:$0xff] %v1066_v19  ;;  %v1070_v21 = vld [vmem:[%s4836_s19 + $0x1948] sm:$0xff]  ;;  %v1072_v22 = vld [vmem:[%s4836_s19 + $0x1950] sm:$0xff] }
  0xe6   : > { %1069 = vst [vmem:[%s4841_s20 + $0xca0] sm:$0xff] %v1068_v20  ;;  %v1074_v23 = vld [vmem:[%s4836_s19 + $0x1958] sm:$0xff]  ;;  %1071 = vst [vmem:[%s4841_s20 + $0xca8] sm:$0xff] %v1070_v21  ;;  %v1076_v24 = vld [vmem:[%s4836_s19 + $0x1980] sm:$0xff] }
  0xe7   : > { %1073 = vst [vmem:[%s4841_s20 + $0xcb0] sm:$0xff] %v1072_v22  ;;  %1075 = vst [vmem:[%s4841_s20 + $0xcb8] sm:$0xff] %v1074_v23  ;;  %v1078_v25 = vld [vmem:[%s4836_s19 + $0x1988] sm:$0xff]  ;;  %v1080_v26 = vld [vmem:[%s4836_s19 + $0x1990] sm:$0xff] }
  0xe8   : > { %1077 = vst [vmem:[%s4841_s20 + $0xcc0] sm:$0xff] %v1076_v24  ;;  %1079 = vst [vmem:[%s4841_s20 + $0xcc8] sm:$0xff] %v1078_v25  ;;  %v1082_v27 = vld [vmem:[%s4836_s19 + $0x1998] sm:$0xff]  ;;  %v1084_v28 = vld [vmem:[%s4836_s19 + $0x19c0] sm:$0xff] }
  0xe9   : > { %1081 = vst [vmem:[%s4841_s20 + $0xcd0] sm:$0xff] %v1080_v26  ;;  %v1086_v29 = vld [vmem:[%s4836_s19 + $0x19c8] sm:$0xff]  ;;  %1083 = vst [vmem:[%s4841_s20 + $0xcd8] sm:$0xff] %v1082_v27  ;;  %v1088_v30 = vld [vmem:[%s4836_s19 + $0x19d0] sm:$0xff] }
  0xea   : > { %1085 = vst [vmem:[%s4841_s20 + $0xce0] sm:$0xff] %v1084_v28  ;;  %1087 = vst [vmem:[%s4841_s20 + $0xce8] sm:$0xff] %v1086_v29  ;;  %v1090_v31 = vld [vmem:[%s4836_s19 + $0x19d8] sm:$0xff]  ;;  %v1092_v32 = vld [vmem:[%s4836_s19 + $0x1a00] sm:$0xff] }
  0xeb   : > { %1089 = vst [vmem:[%s4841_s20 + $0xcf0] sm:$0xff] %v1088_v30  ;;  %1091 = vst [vmem:[%s4841_s20 + $0xcf8] sm:$0xff] %v1090_v31  ;;  %v1094_v33 = vld [vmem:[%s4836_s19 + $0x1a08] sm:$0xff]  ;;  %v1096_v34 = vld [vmem:[%s4836_s19 + $0x1a10] sm:$0xff] }
  0xec   : > { %1093 = vst [vmem:[%s4841_s20 + $0xd00] sm:$0xff] %v1092_v32  ;;  %v1098_v35 = vld [vmem:[%s4836_s19 + $0x1a18] sm:$0xff]  ;;  %1095 = vst [vmem:[%s4841_s20 + $0xd08] sm:$0xff] %v1094_v33  ;;  %v1100_v36 = vld [vmem:[%s4836_s19 + $0x1a40] sm:$0xff] }
  0xed   : > { %1097 = vst [vmem:[%s4841_s20 + $0xd10] sm:$0xff] %v1096_v34  ;;  %1099 = vst [vmem:[%s4841_s20 + $0xd18] sm:$0xff] %v1098_v35  ;;  %v1102_v37 = vld [vmem:[%s4836_s19 + $0x1a48] sm:$0xff]  ;;  %v1104_v38 = vld [vmem:[%s4836_s19 + $0x1a50] sm:$0xff] }
  0xee   : > { %1101 = vst [vmem:[%s4841_s20 + $0xd20] sm:$0xff] %v1100_v36  ;;  %1103 = vst [vmem:[%s4841_s20 + $0xd28] sm:$0xff] %v1102_v37  ;;  %v1106_v39 = vld [vmem:[%s4836_s19 + $0x1a58] sm:$0xff]  ;;  %v1108_v40 = vld [vmem:[%s4836_s19 + $0x1a80] sm:$0xff] }
  0xef   : > { %1105 = vst [vmem:[%s4841_s20 + $0xd30] sm:$0xff] %v1104_v38  ;;  %v1110_v41 = vld [vmem:[%s4836_s19 + $0x1a88] sm:$0xff]  ;;  %1107 = vst [vmem:[%s4841_s20 + $0xd38] sm:$0xff] %v1106_v39  ;;  %v1112_v42 = vld [vmem:[%s4836_s19 + $0x1a90] sm:$0xff] }
  0xf0   : > { %1109 = vst [vmem:[%s4841_s20 + $0xd40] sm:$0xff] %v1108_v40  ;;  %1111 = vst [vmem:[%s4841_s20 + $0xd48] sm:$0xff] %v1110_v41  ;;  %v1114_v43 = vld [vmem:[%s4836_s19 + $0x1a98] sm:$0xff]  ;;  %v1116_v44 = vld [vmem:[%s4836_s19 + $0x1ac0] sm:$0xff] }
  0xf1   : > { %1113 = vst [vmem:[%s4841_s20 + $0xd50] sm:$0xff] %v1112_v42  ;;  %1115 = vst [vmem:[%s4841_s20 + $0xd58] sm:$0xff] %v1114_v43  ;;  %v1118_v45 = vld [vmem:[%s4836_s19 + $0x1ac8] sm:$0xff]  ;;  %v1120_v46 = vld [vmem:[%s4836_s19 + $0x1ad0] sm:$0xff] }
  0xf2   : > { %1117 = vst [vmem:[%s4841_s20 + $0xd60] sm:$0xff] %v1116_v44  ;;  %v1122_v47 = vld [vmem:[%s4836_s19 + $0x1ad8] sm:$0xff]  ;;  %1119 = vst [vmem:[%s4841_s20 + $0xd68] sm:$0xff] %v1118_v45 }
  0xf3   : > { %1121 = vst [vmem:[%s4841_s20 + $0xd70] sm:$0xff] %v1120_v46  ;;  %1123 = vst [vmem:[%s4841_s20 + $0xd78] sm:$0xff] %v1122_v47 }
  0xf4 PF: > { %p4364_p7 = scmp.ge.s32.totalorder %s4735_s27, 1  ;;  %p1158_p8 = scmp.lt.s32.totalorder %s4735_s27, 7 }
  0xf6   : > { %p1159_p9 = pnand %p4364_p7, %p1158_p8 }
  0xf7   : > { %s1165_s30 = sand.u32 (!%p1159_p9), 1, %s4711_s21   ;;  %s1213_s7 = smul.u32 (!%p1159_p9), 27, %s4719_s23 }
  0xf8   : > { %1162 = sbr.rel (%p1159_p9) target bundleno = 1593 (0x639), region = 63  ;;  %s4365_s9 = sshll.u32 (!%p1159_p9), %s4723_s24, 2 }
  0xf9   : > { %s4617_s8 = smul.u32 (!%p1159_p9), 3456, %s1165_s30  ;;  %p1214_p10 = scmp.lt.s32.totalorder (!%p1159_p9), %s1213_s7, 80 }
  0xfa   : > { %p1221_p11 = scmp.lt.s32.totalorder (!%p1159_p9), %s4365_s9, 7  ;;  %p1230_p12 = scmp.lt.s32.totalorder (!%p1159_p9), %s4723_s24, 1 }
  0xfb   : > { %s6461_s0 = sld [smem:[#allocation4_spill]] (!%p1159_p9)  ;;  %s5744_s17 = scalar_lea.vmem (!%p1159_p9), [#allocation3], %s4617_s8 }
  0xfc   : > { %p4370_p13 = scmp.ne.s32.totalorder (!%p1159_p9), %s4719_s23, 0 }
  0xff   : > { %s6476_s7 = smov (!%p1214_p10, %s1213_s7), 80  ;;  %s6478_s9 = smov (!%p1221_p11, %s4365_s9), 7 }
 0x100   : > { %s1228_s18 = scalar_lea.vmem %s6456_s3, %s6478_s9  ;;  %s6480_s24 = smov (!%p1230_p12, %s4723_s24), 1  ;;  %v4737_v48 = vmov (!%p4370_p13), 0.0  }
 0x101   : > { %s5715_s13 = scalar_lea.vmem %s6461_s0, %s6476_s7  ;;  %s4377_s19 = sshll.u32 %s6480_s24, 9  ;;  %1247 = vst [vmem:[#allocation2] sm:$0xff] (!%p4370_p13), %v4737_v48 }
 0x102   : > { %s1237_s11 = scalar_lea.vmem %s6458_s5, %s6480_s24  ;;  %s5736_s0 = scalar_lea.vmem %s6457_s4, %s4377_s19 }
 0x103   : > { %s4369_s14 = sshll.u32 %s6480_s24, 1  ;;  %1246 = sbr.rel (%p4370_p13) target bundleno = 266 (0x10a), region = 71 }
 0x104   : > { %s5742_s16 = scalar_lea.vmem %s6459_s6, %s4369_s14 }
 0x10a PF: > { %v1249_v49 = vld [vmem:[%s5744_s17 + $0x8] sm:$0xff]  ;;  %v1251_v50 = vld [vmem:[%s5744_s17 + $0x18] sm:$0xff]  ;;  %v1248_v51 = vld [vmem:[%s5744_s17] sm:$0xff]  ;;  %v2557_v15 = vlaneseq  ;;  %v4738_v20 = vmov 1966171168   ;;  %p4372_p0 = scmp.ne.s32.totalorder %s4719_s23, 2 }
 0x10b   : > { %v1681_v52 = vunpack.c.l.s8.bf16 %v1249_v49  ;;  %v1685_v53 = vunpack.c.h.s8.bf16 %v1249_v49  ;;  %v1683_v54 = vunpack.c.l.s8.bf16 %v1251_v50  ;;  %v1687_v55 = vunpack.c.h.s8.bf16 %v1251_v50  ;;  %v1250_v56 = vld [vmem:[%s5744_s17 + $0x10] sm:$0xff]  ;;  %v1253_v59 = vld [vmem:[%s5744_s17 + $0x28] sm:$0xff]  ;;  %v1255_v60 = vld [vmem:[%s5744_s17 + $0x38] sm:$0xff] }
 0x10c   : > { %v1680_v57 = vunpack.c.l.s8.bf16 %v1248_v51  ;;  %v1682_v58 = vunpack.c.l.s8.bf16 %v1250_v56  ;;  %v1684_v61 = vunpack.c.h.s8.bf16 %v1248_v51  ;;  %v1686_v62 = vunpack.c.h.s8.bf16 %v1250_v56  ;;  %v1252_v1 = vld [vmem:[%s5744_s17 + $0x20] sm:$0xff]  ;;  %v1254_v2 = vld [vmem:[%s5744_s17 + $0x30] sm:$0xff]  ;;  %v1257_v7 = vld [vmem:[%s5744_s17 + $0x48] sm:$0xff] }
 0x10d   : > { %2750 = vmatprep.subr.bf16.mxu0 %v1681_v52  ;;  %3324 = vmatprep.subr.bf16.mxu1 %v1683_v54  ;;  %v1689_v63 = vunpack.c.l.s8.bf16 %v1253_v59  ;;  %v1691_v0 = vunpack.c.l.s8.bf16 %v1255_v60  ;;  %v1688_v3 = vunpack.c.l.s8.bf16 %v1252_v1  ;;  %v1690_v4 = vunpack.c.l.s8.bf16 %v1254_v2  ;;  %v1259_v8 = vld [vmem:[%s5744_s17 + $0x58] sm:$0xff]  ;;  %v1256_v13 = vld [vmem:[%s5744_s17 + $0x40] sm:$0xff]  ;;  %v1258_v14 = vld [vmem:[%s5744_s17 + $0x50] sm:$0xff] }
 0x10e   : > { %2751 = vmatpush1.bf16.msra.mxu0 %v1680_v57  ;;  %3325 = vmatpush1.bf16.msra.mxu1 %v1682_v58  ;;  %v1693_v5 = vunpack.c.h.s8.bf16 %v1253_v59  ;;  %v1695_v6 = vunpack.c.h.s8.bf16 %v1255_v60  ;;  %v1692_v9 = vunpack.c.h.s8.bf16 %v1252_v1  ;;  %v1694_v10 = vunpack.c.h.s8.bf16 %v1254_v2  ;;  %v1261_v23 = vld [vmem:[%s5744_s17 + $0x68] sm:$0xff]  ;;  %v1263_v24 = vld [vmem:[%s5744_s17 + $0x78] sm:$0xff]  ;;  %v1260_v31 = vld [vmem:[%s5744_s17 + $0x60] sm:$0xff] }
 0x10f   : > { %2752 = vmatprep.subr.bf16.mxu0 %v1685_v53  ;;  %3326 = vmatprep.subr.bf16.mxu1 %v1687_v55  ;;  %v1697_v11 = vunpack.c.l.s8.bf16 %v1257_v7  ;;  %v1699_v12 = vunpack.c.l.s8.bf16 %v1259_v8  ;;  %v1696_v16 = vunpack.c.l.s8.bf16 %v1256_v13  ;;  %v1698_v17 = vunpack.c.l.s8.bf16 %v1258_v14  ;;  %v5764_v28 = vld [vmem:[%s5715_s13] sm:$0xff]  ;;  %v1262_v32 = vld [vmem:[%s5744_s17 + $0x70] sm:$0xff]  ;;  %v1265_v40 = vld [vmem:[%s5744_s17 + $0x88] sm:$0xff] }
 0x110   : > { %v1701_v18 = vunpack.c.h.s8.bf16 %v1257_v7  ;;  %v1703_v19 = vunpack.c.h.s8.bf16 %v1259_v8  ;;  %v2555_v21 = vunpack.c.l.s4 %v4738_v20  ;;  %v5759_v22 = vshrl.u32 %v2557_v15, 7  ;;  %v1267_v41 = vld [vmem:[%s5744_s17 + $0x98] sm:$0xff]  ;;  %v1264_v47 = vld [vmem:[%s5744_s17 + $0x80] sm:$0xff]  ;;  %v1266_v48 = vld [vmem:[%s5744_s17 + $0x90] sm:$0xff] }
 0x111   : > { %v1700_v26 = vunpack.c.h.s8.bf16 %v1256_v13  ;;  %v1702_v27 = vunpack.c.h.s8.bf16 %v1258_v14  ;;  %v1705_v29 = vunpack.c.l.s8.bf16 %v1261_v23  ;;  %v1707_v30 = vunpack.c.l.s8.bf16 %v1263_v24  ;;  %v1269_v53 = vld [vmem:[%s5744_s17 + $0xa8] sm:$0xff]  ;;  %v1271_v54 = vld [vmem:[%s5744_s17 + $0xb8] sm:$0xff]  ;;  %v1268_v59 = vld [vmem:[%s5744_s17 + $0xa0] sm:$0xff] }
 0x112   : > { %2753 = vmatpush1.bf16.msra.mxu0 %v1684_v61  ;;  %3327 = vmatpush1.bf16.msra.mxu1 %v1686_v62  ;;  %v2556_v25 = vunpack.c.0.s8 %v2555_v21  ;;  %v1704_v35 = vunpack.c.l.s8.bf16 %v1260_v31  ;;  %v1706_v36 = vunpack.c.l.s8.bf16 %v1262_v32  ;;  %v1709_v37 = vunpack.c.h.s8.bf16 %v1261_v23  ;;  %v1270_v60 = vld [vmem:[%s5744_s17 + $0xb0] sm:$0xff]  ;;  %v1273_v1 = vld [vmem:[%s5744_s17 + $0xc8] sm:$0xff]  ;;  %v1275_v2 = vld [vmem:[%s5744_s17 + $0xd8] sm:$0xff] }
 0x113   : > { %2754 = vmatprep.subr.bf16.mxu0 %v1689_v63  ;;  %3328 = vmatprep.subr.bf16.mxu1 %v1691_v0  ;;  %v1711_v38 = vunpack.c.h.s8.bf16 %v1263_v24  ;;  %v1708_v43 = vunpack.c.h.s8.bf16 %v1260_v31  ;;  %v1710_v44 = vunpack.c.h.s8.bf16 %v1262_v32  ;;  %v1713_v45 = vunpack.c.l.s8.bf16 %v1265_v40  ;;  %v1272_v7 = vld [vmem:[%s5744_s17 + $0xc0] sm:$0xff]  ;;  %v1274_v8 = vld [vmem:[%s5744_s17 + $0xd0] sm:$0xff]  ;;  %v1277_v13 = vld [vmem:[%s5744_s17 + $0xe8] sm:$0xff] }
 0x114   : > { %v5769_v33 = vsub.s32 %v2556_v25, %v5759_v22  ;;  %v1715_v46 = vunpack.c.l.s8.bf16 %v1267_v41  ;;  %v1712_v49 = vunpack.c.l.s8.bf16 %v1264_v47  ;;  %v1714_v50 = vunpack.c.l.s8.bf16 %v1266_v48  ;;  %v1279_v14 = vld [vmem:[%s5744_s17 + $0xf8] sm:$0xff]  ;;  %v1278_v20 = vld [vmem:[%s5744_s17 + $0xf0] sm:$0xff] }
 0x115   : > { %v1717_v51 = vunpack.c.h.s8.bf16 %v1265_v40  ;;  %v1719_v52 = vunpack.c.h.s8.bf16 %v1267_v41  ;;  %v1716_v55 = vunpack.c.h.s8.bf16 %v1264_v47  ;;  %v1718_v56 = vunpack.c.h.s8.bf16 %v1266_v48 }
 0x116   : > { %2755 = vmatpush1.bf16.msra.mxu0 %v1688_v3  ;;  %3329 = vmatpush1.bf16.msra.mxu1 %v1690_v4  ;;  %v5773_v34 = vrot.slane %v5764_v28, %v5769_v33  ;;  %v1721_v57 = vunpack.c.l.s8.bf16 %v1269_v53  ;;  %v1723_v58 = vunpack.c.l.s8.bf16 %v1271_v54  ;;  %v1720_v61 = vunpack.c.l.s8.bf16 %v1268_v59 }
 0x117   : > { %2756 = vmatprep.subr.bf16.mxu0 %v1693_v5  ;;  %3330 = vmatprep.subr.bf16.mxu1 %v1695_v6  ;;  %v1722_v62 = vunpack.c.l.s8.bf16 %v1270_v60  ;;  %v1725_v63 = vunpack.c.h.s8.bf16 %v1269_v53  ;;  %v1727_v0 = vunpack.c.h.s8.bf16 %v1271_v54  ;;  %v1724_v3 = vunpack.c.h.s8.bf16 %v1268_v59  ;;  %v1289_v54 = vld [vmem:[%s5744_s17 + $0x148] sm:$0xff] }
 0x118   : > { %v2568_v39 = vcombine.high %v5773_v34, %v5773_v34  ;;  %v1726_v4 = vunpack.c.h.s8.bf16 %v1270_v60  ;;  %v1729_v5 = vunpack.c.l.s8.bf16 %v1273_v1  ;;  %v1731_v6 = vunpack.c.l.s8.bf16 %v1275_v2  ;;  %v1288_v60 = vld [vmem:[%s5744_s17 + $0x140] sm:$0xff] }
 0x119   : > { %v1732_v15 = vunpack.c.h.s8.bf16 %v1272_v7  ;;  %v1738_v23 = vunpack.c.l.s8.bf16 %v1278_v20  ;;  %v1741_v24 = vunpack.c.h.s8.bf16 %v1277_v13  ;;  %v1743_v25 = vunpack.c.h.s8.bf16 %v1279_v14 }
 0x11a   : > { %2757 = vmatpush1.bf16.msra.mxu0 %v1692_v9  ;;  %3331 = vmatpush1.bf16.msra.mxu1 %v1694_v10  ;;  %v5780_v42 = vrot.slane %v2568_v39, %v5769_v33  ;;  %v1728_v9 = vunpack.c.l.s8.bf16 %v1272_v7  ;;  %v1730_v10 = vunpack.c.l.s8.bf16 %v1274_v8 }
 0x11b   : > { %2758 = vmatprep.subr.bf16.mxu0 %v1697_v11  ;;  %3332 = vmatprep.subr.bf16.mxu1 %v1699_v12  ;;  %v1733_v11 = vunpack.c.h.s8.bf16 %v1273_v1  ;;  %v1735_v12 = vunpack.c.h.s8.bf16 %v1275_v2  ;;  %v1293_v2 = vld [vmem:[%s5744_s17 + $0x168] sm:$0xff] }
 0x11c   : > { %2782 = vmatprep.mubr.bf16.mxu0 %v5780_v42  ;;  %3356 = vmatprep.mubr.bf16.mxu1 %v5780_v42 }
 0x11e   : > { %2759 = vmatpush1.bf16.msra.mxu0 %v1696_v16  ;;  %3333 = vmatpush1.bf16.msra.mxu1 %v1698_v17  ;;  %v1734_v16 = vunpack.c.h.s8.bf16 %v1274_v8  ;;  %v1737_v17 = vunpack.c.l.s8.bf16 %v1277_v13  ;;  %v1292_v8 = vld [vmem:[%s5744_s17 + $0x160] sm:$0xff] }
 0x11f   : > { %2760 = vmatprep.subr.bf16.mxu0 %v1701_v18  ;;  %3334 = vmatprep.subr.bf16.mxu1 %v1703_v19  ;;  %v1739_v18 = vunpack.c.l.s8.bf16 %v1279_v14  ;;  %v1276_v19 = vld [vmem:[%s5744_s17 + $0xe0] sm:$0xff]  ;;  %v1297_v14 = vld [vmem:[%s5744_s17 + $0x188] sm:$0xff] }
 0x120   : > { %v1736_v21 = vunpack.c.l.s8.bf16 %v1276_v19 }
 0x122   : > { %2761 = vmatpush1.bf16.msra.mxu0 %v1700_v26  ;;  %3335 = vmatpush1.bf16.msra.mxu1 %v1702_v27  ;;  %v1281_v26 = vld [vmem:[%s5744_s17 + $0x108] sm:$0xff]  ;;  %v1283_v27 = vld [vmem:[%s5744_s17 + $0x118] sm:$0xff] }
 0x123   : > { %2762 = vmatprep.subr.bf16.mxu0 %v1705_v29  ;;  %3336 = vmatprep.subr.bf16.mxu1 %v1707_v30  ;;  %v1740_v29 = vunpack.c.h.s8.bf16 %v1276_v19  ;;  %v1742_v30 = vunpack.c.h.s8.bf16 %v1278_v20  ;;  %v1745_v31 = vunpack.c.l.s8.bf16 %v1281_v26  ;;  %v1747_v32 = vunpack.c.l.s8.bf16 %v1283_v27  ;;  %v1296_v20 = vld [vmem:[%s5744_s17 + $0x180] sm:$0xff] }
 0x124   : > { %v1749_v40 = vunpack.c.h.s8.bf16 %v1281_v26  ;;  %v1751_v41 = vunpack.c.h.s8.bf16 %v1283_v27  ;;  %v1301_v27 = vld [vmem:[%s5744_s17 + $0x1a8] sm:$0xff] }
 0x126   : > { %2763 = vmatpush1.bf16.msra.mxu0 %v1704_v35  ;;  %3337 = vmatpush1.bf16.msra.mxu1 %v1706_v36  ;;  %v1280_v35 = vld [vmem:[%s5744_s17 + $0x100] sm:$0xff]  ;;  %v1282_v36 = vld [vmem:[%s5744_s17 + $0x110] sm:$0xff] }
 0x127   : > { %2764 = vmatprep.subr.bf16.mxu0 %v1709_v37  ;;  %3338 = vmatprep.subr.bf16.mxu1 %v1711_v38  ;;  %v5804_v37 = vrot.slane %v5773_v34, %v5769_v33  ;;  %v1744_v38 = vunpack.c.l.s8.bf16 %v1280_v35  ;;  %v1746_v39 = vunpack.c.l.s8.bf16 %v1282_v36  ;;  %v1748_v34 = vunpack.c.h.s8.bf16 %v1280_v35 }
 0x12a   : > { %2765 = vmatpush1.bf16.msra.mxu0 %v1708_v43  ;;  %3339 = vmatpush1.bf16.msra.mxu1 %v1710_v44  ;;  %v1285_v43 = vld [vmem:[%s5744_s17 + $0x128] sm:$0xff]  ;;  %v1287_v44 = vld [vmem:[%s5744_s17 + $0x138] sm:$0xff] }
 0x12b   : > { %2766 = vmatprep.subr.bf16.mxu0 %v1713_v45  ;;  %3340 = vmatprep.subr.bf16.mxu1 %v1715_v46  ;;  %v2600_v45 = vcombine.high %v5780_v42, %v5780_v42  ;;  %v1750_v46 = vunpack.c.h.s8.bf16 %v1282_v36  ;;  %v1753_v47 = vunpack.c.l.s8.bf16 %v1285_v43  ;;  %v1755_v48 = vunpack.c.l.s8.bf16 %v1287_v44  ;;  %v1300_v36 = vld [vmem:[%s5744_s17 + $0x1a0] sm:$0xff] }
 0x12c   : > { %v1759_v53 = vunpack.c.h.s8.bf16 %v1287_v44  ;;  %v1305_v44 = vld [vmem:[%s5744_s17 + $0x1c8] sm:$0xff] }
 0x12e   : > { %2767 = vmatpush1.bf16.msra.mxu0 %v1712_v49  ;;  %3341 = vmatpush1.bf16.msra.mxu1 %v1714_v50  ;;  %v1284_v49 = vld [vmem:[%s5744_s17 + $0x120] sm:$0xff]  ;;  %v1286_v50 = vld [vmem:[%s5744_s17 + $0x130] sm:$0xff] }
 0x12f   : > { %2768 = vmatprep.subr.bf16.mxu0 %v1717_v51  ;;  %3342 = vmatprep.subr.bf16.mxu1 %v1719_v52  ;;  %v1752_v42 = vunpack.c.l.s8.bf16 %v1284_v49  ;;  %v1754_v51 = vunpack.c.l.s8.bf16 %v1286_v50  ;;  %v1757_v52 = vunpack.c.h.s8.bf16 %v1285_v43 }
 0x132   : > { %2769 = vmatpush1.bf16.msra.mxu0 %v1716_v55  ;;  %3343 = vmatpush1.bf16.msra.mxu1 %v1718_v56  ;;  %v1291_v55 = vld [vmem:[%s5744_s17 + $0x158] sm:$0xff]  ;;  %v1756_v56 = vunpack.c.h.s8.bf16 %v1284_v49  ;;  %v1304_v49 = vld [vmem:[%s5744_s17 + $0x1c0] sm:$0xff] }
 0x133   : > { %2770 = vmatprep.subr.bf16.mxu0 %v1721_v57  ;;  %3344 = vmatprep.subr.bf16.mxu1 %v1723_v58  ;;  %v1758_v57 = vunpack.c.h.s8.bf16 %v1286_v50  ;;  %v1761_v58 = vunpack.c.l.s8.bf16 %v1289_v54  ;;  %v1763_v59 = vunpack.c.l.s8.bf16 %v1291_v55  ;;  %v1767_v1 = vunpack.c.h.s8.bf16 %v1291_v55  ;;  %v1306_v50 = vld [vmem:[%s5744_s17 + $0x1d0] sm:$0xff]  ;;  %v1311_v55 = vld [vmem:[%s5744_s17 + $0x1f8] sm:$0xff] }
 0x136   : > { %2771 = vmatpush1.bf16.msra.mxu0 %v1720_v61  ;;  %3345 = vmatpush1.bf16.msra.mxu1 %v1722_v62  ;;  %v1290_v61 = vld [vmem:[%s5744_s17 + $0x150] sm:$0xff]  ;;  %v1760_v62 = vunpack.c.l.s8.bf16 %v1288_v60 }
 0x137   : > { %2772 = vmatprep.subr.bf16.mxu0 %v1725_v63  ;;  %3346 = vmatprep.subr.bf16.mxu1 %v1727_v0  ;;  %v1762_v63 = vunpack.c.l.s8.bf16 %v1290_v61  ;;  %v1765_v0 = vunpack.c.h.s8.bf16 %v1289_v54  ;;  %v1309_v54 = vld [vmem:[%s5744_s17 + $0x1e8] sm:$0xff] }
 0x13a   : > { %2773 = vmatpush1.bf16.msra.mxu0 %v1724_v3  ;;  %3347 = vmatpush1.bf16.msra.mxu1 %v1726_v4  ;;  %v1295_v3 = vld [vmem:[%s5744_s17 + $0x178] sm:$0xff]  ;;  %v1764_v4 = vunpack.c.h.s8.bf16 %v1288_v60  ;;  %v1308_v60 = vld [vmem:[%s5744_s17 + $0x1e0] sm:$0xff] }
 0x13b   : > { %2774 = vmatprep.subr.bf16.mxu0 %v1729_v5  ;;  %3348 = vmatprep.subr.bf16.mxu1 %v1731_v6  ;;  %v1766_v5 = vunpack.c.h.s8.bf16 %v1290_v61  ;;  %v1769_v6 = vunpack.c.l.s8.bf16 %v1293_v2  ;;  %v1771_v7 = vunpack.c.l.s8.bf16 %v1295_v3  ;;  %v1775_v13 = vunpack.c.h.s8.bf16 %v1295_v3  ;;  %v1310_v61 = vld [vmem:[%s5744_s17 + $0x1f0] sm:$0xff]  ;;  %v1313_v3 = vld [vmem:[%s5744_s17 + $0x208] sm:$0xff] }
 0x13e   : > { %2775 = vmatpush1.bf16.msra.mxu0 %v1728_v9  ;;  %3349 = vmatpush1.bf16.msra.mxu1 %v1730_v10  ;;  %v1294_v9 = vld [vmem:[%s5744_s17 + $0x170] sm:$0xff]  ;;  %v1768_v10 = vunpack.c.l.s8.bf16 %v1292_v8 }
 0x13f   : > { %2776 = vmatprep.subr.bf16.mxu0 %v1733_v11  ;;  %3350 = vmatprep.subr.bf16.mxu1 %v1735_v12  ;;  %v1770_v11 = vunpack.c.l.s8.bf16 %v1294_v9  ;;  %v1773_v12 = vunpack.c.h.s8.bf16 %v1293_v2  ;;  %v1807_v2 = vunpack.c.h.s8.bf16 %v1311_v55 }
 0x142   : > { %2777 = vmatpush1.bf16.msra.mxu0 %v1732_v15  ;;  %3351 = vmatpush1.bf16.msra.mxu1 %v1734_v16  ;;  %v1299_v15 = vld [vmem:[%s5744_s17 + $0x198] sm:$0xff]  ;;  %v1772_v16 = vunpack.c.h.s8.bf16 %v1292_v8 }
 0x143   : > { %2778 = vmatprep.subr.bf16.mxu0 %v1737_v17  ;;  %3352 = vmatprep.subr.bf16.mxu1 %v1739_v18  ;;  %v1774_v17 = vunpack.c.h.s8.bf16 %v1294_v9  ;;  %v1777_v18 = vunpack.c.l.s8.bf16 %v1297_v14  ;;  %v1779_v19 = vunpack.c.l.s8.bf16 %v1299_v15  ;;  %v1783_v26 = vunpack.c.h.s8.bf16 %v1299_v15  ;;  %v1312_v9 = vld [vmem:[%s5744_s17 + $0x200] sm:$0xff] }
 0x144   : > { %v1813_v15 = vunpack.c.h.s8.bf16 %v1313_v3 }
 0x146   : > { %2779 = vmatpush1.bf16.msra.mxu0 %v1736_v21  ;;  %3353 = vmatpush1.bf16.msra.mxu1 %v1738_v23  ;;  %v1298_v21 = vld [vmem:[%s5744_s17 + $0x190] sm:$0xff]  ;;  %v1776_v23 = vunpack.c.l.s8.bf16 %v1296_v20 }
 0x147   : > { %2780 = vmatprep.subr.bf16.mxu0 %v1741_v24  ;;  %3354 = vmatprep.subr.bf16.mxu1 %v1743_v25  ;;  %v1778_v24 = vunpack.c.l.s8.bf16 %v1298_v21  ;;  %v1781_v25 = vunpack.c.h.s8.bf16 %v1297_v14 }
 0x14a   : > { %2781 = vmatpush1.bf16.msra.mxu0 %v1740_v29  ;;  %3355 = vmatpush1.bf16.msra.mxu1 %v1742_v30  ;;  %v1303_v29 = vld [vmem:[%s5744_s17 + $0x1b8] sm:$0xff]  ;;  %v1780_v30 = vunpack.c.h.s8.bf16 %v1296_v20 }
 0x14b   : > { %2791 = vmatprep.subr.bf16.mxu0 %v1745_v31  ;;  %3365 = vmatprep.subr.bf16.mxu1 %v1747_v32  ;;  %v1782_v31 = vunpack.c.h.s8.bf16 %v1298_v21  ;;  %v1785_v32 = vunpack.c.l.s8.bf16 %v1301_v27  ;;  %v1787_v35 = vunpack.c.l.s8.bf16 %v1303_v29  ;;  %v1791_v43 = vunpack.c.h.s8.bf16 %v1303_v29 }
 0x14d   : > { %2783 = vmatmul.mubr.bf16.vlgmr.msra.gmra.mrb[0].mxu0 %v5804_v37  ;;  %3357 = vmatmul.mubr.bf16.vlgmr.msra.gmra.mrb[0].mxu1 %v5804_v37 }
 0x14e   : > { %2792 = vmatpush1.bf16.msra.mxu0 %v1744_v38  ;;  %3366 = vmatpush1.bf16.msra.mxu1 %v1746_v39  ;;  %v1302_v38 = vld [vmem:[%s5744_s17 + $0x1b0] sm:$0xff]  ;;  %v1784_v39 = vunpack.c.l.s8.bf16 %v1300_v36 }
 0x14f   : > { %2793 = vmatprep.subr.bf16.mxu0 %v1749_v40  ;;  %3367 = vmatprep.subr.bf16.mxu1 %v1751_v41  ;;  %v1786_v40 = vunpack.c.l.s8.bf16 %v1302_v38  ;;  %v1789_v41 = vunpack.c.h.s8.bf16 %v1301_v27 }
 0x150   : > { %2823 = vmatprep.mubr.bf16.mxu0 %v2600_v45  ;;  %3397 = vmatprep.mubr.bf16.mxu1 %v2600_v45  ;;  %v1307_v45 = vld [vmem:[%s5744_s17 + $0x1d8] sm:$0xff] }
 0x152   : > { %2794 = vmatpush1.bf16.msra.mxu0 %v1748_v34  ;;  %3368 = vmatpush1.bf16.msra.mxu1 %v1750_v46  ;;  %v1788_v34 = vunpack.c.h.s8.bf16 %v1300_v36  ;;  %v1790_v46 = vunpack.c.h.s8.bf16 %v1302_v38 }
 0x153   : > { %2795 = vmatprep.subr.bf16.mxu0 %v1753_v47  ;;  %3369 = vmatprep.subr.bf16.mxu1 %v1755_v48  ;;  %v1793_v47 = vunpack.c.l.s8.bf16 %v1305_v44  ;;  %v1795_v48 = vunpack.c.l.s8.bf16 %v1307_v45 }
 0x156   : > { %2796 = vmatpush1.bf16.msra.mxu0 %v1752_v42  ;;  %3370 = vmatpush1.bf16.msra.mxu1 %v1754_v51  ;;  %v1792_v42 = vunpack.c.l.s8.bf16 %v1304_v49  ;;  %v1794_v51 = vunpack.c.l.s8.bf16 %v1306_v50 }
 0x157   : > { %2797 = vmatprep.subr.bf16.mxu0 %v1757_v52  ;;  %3371 = vmatprep.subr.bf16.mxu1 %v1759_v53  ;;  %v1797_v52 = vunpack.c.h.s8.bf16 %v1305_v44  ;;  %v1799_v53 = vunpack.c.h.s8.bf16 %v1307_v45 }
 0x15a   : > { %2798 = vmatpush1.bf16.msra.mxu0 %v1756_v56  ;;  %3372 = vmatpush1.bf16.msra.mxu1 %v1758_v57  ;;  %v1796_v56 = vunpack.c.h.s8.bf16 %v1304_v49  ;;  %v1798_v57 = vunpack.c.h.s8.bf16 %v1306_v50 }
 0x15b   : > { %2799 = vmatprep.subr.bf16.mxu0 %v1761_v58  ;;  %3373 = vmatprep.subr.bf16.mxu1 %v1763_v59  ;;  %v1801_v58 = vunpack.c.l.s8.bf16 %v1309_v54  ;;  %v1803_v59 = vunpack.c.l.s8.bf16 %v1311_v55 }
 0x15e   : > { %2800 = vmatpush1.bf16.msra.mxu0 %v1760_v62  ;;  %3374 = vmatpush1.bf16.msra.mxu1 %v1762_v63  ;;  %v2553_v62 = vcombine.high %v5764_v28, %v5764_v28  ;;  %v1800_v63 = vunpack.c.l.s8.bf16 %v1308_v60  ;;  %v1809_v28 = vunpack.c.l.s8.bf16 %v1313_v3 }
 0x15f   : > { %2801 = vmatprep.subr.bf16.mxu0 %v1765_v0  ;;  %3375 = vmatprep.subr.bf16.mxu1 %v1767_v1  ;;  %v1802_v0 = vunpack.c.l.s8.bf16 %v1310_v61  ;;  %v1805_v1 = vunpack.c.h.s8.bf16 %v1309_v54 }
 0x162   : > { %2802 = vmatpush1.bf16.msra.mxu0 %v1764_v4  ;;  %3376 = vmatpush1.bf16.msra.mxu1 %v1766_v5  ;;  %v1315_v4 = vld [vmem:[%s5744_s17 + $0x218] sm:$0xff]  ;;  %v5843_v5 = vrot.slane %v2553_v62, %v5769_v33 }
 0x163   : > { %2803 = vmatprep.subr.bf16.mxu0 %v1769_v6  ;;  %3377 = vmatprep.subr.bf16.mxu1 %v1771_v7  ;;  %v1804_v6 = vunpack.c.h.s8.bf16 %v1308_v60  ;;  %v1806_v7 = vunpack.c.h.s8.bf16 %v1310_v61  ;;  %v1811_v8 = vunpack.c.l.s8.bf16 %v1315_v4 }
 0x166   : > { %2804 = vmatpush1.bf16.msra.mxu0 %v1768_v10  ;;  %3378 = vmatpush1.bf16.msra.mxu1 %v1770_v11  ;;  %v1314_v10 = vld [vmem:[%s5744_s17 + $0x210] sm:$0xff]  ;;  %v2569_v11 = vcombine.high %v5843_v5, %v5843_v5 }
 0x167   : > { %2805 = vmatprep.subr.bf16.mxu0 %v1773_v12  ;;  %3379 = vmatprep.subr.bf16.mxu1 %v1775_v13  ;;  %v2598_v12 = vcombine.high %v5804_v37, %v5804_v37  ;;  %v1808_v13 = vunpack.c.l.s8.bf16 %v1312_v9  ;;  %v1810_v14 = vunpack.c.l.s8.bf16 %v1314_v10  ;;  %v1812_v37 = vunpack.c.h.s8.bf16 %v1312_v9 }
 0x168   : > { %v1814_v20 = vunpack.c.h.s8.bf16 %v1314_v10 }
 0x16a   : > { %2806 = vmatpush1.bf16.msra.mxu0 %v1772_v16  ;;  %3380 = vmatpush1.bf16.msra.mxu1 %v1774_v17  ;;  %v1815_v16 = vunpack.c.h.s8.bf16 %v1315_v4  ;;  %v1317_v17 = vld [vmem:[%s5744_s17 + $0x228] sm:$0xff] }
 0x16b   : > { %2807 = vmatprep.subr.bf16.mxu0 %v1777_v18  ;;  %3381 = vmatprep.subr.bf16.mxu1 %v1779_v19  ;;  %v1319_v18 = vld [vmem:[%s5744_s17 + $0x238] sm:$0xff]  ;;  %v5854_v19 = vrot.slane %v2569_v11, %v5769_v33  ;;  %v1817_v21 = vunpack.c.l.s8.bf16 %v1317_v17  ;;  %v1821_v29 = vunpack.c.h.s8.bf16 %v1317_v17  ;;  %v1332_v11 = vld [vmem:[%s5744_s17 + $0x2a0] sm:$0xff]  ;;  %v1337_v17 = vld [vmem:[%s5744_s17 + $0x2c8] sm:$0xff] }
 0x16e   : > { %2808 = vmatpush1.bf16.msra.mxu0 %v1776_v23  ;;  %3382 = vmatpush1.bf16.msra.mxu1 %v1778_v24  ;;  %v1819_v23 = vunpack.c.l.s8.bf16 %v1319_v18  ;;  %v1316_v24 = vld [vmem:[%s5744_s17 + $0x220] sm:$0xff] }
 0x16f   : > { %2809 = vmatprep.subr.bf16.mxu0 %v1781_v25  ;;  %3383 = vmatprep.subr.bf16.mxu1 %v1783_v26  ;;  %v1318_v25 = vld [vmem:[%s5744_s17 + $0x230] sm:$0xff]  ;;  %v1816_v26 = vunpack.c.l.s8.bf16 %v1316_v24 }
 0x170   : > { %v1818_v27 = vunpack.c.l.s8.bf16 %v1318_v25  ;;  %v1822_v36 = vunpack.c.h.s8.bf16 %v1318_v25  ;;  %v1338_v25 = vld [vmem:[%s5744_s17 + $0x2d0] sm:$0xff] }
 0x172   : > { %2810 = vmatpush1.bf16.msra.mxu0 %v1780_v30  ;;  %3384 = vmatpush1.bf16.msra.mxu1 %v1782_v31  ;;  %v1823_v30 = vunpack.c.h.s8.bf16 %v1319_v18  ;;  %v1321_v31 = vld [vmem:[%s5744_s17 + $0x248] sm:$0xff]  ;;  %v1339_v18 = vld [vmem:[%s5744_s17 + $0x2d8] sm:$0xff] }
 0x173   : > { %2811 = vmatprep.subr.bf16.mxu0 %v1785_v32  ;;  %3385 = vmatprep.subr.bf16.mxu1 %v1787_v35  ;;  %v1323_v32 = vld [vmem:[%s5744_s17 + $0x258] sm:$0xff]  ;;  %v1820_v35 = vunpack.c.h.s8.bf16 %v1316_v24  ;;  %v1825_v38 = vunpack.c.l.s8.bf16 %v1321_v31  ;;  %v1829_v45 = vunpack.c.h.s8.bf16 %v1321_v31  ;;  %v1336_v24 = vld [vmem:[%s5744_s17 + $0x2c0] sm:$0xff]  ;;  %v1341_v31 = vld [vmem:[%s5744_s17 + $0x2e8] sm:$0xff] }
 0x176   : > { %2812 = vmatpush1.bf16.msra.mxu0 %v1784_v39  ;;  %3386 = vmatpush1.bf16.msra.mxu1 %v1786_v40  ;;  %v1827_v39 = vunpack.c.l.s8.bf16 %v1323_v32  ;;  %v1320_v40 = vld [vmem:[%s5744_s17 + $0x240] sm:$0xff] }
 0x177   : > { %2813 = vmatprep.subr.bf16.mxu0 %v1789_v41  ;;  %3387 = vmatprep.subr.bf16.mxu1 %v1791_v43  ;;  %v1322_v41 = vld [vmem:[%s5744_s17 + $0x250] sm:$0xff]  ;;  %v1824_v43 = vunpack.c.l.s8.bf16 %v1320_v40 }
 0x178   : > { %v1826_v44 = vunpack.c.l.s8.bf16 %v1322_v41  ;;  %v1830_v49 = vunpack.c.h.s8.bf16 %v1322_v41  ;;  %v1342_v41 = vld [vmem:[%s5744_s17 + $0x2f0] sm:$0xff] }
 0x17a   : > { %2814 = vmatpush1.bf16.msra.mxu0 %v1788_v34  ;;  %3388 = vmatpush1.bf16.msra.mxu1 %v1790_v46  ;;  %v1831_v34 = vunpack.c.h.s8.bf16 %v1323_v32  ;;  %v1325_v46 = vld [vmem:[%s5744_s17 + $0x268] sm:$0xff]  ;;  %v1343_v32 = vld [vmem:[%s5744_s17 + $0x2f8] sm:$0xff] }
 0x17b   : > { %2815 = vmatprep.subr.bf16.mxu0 %v1793_v47  ;;  %3389 = vmatprep.subr.bf16.mxu1 %v1795_v48  ;;  %v1327_v47 = vld [vmem:[%s5744_s17 + $0x278] sm:$0xff]  ;;  %v1828_v48 = vunpack.c.h.s8.bf16 %v1320_v40  ;;  %v1833_v50 = vunpack.c.l.s8.bf16 %v1325_v46  ;;  %v1837_v55 = vunpack.c.h.s8.bf16 %v1325_v46  ;;  %v1340_v40 = vld [vmem:[%s5744_s17 + $0x2e0] sm:$0xff]  ;;  %v1345_v46 = vld [vmem:[%s5744_s17 + $0x308] sm:$0xff] }
 0x17e   : > { %2816 = vmatpush1.bf16.msra.mxu0 %v1792_v42  ;;  %3390 = vmatpush1.bf16.msra.mxu1 %v1794_v51  ;;  %v1835_v42 = vunpack.c.l.s8.bf16 %v1327_v47  ;;  %v1324_v51 = vld [vmem:[%s5744_s17 + $0x260] sm:$0xff] }
 0x17f   : > { %2817 = vmatprep.subr.bf16.mxu0 %v1797_v52  ;;  %3391 = vmatprep.subr.bf16.mxu1 %v1799_v53  ;;  %v1326_v52 = vld [vmem:[%s5744_s17 + $0x270] sm:$0xff]  ;;  %v1832_v53 = vunpack.c.l.s8.bf16 %v1324_v51 }
 0x180   : > { %v1834_v54 = vunpack.c.l.s8.bf16 %v1326_v52  ;;  %v1838_v60 = vunpack.c.h.s8.bf16 %v1326_v52  ;;  %v1346_v52 = vld [vmem:[%s5744_s17 + $0x310] sm:$0xff] }
 0x182   : > { %2818 = vmatpush1.bf16.msra.mxu0 %v1796_v56  ;;  %3392 = vmatpush1.bf16.msra.mxu1 %v1798_v57  ;;  %v1839_v56 = vunpack.c.h.s8.bf16 %v1327_v47  ;;  %v1329_v57 = vld [vmem:[%s5744_s17 + $0x288] sm:$0xff]  ;;  %v1347_v47 = vld [vmem:[%s5744_s17 + $0x318] sm:$0xff] }
 0x183   : > { %2819 = vmatprep.subr.bf16.mxu0 %v1801_v58  ;;  %3393 = vmatprep.subr.bf16.mxu1 %v1803_v59  ;;  %v1331_v58 = vld [vmem:[%s5744_s17 + $0x298] sm:$0xff]  ;;  %v1836_v59 = vunpack.c.h.s8.bf16 %v1324_v51  ;;  %v1841_v61 = vunpack.c.l.s8.bf16 %v1329_v57  ;;  %v1845_v3 = vunpack.c.h.s8.bf16 %v1329_v57  ;;  %v1344_v51 = vld [vmem:[%s5744_s17 + $0x300] sm:$0xff]  ;;  %v1879_v57 = vunpack.c.h.s8.bf16 %v1347_v47 }
 0x184   : > { %v1843_v62 = vunpack.c.l.s8.bf16 %v1331_v58  ;;  %v1847_v4 = vunpack.c.h.s8.bf16 %v1331_v58  ;;  %v1349_v58 = vld [vmem:[%s5744_s17 + $0x328] sm:$0xff] }
 0x186   : > { %2820 = vmatpush1.bf16.msra.mxu0 %v1800_v63  ;;  %3394 = vmatpush1.bf16.msra.mxu1 %v1802_v0  ;;  %v1328_v63 = vld [vmem:[%s5744_s17 + $0x280] sm:$0xff]  ;;  %v1330_v0 = vld [vmem:[%s5744_s17 + $0x290] sm:$0xff] }
 0x187   : > { %2821 = vmatprep.subr.bf16.mxu0 %v1805_v1  ;;  %3395 = vmatprep.subr.bf16.mxu1 %v1807_v2  ;;  %v1840_v1 = vunpack.c.l.s8.bf16 %v1328_v63  ;;  %v1842_v2 = vunpack.c.l.s8.bf16 %v1330_v0 }
 0x18a   : > { %2822 = vmatpush1.bf16.msra.mxu0 %v1804_v6  ;;  %3396 = vmatpush1.bf16.msra.mxu1 %v1806_v7  ;;  %v1333_v6 = vld [vmem:[%s5744_s17 + $0x2a8] sm:$0xff]  ;;  %v1335_v7 = vld [vmem:[%s5744_s17 + $0x2b8] sm:$0xff] }
 0x18b   : > { %2832 = vmatprep.subr.bf16.mxu0 %v1809_v28  ;;  %3406 = vmatprep.subr.bf16.mxu1 %v1811_v8  ;;  %v1844_v28 = vunpack.c.h.s8.bf16 %v1328_v63  ;;  %v1846_v8 = vunpack.c.h.s8.bf16 %v1330_v0  ;;  %v1849_v9 = vunpack.c.l.s8.bf16 %v1333_v6  ;;  %v1851_v10 = vunpack.c.l.s8.bf16 %v1335_v7  ;;  %v1348_v0 = vld [vmem:[%s5744_s17 + $0x320] sm:$0xff] }
 0x18d   : > { %2824 = vmatmul.mubr.bf16.vlgmr.msra.gmra.mrb[0].mxu0 %v2598_v12  ;;  %3398 = vmatmul.mubr.bf16.vlgmr.msra.gmra.mrb[0].mxu1 %v2598_v12  ;;  %v1334_v12 = vld [vmem:[%s5744_s17 + $0x2b0] sm:$0xff] }
 0x18e   : > { %2833 = vmatpush1.bf16.msra.mxu0 %v1808_v13  ;;  %3407 = vmatpush1.bf16.msra.mxu1 %v1810_v14  ;;  %v1848_v13 = vunpack.c.l.s8.bf16 %v1332_v11  ;;  %v1850_v14 = vunpack.c.l.s8.bf16 %v1334_v12 }
 0x18f   : > { %2834 = vmatprep.subr.bf16.mxu0 %v1813_v15  ;;  %3408 = vmatprep.subr.bf16.mxu1 %v1815_v16  ;;  %v1853_v15 = vunpack.c.h.s8.bf16 %v1333_v6  ;;  %v1855_v16 = vunpack.c.h.s8.bf16 %v1335_v7  ;;  %v1353_v6 = vld [vmem:[%s5744_s17 + $0x348] sm:$0xff]  ;;  %v1355_v7 = vld [vmem:[%s5744_s17 + $0x358] sm:$0xff] }
 0x190   : > { %2864 = vmatprep.mubr.bf16.mxu0 %v5854_v19  ;;  %3438 = vmatprep.mubr.bf16.mxu1 %v5854_v19 }
 0x192   : > { %2835 = vmatpush1.bf16.msra.mxu0 %v1812_v37  ;;  %3409 = vmatpush1.bf16.msra.mxu1 %v1814_v20  ;;  %v1852_v37 = vunpack.c.h.s8.bf16 %v1332_v11  ;;  %v1854_v20 = vunpack.c.h.s8.bf16 %v1334_v12  ;;  %v1352_v11 = vld [vmem:[%s5744_s17 + $0x340] sm:$0xff]  ;;  %v1354_v12 = vld [vmem:[%s5744_s17 + $0x350] sm:$0xff] }
 0x193   : > { %2836 = vmatprep.subr.bf16.mxu0 %v1817_v21  ;;  %3410 = vmatprep.subr.bf16.mxu1 %v1819_v23  ;;  %v1857_v21 = vunpack.c.l.s8.bf16 %v1337_v17  ;;  %v1859_v23 = vunpack.c.l.s8.bf16 %v1339_v18 }
 0x196   : > { %2837 = vmatpush1.bf16.msra.mxu0 %v1816_v26  ;;  %3411 = vmatpush1.bf16.msra.mxu1 %v1818_v27  ;;  %v1856_v26 = vunpack.c.l.s8.bf16 %v1336_v24  ;;  %v1858_v27 = vunpack.c.l.s8.bf16 %v1338_v25 }
 0x197   : > { %2838 = vmatprep.subr.bf16.mxu0 %v1821_v29  ;;  %3412 = vmatprep.subr.bf16.mxu1 %v1823_v30  ;;  %v1861_v29 = vunpack.c.h.s8.bf16 %v1337_v17  ;;  %v1863_v30 = vunpack.c.h.s8.bf16 %v1339_v18  ;;  %v1357_v17 = vld [vmem:[%s5744_s17 + $0x368] sm:$0xff]  ;;  %v1359_v18 = vld [vmem:[%s5744_s17 + $0x378] sm:$0xff] }
 0x19a   : > { %2839 = vmatpush1.bf16.msra.mxu0 %v1820_v35  ;;  %3413 = vmatpush1.bf16.msra.mxu1 %v1822_v36  ;;  %v1860_v35 = vunpack.c.h.s8.bf16 %v1336_v24  ;;  %v1862_v36 = vunpack.c.h.s8.bf16 %v1338_v25  ;;  %v1356_v24 = vld [vmem:[%s5744_s17 + $0x360] sm:$0xff]  ;;  %v1358_v25 = vld [vmem:[%s5744_s17 + $0x370] sm:$0xff] }
 0x19b   : > { %2840 = vmatprep.subr.bf16.mxu0 %v1825_v38  ;;  %3414 = vmatprep.subr.bf16.mxu1 %v1827_v39  ;;  %v1865_v38 = vunpack.c.l.s8.bf16 %v1341_v31  ;;  %v1867_v39 = vunpack.c.l.s8.bf16 %v1343_v32 }
 0x19e   : > { %2841 = vmatpush1.bf16.msra.mxu0 %v1824_v43  ;;  %3415 = vmatpush1.bf16.msra.mxu1 %v1826_v44  ;;  %v1864_v43 = vunpack.c.l.s8.bf16 %v1340_v40  ;;  %v1866_v44 = vunpack.c.l.s8.bf16 %v1342_v41 }
 0x19f   : > { %2842 = vmatprep.subr.bf16.mxu0 %v1829_v45  ;;  %3416 = vmatprep.subr.bf16.mxu1 %v1831_v34  ;;  %v1869_v45 = vunpack.c.h.s8.bf16 %v1341_v31  ;;  %v1871_v34 = vunpack.c.h.s8.bf16 %v1343_v32  ;;  %v1361_v31 = vld [vmem:[%s5744_s17 + $0x388] sm:$0xff]  ;;  %v1363_v32 = vld [vmem:[%s5744_s17 + $0x398] sm:$0xff] }
 0x1a2   : > { %2843 = vmatpush1.bf16.msra.mxu0 %v1828_v48  ;;  %3417 = vmatpush1.bf16.msra.mxu1 %v1830_v49  ;;  %v1868_v48 = vunpack.c.h.s8.bf16 %v1340_v40  ;;  %v1870_v49 = vunpack.c.h.s8.bf16 %v1342_v41  ;;  %v1360_v40 = vld [vmem:[%s5744_s17 + $0x380] sm:$0xff]  ;;  %v1362_v41 = vld [vmem:[%s5744_s17 + $0x390] sm:$0xff] }
 0x1a3   : > { %2844 = vmatprep.subr.bf16.mxu0 %v1833_v50  ;;  %3418 = vmatprep.subr.bf16.mxu1 %v1835_v42  ;;  %v1873_v50 = vunpack.c.l.s8.bf16 %v1345_v46  ;;  %v1875_v42 = vunpack.c.l.s8.bf16 %v1347_v47  ;;  %v1367_v47 = vld [vmem:[%s5744_s17 + $0x3b8] sm:$0xff] }
 0x1a6   : > { %2845 = vmatpush1.bf16.msra.mxu0 %v1832_v53  ;;  %3419 = vmatpush1.bf16.msra.mxu1 %v1834_v54  ;;  %v5890_v53 = vrot.slane %v5843_v5, %v5769_v33  ;;  %v1872_v54 = vunpack.c.l.s8.bf16 %v1344_v51  ;;  %v1876_v5 = vunpack.c.h.s8.bf16 %v1344_v51  ;;  %v1364_v51 = vld [vmem:[%s5744_s17 + $0x3a0] sm:$0xff] }
 0x1a7   : > { %2846 = vmatprep.subr.bf16.mxu0 %v1837_v55  ;;  %3420 = vmatprep.subr.bf16.mxu1 %v1839_v56  ;;  %v1874_v55 = vunpack.c.l.s8.bf16 %v1346_v52  ;;  %v1877_v56 = vunpack.c.h.s8.bf16 %v1345_v46  ;;  %v1365_v46 = vld [vmem:[%s5744_s17 + $0x3a8] sm:$0xff] }
 0x1aa   : > { %2847 = vmatpush1.bf16.msra.mxu0 %v1836_v59  ;;  %3421 = vmatpush1.bf16.msra.mxu1 %v1838_v60  ;;  %v1351_v59 = vld [vmem:[%s5744_s17 + $0x338] sm:$0xff]  ;;  %v2601_v60 = vcombine.high %v5854_v19, %v5854_v19  ;;  %v1880_v19 = vunpack.c.l.s8.bf16 %v1348_v0 }
 0x1ab   : > { %2848 = vmatprep.subr.bf16.mxu0 %v1841_v61  ;;  %3422 = vmatprep.subr.bf16.mxu1 %v1843_v62  ;;  %v1878_v61 = vunpack.c.h.s8.bf16 %v1346_v52  ;;  %v1881_v62 = vunpack.c.l.s8.bf16 %v1349_v58  ;;  %v1883_v63 = vunpack.c.l.s8.bf16 %v1351_v59  ;;  %v1366_v52 = vld [vmem:[%s5744_s17 + $0x3b0] sm:$0xff] }
 0x1ae   : > { %2849 = vmatpush1.bf16.msra.mxu0 %v1840_v1  ;;  %3423 = vmatpush1.bf16.msra.mxu1 %v1842_v2  ;;  %v1350_v1 = vld [vmem:[%s5744_s17 + $0x330] sm:$0xff] }
 0x1af   : > { %2850 = vmatprep.subr.bf16.mxu0 %v1845_v3  ;;  %3424 = vmatprep.subr.bf16.mxu1 %v1847_v4  ;;  %v1882_v2 = vunpack.c.l.s8.bf16 %v1350_v1  ;;  %v1885_v3 = vunpack.c.h.s8.bf16 %v1349_v58  ;;  %v1887_v4 = vunpack.c.h.s8.bf16 %v1351_v59  ;;  %v1369_v58 = vld [vmem:[%s5744_s17 + $0x3c8] sm:$0xff]  ;;  %v1371_v59 = vld [vmem:[%s5744_s17 + $0x3d8] sm:$0xff] }
 0x1b2   : > { %2851 = vmatpush1.bf16.msra.mxu0 %v1844_v28  ;;  %3425 = vmatpush1.bf16.msra.mxu1 %v1846_v8  ;;  %v1884_v28 = vunpack.c.h.s8.bf16 %v1348_v0  ;;  %v1886_v8 = vunpack.c.h.s8.bf16 %v1350_v1  ;;  %v1370_v0 = vld [vmem:[%s5744_s17 + $0x3d0] sm:$0xff] }
 0x1b3   : > { %2852 = vmatprep.subr.bf16.mxu0 %v1849_v9  ;;  %3426 = vmatprep.subr.bf16.mxu1 %v1851_v10  ;;  %v1889_v9 = vunpack.c.l.s8.bf16 %v1353_v6  ;;  %v1891_v10 = vunpack.c.l.s8.bf16 %v1355_v7 }
 0x1b6   : > { %2853 = vmatpush1.bf16.msra.mxu0 %v1848_v13  ;;  %3427 = vmatpush1.bf16.msra.mxu1 %v1850_v14  ;;  %v1888_v13 = vunpack.c.l.s8.bf16 %v1352_v11  ;;  %v1890_v14 = vunpack.c.l.s8.bf16 %v1354_v12 }
 0x1b7   : > { %2854 = vmatprep.subr.bf16.mxu0 %v1853_v15  ;;  %3428 = vmatprep.subr.bf16.mxu1 %v1855_v16  ;;  %v1893_v15 = vunpack.c.h.s8.bf16 %v1353_v6  ;;  %v1895_v16 = vunpack.c.h.s8.bf16 %v1355_v7  ;;  %v1375_v6 = vld [vmem:[%s5744_s17 + $0x3f8] sm:$0xff] }
 0x1ba   : > { %2855 = vmatpush1.bf16.msra.mxu0 %v1852_v37  ;;  %3429 = vmatpush1.bf16.msra.mxu1 %v1854_v20  ;;  %v1892_v37 = vunpack.c.h.s8.bf16 %v1352_v11  ;;  %v1894_v20 = vunpack.c.h.s8.bf16 %v1354_v12  ;;  %v1374_v11 = vld [vmem:[%s5744_s17 + $0x3f0] sm:$0xff]  ;;  %v5925_v12 = vld [vmem:[%s5715_s13 + $0x8] sm:$0xff] }
 0x1bb   : > { %2856 = vmatprep.subr.bf16.mxu0 %v1857_v21  ;;  %3430 = vmatprep.subr.bf16.mxu1 %v1859_v23  ;;  %v1897_v21 = vunpack.c.l.s8.bf16 %v1357_v17  ;;  %v1899_v23 = vunpack.c.l.s8.bf16 %v1359_v18 }
 0x1be   : > { %2857 = vmatpush1.bf16.msra.mxu0 %v1856_v26  ;;  %3431 = vmatpush1.bf16.msra.mxu1 %v1858_v27  ;;  %v1896_v26 = vunpack.c.l.s8.bf16 %v1356_v24  ;;  %v1898_v27 = vunpack.c.l.s8.bf16 %v1358_v25 }
 0x1bf   : > { %2858 = vmatprep.subr.bf16.mxu0 %v1861_v29  ;;  %3432 = vmatprep.subr.bf16.mxu1 %v1863_v30  ;;  %v1901_v29 = vunpack.c.h.s8.bf16 %v1357_v17  ;;  %v1903_v30 = vunpack.c.h.s8.bf16 %v1359_v18  ;;  %v1377_v17 = vld [vmem:[%s5744_s17 + $0x408] sm:$0xff]  ;;  %v1379_v18 = vld [vmem:[%s5744_s17 + $0x418] sm:$0xff] }
 0x1c2   : > { %2859 = vmatpush1.bf16.msra.mxu0 %v1860_v35  ;;  %3433 = vmatpush1.bf16.msra.mxu1 %v1862_v36  ;;  %v1900_v35 = vunpack.c.h.s8.bf16 %v1356_v24  ;;  %v1902_v36 = vunpack.c.h.s8.bf16 %v1358_v25  ;;  %v1939_v24 = vunpack.c.l.s8.bf16 %v1379_v18  ;;  %v1376_v25 = vld [vmem:[%s5744_s17 + $0x400] sm:$0xff] }
 0x1c3   : > { %2860 = vmatprep.subr.bf16.mxu0 %v1865_v38  ;;  %3434 = vmatprep.subr.bf16.mxu1 %v1867_v39  ;;  %v1905_v38 = vunpack.c.l.s8.bf16 %v1361_v31  ;;  %v1907_v39 = vunpack.c.l.s8.bf16 %v1363_v32 }
 0x1c6   : > { %2861 = vmatpush1.bf16.msra.mxu0 %v1864_v43  ;;  %3435 = vmatpush1.bf16.msra.mxu1 %v1866_v44  ;;  %v1904_v43 = vunpack.c.l.s8.bf16 %v1360_v40  ;;  %v1906_v44 = vunpack.c.l.s8.bf16 %v1362_v41 }
 0x1c7   : > { %2862 = vmatprep.subr.bf16.mxu0 %v1869_v45  ;;  %3436 = vmatprep.subr.bf16.mxu1 %v1871_v34  ;;  %v1909_v45 = vunpack.c.h.s8.bf16 %v1361_v31  ;;  %v1911_v34 = vunpack.c.h.s8.bf16 %v1363_v32  ;;  %v1941_v32 = vunpack.c.h.s8.bf16 %v1377_v17 }
 0x1ca   : > { %2863 = vmatpush1.bf16.msra.mxu0 %v1868_v48  ;;  %3437 = vmatpush1.bf16.msra.mxu1 %v1870_v49  ;;  %v1908_v48 = vunpack.c.h.s8.bf16 %v1360_v40  ;;  %v1910_v49 = vunpack.c.h.s8.bf16 %v1362_v41 }
 0x1cb   : > { %2873 = vmatprep.subr.bf16.mxu0 %v1873_v50  ;;  %3447 = vmatprep.subr.bf16.mxu1 %v1875_v42  ;;  %v1913_v50 = vunpack.c.l.s8.bf16 %v1365_v46  ;;  %v1915_v42 = vunpack.c.l.s8.bf16 %v1367_v47 }
 0x1cd   : > { %2865 = vmatmul.mubr.bf16.vlgmr.msra.gmra.mrb[0].mxu0 %v5890_v53  ;;  %3439 = vmatmul.mubr.bf16.vlgmr.msra.gmra.mrb[0].mxu1 %v5890_v53 }
 0x1ce   : > { %2874 = vmatpush1.bf16.msra.mxu0 %v1872_v54  ;;  %3448 = vmatpush1.bf16.msra.mxu1 %v1874_v55  ;;  %v1912_v54 = vunpack.c.l.s8.bf16 %v1364_v51  ;;  %v1914_v55 = vunpack.c.l.s8.bf16 %v1366_v52 }
 0x1cf   : > { %2875 = vmatprep.subr.bf16.mxu0 %v1877_v56  ;;  %3449 = vmatprep.subr.bf16.mxu1 %v1879_v57  ;;  %v1917_v56 = vunpack.c.h.s8.bf16 %v1365_v46  ;;  %v1919_v57 = vunpack.c.h.s8.bf16 %v1367_v47 }
 0x1d0   : > { %2905 = vmatprep.mubr.bf16.mxu0 %v2601_v60  ;;  %3479 = vmatprep.mubr.bf16.mxu1 %v2601_v60  ;;  %v1916_v60 = vunpack.c.h.s8.bf16 %v1364_v51 }
 0x1d2   : > { %2876 = vmatpush1.bf16.msra.mxu0 %v1876_v5  ;;  %3450 = vmatpush1.bf16.msra.mxu1 %v1878_v61  ;;  %v1918_v5 = vunpack.c.h.s8.bf16 %v1366_v52  ;;  %v1921_v61 = vunpack.c.l.s8.bf16 %v1369_v58 }
 0x1d3   : > { %2877 = vmatprep.subr.bf16.mxu0 %v1881_v62  ;;  %3451 = vmatprep.subr.bf16.mxu1 %v1883_v63  ;;  %v1923_v62 = vunpack.c.l.s8.bf16 %v1371_v59  ;;  %v1368_v63 = vld [vmem:[%s5744_s17 + $0x3c0] sm:$0xff] }
 0x1d4   : > { %v1920_v1 = vunpack.c.l.s8.bf16 %v1368_v63  ;;  %v1924_v7 = vunpack.c.h.s8.bf16 %v1368_v63 }
 0x1d6   : > { %2878 = vmatpush1.bf16.msra.mxu0 %v1880_v19  ;;  %3452 = vmatpush1.bf16.msra.mxu1 %v1882_v2  ;;  %v1922_v19 = vunpack.c.l.s8.bf16 %v1370_v0  ;;  %v1925_v2 = vunpack.c.h.s8.bf16 %v1369_v58 }
 0x1d7   : > { %2879 = vmatprep.subr.bf16.mxu0 %v1885_v3  ;;  %3453 = vmatprep.subr.bf16.mxu1 %v1887_v4  ;;  %v1927_v3 = vunpack.c.h.s8.bf16 %v1371_v59  ;;  %v1373_v4 = vld [vmem:[%s5744_s17 + $0x3e8] sm:$0xff] }
 0x1da   : > { %2880 = vmatpush1.bf16.msra.mxu0 %v1884_v28  ;;  %3454 = vmatpush1.bf16.msra.mxu1 %v1886_v8  ;;  %v1926_v28 = vunpack.c.h.s8.bf16 %v1370_v0  ;;  %v1929_v8 = vunpack.c.l.s8.bf16 %v1373_v4 }
 0x1db   : > { %2881 = vmatprep.subr.bf16.mxu0 %v1889_v9  ;;  %3455 = vmatprep.subr.bf16.mxu1 %v1891_v10  ;;  %v1931_v9 = vunpack.c.l.s8.bf16 %v1375_v6  ;;  %v1372_v10 = vld [vmem:[%s5744_s17 + $0x3e0] sm:$0xff] }
 0x1de   : > { %2882 = vmatpush1.bf16.msra.mxu0 %v1888_v13  ;;  %3456 = vmatpush1.bf16.msra.mxu1 %v1890_v14  ;;  %v1928_v13 = vunpack.c.l.s8.bf16 %v1372_v10  ;;  %v1930_v14 = vunpack.c.l.s8.bf16 %v1374_v11 }
 0x1df   : > { %2883 = vmatprep.subr.bf16.mxu0 %v1893_v15  ;;  %3457 = vmatprep.subr.bf16.mxu1 %v1895_v16  ;;  %v1933_v15 = vunpack.c.h.s8.bf16 %v1373_v4  ;;  %v1935_v16 = vunpack.c.h.s8.bf16 %v1375_v6 }
 0x1e2   : > { %2884 = vmatpush1.bf16.msra.mxu0 %v1892_v37  ;;  %3458 = vmatpush1.bf16.msra.mxu1 %v1894_v20  ;;  %v5931_v37 = vrot.slane %v5925_v12, %v5769_v33  ;;  %v1932_v20 = vunpack.c.h.s8.bf16 %v1372_v10 }
 0x1e3   : > { %2885 = vmatprep.subr.bf16.mxu0 %v1897_v21  ;;  %3459 = vmatprep.subr.bf16.mxu1 %v1899_v23  ;;  %v1934_v21 = vunpack.c.h.s8.bf16 %v1374_v11  ;;  %v1937_v23 = vunpack.c.l.s8.bf16 %v1377_v17 }
 0x1e6   : > { %2886 = vmatpush1.bf16.msra.mxu0 %v1896_v26  ;;  %3460 = vmatpush1.bf16.msra.mxu1 %v1898_v27  ;;  %v1378_v26 = vld [vmem:[%s5744_s17 + $0x410] sm:$0xff]  ;;  %v2617_v27 = vcombine.high %v5931_v37, %v5931_v37 }
 0x1e7   : > { %2887 = vmatprep.subr.bf16.mxu0 %v1901_v29  ;;  %3461 = vmatprep.subr.bf16.mxu1 %v1903_v30  ;;  %v2599_v29 = vcombine.high %v5890_v53, %v5890_v53  ;;  %v1936_v30 = vunpack.c.l.s8.bf16 %v1376_v25  ;;  %v1938_v31 = vunpack.c.l.s8.bf16 %v1378_v26  ;;  %v1940_v53 = vunpack.c.h.s8.bf16 %v1376_v25 }
 0x1e8   : > { %v1942_v40 = vunpack.c.h.s8.bf16 %v1378_v26 }
 0x1ea   : > { %2888 = vmatpush1.bf16.msra.mxu0 %v1900_v35  ;;  %3462 = vmatpush1.bf16.msra.mxu1 %v1902_v36  ;;  %v1943_v35 = vunpack.c.h.s8.bf16 %v1379_v18  ;;  %v1381_v36 = vld [vmem:[%s5744_s17 + $0x428] sm:$0xff] }
 0x1eb   : > { %2889 = vmatprep.subr.bf16.mxu0 %v1905_v38  ;;  %3463 = vmatprep.subr.bf16.mxu1 %v1907_v39  ;;  %v1383_v38 = vld [vmem:[%s5744_s17 + $0x438] sm:$0xff]  ;;  %v5942_v39 = vrot.slane %v2617_v27, %v5769_v33  ;;  %v1945_v41 = vunpack.c.l.s8.bf16 %v1381_v36  ;;  %v1949_v47 = vunpack.c.h.s8.bf16 %v1381_v36 }
 0x1ee   : > { %2890 = vmatpush1.bf16.msra.mxu0 %v1904_v43  ;;  %3464 = vmatpush1.bf16.msra.mxu1 %v1906_v44  ;;  %v1947_v43 = vunpack.c.l.s8.bf16 %v1383_v38  ;;  %v1380_v44 = vld [vmem:[%s5744_s17 + $0x420] sm:$0xff] }
 0x1ef   : > { %2891 = vmatprep.subr.bf16.mxu0 %v1909_v45  ;;  %3465 = vmatprep.subr.bf16.mxu1 %v1911_v34  ;;  %v1382_v45 = vld [vmem:[%s5744_s17 + $0x430] sm:$0xff]  ;;  %v1944_v34 = vunpack.c.l.s8.bf16 %v1380_v44 }
 0x1f0   : > { %v1946_v46 = vunpack.c.l.s8.bf16 %v1382_v45  ;;  %v1950_v51 = vunpack.c.h.s8.bf16 %v1382_v45  ;;  %v1400_v45 = vld [vmem:[%s5744_s17 + $0x4c0] sm:$0xff] }
 0x1f2   : > { %2892 = vmatpush1.bf16.msra.mxu0 %v1908_v48  ;;  %3466 = vmatpush1.bf16.msra.mxu1 %v1910_v49  ;;  %v1951_v48 = vunpack.c.h.s8.bf16 %v1383_v38  ;;  %v1385_v49 = vld [vmem:[%s5744_s17 + $0x448] sm:$0xff] }
 0x1f3   : > { %2893 = vmatprep.subr.bf16.mxu0 %v1913_v50  ;;  %3467 = vmatprep.subr.bf16.mxu1 %v1915_v42  ;;  %v1387_v50 = vld [vmem:[%s5744_s17 + $0x458] sm:$0xff]  ;;  %v1948_v42 = vunpack.c.h.s8.bf16 %v1380_v44  ;;  %v1953_v52 = vunpack.c.l.s8.bf16 %v1385_v49  ;;  %v1957_v59 = vunpack.c.h.s8.bf16 %v1385_v49  ;;  %v1401_v38 = vld [vmem:[%s5744_s17 + $0x4c8] sm:$0xff] }
 0x1f6   : > { %2894 = vmatpush1.bf16.msra.mxu0 %v1912_v54  ;;  %3468 = vmatpush1.bf16.msra.mxu1 %v1914_v55  ;;  %v1955_v54 = vunpack.c.l.s8.bf16 %v1387_v50  ;;  %v1384_v55 = vld [vmem:[%s5744_s17 + $0x440] sm:$0xff] }
 0x1f7   : > { %2895 = vmatprep.subr.bf16.mxu0 %v1917_v56  ;;  %3469 = vmatprep.subr.bf16.mxu1 %v1919_v57  ;;  %v1386_v56 = vld [vmem:[%s5744_s17 + $0x450] sm:$0xff]  ;;  %v1952_v57 = vunpack.c.l.s8.bf16 %v1384_v55 }
 0x1f8   : > { %v1954_v58 = vunpack.c.l.s8.bf16 %v1386_v56  ;;  %v1958_v63 = vunpack.c.h.s8.bf16 %v1386_v56  ;;  %v1404_v56 = vld [vmem:[%s5744_s17 + $0x4e0] sm:$0xff] }
 0x1fa   : > { %2896 = vmatpush1.bf16.msra.mxu0 %v1916_v60  ;;  %3470 = vmatpush1.bf16.msra.mxu1 %v1918_v5  ;;  %v1959_v60 = vunpack.c.h.s8.bf16 %v1387_v50  ;;  %v1389_v5 = vld [vmem:[%s5744_s17 + $0x468] sm:$0xff] }
 0x1fb   : > { %2897 = vmatprep.subr.bf16.mxu0 %v1921_v61  ;;  %3471 = vmatprep.subr.bf16.mxu1 %v1923_v62  ;;  %v1391_v61 = vld [vmem:[%s5744_s17 + $0x478] sm:$0xff]  ;;  %v1956_v62 = vunpack.c.h.s8.bf16 %v1384_v55  ;;  %v1961_v0 = vunpack.c.l.s8.bf16 %v1389_v5  ;;  %v1965_v6 = vunpack.c.h.s8.bf16 %v1389_v5  ;;  %v1405_v50 = vld [vmem:[%s5744_s17 + $0x4e8] sm:$0xff] }
 0x1fe   : > { %2898 = vmatpush1.bf16.msra.mxu0 %v1920_v1  ;;  %3472 = vmatpush1.bf16.msra.mxu1 %v1922_v19  ;;  %v1963_v1 = vunpack.c.l.s8.bf16 %v1391_v61  ;;  %v1388_v19 = vld [vmem:[%s5744_s17 + $0x460] sm:$0xff] }
 0x1ff   : > { %2899 = vmatprep.subr.bf16.mxu0 %v1925_v2  ;;  %3473 = vmatprep.subr.bf16.mxu1 %v1927_v3  ;;  %v1390_v2 = vld [vmem:[%s5744_s17 + $0x470] sm:$0xff]  ;;  %v1960_v3 = vunpack.c.l.s8.bf16 %v1388_v19 }
 0x200   : > { %v1962_v4 = vunpack.c.l.s8.bf16 %v1390_v2  ;;  %v1966_v10 = vunpack.c.h.s8.bf16 %v1390_v2  ;;  %v1408_v2 = vld [vmem:[%s5744_s17 + $0x500] sm:$0xff] }
 0x202   : > { %2900 = vmatpush1.bf16.msra.mxu0 %v1924_v7  ;;  %3474 = vmatpush1.bf16.msra.mxu1 %v1926_v28  ;;  %v1967_v7 = vunpack.c.h.s8.bf16 %v1391_v61  ;;  %v1393_v28 = vld [vmem:[%s5744_s17 + $0x488] sm:$0xff] }
 0x203   : > { %2901 = vmatprep.subr.bf16.mxu0 %v1929_v8  ;;  %3475 = vmatprep.subr.bf16.mxu1 %v1931_v9  ;;  %v1395_v8 = vld [vmem:[%s5744_s17 + $0x498] sm:$0xff]  ;;  %v1964_v9 = vunpack.c.h.s8.bf16 %v1388_v19  ;;  %v1969_v11 = vunpack.c.l.s8.bf16 %v1393_v28  ;;  %v1973_v18 = vunpack.c.h.s8.bf16 %v1393_v28  ;;  %v1409_v61 = vld [vmem:[%s5744_s17 + $0x508] sm:$0xff] }
 0x204   : > { %v2005_v28 = vunpack.c.h.s8.bf16 %v1409_v61 }
 0x206   : > { %2902 = vmatpush1.bf16.msra.mxu0 %v1928_v13  ;;  %3476 = vmatpush1.bf16.msra.mxu1 %v1930_v14  ;;  %v1971_v13 = vunpack.c.l.s8.bf16 %v1395_v8  ;;  %v1392_v14 = vld [vmem:[%s5744_s17 + $0x480] sm:$0xff] }
 0x207   : > { %2903 = vmatprep.subr.bf16.mxu0 %v1933_v15  ;;  %3477 = vmatprep.subr.bf16.mxu1 %v1935_v16  ;;  %v1394_v15 = vld [vmem:[%s5744_s17 + $0x490] sm:$0xff]  ;;  %v1968_v16 = vunpack.c.l.s8.bf16 %v1392_v14 }
 0x208   : > { %v1970_v17 = vunpack.c.l.s8.bf16 %v1394_v15  ;;  %v1974_v25 = vunpack.c.h.s8.bf16 %v1394_v15 }
 0x20a   : > { %2904 = vmatpush1.bf16.msra.mxu0 %v1932_v20  ;;  %3478 = vmatpush1.bf16.msra.mxu1 %v1934_v21  ;;  %v1975_v20 = vunpack.c.h.s8.bf16 %v1395_v8  ;;  %v1397_v21 = vld [vmem:[%s5744_s17 + $0x4a8] sm:$0xff] }
 0x20b   : > { %2914 = vmatprep.subr.bf16.mxu0 %v1937_v23  ;;  %3488 = vmatprep.subr.bf16.mxu1 %v1939_v24  ;;  %v1399_v23 = vld [vmem:[%s5744_s17 + $0x4b8] sm:$0xff]  ;;  %v1972_v24 = vunpack.c.h.s8.bf16 %v1392_v14  ;;  %v1977_v26 = vunpack.c.l.s8.bf16 %v1397_v21 }
 0x20c   : > { %v1979_v27 = vunpack.c.l.s8.bf16 %v1399_v23  ;;  %v1983_v36 = vunpack.c.h.s8.bf16 %v1399_v23  ;;  %v1417_v23 = vld [vmem:[%s5744_s17 + $0x548] sm:$0xff] }
 0x20d   : > { %2906 = vmatmul.mubr.bf16.vlgmr.msra.gmra.mrb[0].mxu0 %v2599_v29  ;;  %3480 = vmatmul.mubr.bf16.vlgmr.msra.gmra.mrb[0].mxu1 %v2599_v29  ;;  %v1396_v29 = vld [vmem:[%s5744_s17 + $0x4a0] sm:$0xff] }
 0x20e   : > { %2915 = vmatpush1.bf16.msra.mxu0 %v1936_v30  ;;  %3489 = vmatpush1.bf16.msra.mxu1 %v1938_v31  ;;  %v1398_v30 = vld [vmem:[%s5744_s17 + $0x4b0] sm:$0xff]  ;;  %v1976_v31 = vunpack.c.l.s8.bf16 %v1396_v29 }
 0x20f   : > { %2916 = vmatprep.subr.bf16.mxu0 %v1941_v32  ;;  %3490 = vmatprep.subr.bf16.mxu1 %v1943_v35  ;;  %v1978_v32 = vunpack.c.l.s8.bf16 %v1398_v30  ;;  %v1981_v35 = vunpack.c.h.s8.bf16 %v1397_v21 }
 0x210   : > { %2946 = vmatprep.mubr.bf16.mxu0 %v5942_v39  ;;  %3520 = vmatprep.mubr.bf16.mxu1 %v5942_v39 }
 0x212   : > { %2917 = vmatpush1.bf16.msra.mxu0 %v1940_v53  ;;  %3491 = vmatpush1.bf16.msra.mxu1 %v1942_v40  ;;  %v1403_v53 = vld [vmem:[%s5744_s17 + $0x4d8] sm:$0xff]  ;;  %v1980_v40 = vunpack.c.h.s8.bf16 %v1396_v29 }
 0x213   : > { %2918 = vmatprep.subr.bf16.mxu0 %v1945_v41  ;;  %3492 = vmatprep.subr.bf16.mxu1 %v1947_v43  ;;  %v1982_v41 = vunpack.c.h.s8.bf16 %v1398_v30  ;;  %v1985_v43 = vunpack.c.l.s8.bf16 %v1401_v38  ;;  %v1987_v44 = vunpack.c.l.s8.bf16 %v1403_v53  ;;  %v1991_v49 = vunpack.c.h.s8.bf16 %v1403_v53  ;;  %v1416_v30 = vld [vmem:[%s5744_s17 + $0x540] sm:$0xff]  ;;  %v1421_v53 = vld [vmem:[%s5744_s17 + $0x568] sm:$0xff] }
 0x216   : > { %2919 = vmatpush1.bf16.msra.mxu0 %v1944_v34  ;;  %3493 = vmatpush1.bf16.msra.mxu1 %v1946_v46  ;;  %v1402_v34 = vld [vmem:[%s5744_s17 + $0x4d0] sm:$0xff]  ;;  %v1984_v46 = vunpack.c.l.s8.bf16 %v1400_v45 }
 0x217   : > { %2920 = vmatprep.subr.bf16.mxu0 %v1949_v47  ;;  %3494 = vmatprep.subr.bf16.mxu1 %v1951_v48  ;;  %v1986_v47 = vunpack.c.l.s8.bf16 %v1402_v34  ;;  %v1989_v48 = vunpack.c.h.s8.bf16 %v1401_v38 }
 0x21a   : > { %2921 = vmatpush1.bf16.msra.mxu0 %v1948_v42  ;;  %3495 = vmatpush1.bf16.msra.mxu1 %v1950_v51  ;;  %v1407_v42 = vld [vmem:[%s5744_s17 + $0x4f8] sm:$0xff]  ;;  %v1988_v51 = vunpack.c.h.s8.bf16 %v1400_v45 }
 0x21b   : > { %2922 = vmatprep.subr.bf16.mxu0 %v1953_v52  ;;  %3496 = vmatprep.subr.bf16.mxu1 %v1955_v54  ;;  %v1990_v52 = vunpack.c.h.s8.bf16 %v1402_v34  ;;  %v1993_v54 = vunpack.c.l.s8.bf16 %v1405_v50  ;;  %v1995_v55 = vunpack.c.l.s8.bf16 %v1407_v42  ;;  %v1999_v5 = vunpack.c.h.s8.bf16 %v1407_v42  ;;  %v1420_v34 = vld [vmem:[%s5744_s17 + $0x560] sm:$0xff]  ;;  %v1425_v42 = vld [vmem:[%s5744_s17 + $0x588] sm:$0xff] }
 0x21e   : > { %2923 = vmatpush1.bf16.msra.mxu0 %v1952_v57  ;;  %3497 = vmatpush1.bf16.msra.mxu1 %v1954_v58  ;;  %v1406_v57 = vld [vmem:[%s5744_s17 + $0x4f0] sm:$0xff]  ;;  %v1992_v58 = vunpack.c.l.s8.bf16 %v1404_v56 }
 0x21f   : > { %2924 = vmatprep.subr.bf16.mxu0 %v1957_v59  ;;  %3498 = vmatprep.subr.bf16.mxu1 %v1959_v60  ;;  %v1994_v59 = vunpack.c.l.s8.bf16 %v1406_v57  ;;  %v1997_v60 = vunpack.c.h.s8.bf16 %v1405_v50 }
 0x222   : > { %2925 = vmatpush1.bf16.msra.mxu0 %v1956_v62  ;;  %3499 = vmatpush1.bf16.msra.mxu1 %v1958_v63  ;;  %v1411_v62 = vld [vmem:[%s5744_s17 + $0x518] sm:$0xff]  ;;  %v1996_v63 = vunpack.c.h.s8.bf16 %v1404_v56 }
 0x223   : > { %2926 = vmatprep.subr.bf16.mxu0 %v1961_v0  ;;  %3500 = vmatprep.subr.bf16.mxu1 %v1963_v1  ;;  %v1998_v0 = vunpack.c.h.s8.bf16 %v1406_v57  ;;  %v2001_v1 = vunpack.c.l.s8.bf16 %v1409_v61  ;;  %v2003_v19 = vunpack.c.l.s8.bf16 %v1411_v62  ;;  %v2007_v8 = vunpack.c.h.s8.bf16 %v1411_v62  ;;  %v1424_v57 = vld [vmem:[%s5744_s17 + $0x580] sm:$0xff]  ;;  %v1429_v62 = vld [vmem:[%s5744_s17 + $0x5a8] sm:$0xff] }
 0x226   : > { %2927 = vmatpush1.bf16.msra.mxu0 %v1960_v3  ;;  %3501 = vmatpush1.bf16.msra.mxu1 %v1962_v4  ;;  %v1410_v3 = vld [vmem:[%s5744_s17 + $0x510] sm:$0xff]  ;;  %v5978_v4 = vrot.slane %v5931_v37, %v5769_v33  ;;  %v2004_v37 = vunpack.c.h.s8.bf16 %v1408_v2 }
 0x227   : > { %2928 = vmatprep.subr.bf16.mxu0 %v1965_v6  ;;  %3502 = vmatprep.subr.bf16.mxu1 %v1967_v7  ;;  %v2000_v6 = vunpack.c.l.s8.bf16 %v1408_v2  ;;  %v2002_v7 = vunpack.c.l.s8.bf16 %v1410_v3 }
 0x22a   : > { %2929 = vmatpush1.bf16.msra.mxu0 %v1964_v9  ;;  %3503 = vmatpush1.bf16.msra.mxu1 %v1966_v10  ;;  %v1413_v9 = vld [vmem:[%s5744_s17 + $0x528] sm:$0xff]  ;;  %v1415_v10 = vld [vmem:[%s5744_s17 + $0x538] sm:$0xff] }
 0x22b   : > { %2930 = vmatprep.subr.bf16.mxu0 %v1969_v11  ;;  %3504 = vmatprep.subr.bf16.mxu1 %v1971_v13  ;;  %v2649_v11 = vcombine.high %v5942_v39, %v5942_v39  ;;  %v2006_v13 = vunpack.c.h.s8.bf16 %v1410_v3  ;;  %v2009_v14 = vunpack.c.l.s8.bf16 %v1413_v9  ;;  %v2011_v15 = vunpack.c.l.s8.bf16 %v1415_v10  ;;  %v1428_v3 = vld [vmem:[%s5744_s17 + $0x5a0] sm:$0xff] }
 0x22c   : > { %v2015_v21 = vunpack.c.h.s8.bf16 %v1415_v10  ;;  %v1433_v10 = vld [vmem:[%s5744_s17 + $0x5c8] sm:$0xff] }
 0x22e   : > { %2931 = vmatpush1.bf16.msra.mxu0 %v1968_v16  ;;  %3505 = vmatpush1.bf16.msra.mxu1 %v1970_v17  ;;  %v1412_v16 = vld [vmem:[%s5744_s17 + $0x520] sm:$0xff]  ;;  %v1414_v17 = vld [vmem:[%s5744_s17 + $0x530] sm:$0xff] }
 0x22f   : > { %2932 = vmatprep.subr.bf16.mxu0 %v1973_v18  ;;  %3506 = vmatprep.subr.bf16.mxu1 %v1975_v20  ;;  %v2008_v39 = vunpack.c.l.s8.bf16 %v1412_v16  ;;  %v2010_v18 = vunpack.c.l.s8.bf16 %v1414_v17  ;;  %v2013_v20 = vunpack.c.h.s8.bf16 %v1413_v9 }
 0x232   : > { %2933 = vmatpush1.bf16.msra.mxu0 %v1972_v24  ;;  %3507 = vmatpush1.bf16.msra.mxu1 %v1974_v25  ;;  %v1419_v24 = vld [vmem:[%s5744_s17 + $0x558] sm:$0xff]  ;;  %v2012_v25 = vunpack.c.h.s8.bf16 %v1412_v16  ;;  %v1432_v16 = vld [vmem:[%s5744_s17 + $0x5c0] sm:$0xff] }
 0x233   : > { %2934 = vmatprep.subr.bf16.mxu0 %v1977_v26  ;;  %3508 = vmatprep.subr.bf16.mxu1 %v1979_v27  ;;  %v2014_v26 = vunpack.c.h.s8.bf16 %v1414_v17  ;;  %v2017_v27 = vunpack.c.l.s8.bf16 %v1417_v23  ;;  %v2019_v29 = vunpack.c.l.s8.bf16 %v1419_v24  ;;  %v2023_v38 = vunpack.c.h.s8.bf16 %v1419_v24  ;;  %v1434_v17 = vld [vmem:[%s5744_s17 + $0x5d0] sm:$0xff]  ;;  %v1439_v24 = vld [vmem:[%s5744_s17 + $0x5f8] sm:$0xff] }
 0x236   : > { %2935 = vmatpush1.bf16.msra.mxu0 %v1976_v31  ;;  %3509 = vmatpush1.bf16.msra.mxu1 %v1978_v32  ;;  %v1418_v31 = vld [vmem:[%s5744_s17 + $0x550] sm:$0xff]  ;;  %v2016_v32 = vunpack.c.l.s8.bf16 %v1416_v30 }
 0x237   : > { %2936 = vmatprep.subr.bf16.mxu0 %v1981_v35  ;;  %3510 = vmatprep.subr.bf16.mxu1 %v1983_v36  ;;  %v2018_v35 = vunpack.c.l.s8.bf16 %v1418_v31  ;;  %v2021_v36 = vunpack.c.h.s8.bf16 %v1417_v23  ;;  %v1437_v23 = vld [vmem:[%s5744_s17 + $0x5e8] sm:$0xff] }
 0x23a   : > { %2937 = vmatpush1.bf16.msra.mxu0 %v1980_v40  ;;  %3511 = vmatpush1.bf16.msra.mxu1 %v1982_v41  ;;  %v1423_v40 = vld [vmem:[%s5744_s17 + $0x578] sm:$0xff]  ;;  %v2020_v41 = vunpack.c.h.s8.bf16 %v1416_v30  ;;  %v1436_v30 = vld [vmem:[%s5744_s17 + $0x5e0] sm:$0xff] }
 0x23b   : > { %2938 = vmatprep.subr.bf16.mxu0 %v1985_v43  ;;  %3512 = vmatprep.subr.bf16.mxu1 %v1987_v44  ;;  %v2022_v43 = vunpack.c.h.s8.bf16 %v1418_v31  ;;  %v2025_v44 = vunpack.c.l.s8.bf16 %v1421_v53  ;;  %v2027_v45 = vunpack.c.l.s8.bf16 %v1423_v40  ;;  %v2031_v50 = vunpack.c.h.s8.bf16 %v1423_v40  ;;  %v1438_v31 = vld [vmem:[%s5744_s17 + $0x5f0] sm:$0xff]  ;;  %v1441_v40 = vld [vmem:[%s5744_s17 + $0x608] sm:$0xff] }
 0x23e   : > { %2939 = vmatpush1.bf16.msra.mxu0 %v1984_v46  ;;  %3513 = vmatpush1.bf16.msra.mxu1 %v1986_v47  ;;  %v1422_v46 = vld [vmem:[%s5744_s17 + $0x570] sm:$0xff]  ;;  %v2024_v47 = vunpack.c.l.s8.bf16 %v1420_v34 }
 0x23f   : > { %2940 = vmatprep.subr.bf16.mxu0 %v1989_v48  ;;  %3514 = vmatprep.subr.bf16.mxu1 %v1991_v49  ;;  %v2026_v48 = vunpack.c.l.s8.bf16 %v1422_v46  ;;  %v2029_v49 = vunpack.c.h.s8.bf16 %v1421_v53  ;;  %v2063_v53 = vunpack.c.h.s8.bf16 %v1439_v24 }
 0x242   : > { %2941 = vmatpush1.bf16.msra.mxu0 %v1988_v51  ;;  %3515 = vmatpush1.bf16.msra.mxu1 %v1990_v52  ;;  %v1427_v51 = vld [vmem:[%s5744_s17 + $0x598] sm:$0xff]  ;;  %v2028_v52 = vunpack.c.h.s8.bf16 %v1420_v34 }
 0x243   : > { %2942 = vmatprep.subr.bf16.mxu0 %v1993_v54  ;;  %3516 = vmatprep.subr.bf16.mxu1 %v1995_v55  ;;  %v2030_v54 = vunpack.c.h.s8.bf16 %v1422_v46  ;;  %v2033_v55 = vunpack.c.l.s8.bf16 %v1425_v42  ;;  %v2035_v56 = vunpack.c.l.s8.bf16 %v1427_v51  ;;  %v2039_v61 = vunpack.c.h.s8.bf16 %v1427_v51  ;;  %v1440_v46 = vld [vmem:[%s5744_s17 + $0x600] sm:$0xff] }
 0x244   : > { %v2069_v51 = vunpack.c.h.s8.bf16 %v1441_v40 }
 0x246   : > { %2943 = vmatpush1.bf16.msra.mxu0 %v1992_v58  ;;  %3517 = vmatpush1.bf16.msra.mxu1 %v1994_v59  ;;  %v1426_v58 = vld [vmem:[%s5744_s17 + $0x590] sm:$0xff]  ;;  %v2032_v59 = vunpack.c.l.s8.bf16 %v1424_v57 }
 0x247   : > { %2944 = vmatprep.subr.bf16.mxu0 %v1997_v60  ;;  %3518 = vmatprep.subr.bf16.mxu1 %v1999_v5  ;;  %v2034_v60 = vunpack.c.l.s8.bf16 %v1426_v58  ;;  %v2037_v5 = vunpack.c.h.s8.bf16 %v1425_v42 }
 0x24a   : > { %2945 = vmatpush1.bf16.msra.mxu0 %v1996_v63  ;;  %3519 = vmatpush1.bf16.msra.mxu1 %v1998_v0  ;;  %v1431_v63 = vld [vmem:[%s5744_s17 + $0x5b8] sm:$0xff]  ;;  %v2036_v0 = vunpack.c.h.s8.bf16 %v1424_v57 }
 0x24b   : > { %2955 = vmatprep.subr.bf16.mxu0 %v2001_v1  ;;  %3529 = vmatprep.subr.bf16.mxu1 %v2003_v19  ;;  %v2038_v1 = vunpack.c.h.s8.bf16 %v1426_v58  ;;  %v2041_v19 = vunpack.c.l.s8.bf16 %v1429_v62  ;;  %v2043_v2 = vunpack.c.l.s8.bf16 %v1431_v63  ;;  %v2047_v9 = vunpack.c.h.s8.bf16 %v1431_v63 }
 0x24d   : > { %2947 = vmatmul.mubr.bf16.vlgmr.msra.gmra.mrb[0].mxu0 %v5978_v4  ;;  %3521 = vmatmul.mubr.bf16.vlgmr.msra.gmra.mrb[0].mxu1 %v5978_v4 }
 0x24e   : > { %2956 = vmatpush1.bf16.msra.mxu0 %v2000_v6  ;;  %3530 = vmatpush1.bf16.msra.mxu1 %v2002_v7  ;;  %v1430_v6 = vld [vmem:[%s5744_s17 + $0x5b0] sm:$0xff]  ;;  %v2040_v7 = vunpack.c.l.s8.bf16 %v1428_v3 }
 0x24f   : > { %2957 = vmatprep.subr.bf16.mxu0 %v2005_v28  ;;  %3531 = vmatprep.subr.bf16.mxu1 %v2007_v8  ;;  %v2042_v28 = vunpack.c.l.s8.bf16 %v1430_v6  ;;  %v2045_v8 = vunpack.c.h.s8.bf16 %v1429_v62 }
 0x250   : > { %2987 = vmatprep.mubr.bf16.mxu0 %v2649_v11  ;;  %3561 = vmatprep.mubr.bf16.mxu1 %v2649_v11  ;;  %v1435_v11 = vld [vmem:[%s5744_s17 + $0x5d8] sm:$0xff] }
 0x252   : > { %2958 = vmatpush1.bf16.msra.mxu0 %v2004_v37  ;;  %3532 = vmatpush1.bf16.msra.mxu1 %v2006_v13  ;;  %v2044_v37 = vunpack.c.h.s8.bf16 %v1428_v3  ;;  %v2046_v13 = vunpack.c.h.s8.bf16 %v1430_v6 }
 0x253   : > { %2959 = vmatprep.subr.bf16.mxu0 %v2009_v14  ;;  %3533 = vmatprep.subr.bf16.mxu1 %v2011_v15  ;;  %v2049_v14 = vunpack.c.l.s8.bf16 %v1433_v10  ;;  %v2051_v15 = vunpack.c.l.s8.bf16 %v1435_v11 }
 0x256   : > { %2960 = vmatpush1.bf16.msra.mxu0 %v2008_v39  ;;  %3534 = vmatpush1.bf16.msra.mxu1 %v2010_v18  ;;  %v2048_v39 = vunpack.c.l.s8.bf16 %v1432_v16  ;;  %v2050_v18 = vunpack.c.l.s8.bf16 %v1434_v17 }
 0x257   : > { %2961 = vmatprep.subr.bf16.mxu0 %v2013_v20  ;;  %3535 = vmatprep.subr.bf16.mxu1 %v2015_v21  ;;  %v2053_v20 = vunpack.c.h.s8.bf16 %v1433_v10  ;;  %v2055_v21 = vunpack.c.h.s8.bf16 %v1435_v11 }
 0x25a   : > { %2962 = vmatpush1.bf16.msra.mxu0 %v2012_v25  ;;  %3536 = vmatpush1.bf16.msra.mxu1 %v2014_v26  ;;  %v2052_v25 = vunpack.c.h.s8.bf16 %v1432_v16  ;;  %v2054_v26 = vunpack.c.h.s8.bf16 %v1434_v17 }
 0x25b   : > { %2963 = vmatprep.subr.bf16.mxu0 %v2017_v27  ;;  %3537 = vmatprep.subr.bf16.mxu1 %v2019_v29  ;;  %v2057_v27 = vunpack.c.l.s8.bf16 %v1437_v23  ;;  %v2059_v29 = vunpack.c.l.s8.bf16 %v1439_v24 }
 0x25e   : > { %2964 = vmatpush1.bf16.msra.mxu0 %v2016_v32  ;;  %3538 = vmatpush1.bf16.msra.mxu1 %v2018_v35  ;;  %v2602_v32 = vcombine.high %v5925_v12, %v5925_v12  ;;  %v2056_v35 = vunpack.c.l.s8.bf16 %v1436_v30  ;;  %v2065_v12 = vunpack.c.l.s8.bf16 %v1441_v40 }
 0x25f   : > { %2965 = vmatprep.subr.bf16.mxu0 %v2021_v36  ;;  %3539 = vmatprep.subr.bf16.mxu1 %v2023_v38  ;;  %v2058_v36 = vunpack.c.l.s8.bf16 %v1438_v31  ;;  %v2061_v38 = vunpack.c.h.s8.bf16 %v1437_v23 }
 0x262   : > { %2966 = vmatpush1.bf16.msra.mxu0 %v2020_v41  ;;  %3540 = vmatpush1.bf16.msra.mxu1 %v2022_v43  ;;  %v1443_v41 = vld [vmem:[%s5744_s17 + $0x618] sm:$0xff]  ;;  %v6017_v43 = vrot.slane %v2602_v32, %v5769_v33 }
 0x263   : > { %2967 = vmatprep.subr.bf16.mxu0 %v2025_v44  ;;  %3541 = vmatprep.subr.bf16.mxu1 %v2027_v45  ;;  %v2060_v44 = vunpack.c.h.s8.bf16 %v1436_v30  ;;  %v2062_v45 = vunpack.c.h.s8.bf16 %v1438_v31  ;;  %v2067_v34 = vunpack.c.l.s8.bf16 %v1443_v41 }
 0x266   : > { %2968 = vmatpush1.bf16.msra.mxu0 %v2024_v47  ;;  %3542 = vmatpush1.bf16.msra.mxu1 %v2026_v48  ;;  %v1442_v47 = vld [vmem:[%s5744_s17 + $0x610] sm:$0xff]  ;;  %v2618_v48 = vcombine.high %v6017_v43, %v6017_v43 }
 0x267   : > { %2969 = vmatprep.subr.bf16.mxu0 %v2029_v49  ;;  %3543 = vmatprep.subr.bf16.mxu1 %v2031_v50  ;;  %v2647_v49 = vcombine.high %v5978_v4, %v5978_v4  ;;  %v2064_v50 = vunpack.c.l.s8.bf16 %v1440_v46  ;;  %v2066_v42 = vunpack.c.l.s8.bf16 %v1442_v47  ;;  %v2068_v4 = vunpack.c.h.s8.bf16 %v1440_v46 }
 0x268   : > { %v2070_v57 = vunpack.c.h.s8.bf16 %v1442_v47 }
 0x26a   : > { %2970 = vmatpush1.bf16.msra.mxu0 %v2028_v52  ;;  %3544 = vmatpush1.bf16.msra.mxu1 %v2030_v54  ;;  %v2071_v52 = vunpack.c.h.s8.bf16 %v1443_v41  ;;  %v1445_v54 = vld [vmem:[%s5744_s17 + $0x628] sm:$0xff] }
 0x26b   : > { %2971 = vmatprep.subr.bf16.mxu0 %v2033_v55  ;;  %3545 = vmatprep.subr.bf16.mxu1 %v2035_v56  ;;  %v1447_v55 = vld [vmem:[%s5744_s17 + $0x638] sm:$0xff]  ;;  %v6028_v56 = vrot.slane %v2618_v48, %v5769_v33  ;;  %v2073_v58 = vunpack.c.l.s8.bf16 %v1445_v54  ;;  %v2077_v63 = vunpack.c.h.s8.bf16 %v1445_v54  ;;  %v1460_v48 = vld [vmem:[%s5744_s17 + $0x6a0] sm:$0xff]  ;;  %v1465_v54 = vld [vmem:[%s5744_s17 + $0x6c8] sm:$0xff] }
 0x26e   : > { %2972 = vmatpush1.bf16.msra.mxu0 %v2032_v59  ;;  %3546 = vmatpush1.bf16.msra.mxu1 %v2034_v60  ;;  %v2075_v59 = vunpack.c.l.s8.bf16 %v1447_v55  ;;  %v1444_v60 = vld [vmem:[%s5744_s17 + $0x620] sm:$0xff] }
 0x26f   : > { %2973 = vmatprep.subr.bf16.mxu0 %v2037_v5  ;;  %3547 = vmatprep.subr.bf16.mxu1 %v2039_v61  ;;  %v1446_v5 = vld [vmem:[%s5744_s17 + $0x630] sm:$0xff]  ;;  %v2072_v61 = vunpack.c.l.s8.bf16 %v1444_v60 }
 0x270   : > { %v2074_v62 = vunpack.c.l.s8.bf16 %v1446_v5  ;;  %v2078_v3 = vunpack.c.h.s8.bf16 %v1446_v5  ;;  %v1466_v5 = vld [vmem:[%s5744_s17 + $0x6d0] sm:$0xff] }
 0x272   : > { %2974 = vmatpush1.bf16.msra.mxu0 %v2036_v0  ;;  %3548 = vmatpush1.bf16.msra.mxu1 %v2038_v1  ;;  %v2079_v0 = vunpack.c.h.s8.bf16 %v1447_v55  ;;  %v1449_v1 = vld [vmem:[%s5744_s17 + $0x648] sm:$0xff]  ;;  %v1467_v55 = vld [vmem:[%s5744_s17 + $0x6d8] sm:$0xff] }
 0x273   : > { %2975 = vmatprep.subr.bf16.mxu0 %v2041_v19  ;;  %3549 = vmatprep.subr.bf16.mxu1 %v2043_v2  ;;  %v1451_v19 = vld [vmem:[%s5744_s17 + $0x658] sm:$0xff]  ;;  %v2076_v2 = vunpack.c.h.s8.bf16 %v1444_v60  ;;  %v2081_v6 = vunpack.c.l.s8.bf16 %v1449_v1  ;;  %v2085_v11 = vunpack.c.h.s8.bf16 %v1449_v1  ;;  %v1464_v60 = vld [vmem:[%s5744_s17 + $0x6c0] sm:$0xff]  ;;  %v1469_v1 = vld [vmem:[%s5744_s17 + $0x6e8] sm:$0xff] }
 0x276   : > { %2976 = vmatpush1.bf16.msra.mxu0 %v2040_v7  ;;  %3550 = vmatpush1.bf16.msra.mxu1 %v2042_v28  ;;  %v2083_v7 = vunpack.c.l.s8.bf16 %v1451_v19  ;;  %v1448_v28 = vld [vmem:[%s5744_s17 + $0x640] sm:$0xff] }
 0x277   : > { %2977 = vmatprep.subr.bf16.mxu0 %v2045_v8  ;;  %3551 = vmatprep.subr.bf16.mxu1 %v2047_v9  ;;  %v1450_v8 = vld [vmem:[%s5744_s17 + $0x650] sm:$0xff]  ;;  %v2080_v9 = vunpack.c.l.s8.bf16 %v1448_v28 }
 0x278   : > { %v2082_v10 = vunpack.c.l.s8.bf16 %v1450_v8  ;;  %v2086_v16 = vunpack.c.h.s8.bf16 %v1450_v8  ;;  %v1470_v8 = vld [vmem:[%s5744_s17 + $0x6f0] sm:$0xff] }
 0x27a   : > { %2978 = vmatpush1.bf16.msra.mxu0 %v2044_v37  ;;  %3552 = vmatpush1.bf16.msra.mxu1 %v2046_v13  ;;  %v2087_v37 = vunpack.c.h.s8.bf16 %v1451_v19  ;;  %v1453_v13 = vld [vmem:[%s5744_s17 + $0x668] sm:$0xff]  ;;  %v1471_v19 = vld [vmem:[%s5744_s17 + $0x6f8] sm:$0xff] }
 0x27b   : > { %2979 = vmatprep.subr.bf16.mxu0 %v2049_v14  ;;  %3553 = vmatprep.subr.bf16.mxu1 %v2051_v15  ;;  %v1455_v14 = vld [vmem:[%s5744_s17 + $0x678] sm:$0xff]  ;;  %v2084_v15 = vunpack.c.h.s8.bf16 %v1448_v28  ;;  %v2089_v17 = vunpack.c.l.s8.bf16 %v1453_v13  ;;  %v2093_v24 = vunpack.c.h.s8.bf16 %v1453_v13  ;;  %v1468_v28 = vld [vmem:[%s5744_s17 + $0x6e0] sm:$0xff]  ;;  %v1473_v13 = vld [vmem:[%s5744_s17 + $0x708] sm:$0xff] }
 0x27e   : > { %2980 = vmatpush1.bf16.msra.mxu0 %v2048_v39  ;;  %3554 = vmatpush1.bf16.msra.mxu1 %v2050_v18  ;;  %v2091_v39 = vunpack.c.l.s8.bf16 %v1455_v14  ;;  %v1452_v18 = vld [vmem:[%s5744_s17 + $0x660] sm:$0xff] }
 0x27f   : > { %2981 = vmatprep.subr.bf16.mxu0 %v2053_v20  ;;  %3555 = vmatprep.subr.bf16.mxu1 %v2055_v21  ;;  %v1454_v20 = vld [vmem:[%s5744_s17 + $0x670] sm:$0xff]  ;;  %v2088_v21 = vunpack.c.l.s8.bf16 %v1452_v18 }
 0x280   : > { %v2090_v23 = vunpack.c.l.s8.bf16 %v1454_v20  ;;  %v2094_v30 = vunpack.c.h.s8.bf16 %v1454_v20  ;;  %v1474_v20 = vld [vmem:[%s5744_s17 + $0x710] sm:$0xff] }
 0x282   : > { %2982 = vmatpush1.bf16.msra.mxu0 %v2052_v25  ;;  %3556 = vmatpush1.bf16.msra.mxu1 %v2054_v26  ;;  %v2095_v25 = vunpack.c.h.s8.bf16 %v1455_v14  ;;  %v1457_v26 = vld [vmem:[%s5744_s17 + $0x688] sm:$0xff]  ;;  %v1475_v14 = vld [vmem:[%s5744_s17 + $0x718] sm:$0xff] }
 0x283   : > { %2983 = vmatprep.subr.bf16.mxu0 %v2057_v27  ;;  %3557 = vmatprep.subr.bf16.mxu1 %v2059_v29  ;;  %v1459_v27 = vld [vmem:[%s5744_s17 + $0x698] sm:$0xff]  ;;  %v2092_v29 = vunpack.c.h.s8.bf16 %v1452_v18  ;;  %v2097_v31 = vunpack.c.l.s8.bf16 %v1457_v26  ;;  %v2101_v40 = vunpack.c.h.s8.bf16 %v1457_v26  ;;  %v1472_v18 = vld [vmem:[%s5744_s17 + $0x700] sm:$0xff]  ;;  %v2135_v26 = vunpack.c.h.s8.bf16 %v1475_v14 }
 0x284   : > { %v2099_v32 = vunpack.c.l.s8.bf16 %v1459_v27  ;;  %v2103_v41 = vunpack.c.h.s8.bf16 %v1459_v27  ;;  %v1477_v27 = vld [vmem:[%s5744_s17 + $0x728] sm:$0xff] }
 0x286   : > { %2984 = vmatpush1.bf16.msra.mxu0 %v2056_v35  ;;  %3558 = vmatpush1.bf16.msra.mxu1 %v2058_v36  ;;  %v1456_v35 = vld [vmem:[%s5744_s17 + $0x680] sm:$0xff]  ;;  %v1458_v36 = vld [vmem:[%s5744_s17 + $0x690] sm:$0xff] }
 0x287   : > { %2985 = vmatprep.subr.bf16.mxu0 %v2061_v38  ;;  %3559 = vmatprep.subr.bf16.mxu1 %v2063_v53  ;;  %v2096_v38 = vunpack.c.l.s8.bf16 %v1456_v35  ;;  %v2098_v53 = vunpack.c.l.s8.bf16 %v1458_v36 }
 0x28a   : > { %2986 = vmatpush1.bf16.msra.mxu0 %v2060_v44  ;;  %3560 = vmatpush1.bf16.msra.mxu1 %v2062_v45  ;;  %v1461_v44 = vld [vmem:[%s5744_s17 + $0x6a8] sm:$0xff]  ;;  %v1463_v45 = vld [vmem:[%s5744_s17 + $0x6b8] sm:$0xff] }
 0x28b   : > { %2996 = vmatprep.subr.bf16.mxu0 %v2065_v12  ;;  %3570 = vmatprep.subr.bf16.mxu1 %v2067_v34  ;;  %v2100_v12 = vunpack.c.h.s8.bf16 %v1456_v35  ;;  %v2102_v34 = vunpack.c.h.s8.bf16 %v1458_v36  ;;  %v2105_v46 = vunpack.c.l.s8.bf16 %v1461_v44  ;;  %v2107_v47 = vunpack.c.l.s8.bf16 %v1463_v45  ;;  %v1476_v36 = vld [vmem:[%s5744_s17 + $0x720] sm:$0xff] }
 0x28d   : > { %2988 = vmatmul.mubr.bf16.vlgmr.msra.gmra.mrb[0].mxu0 %v2647_v49  ;;  %3562 = vmatmul.mubr.bf16.vlgmr.msra.gmra.mrb[0].mxu1 %v2647_v49  ;;  %v1462_v49 = vld [vmem:[%s5744_s17 + $0x6b0] sm:$0xff] }
 0x28e   : > { %2997 = vmatpush1.bf16.msra.mxu0 %v2064_v50  ;;  %3571 = vmatpush1.bf16.msra.mxu1 %v2066_v42  ;;  %v2104_v50 = vunpack.c.l.s8.bf16 %v1460_v48  ;;  %v2106_v42 = vunpack.c.l.s8.bf16 %v1462_v49 }
 0x28f   : > { %2998 = vmatprep.subr.bf16.mxu0 %v2069_v51  ;;  %3572 = vmatprep.subr.bf16.mxu1 %v2071_v52  ;;  %v2109_v51 = vunpack.c.h.s8.bf16 %v1461_v44  ;;  %v2111_v52 = vunpack.c.h.s8.bf16 %v1463_v45  ;;  %v1481_v44 = vld [vmem:[%s5744_s17 + $0x748] sm:$0xff]  ;;  %v1483_v45 = vld [vmem:[%s5744_s17 + $0x758] sm:$0xff] }
 0x290   : > { %3028 = vmatprep.mubr.bf16.mxu0 %v6028_v56  ;;  %3602 = vmatprep.mubr.bf16.mxu1 %v6028_v56 }
 0x292   : > { %2999 = vmatpush1.bf16.msra.mxu0 %v2068_v4  ;;  %3573 = vmatpush1.bf16.msra.mxu1 %v2070_v57  ;;  %v2108_v4 = vunpack.c.h.s8.bf16 %v1460_v48  ;;  %v2110_v57 = vunpack.c.h.s8.bf16 %v1462_v49  ;;  %v1480_v48 = vld [vmem:[%s5744_s17 + $0x740] sm:$0xff]  ;;  %v1482_v49 = vld [vmem:[%s5744_s17 + $0x750] sm:$0xff] }
 0x293   : > { %3000 = vmatprep.subr.bf16.mxu0 %v2073_v58  ;;  %3574 = vmatprep.subr.bf16.mxu1 %v2075_v59  ;;  %v2113_v58 = vunpack.c.l.s8.bf16 %v1465_v54  ;;  %v2115_v59 = vunpack.c.l.s8.bf16 %v1467_v55 }
 0x296   : > { %3001 = vmatpush1.bf16.msra.mxu0 %v2072_v61  ;;  %3575 = vmatpush1.bf16.msra.mxu1 %v2074_v62  ;;  %v2112_v61 = vunpack.c.l.s8.bf16 %v1464_v60  ;;  %v2114_v62 = vunpack.c.l.s8.bf16 %v1466_v5 }
 0x297   : > { %3002 = vmatprep.subr.bf16.mxu0 %v2077_v63  ;;  %3576 = vmatprep.subr.bf16.mxu1 %v2079_v0  ;;  %v2117_v63 = vunpack.c.h.s8.bf16 %v1465_v54  ;;  %v2119_v0 = vunpack.c.h.s8.bf16 %v1467_v55  ;;  %v1485_v54 = vld [vmem:[%s5744_s17 + $0x768] sm:$0xff]  ;;  %v1487_v55 = vld [vmem:[%s5744_s17 + $0x778] sm:$0xff] }
 0x29a   : > { %3003 = vmatpush1.bf16.msra.mxu0 %v2076_v2  ;;  %3577 = vmatpush1.bf16.msra.mxu1 %v2078_v3  ;;  %v2116_v2 = vunpack.c.h.s8.bf16 %v1464_v60  ;;  %v2118_v3 = vunpack.c.h.s8.bf16 %v1466_v5  ;;  %v1484_v60 = vld [vmem:[%s5744_s17 + $0x760] sm:$0xff]  ;;  %v1486_v5 = vld [vmem:[%s5744_s17 + $0x770] sm:$0xff] }
 0x29b   : > { %3004 = vmatprep.subr.bf16.mxu0 %v2081_v6  ;;  %3578 = vmatprep.subr.bf16.mxu1 %v2083_v7  ;;  %v2121_v6 = vunpack.c.l.s8.bf16 %v1469_v1  ;;  %v2123_v7 = vunpack.c.l.s8.bf16 %v1471_v19 }
 0x29e   : > { %3005 = vmatpush1.bf16.msra.mxu0 %v2080_v9  ;;  %3579 = vmatpush1.bf16.msra.mxu1 %v2082_v10  ;;  %v2120_v9 = vunpack.c.l.s8.bf16 %v1468_v28  ;;  %v2122_v10 = vunpack.c.l.s8.bf16 %v1470_v8 }
 0x29f   : > { %3006 = vmatprep.subr.bf16.mxu0 %v2085_v11  ;;  %3580 = vmatprep.subr.bf16.mxu1 %v2087_v37  ;;  %v2125_v11 = vunpack.c.h.s8.bf16 %v1469_v1  ;;  %v2127_v37 = vunpack.c.h.s8.bf16 %v1471_v19  ;;  %v1489_v1 = vld [vmem:[%s5744_s17 + $0x788] sm:$0xff]  ;;  %v1491_v19 = vld [vmem:[%s5744_s17 + $0x798] sm:$0xff] }
 0x2a2   : > { %3007 = vmatpush1.bf16.msra.mxu0 %v2084_v15  ;;  %3581 = vmatpush1.bf16.msra.mxu1 %v2086_v16  ;;  %v2124_v15 = vunpack.c.h.s8.bf16 %v1468_v28  ;;  %v2126_v16 = vunpack.c.h.s8.bf16 %v1470_v8  ;;  %v1488_v28 = vld [vmem:[%s5744_s17 + $0x780] sm:$0xff]  ;;  %v1490_v8 = vld [vmem:[%s5744_s17 + $0x790] sm:$0xff] }
 0x2a3   : > { %3008 = vmatprep.subr.bf16.mxu0 %v2089_v17  ;;  %3582 = vmatprep.subr.bf16.mxu1 %v2091_v39  ;;  %v2129_v17 = vunpack.c.l.s8.bf16 %v1473_v13  ;;  %v2131_v39 = vunpack.c.l.s8.bf16 %v1475_v14  ;;  %v1495_v14 = vld [vmem:[%s5744_s17 + $0x7b8] sm:$0xff] }
 0x2a6   : > { %3009 = vmatpush1.bf16.msra.mxu0 %v2088_v21  ;;  %3583 = vmatpush1.bf16.msra.mxu1 %v2090_v23  ;;  %v6064_v21 = vrot.slane %v6017_v43, %v5769_v33  ;;  %v2128_v23 = vunpack.c.l.s8.bf16 %v1472_v18  ;;  %v2132_v43 = vunpack.c.h.s8.bf16 %v1472_v18  ;;  %v1492_v18 = vld [vmem:[%s5744_s17 + $0x7a0] sm:$0xff] }
 0x2a7   : > { %3010 = vmatprep.subr.bf16.mxu0 %v2093_v24  ;;  %3584 = vmatprep.subr.bf16.mxu1 %v2095_v25  ;;  %v2130_v24 = vunpack.c.l.s8.bf16 %v1474_v20  ;;  %v2133_v25 = vunpack.c.h.s8.bf16 %v1473_v13  ;;  %v1493_v13 = vld [vmem:[%s5744_s17 + $0x7a8] sm:$0xff] }
 0x2aa   : > { %3011 = vmatpush1.bf16.msra.mxu0 %v2092_v29  ;;  %3585 = vmatpush1.bf16.msra.mxu1 %v2094_v30  ;;  %v1479_v29 = vld [vmem:[%s5744_s17 + $0x738] sm:$0xff]  ;;  %v2650_v30 = vcombine.high %v6028_v56, %v6028_v56  ;;  %v2136_v56 = vunpack.c.l.s8.bf16 %v1476_v36 }
 0x2ab   : > { %3012 = vmatprep.subr.bf16.mxu0 %v2097_v31  ;;  %3586 = vmatprep.subr.bf16.mxu1 %v2099_v32  ;;  %v2134_v31 = vunpack.c.h.s8.bf16 %v1474_v20  ;;  %v2137_v32 = vunpack.c.l.s8.bf16 %v1477_v27  ;;  %v2139_v35 = vunpack.c.l.s8.bf16 %v1479_v29  ;;  %v1494_v20 = vld [vmem:[%s5744_s17 + $0x7b0] sm:$0xff] }
 0x2ae   : > { %3013 = vmatpush1.bf16.msra.mxu0 %v2096_v38  ;;  %3587 = vmatpush1.bf16.msra.mxu1 %v2098_v53  ;;  %v1478_v38 = vld [vmem:[%s5744_s17 + $0x730] sm:$0xff] }
 0x2af   : > { %3014 = vmatprep.subr.bf16.mxu0 %v2101_v40  ;;  %3588 = vmatprep.subr.bf16.mxu1 %v2103_v41  ;;  %v2138_v53 = vunpack.c.l.s8.bf16 %v1478_v38  ;;  %v2141_v40 = vunpack.c.h.s8.bf16 %v1477_v27  ;;  %v2143_v41 = vunpack.c.h.s8.bf16 %v1479_v29  ;;  %v1497_v27 = vld [vmem:[%s5744_s17 + $0x7c8] sm:$0xff]  ;;  %v1499_v29 = vld [vmem:[%s5744_s17 + $0x7d8] sm:$0xff] }
 0x2b2   : > { %3015 = vmatpush1.bf16.msra.mxu0 %v2100_v12  ;;  %3589 = vmatpush1.bf16.msra.mxu1 %v2102_v34  ;;  %v2140_v12 = vunpack.c.h.s8.bf16 %v1476_v36  ;;  %v2142_v34 = vunpack.c.h.s8.bf16 %v1478_v38  ;;  %v1498_v36 = vld [vmem:[%s5744_s17 + $0x7d0] sm:$0xff] }
 0x2b3   : > { %3016 = vmatprep.subr.bf16.mxu0 %v2105_v46  ;;  %3590 = vmatprep.subr.bf16.mxu1 %v2107_v47  ;;  %v2145_v46 = vunpack.c.l.s8.bf16 %v1481_v44  ;;  %v2147_v47 = vunpack.c.l.s8.bf16 %v1483_v45 }
 0x2b6   : > { %3017 = vmatpush1.bf16.msra.mxu0 %v2104_v50  ;;  %3591 = vmatpush1.bf16.msra.mxu1 %v2106_v42  ;;  %v2144_v50 = vunpack.c.l.s8.bf16 %v1480_v48  ;;  %v2146_v42 = vunpack.c.l.s8.bf16 %v1482_v49 }
 0x2b7   : > { %3018 = vmatprep.subr.bf16.mxu0 %v2109_v51  ;;  %3592 = vmatprep.subr.bf16.mxu1 %v2111_v52  ;;  %v2149_v51 = vunpack.c.h.s8.bf16 %v1481_v44  ;;  %v2151_v52 = vunpack.c.h.s8.bf16 %v1483_v45  ;;  %v1503_v44 = vld [vmem:[%s5744_s17 + $0x7f8] sm:$0xff] }
 0x2ba   : > { %3019 = vmatpush1.bf16.msra.mxu0 %v2108_v4  ;;  %3593 = vmatpush1.bf16.msra.mxu1 %v2110_v57  ;;  %v2148_v4 = vunpack.c.h.s8.bf16 %v1480_v48  ;;  %v2150_v57 = vunpack.c.h.s8.bf16 %v1482_v49  ;;  %v1502_v48 = vld [vmem:[%s5744_s17 + $0x7f0] sm:$0xff]  ;;  %v6099_v49 = vld [vmem:[%s5715_s13 + $0x10] sm:$0xff] }
 0x2bb   : > { %3020 = vmatprep.subr.bf16.mxu0 %v2113_v58  ;;  %3594 = vmatprep.subr.bf16.mxu1 %v2115_v59  ;;  %v2153_v58 = vunpack.c.l.s8.bf16 %v1485_v54  ;;  %v2155_v59 = vunpack.c.l.s8.bf16 %v1487_v55 }
 0x2be   : > { %3021 = vmatpush1.bf16.msra.mxu0 %v2112_v61  ;;  %3595 = vmatpush1.bf16.msra.mxu1 %v2114_v62  ;;  %v2152_v61 = vunpack.c.l.s8.bf16 %v1484_v60  ;;  %v2154_v62 = vunpack.c.l.s8.bf16 %v1486_v5 }
 0x2bf   : > { %3022 = vmatprep.subr.bf16.mxu0 %v2117_v63  ;;  %3596 = vmatprep.subr.bf16.mxu1 %v2119_v0  ;;  %v2157_v63 = vunpack.c.h.s8.bf16 %v1485_v54  ;;  %v2159_v0 = vunpack.c.h.s8.bf16 %v1487_v55  ;;  %v1505_v54 = vld [vmem:[%s5744_s17 + $0x808] sm:$0xff]  ;;  %v1507_v55 = vld [vmem:[%s5744_s17 + $0x818] sm:$0xff] }
 0x2c2   : > { %3023 = vmatpush1.bf16.msra.mxu0 %v2116_v2  ;;  %3597 = vmatpush1.bf16.msra.mxu1 %v2118_v3  ;;  %v2156_v2 = vunpack.c.h.s8.bf16 %v1484_v60  ;;  %v2158_v3 = vunpack.c.h.s8.bf16 %v1486_v5  ;;  %v2195_v60 = vunpack.c.l.s8.bf16 %v1507_v55  ;;  %v1504_v5 = vld [vmem:[%s5744_s17 + $0x800] sm:$0xff] }
 0x2c3   : > { %3024 = vmatprep.subr.bf16.mxu0 %v2121_v6  ;;  %3598 = vmatprep.subr.bf16.mxu1 %v2123_v7  ;;  %v2161_v6 = vunpack.c.l.s8.bf16 %v1489_v1  ;;  %v2163_v7 = vunpack.c.l.s8.bf16 %v1491_v19 }
 0x2c6   : > { %3025 = vmatpush1.bf16.msra.mxu0 %v2120_v9  ;;  %3599 = vmatpush1.bf16.msra.mxu1 %v2122_v10  ;;  %v2160_v9 = vunpack.c.l.s8.bf16 %v1488_v28  ;;  %v2162_v10 = vunpack.c.l.s8.bf16 %v1490_v8 }
 0x2c7   : > { %3026 = vmatprep.subr.bf16.mxu0 %v2125_v11  ;;  %3600 = vmatprep.subr.bf16.mxu1 %v2127_v37  ;;  %v2165_v11 = vunpack.c.h.s8.bf16 %v1489_v1  ;;  %v2167_v37 = vunpack.c.h.s8.bf16 %v1491_v19  ;;  %v2197_v19 = vunpack.c.h.s8.bf16 %v1505_v54 }
 0x2ca   : > { %3027 = vmatpush1.bf16.msra.mxu0 %v2124_v15  ;;  %3601 = vmatpush1.bf16.msra.mxu1 %v2126_v16  ;;  %v2164_v15 = vunpack.c.h.s8.bf16 %v1488_v28  ;;  %v2166_v16 = vunpack.c.h.s8.bf16 %v1490_v8 }
 0x2cb   : > { %3037 = vmatprep.subr.bf16.mxu0 %v2129_v17  ;;  %3611 = vmatprep.subr.bf16.mxu1 %v2131_v39  ;;  %v2169_v17 = vunpack.c.l.s8.bf16 %v1493_v13  ;;  %v2171_v39 = vunpack.c.l.s8.bf16 %v1495_v14 }
 0x2cd   : > { %3029 = vmatmul.mubr.bf16.vlgmr.msra.gmra.mrb[0].mxu0 %v6064_v21  ;;  %3603 = vmatmul.mubr.bf16.vlgmr.msra.gmra.mrb[0].mxu1 %v6064_v21 }
 0x2ce   : > { %3038 = vmatpush1.bf16.msra.mxu0 %v2128_v23  ;;  %3612 = vmatpush1.bf16.msra.mxu1 %v2130_v24  ;;  %v2168_v23 = vunpack.c.l.s8.bf16 %v1492_v18  ;;  %v2170_v24 = vunpack.c.l.s8.bf16 %v1494_v20 }
 0x2cf   : > { %3039 = vmatprep.subr.bf16.mxu0 %v2133_v25  ;;  %3613 = vmatprep.subr.bf16.mxu1 %v2135_v26  ;;  %v2173_v25 = vunpack.c.h.s8.bf16 %v1493_v13  ;;  %v2175_v26 = vunpack.c.h.s8.bf16 %v1495_v14 }
 0x2d0   : > { %3069 = vmatprep.mubr.bf16.mxu0 %v2650_v30  ;;  %3643 = vmatprep.mubr.bf16.mxu1 %v2650_v30  ;;  %v2172_v30 = vunpack.c.h.s8.bf16 %v1492_v18 }
 0x2d2   : > { %3040 = vmatpush1.bf16.msra.mxu0 %v2132_v43  ;;  %3614 = vmatpush1.bf16.msra.mxu1 %v2134_v31  ;;  %v2174_v43 = vunpack.c.h.s8.bf16 %v1494_v20  ;;  %v2177_v31 = vunpack.c.l.s8.bf16 %v1497_v27 }
 0x2d3   : > { %3041 = vmatprep.subr.bf16.mxu0 %v2137_v32  ;;  %3615 = vmatprep.subr.bf16.mxu1 %v2139_v35  ;;  %v2179_v32 = vunpack.c.l.s8.bf16 %v1499_v29  ;;  %v1496_v35 = vld [vmem:[%s5744_s17 + $0x7c0] sm:$0xff] }
 0x2d4   : > { %v2176_v38 = vunpack.c.l.s8.bf16 %v1496_v35  ;;  %v2180_v45 = vunpack.c.h.s8.bf16 %v1496_v35 }
 0x2d6   : > { %3042 = vmatpush1.bf16.msra.mxu0 %v2136_v56  ;;  %3616 = vmatpush1.bf16.msra.mxu1 %v2138_v53  ;;  %v2178_v56 = vunpack.c.l.s8.bf16 %v1498_v36  ;;  %v2181_v53 = vunpack.c.h.s8.bf16 %v1497_v27 }
 0x2d7   : > { %3043 = vmatprep.subr.bf16.mxu0 %v2141_v40  ;;  %3617 = vmatprep.subr.bf16.mxu1 %v2143_v41  ;;  %v2183_v40 = vunpack.c.h.s8.bf16 %v1499_v29  ;;  %v1501_v41 = vld [vmem:[%s5744_s17 + $0x7e8] sm:$0xff] }
 0x2da   : > { %3044 = vmatpush1.bf16.msra.mxu0 %v2140_v12  ;;  %3618 = vmatpush1.bf16.msra.mxu1 %v2142_v34  ;;  %v2182_v12 = vunpack.c.h.s8.bf16 %v1498_v36  ;;  %v2185_v34 = vunpack.c.l.s8.bf16 %v1501_v41 }
 0x2db   : > { %3045 = vmatprep.subr.bf16.mxu0 %v2145_v46  ;;  %3619 = vmatprep.subr.bf16.mxu1 %v2147_v47  ;;  %v2187_v46 = vunpack.c.l.s8.bf16 %v1503_v44  ;;  %v1500_v47 = vld [vmem:[%s5744_s17 + $0x7e0] sm:$0xff] }
 0x2de   : > { %3046 = vmatpush1.bf16.msra.mxu0 %v2144_v50  ;;  %3620 = vmatpush1.bf16.msra.mxu1 %v2146_v42  ;;  %v2184_v50 = vunpack.c.l.s8.bf16 %v1500_v47  ;;  %v2186_v42 = vunpack.c.l.s8.bf16 %v1502_v48 }
 0x2df   : > { %3047 = vmatprep.subr.bf16.mxu0 %v2149_v51  ;;  %3621 = vmatprep.subr.bf16.mxu1 %v2151_v52  ;;  %v2189_v51 = vunpack.c.h.s8.bf16 %v1501_v41  ;;  %v2191_v52 = vunpack.c.h.s8.bf16 %v1503_v44 }
 0x2e2   : > { %3048 = vmatpush1.bf16.msra.mxu0 %v2148_v4  ;;  %3622 = vmatpush1.bf16.msra.mxu1 %v2150_v57  ;;  %v6105_v4 = vrot.slane %v6099_v49, %v5769_v33  ;;  %v2188_v57 = vunpack.c.h.s8.bf16 %v1500_v47 }
 0x2e3   : > { %3049 = vmatprep.subr.bf16.mxu0 %v2153_v58  ;;  %3623 = vmatprep.subr.bf16.mxu1 %v2155_v59  ;;  %v2190_v58 = vunpack.c.h.s8.bf16 %v1502_v48  ;;  %v2193_v59 = vunpack.c.l.s8.bf16 %v1505_v54 }
 0x2e6   : > { %3050 = vmatpush1.bf16.msra.mxu0 %v2152_v61  ;;  %3624 = vmatpush1.bf16.msra.mxu1 %v2154_v62  ;;  %v1506_v61 = vld [vmem:[%s5744_s17 + $0x810] sm:$0xff]  ;;  %v2666_v62 = vcombine.high %v6105_v4, %v6105_v4 }
 0x2e7   : > { %3051 = vmatprep.subr.bf16.mxu0 %v2157_v63  ;;  %3625 = vmatprep.subr.bf16.mxu1 %v2159_v0  ;;  %v2648_v63 = vcombine.high %v6064_v21, %v6064_v21  ;;  %v2192_v0 = vunpack.c.l.s8.bf16 %v1504_v5  ;;  %v2194_v1 = vunpack.c.l.s8.bf16 %v1506_v61  ;;  %v2196_v21 = vunpack.c.h.s8.bf16 %v1504_v5 }
 0x2e8   : > { %v2198_v28 = vunpack.c.h.s8.bf16 %v1506_v61 }
 0x2ea   : > { %3052 = vmatpush1.bf16.msra.mxu0 %v2156_v2  ;;  %3626 = vmatpush1.bf16.msra.mxu1 %v2158_v3  ;;  %v2199_v2 = vunpack.c.h.s8.bf16 %v1507_v55  ;;  %v1509_v3 = vld [vmem:[%s5744_s17 + $0x828] sm:$0xff] }
 0x2eb   : > { %3053 = vmatprep.subr.bf16.mxu0 %v2161_v6  ;;  %3627 = vmatprep.subr.bf16.mxu1 %v2163_v7  ;;  %v1511_v6 = vld [vmem:[%s5744_s17 + $0x838] sm:$0xff]  ;;  %v6116_v7 = vrot.slane %v2666_v62, %v5769_v33  ;;  %v2201_v8 = vunpack.c.l.s8.bf16 %v1509_v3  ;;  %v2205_v14 = vunpack.c.h.s8.bf16 %v1509_v3 }
 0x2ee   : > { %3054 = vmatpush1.bf16.msra.mxu0 %v2160_v9  ;;  %3628 = vmatpush1.bf16.msra.mxu1 %v2162_v10  ;;  %v2203_v9 = vunpack.c.l.s8.bf16 %v1511_v6  ;;  %v1508_v10 = vld [vmem:[%s5744_s17 + $0x820] sm:$0xff] }
 0x2ef   : > { %3055 = vmatprep.subr.bf16.mxu0 %v2165_v11  ;;  %3629 = vmatprep.subr.bf16.mxu1 %v2167_v37  ;;  %v1510_v11 = vld [vmem:[%s5744_s17 + $0x830] sm:$0xff]  ;;  %v2200_v37 = vunpack.c.l.s8.bf16 %v1508_v10 }
 0x2f0   : > { %v2202_v13 = vunpack.c.l.s8.bf16 %v1510_v11  ;;  %v2206_v18 = vunpack.c.h.s8.bf16 %v1510_v11  ;;  %v1528_v11 = vld [vmem:[%s5744_s17 + $0x8c0] sm:$0xff] }
 0x2f2   : > { %3056 = vmatpush1.bf16.msra.mxu0 %v2164_v15  ;;  %3630 = vmatpush1.bf16.msra.mxu1 %v2166_v16  ;;  %v2207_v15 = vunpack.c.h.s8.bf16 %v1511_v6  ;;  %v1513_v16 = vld [vmem:[%s5744_s17 + $0x848] sm:$0xff] }
 0x2f3   : > { %3057 = vmatprep.subr.bf16.mxu0 %v2169_v17  ;;  %3631 = vmatprep.subr.bf16.mxu1 %v2171_v39  ;;  %v1515_v17 = vld [vmem:[%s5744_s17 + $0x858] sm:$0xff]  ;;  %v2204_v39 = vunpack.c.h.s8.bf16 %v1508_v10  ;;  %v2209_v20 = vunpack.c.l.s8.bf16 %v1513_v16  ;;  %v2213_v29 = vunpack.c.h.s8.bf16 %v1513_v16  ;;  %v1529_v6 = vld [vmem:[%s5744_s17 + $0x8c8] sm:$0xff] }
 0x2f6   : > { %3058 = vmatpush1.bf16.msra.mxu0 %v2168_v23  ;;  %3632 = vmatpush1.bf16.msra.mxu1 %v2170_v24  ;;  %v2211_v23 = vunpack.c.l.s8.bf16 %v1515_v17  ;;  %v1512_v24 = vld [vmem:[%s5744_s17 + $0x840] sm:$0xff] }
 0x2f7   : > { %3059 = vmatprep.subr.bf16.mxu0 %v2173_v25  ;;  %3633 = vmatprep.subr.bf16.mxu1 %v2175_v26  ;;  %v1514_v25 = vld [vmem:[%s5744_s17 + $0x850] sm:$0xff]  ;;  %v2208_v26 = vunpack.c.l.s8.bf16 %v1512_v24 }
 0x2f8   : > { %v2210_v27 = vunpack.c.l.s8.bf16 %v1514_v25  ;;  %v2214_v35 = vunpack.c.h.s8.bf16 %v1514_v25  ;;  %v1532_v25 = vld [vmem:[%s5744_s17 + $0x8e0] sm:$0xff] }
 0x2fa   : > { %3060 = vmatpush1.bf16.msra.mxu0 %v2172_v30  ;;  %3634 = vmatpush1.bf16.msra.mxu1 %v2174_v43  ;;  %v2215_v30 = vunpack.c.h.s8.bf16 %v1515_v17  ;;  %v1517_v43 = vld [vmem:[%s5744_s17 + $0x868] sm:$0xff] }
 0x2fb   : > { %3061 = vmatprep.subr.bf16.mxu0 %v2177_v31  ;;  %3635 = vmatprep.subr.bf16.mxu1 %v2179_v32  ;;  %v1519_v31 = vld [vmem:[%s5744_s17 + $0x878] sm:$0xff]  ;;  %v2212_v32 = vunpack.c.h.s8.bf16 %v1512_v24  ;;  %v2217_v36 = vunpack.c.l.s8.bf16 %v1517_v43  ;;  %v2221_v44 = vunpack.c.h.s8.bf16 %v1517_v43  ;;  %v1533_v17 = vld [vmem:[%s5744_s17 + $0x8e8] sm:$0xff] }
 0x2fe   : > { %3062 = vmatpush1.bf16.msra.mxu0 %v2176_v38  ;;  %3636 = vmatpush1.bf16.msra.mxu1 %v2178_v56  ;;  %v2219_v38 = vunpack.c.l.s8.bf16 %v1519_v31  ;;  %v1516_v56 = vld [vmem:[%s5744_s17 + $0x860] sm:$0xff] }
 0x2ff   : > { %3063 = vmatprep.subr.bf16.mxu0 %v2181_v53  ;;  %3637 = vmatprep.subr.bf16.mxu1 %v2183_v40  ;;  %v1518_v53 = vld [vmem:[%s5744_s17 + $0x870] sm:$0xff]  ;;  %v2216_v40 = vunpack.c.l.s8.bf16 %v1516_v56 }
 0x300   : > { %v2218_v41 = vunpack.c.l.s8.bf16 %v1518_v53  ;;  %v2222_v47 = vunpack.c.h.s8.bf16 %v1518_v53  ;;  %v1536_v53 = vld [vmem:[%s5744_s17 + $0x900] sm:$0xff] }
 0x302   : > { %3064 = vmatpush1.bf16.msra.mxu0 %v2180_v45  ;;  %3638 = vmatpush1.bf16.msra.mxu1 %v2182_v12  ;;  %v2223_v45 = vunpack.c.h.s8.bf16 %v1519_v31  ;;  %v1521_v12 = vld [vmem:[%s5744_s17 + $0x888] sm:$0xff] }
 0x303   : > { %3065 = vmatprep.subr.bf16.mxu0 %v2185_v34  ;;  %3639 = vmatprep.subr.bf16.mxu1 %v2187_v46  ;;  %v1523_v34 = vld [vmem:[%s5744_s17 + $0x898] sm:$0xff]  ;;  %v2220_v46 = vunpack.c.h.s8.bf16 %v1516_v56  ;;  %v2225_v48 = vunpack.c.l.s8.bf16 %v1521_v12  ;;  %v2229_v55 = vunpack.c.h.s8.bf16 %v1521_v12  ;;  %v1537_v31 = vld [vmem:[%s5744_s17 + $0x908] sm:$0xff] }
 0x304   : > { %v2261_v12 = vunpack.c.h.s8.bf16 %v1537_v31 }
 0x306   : > { %3066 = vmatpush1.bf16.msra.mxu0 %v2184_v50  ;;  %3640 = vmatpush1.bf16.msra.mxu1 %v2186_v42  ;;  %v2227_v50 = vunpack.c.l.s8.bf16 %v1523_v34  ;;  %v1520_v42 = vld [vmem:[%s5744_s17 + $0x880] sm:$0xff] }
 0x307   : > { %3067 = vmatprep.subr.bf16.mxu0 %v2189_v51  ;;  %3641 = vmatprep.subr.bf16.mxu1 %v2191_v52  ;;  %v1522_v51 = vld [vmem:[%s5744_s17 + $0x890] sm:$0xff]  ;;  %v2224_v52 = vunpack.c.l.s8.bf16 %v1520_v42 }
 0x308   : > { %v2226_v54 = vunpack.c.l.s8.bf16 %v1522_v51  ;;  %v2230_v5 = vunpack.c.h.s8.bf16 %v1522_v51 }
 0x30a   : > { %3068 = vmatpush1.bf16.msra.mxu0 %v2188_v57  ;;  %3642 = vmatpush1.bf16.msra.mxu1 %v2190_v58  ;;  %v2231_v57 = vunpack.c.h.s8.bf16 %v1523_v34  ;;  %v1525_v58 = vld [vmem:[%s5744_s17 + $0x8a8] sm:$0xff] }
 0x30b   : > { %3078 = vmatprep.subr.bf16.mxu0 %v2193_v59  ;;  %3652 = vmatprep.subr.bf16.mxu1 %v2195_v60  ;;  %v1527_v59 = vld [vmem:[%s5744_s17 + $0x8b8] sm:$0xff]  ;;  %v2228_v60 = vunpack.c.h.s8.bf16 %v1520_v42  ;;  %v2233_v61 = vunpack.c.l.s8.bf16 %v1525_v58 }
 0x30c   : > { %v2235_v62 = vunpack.c.l.s8.bf16 %v1527_v59  ;;  %v2239_v3 = vunpack.c.h.s8.bf16 %v1527_v59  ;;  %v1545_v59 = vld [vmem:[%s5744_s17 + $0x948] sm:$0xff] }
 0x30d   : > { %3070 = vmatmul.mubr.bf16.vlgmr.msra.gmra.mrb[0].mxu0 %v2648_v63  ;;  %3644 = vmatmul.mubr.bf16.vlgmr.msra.gmra.mrb[0].mxu1 %v2648_v63  ;;  %v1524_v63 = vld [vmem:[%s5744_s17 + $0x8a0] sm:$0xff] }
 0x30e   : > { %3079 = vmatpush1.bf16.msra.mxu0 %v2192_v0  ;;  %3653 = vmatpush1.bf16.msra.mxu1 %v2194_v1  ;;  %v1526_v0 = vld [vmem:[%s5744_s17 + $0x8b0] sm:$0xff]  ;;  %v2232_v1 = vunpack.c.l.s8.bf16 %v1524_v63 }
 0x30f   : > { %3080 = vmatprep.subr.bf16.mxu0 %v2197_v19  ;;  %3654 = vmatprep.subr.bf16.mxu1 %v2199_v2  ;;  %v2234_v19 = vunpack.c.l.s8.bf16 %v1526_v0  ;;  %v2237_v2 = vunpack.c.h.s8.bf16 %v1525_v58 }
 0x310   : > { %3110 = vmatprep.mubr.bf16.mxu0 %v6116_v7  ;;  %3684 = vmatprep.mubr.bf16.mxu1 %v6116_v7 }
 0x312   : > { %3081 = vmatpush1.bf16.msra.mxu0 %v2196_v21  ;;  %3655 = vmatpush1.bf16.msra.mxu1 %v2198_v28  ;;  %v1531_v21 = vld [vmem:[%s5744_s17 + $0x8d8] sm:$0xff]  ;;  %v2236_v28 = vunpack.c.h.s8.bf16 %v1524_v63 }
 0x313   : > { %3082 = vmatprep.subr.bf16.mxu0 %v2201_v8  ;;  %3656 = vmatprep.subr.bf16.mxu1 %v2203_v9  ;;  %v2238_v8 = vunpack.c.h.s8.bf16 %v1526_v0  ;;  %v2241_v9 = vunpack.c.l.s8.bf16 %v1529_v6  ;;  %v2243_v10 = vunpack.c.l.s8.bf16 %v1531_v21  ;;  %v2247_v16 = vunpack.c.h.s8.bf16 %v1531_v21  ;;  %v1544_v0 = vld [vmem:[%s5744_s17 + $0x940] sm:$0xff]  ;;  %v1549_v21 = vld [vmem:[%s5744_s17 + $0x968] sm:$0xff] }
 0x316   : > { %3083 = vmatpush1.bf16.msra.mxu0 %v2200_v37  ;;  %3657 = vmatpush1.bf16.msra.mxu1 %v2202_v13  ;;  %v1530_v37 = vld [vmem:[%s5744_s17 + $0x8d0] sm:$0xff]  ;;  %v2240_v13 = vunpack.c.l.s8.bf16 %v1528_v11 }
 0x317   : > { %3084 = vmatprep.subr.bf16.mxu0 %v2205_v14  ;;  %3658 = vmatprep.subr.bf16.mxu1 %v2207_v15  ;;  %v2242_v14 = vunpack.c.l.s8.bf16 %v1530_v37  ;;  %v2245_v15 = vunpack.c.h.s8.bf16 %v1529_v6 }
 0x31a   : > { %3085 = vmatpush1.bf16.msra.mxu0 %v2204_v39  ;;  %3659 = vmatpush1.bf16.msra.mxu1 %v2206_v18  ;;  %v1535_v39 = vld [vmem:[%s5744_s17 + $0x8f8] sm:$0xff]  ;;  %v2244_v18 = vunpack.c.h.s8.bf16 %v1528_v11 }
 0x31b   : > { %3086 = vmatprep.subr.bf16.mxu0 %v2209_v20  ;;  %3660 = vmatprep.subr.bf16.mxu1 %v2211_v23  ;;  %v2246_v20 = vunpack.c.h.s8.bf16 %v1530_v37  ;;  %v2249_v23 = vunpack.c.l.s8.bf16 %v1533_v17  ;;  %v2251_v24 = vunpack.c.l.s8.bf16 %v1535_v39  ;;  %v2255_v43 = vunpack.c.h.s8.bf16 %v1535_v39  ;;  %v1548_v37 = vld [vmem:[%s5744_s17 + $0x960] sm:$0xff]  ;;  %v1553_v39 = vld [vmem:[%s5744_s17 + $0x988] sm:$0xff] }
 0x31e   : > { %3087 = vmatpush1.bf16.msra.mxu0 %v2208_v26  ;;  %3661 = vmatpush1.bf16.msra.mxu1 %v2210_v27  ;;  %v1534_v26 = vld [vmem:[%s5744_s17 + $0x8f0] sm:$0xff]  ;;  %v2248_v27 = vunpack.c.l.s8.bf16 %v1532_v25 }
 0x31f   : > { %3088 = vmatprep.subr.bf16.mxu0 %v2213_v29  ;;  %3662 = vmatprep.subr.bf16.mxu1 %v2215_v30  ;;  %v2250_v29 = vunpack.c.l.s8.bf16 %v1534_v26  ;;  %v2253_v30 = vunpack.c.h.s8.bf16 %v1533_v17 }
 0x322   : > { %3089 = vmatpush1.bf16.msra.mxu0 %v2212_v32  ;;  %3663 = vmatpush1.bf16.msra.mxu1 %v2214_v35  ;;  %v1539_v32 = vld [vmem:[%s5744_s17 + $0x918] sm:$0xff]  ;;  %v2252_v35 = vunpack.c.h.s8.bf16 %v1532_v25 }
 0x323   : > { %3090 = vmatprep.subr.bf16.mxu0 %v2217_v36  ;;  %3664 = vmatprep.subr.bf16.mxu1 %v2219_v38  ;;  %v2254_v36 = vunpack.c.h.s8.bf16 %v1534_v26  ;;  %v2257_v38 = vunpack.c.l.s8.bf16 %v1537_v31  ;;  %v2259_v56 = vunpack.c.l.s8.bf16 %v1539_v32  ;;  %v2263_v34 = vunpack.c.h.s8.bf16 %v1539_v32  ;;  %v1552_v26 = vld [vmem:[%s5744_s17 + $0x980] sm:$0xff]  ;;  %v1557_v32 = vld [vmem:[%s5744_s17 + $0x9a8] sm:$0xff] }
 0x326   : > { %3091 = vmatpush1.bf16.msra.mxu0 %v2216_v40  ;;  %3665 = vmatpush1.bf16.msra.mxu1 %v2218_v41  ;;  %v1538_v40 = vld [vmem:[%s5744_s17 + $0x910] sm:$0xff]  ;;  %v6152_v41 = vrot.slane %v6105_v4, %v5769_v33  ;;  %v2260_v4 = vunpack.c.h.s8.bf16 %v1536_v53 }
 0x327   : > { %3092 = vmatprep.subr.bf16.mxu0 %v2221_v44  ;;  %3666 = vmatprep.subr.bf16.mxu1 %v2223_v45  ;;  %v2256_v44 = vunpack.c.l.s8.bf16 %v1536_v53  ;;  %v2258_v45 = vunpack.c.l.s8.bf16 %v1538_v40 }
 0x32a   : > { %3093 = vmatpush1.bf16.msra.mxu0 %v2220_v46  ;;  %3667 = vmatpush1.bf16.msra.mxu1 %v2222_v47  ;;  %v1541_v46 = vld [vmem:[%s5744_s17 + $0x928] sm:$0xff]  ;;  %v1543_v47 = vld [vmem:[%s5744_s17 + $0x938] sm:$0xff] }
 0x32b   : > { %3094 = vmatprep.subr.bf16.mxu0 %v2225_v48  ;;  %3668 = vmatprep.subr.bf16.mxu1 %v2227_v50  ;;  %v2698_v48 = vcombine.high %v6116_v7, %v6116_v7  ;;  %v2262_v50 = vunpack.c.h.s8.bf16 %v1538_v40  ;;  %v2265_v42 = vunpack.c.l.s8.bf16 %v1541_v46  ;;  %v2267_v51 = vunpack.c.l.s8.bf16 %v1543_v47  ;;  %v1556_v40 = vld [vmem:[%s5744_s17 + $0x9a0] sm:$0xff] }
 0x32c   : > { %v2271_v58 = vunpack.c.h.s8.bf16 %v1543_v47  ;;  %v1561_v47 = vld [vmem:[%s5744_s17 + $0x9c8] sm:$0xff] }
 0x32e   : > { %3095 = vmatpush1.bf16.msra.mxu0 %v2224_v52  ;;  %3669 = vmatpush1.bf16.msra.mxu1 %v2226_v54  ;;  %v1540_v52 = vld [vmem:[%s5744_s17 + $0x920] sm:$0xff]  ;;  %v1542_v54 = vld [vmem:[%s5744_s17 + $0x930] sm:$0xff] }
 0x32f   : > { %3096 = vmatprep.subr.bf16.mxu0 %v2229_v55  ;;  %3670 = vmatprep.subr.bf16.mxu1 %v2231_v57  ;;  %v2264_v7 = vunpack.c.l.s8.bf16 %v1540_v52  ;;  %v2266_v55 = vunpack.c.l.s8.bf16 %v1542_v54  ;;  %v2269_v57 = vunpack.c.h.s8.bf16 %v1541_v46 }
 0x332   : > { %3097 = vmatpush1.bf16.msra.mxu0 %v2228_v60  ;;  %3671 = vmatpush1.bf16.msra.mxu1 %v2230_v5  ;;  %v1547_v60 = vld [vmem:[%s5744_s17 + $0x958] sm:$0xff]  ;;  %v2268_v5 = vunpack.c.h.s8.bf16 %v1540_v52  ;;  %v1560_v52 = vld [vmem:[%s5744_s17 + $0x9c0] sm:$0xff] }
 0x333   : > { %3098 = vmatprep.subr.bf16.mxu0 %v2233_v61  ;;  %3672 = vmatprep.subr.bf16.mxu1 %v2235_v62  ;;  %v2270_v61 = vunpack.c.h.s8.bf16 %v1542_v54  ;;  %v2273_v62 = vunpack.c.l.s8.bf16 %v1545_v59  ;;  %v2275_v63 = vunpack.c.l.s8.bf16 %v1547_v60  ;;  %v2279_v6 = vunpack.c.h.s8.bf16 %v1547_v60  ;;  %v1562_v54 = vld [vmem:[%s5744_s17 + $0x9d0] sm:$0xff]  ;;  %v1567_v60 = vld [vmem:[%s5744_s17 + $0x9f8] sm:$0xff] }
 0x336   : > { %3099 = vmatpush1.bf16.msra.mxu0 %v2232_v1  ;;  %3673 = vmatpush1.bf16.msra.mxu1 %v2234_v19  ;;  %v1546_v1 = vld [vmem:[%s5744_s17 + $0x950] sm:$0xff]  ;;  %v2272_v19 = vunpack.c.l.s8.bf16 %v1544_v0 }
 0x337   : > { %3100 = vmatprep.subr.bf16.mxu0 %v2237_v2  ;;  %3674 = vmatprep.subr.bf16.mxu1 %v2239_v3  ;;  %v2274_v2 = vunpack.c.l.s8.bf16 %v1546_v1  ;;  %v2277_v3 = vunpack.c.h.s8.bf16 %v1545_v59  ;;  %v1565_v59 = vld [vmem:[%s5744_s17 + $0x9e8] sm:$0xff] }
 0x33a   : > { %3101 = vmatpush1.bf16.msra.mxu0 %v2236_v28  ;;  %3675 = vmatpush1.bf16.msra.mxu1 %v2238_v8  ;;  %v1551_v28 = vld [vmem:[%s5744_s17 + $0x978] sm:$0xff]  ;;  %v2276_v8 = vunpack.c.h.s8.bf16 %v1544_v0  ;;  %v1564_v0 = vld [vmem:[%s5744_s17 + $0x9e0] sm:$0xff] }
 0x33b   : > { %3102 = vmatprep.subr.bf16.mxu0 %v2241_v9  ;;  %3676 = vmatprep.subr.bf16.mxu1 %v2243_v10  ;;  %v2278_v9 = vunpack.c.h.s8.bf16 %v1546_v1  ;;  %v2281_v10 = vunpack.c.l.s8.bf16 %v1549_v21  ;;  %v2283_v11 = vunpack.c.l.s8.bf16 %v1551_v28  ;;  %v2287_v17 = vunpack.c.h.s8.bf16 %v1551_v28  ;;  %v1566_v1 = vld [vmem:[%s5744_s17 + $0x9f0] sm:$0xff]  ;;  %v1569_v28 = vld [vmem:[%s5744_s17 + $0xa08] sm:$0xff] }
 0x33e   : > { %3103 = vmatpush1.bf16.msra.mxu0 %v2240_v13  ;;  %3677 = vmatpush1.bf16.msra.mxu1 %v2242_v14  ;;  %v1550_v13 = vld [vmem:[%s5744_s17 + $0x970] sm:$0xff]  ;;  %v2280_v14 = vunpack.c.l.s8.bf16 %v1548_v37 }
 0x33f   : > { %3104 = vmatprep.subr.bf16.mxu0 %v2245_v15  ;;  %3678 = vmatprep.subr.bf16.mxu1 %v2247_v16  ;;  %v2282_v15 = vunpack.c.l.s8.bf16 %v1550_v13  ;;  %v2285_v16 = vunpack.c.h.s8.bf16 %v1549_v21  ;;  %v2319_v21 = vunpack.c.h.s8.bf16 %v1567_v60 }
 0x342   : > { %3105 = vmatpush1.bf16.msra.mxu0 %v2244_v18  ;;  %3679 = vmatpush1.bf16.msra.mxu1 %v2246_v20  ;;  %v1555_v18 = vld [vmem:[%s5744_s17 + $0x998] sm:$0xff]  ;;  %v2284_v20 = vunpack.c.h.s8.bf16 %v1548_v37 }
 0x343   : > { %3106 = vmatprep.subr.bf16.mxu0 %v2249_v23  ;;  %3680 = vmatprep.subr.bf16.mxu1 %v2251_v24  ;;  %v2286_v23 = vunpack.c.h.s8.bf16 %v1550_v13  ;;  %v2289_v24 = vunpack.c.l.s8.bf16 %v1553_v39  ;;  %v2291_v25 = vunpack.c.l.s8.bf16 %v1555_v18  ;;  %v2295_v31 = vunpack.c.h.s8.bf16 %v1555_v18  ;;  %v1568_v13 = vld [vmem:[%s5744_s17 + $0xa00] sm:$0xff] }
 0x344   : > { %v2325_v18 = vunpack.c.h.s8.bf16 %v1569_v28 }
 0x346   : > { %3107 = vmatpush1.bf16.msra.mxu0 %v2248_v27  ;;  %3681 = vmatpush1.bf16.msra.mxu1 %v2250_v29  ;;  %v1554_v27 = vld [vmem:[%s5744_s17 + $0x990] sm:$0xff]  ;;  %v2288_v29 = vunpack.c.l.s8.bf16 %v1552_v26 }
 0x347   : > { %3108 = vmatprep.subr.bf16.mxu0 %v2253_v30  ;;  %3682 = vmatprep.subr.bf16.mxu1 %v2255_v43  ;;  %v2290_v30 = vunpack.c.l.s8.bf16 %v1554_v27  ;;  %v2293_v43 = vunpack.c.h.s8.bf16 %v1553_v39 }
 0x34a   : > { %3109 = vmatpush1.bf16.msra.mxu0 %v2252_v35  ;;  %3683 = vmatpush1.bf16.msra.mxu1 %v2254_v36  ;;  %v1559_v35 = vld [vmem:[%s5744_s17 + $0x9b8] sm:$0xff]  ;;  %v2292_v36 = vunpack.c.h.s8.bf16 %v1552_v26 }
 0x34b   : > { %3119 = vmatprep.subr.bf16.mxu0 %v2257_v38  ;;  %3693 = vmatprep.subr.bf16.mxu1 %v2259_v56  ;;  %v2294_v38 = vunpack.c.h.s8.bf16 %v1554_v27  ;;  %v2297_v56 = vunpack.c.l.s8.bf16 %v1557_v32  ;;  %v2299_v53 = vunpack.c.l.s8.bf16 %v1559_v35  ;;  %v2303_v46 = vunpack.c.h.s8.bf16 %v1559_v35 }
 0x34d   : > { %3111 = vmatmul.mubr.bf16.vlgmr.msra.gmra.mrb[0].mxu0 %v6152_v41  ;;  %3685 = vmatmul.mubr.bf16.vlgmr.msra.gmra.mrb[0].mxu1 %v6152_v41 }
 0x34e   : > { %3120 = vmatpush1.bf16.msra.mxu0 %v2256_v44  ;;  %3694 = vmatpush1.bf16.msra.mxu1 %v2258_v45  ;;  %v1558_v44 = vld [vmem:[%s5744_s17 + $0x9b0] sm:$0xff]  ;;  %v2296_v45 = vunpack.c.l.s8.bf16 %v1556_v40 }
 0x34f   : > { %3121 = vmatprep.subr.bf16.mxu0 %v2261_v12  ;;  %3695 = vmatprep.subr.bf16.mxu1 %v2263_v34  ;;  %v2298_v12 = vunpack.c.l.s8.bf16 %v1558_v44  ;;  %v2301_v34 = vunpack.c.h.s8.bf16 %v1557_v32 }
 0x350   : > { %3151 = vmatprep.mubr.bf16.mxu0 %v2698_v48  ;;  %3725 = vmatprep.mubr.bf16.mxu1 %v2698_v48  ;;  %v1563_v48 = vld [vmem:[%s5744_s17 + $0x9d8] sm:$0xff] }
 0x352   : > { %3122 = vmatpush1.bf16.msra.mxu0 %v2260_v4  ;;  %3696 = vmatpush1.bf16.msra.mxu1 %v2262_v50  ;;  %v2300_v4 = vunpack.c.h.s8.bf16 %v1556_v40  ;;  %v2302_v50 = vunpack.c.h.s8.bf16 %v1558_v44 }
 0x353   : > { %3123 = vmatprep.subr.bf16.mxu0 %v2265_v42  ;;  %3697 = vmatprep.subr.bf16.mxu1 %v2267_v51  ;;  %v2305_v42 = vunpack.c.l.s8.bf16 %v1561_v47  ;;  %v2307_v51 = vunpack.c.l.s8.bf16 %v1563_v48 }
 0x356   : > { %3124 = vmatpush1.bf16.msra.mxu0 %v2264_v7  ;;  %3698 = vmatpush1.bf16.msra.mxu1 %v2266_v55  ;;  %v2304_v7 = vunpack.c.l.s8.bf16 %v1560_v52  ;;  %v2306_v55 = vunpack.c.l.s8.bf16 %v1562_v54 }
 0x357   : > { %3125 = vmatprep.subr.bf16.mxu0 %v2269_v57  ;;  %3699 = vmatprep.subr.bf16.mxu1 %v2271_v58  ;;  %v2309_v57 = vunpack.c.h.s8.bf16 %v1561_v47  ;;  %v2311_v58 = vunpack.c.h.s8.bf16 %v1563_v48 }
 0x35a   : > { %3126 = vmatpush1.bf16.msra.mxu0 %v2268_v5  ;;  %3700 = vmatpush1.bf16.msra.mxu1 %v2270_v61  ;;  %v2308_v5 = vunpack.c.h.s8.bf16 %v1560_v52  ;;  %v2310_v61 = vunpack.c.h.s8.bf16 %v1562_v54 }
 0x35b   : > { %3127 = vmatprep.subr.bf16.mxu0 %v2273_v62  ;;  %3701 = vmatprep.subr.bf16.mxu1 %v2275_v63  ;;  %v2313_v62 = vunpack.c.l.s8.bf16 %v1565_v59  ;;  %v2315_v63 = vunpack.c.l.s8.bf16 %v1567_v60 }
 0x35e   : > { %3128 = vmatpush1.bf16.msra.mxu0 %v2272_v19  ;;  %3702 = vmatpush1.bf16.msra.mxu1 %v2274_v2  ;;  %v2651_v19 = vcombine.high %v6099_v49, %v6099_v49  ;;  %v2312_v2 = vunpack.c.l.s8.bf16 %v1564_v0  ;;  %v2321_v49 = vunpack.c.l.s8.bf16 %v1569_v28 }
 0x35f   : > { %3129 = vmatprep.subr.bf16.mxu0 %v2277_v3  ;;  %3703 = vmatprep.subr.bf16.mxu1 %v2279_v6  ;;  %v2314_v3 = vunpack.c.l.s8.bf16 %v1566_v1  ;;  %v2317_v6 = vunpack.c.h.s8.bf16 %v1565_v59 }
 0x362   : > { %3130 = vmatpush1.bf16.msra.mxu0 %v2276_v8  ;;  %3704 = vmatpush1.bf16.msra.mxu1 %v2278_v9  ;;  %v1571_v8 = vld [vmem:[%s5744_s17 + $0xa18] sm:$0xff]  ;;  %v6191_v9 = vrot.slane %v2651_v19, %v5769_v33 }
 0x363   : > { %3131 = vmatprep.subr.bf16.mxu0 %v2281_v10  ;;  %3705 = vmatprep.subr.bf16.mxu1 %v2283_v11  ;;  %v2316_v10 = vunpack.c.h.s8.bf16 %v1564_v0  ;;  %v2318_v11 = vunpack.c.h.s8.bf16 %v1566_v1  ;;  %v2323_v37 = vunpack.c.l.s8.bf16 %v1571_v8 }
 0x366   : > { %3132 = vmatpush1.bf16.msra.mxu0 %v2280_v14  ;;  %3706 = vmatpush1.bf16.msra.mxu1 %v2282_v15  ;;  %v1570_v14 = vld [vmem:[%s5744_s17 + $0xa10] sm:$0xff]  ;;  %v2667_v15 = vcombine.high %v6191_v9, %v6191_v9 }
 0x367   : > { %3133 = vmatprep.subr.bf16.mxu0 %v2285_v16  ;;  %3707 = vmatprep.subr.bf16.mxu1 %v2287_v17  ;;  %v2696_v16 = vcombine.high %v6152_v41, %v6152_v41  ;;  %v2320_v17 = vunpack.c.l.s8.bf16 %v1568_v13  ;;  %v2322_v39 = vunpack.c.l.s8.bf16 %v1570_v14  ;;  %v2324_v41 = vunpack.c.h.s8.bf16 %v1568_v13 }
 0x368   : > { %v2326_v26 = vunpack.c.h.s8.bf16 %v1570_v14 }
 0x36a   : > { %3134 = vmatpush1.bf16.msra.mxu0 %v2284_v20  ;;  %3708 = vmatpush1.bf16.msra.mxu1 %v2286_v23  ;;  %v2327_v20 = vunpack.c.h.s8.bf16 %v1571_v8  ;;  %v1573_v23 = vld [vmem:[%s5744_s17 + $0xa28] sm:$0xff] }
 0x36b   : > { %3135 = vmatprep.subr.bf16.mxu0 %v2289_v24  ;;  %3709 = vmatprep.subr.bf16.mxu1 %v2291_v25  ;;  %v1575_v24 = vld [vmem:[%s5744_s17 + $0xa38] sm:$0xff]  ;;  %v6202_v25 = vrot.slane %v2667_v15, %v5769_v33  ;;  %v2329_v27 = vunpack.c.l.s8.bf16 %v1573_v23  ;;  %v2333_v35 = vunpack.c.h.s8.bf16 %v1573_v23  ;;  %v1588_v15 = vld [vmem:[%s5744_s17 + $0xaa0] sm:$0xff]  ;;  %v1593_v23 = vld [vmem:[%s5744_s17 + $0xac8] sm:$0xff] }
 0x36e   : > { %3136 = vmatpush1.bf16.msra.mxu0 %v2288_v29  ;;  %3710 = vmatpush1.bf16.msra.mxu1 %v2290_v30  ;;  %v2331_v29 = vunpack.c.l.s8.bf16 %v1575_v24  ;;  %v1572_v30 = vld [vmem:[%s5744_s17 + $0xa20] sm:$0xff] }
 0x36f   : > { %3137 = vmatprep.subr.bf16.mxu0 %v2293_v43  ;;  %3711 = vmatprep.subr.bf16.mxu1 %v2295_v31  ;;  %v1574_v43 = vld [vmem:[%s5744_s17 + $0xa30] sm:$0xff]  ;;  %v2328_v31 = vunpack.c.l.s8.bf16 %v1572_v30 }
 0x370   : > { %v2330_v32 = vunpack.c.l.s8.bf16 %v1574_v43  ;;  %v2334_v40 = vunpack.c.h.s8.bf16 %v1574_v43  ;;  %v1594_v43 = vld [vmem:[%s5744_s17 + $0xad0] sm:$0xff] }
 0x372   : > { %3138 = vmatpush1.bf16.msra.mxu0 %v2292_v36  ;;  %3712 = vmatpush1.bf16.msra.mxu1 %v2294_v38  ;;  %v2335_v36 = vunpack.c.h.s8.bf16 %v1575_v24  ;;  %v1577_v38 = vld [vmem:[%s5744_s17 + $0xa48] sm:$0xff]  ;;  %v1595_v24 = vld [vmem:[%s5744_s17 + $0xad8] sm:$0xff] }
 0x373   : > { %3139 = vmatprep.subr.bf16.mxu0 %v2297_v56  ;;  %3713 = vmatprep.subr.bf16.mxu1 %v2299_v53  ;;  %v1579_v56 = vld [vmem:[%s5744_s17 + $0xa58] sm:$0xff]  ;;  %v2332_v53 = vunpack.c.h.s8.bf16 %v1572_v30  ;;  %v2337_v44 = vunpack.c.l.s8.bf16 %v1577_v38  ;;  %v2341_v48 = vunpack.c.h.s8.bf16 %v1577_v38  ;;  %v1592_v30 = vld [vmem:[%s5744_s17 + $0xac0] sm:$0xff]  ;;  %v1597_v38 = vld [vmem:[%s5744_s17 + $0xae8] sm:$0xff] }
 0x376   : > { %3140 = vmatpush1.bf16.msra.mxu0 %v2296_v45  ;;  %3714 = vmatpush1.bf16.msra.mxu1 %v2298_v12  ;;  %v2339_v45 = vunpack.c.l.s8.bf16 %v1579_v56  ;;  %v1576_v12 = vld [vmem:[%s5744_s17 + $0xa40] sm:$0xff] }
 0x377   : > { %3141 = vmatprep.subr.bf16.mxu0 %v2301_v34  ;;  %3715 = vmatprep.subr.bf16.mxu1 %v2303_v46  ;;  %v1578_v34 = vld [vmem:[%s5744_s17 + $0xa50] sm:$0xff]  ;;  %v2336_v46 = vunpack.c.l.s8.bf16 %v1576_v12 }
 0x378   : > { %v2338_v47 = vunpack.c.l.s8.bf16 %v1578_v34  ;;  %v2342_v52 = vunpack.c.h.s8.bf16 %v1578_v34  ;;  %v1598_v34 = vld [vmem:[%s5744_s17 + $0xaf0] sm:$0xff] }
 0x37a   : > { %3142 = vmatpush1.bf16.msra.mxu0 %v2300_v4  ;;  %3716 = vmatpush1.bf16.msra.mxu1 %v2302_v50  ;;  %v2343_v4 = vunpack.c.h.s8.bf16 %v1579_v56  ;;  %v1581_v50 = vld [vmem:[%s5744_s17 + $0xa68] sm:$0xff]  ;;  %v1599_v56 = vld [vmem:[%s5744_s17 + $0xaf8] sm:$0xff] }
 0x37b   : > { %3143 = vmatprep.subr.bf16.mxu0 %v2305_v42  ;;  %3717 = vmatprep.subr.bf16.mxu1 %v2307_v51  ;;  %v1583_v42 = vld [vmem:[%s5744_s17 + $0xa78] sm:$0xff]  ;;  %v2340_v51 = vunpack.c.h.s8.bf16 %v1576_v12  ;;  %v2345_v54 = vunpack.c.l.s8.bf16 %v1581_v50  ;;  %v2349_v60 = vunpack.c.h.s8.bf16 %v1581_v50  ;;  %v1596_v12 = vld [vmem:[%s5744_s17 + $0xae0] sm:$0xff]  ;;  %v1601_v50 = vld [vmem:[%s5744_s17 + $0xb08] sm:$0xff] }
 0x37e   : > { %3144 = vmatpush1.bf16.msra.mxu0 %v2304_v7  ;;  %3718 = vmatpush1.bf16.msra.mxu1 %v2306_v55  ;;  %v2347_v7 = vunpack.c.l.s8.bf16 %v1583_v42  ;;  %v1580_v55 = vld [vmem:[%s5744_s17 + $0xa60] sm:$0xff] }
 0x37f   : > { %3145 = vmatprep.subr.bf16.mxu0 %v2309_v57  ;;  %3719 = vmatprep.subr.bf16.mxu1 %v2311_v58  ;;  %v1582_v57 = vld [vmem:[%s5744_s17 + $0xa70] sm:$0xff]  ;;  %v2344_v58 = vunpack.c.l.s8.bf16 %v1580_v55 }
 0x380   : > { %v2346_v59 = vunpack.c.l.s8.bf16 %v1582_v57  ;;  %v2350_v0 = vunpack.c.h.s8.bf16 %v1582_v57  ;;  %v1602_v57 = vld [vmem:[%s5744_s17 + $0xb10] sm:$0xff] }
 0x382   : > { %3146 = vmatpush1.bf16.msra.mxu0 %v2308_v5  ;;  %3720 = vmatpush1.bf16.msra.mxu1 %v2310_v61  ;;  %v2351_v5 = vunpack.c.h.s8.bf16 %v1583_v42  ;;  %v1585_v61 = vld [vmem:[%s5744_s17 + $0xa88] sm:$0xff]  ;;  %v1603_v42 = vld [vmem:[%s5744_s17 + $0xb18] sm:$0xff] }
 0x383   : > { %3147 = vmatprep.subr.bf16.mxu0 %v2313_v62  ;;  %3721 = vmatprep.subr.bf16.mxu1 %v2315_v63  ;;  %v1587_v62 = vld [vmem:[%s5744_s17 + $0xa98] sm:$0xff]  ;;  %v2348_v63 = vunpack.c.h.s8.bf16 %v1580_v55  ;;  %v2353_v1 = vunpack.c.l.s8.bf16 %v1585_v61  ;;  %v2357_v28 = vunpack.c.h.s8.bf16 %v1585_v61  ;;  %v1600_v55 = vld [vmem:[%s5744_s17 + $0xb00] sm:$0xff]  ;;  %v2391_v61 = vunpack.c.h.s8.bf16 %v1603_v42 }
 0x384   : > { %v2355_v19 = vunpack.c.l.s8.bf16 %v1587_v62  ;;  %v2359_v8 = vunpack.c.h.s8.bf16 %v1587_v62  ;;  %v1605_v62 = vld [vmem:[%s5744_s17 + $0xb28] sm:$0xff] }
 0x386   : > { %3148 = vmatpush1.bf16.msra.mxu0 %v2312_v2  ;;  %3722 = vmatpush1.bf16.msra.mxu1 %v2314_v3  ;;  %v1584_v2 = vld [vmem:[%s5744_s17 + $0xa80] sm:$0xff]  ;;  %v1586_v3 = vld [vmem:[%s5744_s17 + $0xa90] sm:$0xff] }
 0x387   : > { %3149 = vmatprep.subr.bf16.mxu0 %v2317_v6  ;;  %3723 = vmatprep.subr.bf16.mxu1 %v2319_v21  ;;  %v2352_v6 = vunpack.c.l.s8.bf16 %v1584_v2  ;;  %v2354_v21 = vunpack.c.l.s8.bf16 %v1586_v3 }
 0x38a   : > { %3150 = vmatpush1.bf16.msra.mxu0 %v2316_v10  ;;  %3724 = vmatpush1.bf16.msra.mxu1 %v2318_v11  ;;  %v1589_v10 = vld [vmem:[%s5744_s17 + $0xaa8] sm:$0xff]  ;;  %v1591_v11 = vld [vmem:[%s5744_s17 + $0xab8] sm:$0xff] }
 0x38b   : > { %3160 = vmatprep.subr.bf16.mxu0 %v2321_v49  ;;  %3734 = vmatprep.subr.bf16.mxu1 %v2323_v37  ;;  %v2356_v49 = vunpack.c.h.s8.bf16 %v1584_v2  ;;  %v2358_v37 = vunpack.c.h.s8.bf16 %v1586_v3  ;;  %v2361_v13 = vunpack.c.l.s8.bf16 %v1589_v10  ;;  %v2363_v14 = vunpack.c.l.s8.bf16 %v1591_v11  ;;  %v1604_v3 = vld [vmem:[%s5744_s17 + $0xb20] sm:$0xff] }
 0x38d   : > { %3152 = vmatmul.mubr.bf16.vlgmr.msra.gmra.mrb[0].mxu0 %v2696_v16  ;;  %3726 = vmatmul.mubr.bf16.vlgmr.msra.gmra.mrb[0].mxu1 %v2696_v16  ;;  %v1590_v16 = vld [vmem:[%s5744_s17 + $0xab0] sm:$0xff] }
 0x38e   : > { %3161 = vmatpush1.bf16.msra.mxu0 %v2320_v17  ;;  %3735 = vmatpush1.bf16.msra.mxu1 %v2322_v39  ;;  %v2360_v17 = vunpack.c.l.s8.bf16 %v1588_v15  ;;  %v2362_v39 = vunpack.c.l.s8.bf16 %v1590_v16 }
 0x38f   : > { %3162 = vmatprep.subr.bf16.mxu0 %v2325_v18  ;;  %3736 = vmatprep.subr.bf16.mxu1 %v2327_v20  ;;  %v2365_v18 = vunpack.c.h.s8.bf16 %v1589_v10  ;;  %v2367_v20 = vunpack.c.h.s8.bf16 %v1591_v11  ;;  %v1609_v10 = vld [vmem:[%s5744_s17 + $0xb48] sm:$0xff]  ;;  %v1611_v11 = vld [vmem:[%s5744_s17 + $0xb58] sm:$0xff] }
 0x390   : > { %3192 = vmatprep.mubr.bf16.mxu0 %v6202_v25  ;;  %3766 = vmatprep.mubr.bf16.mxu1 %v6202_v25 }
 0x392   : > { %3163 = vmatpush1.bf16.msra.mxu0 %v2324_v41  ;;  %3737 = vmatpush1.bf16.msra.mxu1 %v2326_v26  ;;  %v2364_v41 = vunpack.c.h.s8.bf16 %v1588_v15  ;;  %v2366_v26 = vunpack.c.h.s8.bf16 %v1590_v16  ;;  %v1608_v15 = vld [vmem:[%s5744_s17 + $0xb40] sm:$0xff]  ;;  %v1610_v16 = vld [vmem:[%s5744_s17 + $0xb50] sm:$0xff] }
 0x393   : > { %3164 = vmatprep.subr.bf16.mxu0 %v2329_v27  ;;  %3738 = vmatprep.subr.bf16.mxu1 %v2331_v29  ;;  %v2369_v27 = vunpack.c.l.s8.bf16 %v1593_v23  ;;  %v2371_v29 = vunpack.c.l.s8.bf16 %v1595_v24 }
 0x396   : > { %3165 = vmatpush1.bf16.msra.mxu0 %v2328_v31  ;;  %3739 = vmatpush1.bf16.msra.mxu1 %v2330_v32  ;;  %v2368_v31 = vunpack.c.l.s8.bf16 %v1592_v30  ;;  %v2370_v32 = vunpack.c.l.s8.bf16 %v1594_v43 }
 0x397   : > { %3166 = vmatprep.subr.bf16.mxu0 %v2333_v35  ;;  %3740 = vmatprep.subr.bf16.mxu1 %v2335_v36  ;;  %v2373_v35 = vunpack.c.h.s8.bf16 %v1593_v23  ;;  %v2375_v36 = vunpack.c.h.s8.bf16 %v1595_v24  ;;  %v1613_v23 = vld [vmem:[%s5744_s17 + $0xb68] sm:$0xff]  ;;  %v1615_v24 = vld [vmem:[%s5744_s17 + $0xb78] sm:$0xff] }
 0x39a   : > { %3167 = vmatpush1.bf16.msra.mxu0 %v2332_v53  ;;  %3741 = vmatpush1.bf16.msra.mxu1 %v2334_v40  ;;  %v2372_v53 = vunpack.c.h.s8.bf16 %v1592_v30  ;;  %v2374_v40 = vunpack.c.h.s8.bf16 %v1594_v43  ;;  %v1612_v30 = vld [vmem:[%s5744_s17 + $0xb60] sm:$0xff]  ;;  %v1614_v43 = vld [vmem:[%s5744_s17 + $0xb70] sm:$0xff] }
 0x39b   : > { %3168 = vmatprep.subr.bf16.mxu0 %v2337_v44  ;;  %3742 = vmatprep.subr.bf16.mxu1 %v2339_v45  ;;  %v2377_v44 = vunpack.c.l.s8.bf16 %v1597_v38  ;;  %v2379_v45 = vunpack.c.l.s8.bf16 %v1599_v56 }
 0x39e   : > { %3169 = vmatpush1.bf16.msra.mxu0 %v2336_v46  ;;  %3743 = vmatpush1.bf16.msra.mxu1 %v2338_v47  ;;  %v2376_v46 = vunpack.c.l.s8.bf16 %v1596_v12  ;;  %v2378_v47 = vunpack.c.l.s8.bf16 %v1598_v34 }
 0x39f   : > { %3170 = vmatprep.subr.bf16.mxu0 %v2341_v48  ;;  %3744 = vmatprep.subr.bf16.mxu1 %v2343_v4  ;;  %v2381_v48 = vunpack.c.h.s8.bf16 %v1597_v38  ;;  %v2383_v4 = vunpack.c.h.s8.bf16 %v1599_v56  ;;  %v1617_v38 = vld [vmem:[%s5744_s17 + $0xb88] sm:$0xff]  ;;  %v1619_v56 = vld [vmem:[%s5744_s17 + $0xb98] sm:$0xff] }
 0x3a2   : > { %3171 = vmatpush1.bf16.msra.mxu0 %v2340_v51  ;;  %3745 = vmatpush1.bf16.msra.mxu1 %v2342_v52  ;;  %v2380_v51 = vunpack.c.h.s8.bf16 %v1596_v12  ;;  %v2382_v52 = vunpack.c.h.s8.bf16 %v1598_v34  ;;  %v1616_v12 = vld [vmem:[%s5744_s17 + $0xb80] sm:$0xff]  ;;  %v1618_v34 = vld [vmem:[%s5744_s17 + $0xb90] sm:$0xff] }
 0x3a3   : > { %3172 = vmatprep.subr.bf16.mxu0 %v2345_v54  ;;  %3746 = vmatprep.subr.bf16.mxu1 %v2347_v7  ;;  %v2385_v54 = vunpack.c.l.s8.bf16 %v1601_v50  ;;  %v2387_v7 = vunpack.c.l.s8.bf16 %v1603_v42  ;;  %v1623_v42 = vld [vmem:[%s5744_s17 + $0xbb8] sm:$0xff] }
 0x3a6   : > { %3173 = vmatpush1.bf16.msra.mxu0 %v2344_v58  ;;  %3747 = vmatpush1.bf16.msra.mxu1 %v2346_v59  ;;  %v6238_v58 = vrot.slane %v6191_v9, %v5769_v33  ;;  %v2384_v59 = vunpack.c.l.s8.bf16 %v1600_v55  ;;  %v2388_v9 = vunpack.c.h.s8.bf16 %v1600_v55  ;;  %v1620_v55 = vld [vmem:[%s5744_s17 + $0xba0] sm:$0xff] }
 0x3a7   : > { %3174 = vmatprep.subr.bf16.mxu0 %v2349_v60  ;;  %3748 = vmatprep.subr.bf16.mxu1 %v2351_v5  ;;  %v2386_v60 = vunpack.c.l.s8.bf16 %v1602_v57  ;;  %v2389_v5 = vunpack.c.h.s8.bf16 %v1601_v50  ;;  %v1621_v50 = vld [vmem:[%s5744_s17 + $0xba8] sm:$0xff] }
 0x3aa   : > { %3175 = vmatpush1.bf16.msra.mxu0 %v2348_v63  ;;  %3749 = vmatpush1.bf16.msra.mxu1 %v2350_v0  ;;  %v1607_v63 = vld [vmem:[%s5744_s17 + $0xb38] sm:$0xff]  ;;  %v2699_v0 = vcombine.high %v6202_v25, %v6202_v25  ;;  %v2392_v25 = vunpack.c.l.s8.bf16 %v1604_v3 }
 0x3ab   : > { %3176 = vmatprep.subr.bf16.mxu0 %v2353_v1  ;;  %3750 = vmatprep.subr.bf16.mxu1 %v2355_v19  ;;  %v2390_v1 = vunpack.c.h.s8.bf16 %v1602_v57  ;;  %v2393_v19 = vunpack.c.l.s8.bf16 %v1605_v62  ;;  %v2395_v2 = vunpack.c.l.s8.bf16 %v1607_v63  ;;  %v1622_v57 = vld [vmem:[%s5744_s17 + $0xbb0] sm:$0xff] }
 0x3ae   : > { %3177 = vmatpush1.bf16.msra.mxu0 %v2352_v6  ;;  %3751 = vmatpush1.bf16.msra.mxu1 %v2354_v21  ;;  %v1606_v6 = vld [vmem:[%s5744_s17 + $0xb30] sm:$0xff] }
 0x3af   : > { %3178 = vmatprep.subr.bf16.mxu0 %v2357_v28  ;;  %3752 = vmatprep.subr.bf16.mxu1 %v2359_v8  ;;  %v2394_v21 = vunpack.c.l.s8.bf16 %v1606_v6  ;;  %v2397_v28 = vunpack.c.h.s8.bf16 %v1605_v62  ;;  %v2399_v8 = vunpack.c.h.s8.bf16 %v1607_v63  ;;  %v1625_v62 = vld [vmem:[%s5744_s17 + $0xbc8] sm:$0xff]  ;;  %v1627_v63 = vld [vmem:[%s5744_s17 + $0xbd8] sm:$0xff] }
 0x3b2   : > { %3179 = vmatpush1.bf16.msra.mxu0 %v2356_v49  ;;  %3753 = vmatpush1.bf16.msra.mxu1 %v2358_v37  ;;  %v2396_v49 = vunpack.c.h.s8.bf16 %v1604_v3  ;;  %v2398_v37 = vunpack.c.h.s8.bf16 %v1606_v6  ;;  %v1626_v3 = vld [vmem:[%s5744_s17 + $0xbd0] sm:$0xff] }
 0x3b3   : > { %3180 = vmatprep.subr.bf16.mxu0 %v2361_v13  ;;  %3754 = vmatprep.subr.bf16.mxu1 %v2363_v14  ;;  %v2401_v13 = vunpack.c.l.s8.bf16 %v1609_v10  ;;  %v2403_v14 = vunpack.c.l.s8.bf16 %v1611_v11 }
 0x3b6   : > { %3181 = vmatpush1.bf16.msra.mxu0 %v2360_v17  ;;  %3755 = vmatpush1.bf16.msra.mxu1 %v2362_v39  ;;  %v2400_v17 = vunpack.c.l.s8.bf16 %v1608_v15  ;;  %v2402_v39 = vunpack.c.l.s8.bf16 %v1610_v16 }
 0x3b7   : > { %3182 = vmatprep.subr.bf16.mxu0 %v2365_v18  ;;  %3756 = vmatprep.subr.bf16.mxu1 %v2367_v20  ;;  %v2405_v18 = vunpack.c.h.s8.bf16 %v1609_v10  ;;  %v2407_v20 = vunpack.c.h.s8.bf16 %v1611_v11  ;;  %v1631_v10 = vld [vmem:[%s5744_s17 + $0xbf8] sm:$0xff] }
 0x3ba   : > { %3183 = vmatpush1.bf16.msra.mxu0 %v2364_v41  ;;  %3757 = vmatpush1.bf16.msra.mxu1 %v2366_v26  ;;  %v2404_v41 = vunpack.c.h.s8.bf16 %v1608_v15  ;;  %v2406_v26 = vunpack.c.h.s8.bf16 %v1610_v16  ;;  %v1630_v15 = vld [vmem:[%s5744_s17 + $0xbf0] sm:$0xff] }
 0x3bb   : > { %3184 = vmatprep.subr.bf16.mxu0 %v2369_v27  ;;  %3758 = vmatprep.subr.bf16.mxu1 %v2371_v29  ;;  %v2409_v27 = vunpack.c.l.s8.bf16 %v1613_v23  ;;  %v2411_v29 = vunpack.c.l.s8.bf16 %v1615_v24 }
 0x3be   : > { %3185 = vmatpush1.bf16.msra.mxu0 %v2368_v31  ;;  %3759 = vmatpush1.bf16.msra.mxu1 %v2370_v32  ;;  %v2408_v31 = vunpack.c.l.s8.bf16 %v1612_v30  ;;  %v2410_v32 = vunpack.c.l.s8.bf16 %v1614_v43 }
 0x3bf   : > { %3186 = vmatprep.subr.bf16.mxu0 %v2373_v35  ;;  %3760 = vmatprep.subr.bf16.mxu1 %v2375_v36  ;;  %v2413_v35 = vunpack.c.h.s8.bf16 %v1613_v23  ;;  %v2415_v36 = vunpack.c.h.s8.bf16 %v1615_v24  ;;  %v1635_v23 = vld [vmem:[%s5744_s17 + $0xc18] sm:$0xff]  ;;  %v6275_v24 = vld.sshfl [vmem:[%s5715_s13 + $0x18] sm:$0x13 pattern:$0x75316420]  ;;  %s6462_s13 = scalar_lea.vmem (!%p4372_p0), %s6455_s2, %s6478_s9 }
 0x3c2   : > { %3187 = vmatpush1.bf16.msra.mxu0 %v2372_v53  ;;  %3761 = vmatpush1.bf16.msra.mxu1 %v2374_v40  ;;  %v2412_v53 = vunpack.c.h.s8.bf16 %v1612_v30  ;;  %v2414_v40 = vunpack.c.h.s8.bf16 %v1614_v43  ;;  %v1632_v30 = vld [vmem:[%s5744_s17 + $0xc00] sm:$0xff]  ;;  %v1634_v43 = vld [vmem:[%s5744_s17 + $0xc10] sm:$0xff] }
 0x3c3   : > { %3188 = vmatprep.subr.bf16.mxu0 %v2377_v44  ;;  %3762 = vmatprep.subr.bf16.mxu1 %v2379_v45  ;;  %v2417_v44 = vunpack.c.l.s8.bf16 %v1617_v38  ;;  %v2419_v45 = vunpack.c.l.s8.bf16 %v1619_v56 }
 0x3c6   : > { %3189 = vmatpush1.bf16.msra.mxu0 %v2376_v46  ;;  %3763 = vmatpush1.bf16.msra.mxu1 %v2378_v47  ;;  %v2416_v46 = vunpack.c.l.s8.bf16 %v1616_v12  ;;  %v2418_v47 = vunpack.c.l.s8.bf16 %v1618_v34 }
 0x3c7   : > { %3190 = vmatprep.subr.bf16.mxu0 %v2381_v48  ;;  %3764 = vmatprep.subr.bf16.mxu1 %v2383_v4  ;;  %v2421_v48 = vunpack.c.h.s8.bf16 %v1617_v38  ;;  %v2423_v4 = vunpack.c.h.s8.bf16 %v1619_v56  ;;  %v2455_v56 = vunpack.c.h.s8.bf16 %v1635_v23 }
 0x3ca   : > { %3191 = vmatpush1.bf16.msra.mxu0 %v2380_v51  ;;  %3765 = vmatpush1.bf16.msra.mxu1 %v2382_v52  ;;  %v2420_v51 = vunpack.c.h.s8.bf16 %v1616_v12  ;;  %v2422_v52 = vunpack.c.h.s8.bf16 %v1618_v34 }
 0x3cb   : > { %3201 = vmatprep.subr.bf16.mxu0 %v2385_v54  ;;  %3775 = vmatprep.subr.bf16.mxu1 %v2387_v7  ;;  %v2425_v54 = vunpack.c.l.s8.bf16 %v1621_v50  ;;  %v2427_v7 = vunpack.c.l.s8.bf16 %v1623_v42 }
 0x3cd   : > { %3193 = vmatmul.mubr.bf16.vlgmr.msra.gmra.mrb[0].mxu0 %v6238_v58  ;;  %3767 = vmatmul.mubr.bf16.vlgmr.msra.gmra.mrb[0].mxu1 %v6238_v58 }
 0x3ce   : > { %3202 = vmatpush1.bf16.msra.mxu0 %v2384_v59  ;;  %3776 = vmatpush1.bf16.msra.mxu1 %v2386_v60  ;;  %v2424_v59 = vunpack.c.l.s8.bf16 %v1620_v55  ;;  %v2426_v60 = vunpack.c.l.s8.bf16 %v1622_v57 }
 0x3cf   : > { %3203 = vmatprep.subr.bf16.mxu0 %v2389_v5  ;;  %3777 = vmatprep.subr.bf16.mxu1 %v2391_v61  ;;  %v2429_v5 = vunpack.c.h.s8.bf16 %v1621_v50  ;;  %v2431_v61 = vunpack.c.h.s8.bf16 %v1623_v42 }
 0x3d0   : > { %3233 = vmatprep.mubr.bf16.mxu0 %v2699_v0  ;;  %3807 = vmatprep.mubr.bf16.mxu1 %v2699_v0  ;;  %v2428_v0 = vunpack.c.h.s8.bf16 %v1620_v55 }
 0x3d2   : > { %3204 = vmatpush1.bf16.msra.mxu0 %v2388_v9  ;;  %3778 = vmatpush1.bf16.msra.mxu1 %v2390_v1  ;;  %v2430_v9 = vunpack.c.h.s8.bf16 %v1622_v57  ;;  %v2433_v1 = vunpack.c.l.s8.bf16 %v1625_v62 }
 0x3d3   : > { %3205 = vmatprep.subr.bf16.mxu0 %v2393_v19  ;;  %3779 = vmatprep.subr.bf16.mxu1 %v2395_v2  ;;  %v2435_v19 = vunpack.c.l.s8.bf16 %v1627_v63  ;;  %v1624_v2 = vld [vmem:[%s5744_s17 + $0xbc0] sm:$0xff] }
 0x3d4   : > { %v2432_v6 = vunpack.c.l.s8.bf16 %v1624_v2  ;;  %v2436_v11 = vunpack.c.h.s8.bf16 %v1624_v2 }
 0x3d6   : > { %3206 = vmatpush1.bf16.msra.mxu0 %v2392_v25  ;;  %3780 = vmatpush1.bf16.msra.mxu1 %v2394_v21  ;;  %v2434_v25 = vunpack.c.l.s8.bf16 %v1626_v3  ;;  %v2437_v21 = vunpack.c.h.s8.bf16 %v1625_v62 }
 0x3d7   : > { %3207 = vmatprep.subr.bf16.mxu0 %v2397_v28  ;;  %3781 = vmatprep.subr.bf16.mxu1 %v2399_v8  ;;  %v2439_v28 = vunpack.c.h.s8.bf16 %v1627_v63  ;;  %v1629_v8 = vld [vmem:[%s5744_s17 + $0xbe8] sm:$0xff] }
 0x3da   : > { %3208 = vmatpush1.bf16.msra.mxu0 %v2396_v49  ;;  %3782 = vmatpush1.bf16.msra.mxu1 %v2398_v37  ;;  %v2438_v49 = vunpack.c.h.s8.bf16 %v1626_v3  ;;  %v2441_v37 = vunpack.c.l.s8.bf16 %v1629_v8 }
 0x3db   : > { %3209 = vmatprep.subr.bf16.mxu0 %v2401_v13  ;;  %3783 = vmatprep.subr.bf16.mxu1 %v2403_v14  ;;  %v2443_v13 = vunpack.c.l.s8.bf16 %v1631_v10  ;;  %v1628_v14 = vld [vmem:[%s5744_s17 + $0xbe0] sm:$0xff] }
 0x3dc   : > { %v2440_v16 = vunpack.c.l.s8.bf16 %v1628_v14 }
 0x3de   : > { %3210 = vmatpush1.bf16.msra.mxu0 %v2400_v17  ;;  %3784 = vmatpush1.bf16.msra.mxu1 %v2402_v39  ;;  %v2442_v17 = vunpack.c.l.s8.bf16 %v1630_v15  ;;  %v2445_v39 = vunpack.c.h.s8.bf16 %v1629_v8 }
 0x3df   : > { %3211 = vmatprep.subr.bf16.mxu0 %v2405_v18  ;;  %3785 = vmatprep.subr.bf16.mxu1 %v2407_v20  ;;  %v2447_v18 = vunpack.c.h.s8.bf16 %v1631_v10  ;;  %v1633_v20 = vld [vmem:[%s5744_s17 + $0xc08] sm:$0xff] }
 0x3e0   : > { %v2453_v38 = vunpack.c.h.s8.bf16 %v1633_v20 }
 0x3e2   : > { %3212 = vmatpush1.bf16.msra.mxu0 %v2404_v41  ;;  %3786 = vmatpush1.bf16.msra.mxu1 %v2406_v26  ;;  %v2444_v41 = vunpack.c.h.s8.bf16 %v1628_v14  ;;  %v2446_v26 = vunpack.c.h.s8.bf16 %v1630_v15 }
 0x3e3   : > { %3213 = vmatprep.subr.bf16.mxu0 %v2409_v27  ;;  %3787 = vmatprep.subr.bf16.mxu1 %v2411_v29  ;;  %v2449_v27 = vunpack.c.l.s8.bf16 %v1633_v20  ;;  %v2451_v29 = vunpack.c.l.s8.bf16 %v1635_v23 }
 0x3e6   : > { %3214 = vmatpush1.bf16.msra.mxu0 %v2408_v31  ;;  %3788 = vmatpush1.bf16.msra.mxu1 %v2410_v32  ;;  %v2707_v31 = vcombine.high %v6275_v24, %v6275_v24  ;;  %v2697_v32 = vcombine.high %v6238_v58, %v6238_v58  ;;  %v2454_v58 = vunpack.c.h.s8.bf16 %v1634_v43 }
 0x3e7   : > { %3215 = vmatprep.subr.bf16.mxu0 %v2413_v35  ;;  %3789 = vmatprep.subr.bf16.mxu1 %v2415_v36  ;;  %v2448_v35 = vunpack.c.l.s8.bf16 %v1632_v30  ;;  %v2450_v36 = vunpack.c.l.s8.bf16 %v1634_v43 }
 0x3ea   : > { %3216 = vmatpush1.bf16.msra.mxu0 %v2412_v53  ;;  %3790 = vmatpush1.bf16.msra.mxu1 %v2414_v40  ;;  %v1637_v53 = vld [vmem:[%s5744_s17 + $0xc28] sm:$0xff]  ;;  %v1639_v40 = vld [vmem:[%s5744_s17 + $0xc38] sm:$0xff] }
 0x3eb   : > { %3217 = vmatprep.subr.bf16.mxu0 %v2417_v44  ;;  %3791 = vmatprep.subr.bf16.mxu1 %v2419_v45  ;;  %v2721_v44 = vrot.slane %v2707_v31, %v5769_v33  ;;  %v2452_v45 = vunpack.c.h.s8.bf16 %v1632_v30  ;;  %v2457_v12 = vunpack.c.l.s8.bf16 %v1637_v53  ;;  %v2459_v34 = vunpack.c.l.s8.bf16 %v1639_v40  ;;  %v1652_v31 = vld [vmem:[%s5744_s17 + $0xca0] sm:$0xff] }
 0x3ec   : > { %v2461_v50 = vunpack.c.h.s8.bf16 %v1637_v53  ;;  %v2463_v42 = vunpack.c.h.s8.bf16 %v1639_v40  ;;  %v1657_v53 = vld [vmem:[%s5744_s17 + $0xcc8] sm:$0xff]  ;;  %v1659_v40 = vld [vmem:[%s5744_s17 + $0xcd8] sm:$0xff] }
 0x3ee   : > { %3218 = vmatpush1.bf16.msra.mxu0 %v2416_v46  ;;  %3792 = vmatpush1.bf16.msra.mxu1 %v2418_v47  ;;  %v1636_v46 = vld [vmem:[%s5744_s17 + $0xc20] sm:$0xff]  ;;  %v1638_v47 = vld [vmem:[%s5744_s17 + $0xc30] sm:$0xff] }
 0x3ef   : > { %3219 = vmatprep.subr.bf16.mxu0 %v2421_v48  ;;  %3793 = vmatprep.subr.bf16.mxu1 %v2423_v4  ;;  %v2456_v48 = vunpack.c.l.s8.bf16 %v1636_v46  ;;  %v2458_v4 = vunpack.c.l.s8.bf16 %v1638_v47 }
 0x3f2   : > { %3220 = vmatpush1.bf16.msra.mxu0 %v2420_v51  ;;  %3794 = vmatpush1.bf16.msra.mxu1 %v2422_v52  ;;  %v1641_v51 = vld [vmem:[%s5744_s17 + $0xc48] sm:$0xff]  ;;  %v1643_v52 = vld [vmem:[%s5744_s17 + $0xc58] sm:$0xff] }
 0x3f3   : > { %3221 = vmatprep.subr.bf16.mxu0 %v2425_v54  ;;  %3795 = vmatprep.subr.bf16.mxu1 %v2427_v7  ;;  %v2460_v54 = vunpack.c.h.s8.bf16 %v1636_v46  ;;  %v2462_v7 = vunpack.c.h.s8.bf16 %v1638_v47  ;;  %v2465_v55 = vunpack.c.l.s8.bf16 %v1641_v51  ;;  %v2467_v57 = vunpack.c.l.s8.bf16 %v1643_v52  ;;  %v1658_v46 = vld [vmem:[%s5744_s17 + $0xcd0] sm:$0xff] }
 0x3f4   : > { %v2469_v62 = vunpack.c.h.s8.bf16 %v1641_v51  ;;  %v2471_v63 = vunpack.c.h.s8.bf16 %v1643_v52  ;;  %v1663_v51 = vld [vmem:[%s5744_s17 + $0xcf8] sm:$0xff] }
 0x3f6   : > { %3222 = vmatpush1.bf16.msra.mxu0 %v2424_v59  ;;  %3796 = vmatpush1.bf16.msra.mxu1 %v2426_v60  ;;  %v1640_v59 = vld [vmem:[%s5744_s17 + $0xc40] sm:$0xff]  ;;  %v1642_v60 = vld [vmem:[%s5744_s17 + $0xc50] sm:$0xff] }
 0x3f7   : > { %3223 = vmatprep.subr.bf16.mxu0 %v2429_v5  ;;  %3797 = vmatprep.subr.bf16.mxu1 %v2431_v61  ;;  %v2464_v5 = vunpack.c.l.s8.bf16 %v1640_v59  ;;  %v2466_v61 = vunpack.c.l.s8.bf16 %v1642_v60 }
 0x3fa   : > { %3224 = vmatpush1.bf16.msra.mxu0 %v2428_v0  ;;  %3798 = vmatpush1.bf16.msra.mxu1 %v2430_v9  ;;  %v1645_v0 = vld [vmem:[%s5744_s17 + $0xc68] sm:$0xff]  ;;  %v1647_v9 = vld [vmem:[%s5744_s17 + $0xc78] sm:$0xff] }
 0x3fb   : > { %3225 = vmatprep.subr.bf16.mxu0 %v2433_v1  ;;  %3799 = vmatprep.subr.bf16.mxu1 %v2435_v19  ;;  %v2468_v1 = vunpack.c.h.s8.bf16 %v1640_v59  ;;  %v2470_v19 = vunpack.c.h.s8.bf16 %v1642_v60  ;;  %v2473_v2 = vunpack.c.l.s8.bf16 %v1645_v0  ;;  %v2475_v3 = vunpack.c.l.s8.bf16 %v1647_v9  ;;  %v1662_v59 = vld [vmem:[%s5744_s17 + $0xcf0] sm:$0xff] }
 0x3fc   : > { %v2477_v8 = vunpack.c.h.s8.bf16 %v1645_v0  ;;  %v2479_v10 = vunpack.c.h.s8.bf16 %v1647_v9  ;;  %v1667_v0 = vld [vmem:[%s5744_s17 + $0xd18] sm:$0xff] }
 0x3fe   : > { %3226 = vmatpush1.bf16.msra.mxu0 %v2432_v6  ;;  %3800 = vmatpush1.bf16.msra.mxu1 %v2434_v25  ;;  %v1644_v6 = vld [vmem:[%s5744_s17 + $0xc60] sm:$0xff]  ;;  %v1646_v25 = vld [vmem:[%s5744_s17 + $0xc70] sm:$0xff] }
 0x3ff   : > { %3227 = vmatprep.subr.bf16.mxu0 %v2437_v21  ;;  %3801 = vmatprep.subr.bf16.mxu1 %v2439_v28  ;;  %v2472_v21 = vunpack.c.l.s8.bf16 %v1644_v6  ;;  %v2474_v28 = vunpack.c.l.s8.bf16 %v1646_v25 }
 0x402   : > { %3228 = vmatpush1.bf16.msra.mxu0 %v2436_v11  ;;  %3802 = vmatpush1.bf16.msra.mxu1 %v2438_v49  ;;  %v1649_v11 = vld [vmem:[%s5744_s17 + $0xc88] sm:$0xff]  ;;  %v1651_v49 = vld [vmem:[%s5744_s17 + $0xc98] sm:$0xff] }
 0x403   : > { %3229 = vmatprep.subr.bf16.mxu0 %v2441_v37  ;;  %3803 = vmatprep.subr.bf16.mxu1 %v2443_v13  ;;  %v2476_v37 = vunpack.c.h.s8.bf16 %v1644_v6  ;;  %v2478_v13 = vunpack.c.h.s8.bf16 %v1646_v25  ;;  %v2481_v14 = vunpack.c.l.s8.bf16 %v1649_v11  ;;  %v2483_v15 = vunpack.c.l.s8.bf16 %v1651_v49  ;;  %v1666_v6 = vld [vmem:[%s5744_s17 + $0xd10] sm:$0xff] }
 0x404   : > { %v2485_v20 = vunpack.c.h.s8.bf16 %v1649_v11  ;;  %v2487_v23 = vunpack.c.h.s8.bf16 %v1651_v49  ;;  %v6318_v25 = vrot.slane %v6275_v24, %v5769_v33  ;;  %v1669_v11 = vld [vmem:[%s5744_s17 + $0xd28] sm:$0xff]  ;;  %v1671_v49 = vld [vmem:[%s5744_s17 + $0xd38] sm:$0xff]  ;;  %v2518_v24 = vunpack.c.h.s8.bf16 %v1666_v6 }
 0x406   : > { %3230 = vmatpush1.bf16.msra.mxu0 %v2440_v16  ;;  %3804 = vmatpush1.bf16.msra.mxu1 %v2442_v17  ;;  %v1648_v16 = vld [vmem:[%s5744_s17 + $0xc80] sm:$0xff]  ;;  %v1650_v17 = vld [vmem:[%s5744_s17 + $0xc90] sm:$0xff] }
 0x407   : > { %3231 = vmatprep.subr.bf16.mxu0 %v2445_v39  ;;  %3805 = vmatprep.subr.bf16.mxu1 %v2447_v18  ;;  %v2480_v39 = vunpack.c.l.s8.bf16 %v1648_v16  ;;  %v2482_v18 = vunpack.c.l.s8.bf16 %v1650_v17 }
 0x40a   : > { %3232 = vmatpush1.bf16.msra.mxu0 %v2444_v41  ;;  %3806 = vmatpush1.bf16.msra.mxu1 %v2446_v26  ;;  %v1653_v41 = vld [vmem:[%s5744_s17 + $0xca8] sm:$0xff]  ;;  %v1655_v26 = vld [vmem:[%s5744_s17 + $0xcb8] sm:$0xff] }
 0x40b   : > { %3242 = vmatprep.subr.bf16.mxu0 %v2449_v27  ;;  %3816 = vmatprep.subr.bf16.mxu1 %v2451_v29  ;;  %v2484_v27 = vunpack.c.h.s8.bf16 %v1648_v16  ;;  %v2486_v29 = vunpack.c.h.s8.bf16 %v1650_v17  ;;  %v2489_v30 = vunpack.c.l.s8.bf16 %v1653_v41  ;;  %v2491_v43 = vunpack.c.l.s8.bf16 %v1655_v26 }
 0x40c   : > { %v4739_v16 = vmov 0  }
 0x40d   : > { %3234 = vmatmul.mubr.bf16.vlgmr.msra.gmra.mrb[0].mxu0 %v2697_v32  ;;  %3808 = vmatmul.mubr.bf16.vlgmr.msra.gmra.mrb[0].mxu1 %v2697_v32  ;;  %v1654_v32 = vld [vmem:[%s5744_s17 + $0xcb0] sm:$0xff] }
 0x40e   : > { %3243 = vmatpush1.bf16.msra.mxu0 %v2448_v35  ;;  %3817 = vmatpush1.bf16.msra.mxu1 %v2450_v36  ;;  %v2488_v35 = vunpack.c.l.s8.bf16 %v1652_v31  ;;  %v2490_v36 = vunpack.c.l.s8.bf16 %v1654_v32 }
 0x40f   : > { %3244 = vmatprep.subr.bf16.mxu0 %v2453_v38  ;;  %3818 = vmatprep.subr.bf16.mxu1 %v2455_v56  ;;  %v2493_v38 = vunpack.c.h.s8.bf16 %v1653_v41  ;;  %v2495_v56 = vunpack.c.h.s8.bf16 %v1655_v26  ;;  %v1675_v41 = vld [vmem:[%s5744_s17 + $0xd58] sm:$0xff] }
 0x410   : > { %3274 = vmatprep.mubr.bf16.mxu0 %v2721_v44  ;;  %3848 = vmatprep.mubr.bf16.mxu1 %v2721_v44  ;;  %v2492_v44 = vunpack.c.h.s8.bf16 %v1652_v31  ;;  %v1674_v31 = vld [vmem:[%s5744_s17 + $0xd50] sm:$0xff] }
 0x412   : > { %3245 = vmatpush1.bf16.msra.mxu0 %v2452_v45  ;;  %3819 = vmatpush1.bf16.msra.mxu1 %v2454_v58  ;;  %v2494_v45 = vunpack.c.h.s8.bf16 %v1654_v32  ;;  %v2497_v58 = vunpack.c.l.s8.bf16 %v1657_v53 }
 0x413   : > { %3246 = vmatprep.subr.bf16.mxu0 %v2457_v12  ;;  %3820 = vmatprep.subr.bf16.mxu1 %v2459_v34  ;;  %v2499_v12 = vunpack.c.l.s8.bf16 %v1659_v40  ;;  %v1656_v34 = vld [vmem:[%s5744_s17 + $0xcc0] sm:$0xff] }
 0x414   : > { %v2496_v47 = vunpack.c.l.s8.bf16 %v1656_v34  ;;  %v2500_v52 = vunpack.c.h.s8.bf16 %v1656_v34  ;;  %v1678_v34 = vld [vmem:[%s5744_s17 + $0xd70] sm:$0xff] }
 0x416   : > { %3247 = vmatpush1.bf16.msra.mxu0 %v2456_v48  ;;  %3821 = vmatpush1.bf16.msra.mxu1 %v2458_v4  ;;  %v2498_v48 = vunpack.c.l.s8.bf16 %v1658_v46  ;;  %v2501_v4 = vunpack.c.h.s8.bf16 %v1657_v53  ;;  %v1679_v53 = vld [vmem:[%s5744_s17 + $0xd78] sm:$0xff] }
 0x417   : > { %3248 = vmatprep.subr.bf16.mxu0 %v2461_v50  ;;  %3822 = vmatprep.subr.bf16.mxu1 %v2463_v42  ;;  %v2503_v50 = vunpack.c.h.s8.bf16 %v1659_v40  ;;  %v1661_v42 = vld [vmem:[%s5744_s17 + $0xce8] sm:$0xff] }
 0x41a   : > { %3249 = vmatpush1.bf16.msra.mxu0 %v2460_v54  ;;  %3823 = vmatpush1.bf16.msra.mxu1 %v2462_v7  ;;  %v2502_v54 = vunpack.c.h.s8.bf16 %v1658_v46  ;;  %v2505_v7 = vunpack.c.l.s8.bf16 %v1661_v42 }
 0x41b   : > { %3250 = vmatprep.subr.bf16.mxu0 %v2465_v55  ;;  %3824 = vmatprep.subr.bf16.mxu1 %v2467_v57  ;;  %v2507_v55 = vunpack.c.l.s8.bf16 %v1663_v51  ;;  %v1660_v57 = vld [vmem:[%s5744_s17 + $0xce0] sm:$0xff] }
 0x41c   : > { %v2504_v60 = vunpack.c.l.s8.bf16 %v1660_v57  ;;  %v2508_v9 = vunpack.c.h.s8.bf16 %v1660_v57 }
 0x41e   : > { %3251 = vmatpush1.bf16.msra.mxu0 %v2464_v5  ;;  %3825 = vmatpush1.bf16.msra.mxu1 %v2466_v61  ;;  %v2506_v5 = vunpack.c.l.s8.bf16 %v1662_v59  ;;  %v2509_v61 = vunpack.c.h.s8.bf16 %v1661_v42  ;;  %v2542_v42 = vunpack.c.h.s8.bf16 %v1678_v34 }
 0x41f   : > { %3252 = vmatprep.subr.bf16.mxu0 %v2469_v62  ;;  %3826 = vmatprep.subr.bf16.mxu1 %v2471_v63  ;;  %v2511_v62 = vunpack.c.h.s8.bf16 %v1663_v51  ;;  %v1665_v63 = vld [vmem:[%s5744_s17 + $0xd08] sm:$0xff]  ;;  %v2722_v51 = vcombine.high %v6318_v25, %v6318_v25 }
 0x422   : > { %3253 = vmatpush1.bf16.msra.mxu0 %v2468_v1  ;;  %3827 = vmatpush1.bf16.msra.mxu1 %v2470_v19  ;;  %v2510_v1 = vunpack.c.h.s8.bf16 %v1662_v59  ;;  %v2513_v19 = vunpack.c.l.s8.bf16 %v1665_v63 }
 0x423   : > { %3254 = vmatprep.subr.bf16.mxu0 %v2473_v2  ;;  %3828 = vmatprep.subr.bf16.mxu1 %v2475_v3  ;;  %v2515_v2 = vunpack.c.l.s8.bf16 %v1667_v0  ;;  %v1664_v3 = vld [vmem:[%s5744_s17 + $0xd00] sm:$0xff] }
 0x424   : > { %v2516_v33 = vunpack.c.h.s8.bf16 %v1664_v3 }
 0x426   : > { %3255 = vmatpush1.bf16.msra.mxu0 %v2472_v21  ;;  %3829 = vmatpush1.bf16.msra.mxu1 %v2474_v28  ;;  %v2512_v21 = vunpack.c.l.s8.bf16 %v1664_v3  ;;  %v2514_v28 = vunpack.c.l.s8.bf16 %v1666_v6  ;;  %v2544_v3 = vld [vmem:[#allocation2] sm:$0xff] }
 0x427   : > { %3256 = vmatprep.subr.bf16.mxu0 %v2477_v8  ;;  %3830 = vmatprep.subr.bf16.mxu1 %v2479_v10  ;;  %v2517_v8 = vunpack.c.h.s8.bf16 %v1665_v63  ;;  %v2519_v10 = vunpack.c.h.s8.bf16 %v1667_v0 }
 0x42a   : > { %3257 = vmatpush1.bf16.msra.mxu0 %v2476_v37  ;;  %3831 = vmatpush1.bf16.msra.mxu1 %v2478_v13  ;;  %v2521_v37 = vunpack.c.l.s8.bf16 %v1669_v11  ;;  %v2523_v13 = vunpack.c.l.s8.bf16 %v1671_v49 }
 0x42b   : > { %3258 = vmatprep.subr.bf16.mxu0 %v2481_v14  ;;  %3832 = vmatprep.subr.bf16.mxu1 %v2483_v15  ;;  %v1668_v14 = vld [vmem:[%s5744_s17 + $0xd20] sm:$0xff]  ;;  %v1670_v15 = vld [vmem:[%s5744_s17 + $0xd30] sm:$0xff] }
 0x42c   : > { %v2520_v17 = vunpack.c.l.s8.bf16 %v1668_v14  ;;  %v2524_v26 = vunpack.c.h.s8.bf16 %v1668_v14  ;;  %v4035_v14 = vld [vmem:[%s5736_s0 + $0x108] sm:$0xff] (!%p4372_p0) }
 0x42e   : > { %3259 = vmatpush1.bf16.msra.mxu0 %v2480_v39  ;;  %3833 = vmatpush1.bf16.msra.mxu1 %v2482_v18  ;;  %v2522_v39 = vunpack.c.l.s8.bf16 %v1670_v15  ;;  %v2525_v18 = vunpack.c.h.s8.bf16 %v1669_v11  ;;  %v4003_v11 = vld [vmem:[%s5736_s0 + $0x8] sm:$0xff] (!%p4372_p0) }
 0x42f   : > { %3260 = vmatprep.subr.bf16.mxu0 %v2485_v20  ;;  %3834 = vmatprep.subr.bf16.mxu1 %v2487_v23  ;;  %v2527_v20 = vunpack.c.h.s8.bf16 %v1671_v49  ;;  %v1673_v23 = vld [vmem:[%s5744_s17 + $0xd48] sm:$0xff]  ;;  %v4050_v49 = vld [vmem:[%s5736_s0 + $0x180] sm:$0xff] (!%p4372_p0) }
 0x432   : > { %3261 = vmatpush1.bf16.msra.mxu0 %v2484_v27  ;;  %3835 = vmatpush1.bf16.msra.mxu1 %v2486_v29  ;;  %v2526_v27 = vunpack.c.h.s8.bf16 %v1670_v15  ;;  %v2529_v29 = vunpack.c.l.s8.bf16 %v1673_v23  ;;  %v4020_v15 = vld [vmem:[%s5736_s0 + $0x90] sm:$0xff] (!%p4372_p0) }
 0x433   : > { %3262 = vmatprep.subr.bf16.mxu0 %v2489_v30  ;;  %3836 = vmatprep.subr.bf16.mxu1 %v2491_v43  ;;  %v2531_v30 = vunpack.c.l.s8.bf16 %v1675_v41  ;;  %v1672_v43 = vld [vmem:[%s5744_s17 + $0xd40] sm:$0xff] }
 0x434   : > { %v2528_v32 = vunpack.c.l.s8.bf16 %v1672_v43  ;;  %v2532_v40 = vunpack.c.h.s8.bf16 %v1672_v43  ;;  %v4022_v43 = vld [vmem:[%s5736_s0 + $0xa0] sm:$0xff] (!%p4372_p0) }
 0x436   : > { %3263 = vmatpush1.bf16.msra.mxu0 %v2488_v35  ;;  %3837 = vmatpush1.bf16.msra.mxu1 %v2490_v36  ;;  %v2530_v35 = vunpack.c.l.s8.bf16 %v1674_v31  ;;  %v2533_v36 = vunpack.c.h.s8.bf16 %v1673_v23 }
 0x437   : > { %3264 = vmatprep.subr.bf16.mxu0 %v2493_v38  ;;  %3838 = vmatprep.subr.bf16.mxu1 %v2495_v56  ;;  %v2535_v38 = vunpack.c.h.s8.bf16 %v1675_v41  ;;  %v1677_v56 = vld [vmem:[%s5744_s17 + $0xd68] sm:$0xff] }
 0x438   : > { %v4052_v41 = vld [vmem:[%s5736_s0 + $0x190] sm:$0xff] (!%p4372_p0) }
 0x43a   : > { %3265 = vmatpush1.bf16.msra.mxu0 %v2492_v44  ;;  %3839 = vmatpush1.bf16.msra.mxu1 %v2494_v45  ;;  %v2534_v44 = vunpack.c.h.s8.bf16 %v1674_v31  ;;  %v2537_v45 = vunpack.c.l.s8.bf16 %v1677_v56  ;;  %v4023_v31 = vld [vmem:[%s5736_s0 + $0xa8] sm:$0xff] (!%p4372_p0) }
 0x43b   : > { %3266 = vmatprep.subr.bf16.mxu0 %v2497_v58  ;;  %3840 = vmatprep.subr.bf16.mxu1 %v2499_v12  ;;  %v2539_v58 = vunpack.c.l.s8.bf16 %v1679_v53  ;;  %v1676_v12 = vld [vmem:[%s5744_s17 + $0xd60] sm:$0xff] }
 0x43c   : > { %v2536_v46 = vunpack.c.l.s8.bf16 %v1676_v12 }
 0x43e   : > { %3267 = vmatpush1.bf16.msra.mxu0 %v2496_v47  ;;  %3841 = vmatpush1.bf16.msra.mxu1 %v2498_v48  ;;  %v2538_v47 = vunpack.c.l.s8.bf16 %v1678_v34  ;;  %v2541_v48 = vunpack.c.h.s8.bf16 %v1677_v56  ;;  %v4054_v56 = vld [vmem:[%s5736_s0 + $0x1a0] sm:$0xff] (!%p4372_p0)  ;;  %v4025_v34 = vld [vmem:[%s5736_s0 + $0xb8] sm:$0xff] (!%p4372_p0) }
 0x43f   : > { %3268 = vmatprep.subr.bf16.mxu0 %v2501_v4  ;;  %3842 = vmatprep.subr.bf16.mxu1 %v2503_v50  ;;  %v2543_v4 = vunpack.c.h.s8.bf16 %v1679_v53  ;;  %v2540_v50 = vunpack.c.h.s8.bf16 %v1676_v12  ;;  %v4055_v53 = vld [vmem:[%s5736_s0 + $0x1a8] sm:$0xff] (!%p4372_p0)  ;;  %v4024_v12 = vld [vmem:[%s5736_s0 + $0xb0] sm:$0xff] (!%p4372_p0) }
 0x442   : > { %3269 = vmatpush1.bf16.msra.mxu0 %v2500_v52  ;;  %3843 = vmatpush1.bf16.msra.mxu1 %v2502_v54  ;;  %v4740_v52 = vmov 1983009808  }
 0x443   : > { %3270 = vmatprep.subr.bf16.mxu0 %v2505_v7  ;;  %3844 = vmatprep.subr.bf16.mxu1 %v2507_v55  ;;  %v3905_v54 = vunpack.c.l.s4 %v4740_v52  ;;  %v4040_v52 = vld [vmem:[%s5736_s0 + $0x130] sm:$0xff] (!%p4372_p0) }
 0x445   : > { %v3906_v7 = vunpack.c.0.s8 %v3905_v54  ;;  %v4041_v54 = vld [vmem:[%s5736_s0 + $0x138] sm:$0xff] (!%p4372_p0) }
 0x446   : > { %3271 = vmatpush1.bf16.msra.mxu0 %v2504_v60  ;;  %3845 = vmatpush1.bf16.msra.mxu1 %v2506_v5 }
 0x447   : > { %3272 = vmatprep.subr.bf16.mxu0 %v2509_v61  ;;  %3846 = vmatprep.subr.bf16.mxu1 %v2511_v62  ;;  %v6337_v59 = vsub.s32 %v3906_v7, %v5759_v22  ;;  %v4026_v7 = vld [vmem:[%s5736_s0 + $0xc0] sm:$0xff] (!%p4372_p0) }
 0x44a   : > { %3273 = vmatpush1.bf16.msra.mxu0 %v2508_v9  ;;  %3847 = vmatpush1.bf16.msra.mxu1 %v2510_v1 }
 0x44b   : > { %3283 = vmatprep.subr.bf16.mxu0 %v2513_v19  ;;  %3857 = vmatprep.subr.bf16.mxu1 %v2515_v2 }
 0x44d   : > { %3275 = vmatmul.mubr.bf16.vlgmr.msra.gmra.mrb[0].mxu0 %v6318_v25  ;;  %3849 = vmatmul.mubr.bf16.vlgmr.msra.gmra.mrb[0].mxu1 %v6318_v25 }
 0x44e   : > { %3284 = vmatpush1.bf16.msra.mxu0 %v2512_v21  ;;  %3858 = vmatpush1.bf16.msra.mxu1 %v2514_v28  ;;  %v4018_v21 = vld [vmem:[%s5736_s0 + $0x80] sm:$0xff] (!%p4372_p0)  ;;  %v4019_v28 = vld [vmem:[%s5736_s0 + $0x88] sm:$0xff] (!%p4372_p0) }
 0x44f   : > { %3285 = vmatprep.subr.bf16.mxu0 %v2517_v8  ;;  %3859 = vmatprep.subr.bf16.mxu1 %v2519_v10  ;;  %v4002_v8 = vld [vmem:[%s5736_s0] sm:$0xff] (!%p4372_p0)  ;;  %v4448_v10 = vpack.c.bf16 (!%p4372_p0), %v4019_v28, %v4018_v21 }
 0x450   : > { %3315 = vmatprep.mubr.bf16.mxu0 %v4739_v16  ;;  %3889 = vmatprep.mubr.bf16.mxu1 %v4739_v16 }
 0x452   : > { %3286 = vmatpush1.bf16.msra.mxu0 %v2516_v33  ;;  %3860 = vmatpush1.bf16.msra.mxu1 %v2518_v24  ;;  %v4051_v33 = vld [vmem:[%s5736_s0 + $0x188] sm:$0xff] (!%p4372_p0)  ;;  %v4450_v24 = vpack.c.bf16 (!%p4372_p0), %v4003_v11, %v4002_v8  ;;  %v4013_v11 = vld [vmem:[%s5736_s0 + $0x58] sm:$0xff] (!%p4372_p0) }
 0x453   : > { %3287 = vmatprep.subr.bf16.mxu0 %v2521_v37  ;;  %3861 = vmatprep.subr.bf16.mxu1 %v2523_v13  ;;  %v4480_v37 = vpack.c.bf16 (!%p4372_p0), %v4051_v33, %v4050_v49  ;;  %v4034_v13 = vld [vmem:[%s5736_s0 + $0x100] sm:$0xff] (!%p4372_p0)  ;;  %v4044_v49 = vld [vmem:[%s5736_s0 + $0x150] sm:$0xff] (!%p4372_p0) }
 0x454   : > { %v4482_v16 = vpack.c.bf16 (!%p4372_p0), %v4035_v14, %v4034_v13  ;;  %v4031_v13 = vld [vmem:[%s5736_s0 + $0xe8] sm:$0xff] (!%p4372_p0)  ;;  %v3931_v14 = vsub.s32 (!%p4372_p0), 0, %v5759_v22 }
 0x456   : > { %3288 = vmatpush1.bf16.msra.mxu0 %v2520_v17  ;;  %3862 = vmatpush1.bf16.msra.mxu1 %v2522_v39  ;;  %v4021_v17 = vld [vmem:[%s5736_s0 + $0x98] sm:$0xff] (!%p4372_p0)  ;;  %v4004_v39 = vld [vmem:[%s5736_s0 + $0x10] sm:$0xff] (!%p4372_p0) }
 0x457   : > { %3289 = vmatprep.subr.bf16.mxu0 %v2525_v18  ;;  %3863 = vmatprep.subr.bf16.mxu1 %v2527_v20  ;;  %v4005_v18 = vld [vmem:[%s5736_s0 + $0x18] sm:$0xff] (!%p4372_p0)  ;;  %v4452_v20 = vpack.c.bf16 (!%p4372_p0), %v4021_v17, %v4020_v15  ;;  %v3935_v15 = vsub.s32 (!%p4372_p0), 1, %v5759_v22  ;;  %v4062_v17 = vld [vmem:[%s5736_s0 + $0x1e0] sm:$0xff] (!%p4372_p0) }
 0x458   : > { %v4454_v23 = vpack.c.bf16 (!%p4372_p0), %v4005_v18, %v4004_v39  ;;  %v4063_v39 = vld [vmem:[%s5736_s0 + $0x1e8] sm:$0xff] (!%p4372_p0)  ;;  %v3943_v18 = vsub.s32 (!%p4372_p0), 3, %v5759_v22 }
 0x45a   : > { %3290 = vmatpush1.bf16.msra.mxu0 %v2524_v26  ;;  %3864 = vmatpush1.bf16.msra.mxu1 %v2526_v27  ;;  %v4053_v26 = vld [vmem:[%s5736_s0 + $0x198] sm:$0xff] (!%p4372_p0)  ;;  %v4036_v27 = vld [vmem:[%s5736_s0 + $0x110] sm:$0xff] (!%p4372_p0) }
 0x45b   : > { %3291 = vmatprep.subr.bf16.mxu0 %v2529_v29  ;;  %3865 = vmatprep.subr.bf16.mxu1 %v2531_v30  ;;  %v4484_v29 = vpack.c.bf16 (!%p4372_p0), %v4053_v26, %v4052_v41  ;;  %v4037_v30 = vld [vmem:[%s5736_s0 + $0x118] sm:$0xff] (!%p4372_p0)  ;;  %v4015_v41 = vld [vmem:[%s5736_s0 + $0x68] sm:$0xff] (!%p4372_p0) }
 0x45e   : > { %3292 = vmatpush1.bf16.msra.mxu0 %v2528_v32  ;;  %3866 = vmatpush1.bf16.msra.mxu1 %v2530_v35  ;;  %v4486_v32 = vpack.c.bf16 (!%p4372_p0), %v4037_v30, %v4036_v27  ;;  %v4456_v35 = vpack.c.bf16 (!%p4372_p0), %v4023_v31, %v4022_v43  ;;  %v4047_v30 = vld [vmem:[%s5736_s0 + $0x168] sm:$0xff] (!%p4372_p0)  ;;  %v3927_v43 = vld [vmem:[%s6462_s13] sm:$0xf] (!%p4372_p0)  ;;  %v4032_v31 = vld [vmem:[%s5736_s0 + $0xf0] sm:$0xff] (!%p4372_p0) }
 0x45f   : > { %3293 = vmatprep.subr.bf16.mxu0 %v2533_v36  ;;  %3867 = vmatprep.subr.bf16.mxu1 %v2535_v38  ;;  %v4006_v36 = vld [vmem:[%s5736_s0 + $0x20] sm:$0xff] (!%p4372_p0)  ;;  %v4007_v38 = vld [vmem:[%s5736_s0 + $0x28] sm:$0xff] (!%p4372_p0) }
 0x462   : > { %3294 = vmatpush1.bf16.msra.mxu0 %v2532_v40  ;;  %3868 = vmatpush1.bf16.msra.mxu1 %v2534_v44  ;;  %v4038_v40 = vld [vmem:[%s5736_s0 + $0x120] sm:$0xff] (!%p4372_p0)  ;;  %v4039_v44 = vld [vmem:[%s5736_s0 + $0x128] sm:$0xff] (!%p4372_p0) }
 0x463   : > { %3295 = vmatprep.subr.bf16.mxu0 %v2537_v45  ;;  %3869 = vmatprep.subr.bf16.mxu1 %v2539_v58  ;;  %v4458_v45 = vpack.c.bf16 (!%p4372_p0), %v4007_v38, %v4006_v36  ;;  %v4488_v58 = vpack.c.bf16 (!%p4372_p0), %v4055_v53, %v4054_v56  ;;  %v3936_v36 = vrot.slane (!%p4372_p0), %v3927_v43, %v3935_v15  ;;  %v3964_v56 = vld [vmem:[%s1228_s18] sm:$0xf] (!%p4372_p0)  ;;  %v4064_v53 = vld [vmem:[%s5736_s0 + $0x1f0] sm:$0xff] (!%p4372_p0) }
 0x466   : > { %3296 = vmatpush1.bf16.msra.mxu0 %v2536_v46  ;;  %3870 = vmatpush1.bf16.msra.mxu1 %v2538_v47  ;;  %v4008_v46 = vld [vmem:[%s5736_s0 + $0x30] sm:$0xff] (!%p4372_p0)  ;;  %v4490_v47 = vpack.c.bf16 (!%p4372_p0), %v4039_v44, %v4038_v40  ;;  %v4065_v40 = vld [vmem:[%s5736_s0 + $0x1f8] sm:$0xff] (!%p4372_p0)  ;;  %v3944_v44 = vrot.slane (!%p4372_p0), %v3927_v43, %v3943_v18 }
 0x467   : > { %3297 = vmatprep.subr.bf16.mxu0 %v2541_v48  ;;  %3871 = vmatprep.subr.bf16.mxu1 %v2543_v4  ;;  %v4460_v48 = vpack.c.bf16 (!%p4372_p0), %v4025_v34, %v4024_v12  ;;  %v4009_v4 = vld [vmem:[%s5736_s0 + $0x38] sm:$0xff] (!%p4372_p0) }
 0x46a   : > { %3298 = vmatpush1.bf16.msra.mxu0 %v2540_v50  ;;  %3872 = vmatpush1.bf16.msra.mxu1 %v2542_v42  ;;  %v4056_v50 = vld [vmem:[%s5736_s0 + $0x1b0] sm:$0xff] (!%p4372_p0)  ;;  %v4057_v42 = vld [vmem:[%s5736_s0 + $0x1b8] sm:$0xff] (!%p4372_p0) }
 0x46b   : > { %4449 = vmatprep.subr.bf16.mxu0 (!%p4372_p0), %v4448_v10  ;;  %4481 = vmatprep.subr.bf16.mxu1 (!%p4372_p0), %v4480_v37  ;;  %v4012_v10 = vld [vmem:[%s5736_s0 + $0x50] sm:$0xff] (!%p4372_p0)  ;;  %v4030_v37 = vld [vmem:[%s5736_s0 + $0xe0] sm:$0xff] (!%p4372_p0) }
 0x46c   : > { %v4472_v27 = vpack.c.bf16 (!%p4372_p0), %v4031_v13, %v4030_v37 }
 0x46d   : > { %3316 = vmatmul.mubr.bf16.vlgmr.msra.gmra.mrb[0].mxu0 %v2722_v51  ;;  %3890 = vmatmul.mubr.bf16.vlgmr.msra.gmra.mrb[0].mxu1 %v2722_v51  ;;  %v4492_v51 = vpack.c.bf16 (!%p4372_p0), %v4057_v42, %v4056_v50  ;;  %v4016_v50 = vld [vmem:[%s5736_s0 + $0x70] sm:$0xff] (!%p4372_p0)  ;;  %v4017_v42 = vld [vmem:[%s5736_s0 + $0x78] sm:$0xff] (!%p4372_p0) }
 0x46e   : > { %4451 = vmatpush3.bf16.msra.mxu0 (!%p4372_p0), %v4450_v24  ;;  %4483 = vmatpush3.bf16.msra.mxu1 (!%p4372_p0), %v4482_v16  ;;  %v4045_v24 = vld [vmem:[%s5736_s0 + $0x158] sm:$0xff] (!%p4372_p0)  ;;  %v3939_v16 = vsub.s32 (!%p4372_p0), 2, %v5759_v22  ;;  %v4504_v22 = vpack.c.bf16 (!%p4372_p0), %v4063_v39, %v4062_v17 }
 0x46f   : > { %4453 = vmatprep.subr.bf16.mxu0 (!%p4372_p0), %v4452_v20  ;;  %4485 = vmatprep.subr.bf16.mxu1 (!%p4372_p0), %v4484_v29  ;;  %v4470_v20 = vpack.c.bf16 (!%p4372_p0), %v4013_v11, %v4012_v10  ;;  %v4502_v26 = vpack.c.bf16 (!%p4372_p0), %v4045_v24, %v4044_v49  ;;  %v4046_v29 = vld [vmem:[%s5736_s0 + $0x160] sm:$0xff] (!%p4372_p0) }
 0x470   : > { %v3940_v38 = vrot.slane (!%p4372_p0), %v3927_v43, %v3939_v16  ;;  %v3977_v12 = vrot.slane (!%p4372_p0), %v3964_v56, %v3939_v16  ;;  %v4373_v49 = vld [vmem:[%s1237_s11] ss:$0 sm:$0xff] (!%p4372_p0) }
 0x472   : > { %4455 = vmatpush3.bf16.msra.mxu0 (!%p4372_p0), %v4454_v23  ;;  %4487 = vmatpush3.bf16.msra.mxu1 (!%p4372_p0), %v4486_v32  ;;  %v4014_v23 = vld [vmem:[%s5736_s0 + $0x60] sm:$0xff] (!%p4372_p0)  ;;  %v4033_v32 = vld [vmem:[%s5736_s0 + $0xf8] sm:$0xff] (!%p4372_p0) }
 0x473   : > { %4457 = vmatprep.subr.bf16.mxu0 (!%p4372_p0), %v4456_v35  ;;  %4489 = vmatprep.subr.bf16.mxu1 (!%p4372_p0), %v4488_v58  ;;  %v3932_v35 = vrot.slane (!%p4372_p0), %v3927_v43, %v3931_v14  ;;  %v3973_v58 = vrot.slane (!%p4372_p0), %v3964_v56, %v3935_v15  ;;  %v4474_v34 = vpack.c.bf16 (!%p4372_p0), %v4015_v41, %v4014_v23 }
 0x476   : > { %4459 = vmatpush3.bf16.msra.mxu0 (!%p4372_p0), %v4458_v45  ;;  %4491 = vmatpush3.bf16.msra.mxu1 (!%p4372_p0), %v4490_v47  ;;  %v3969_v45 = vrot.slane (!%p4372_p0), %v3964_v56, %v3931_v14  ;;  %v3945_v47 = vcombine.low (!%p4372_p0), %v3932_v35, %v3936_v36 }
 0x477   : > { %4461 = vmatprep.subr.bf16.mxu0 (!%p4372_p0), %v4460_v48  ;;  %4493 = vmatprep.subr.bf16.mxu1 (!%p4372_p0), %v4492_v51  ;;  %v3981_v48 = vrot.slane (!%p4372_p0), %v3964_v56, %v3943_v18  ;;  %v3946_v51 = vcombine.low (!%p4372_p0), %v3940_v38, %v3944_v44 }
 0x540   : > { %v3317_v55 = vpop.f32.mrb[0].mxu0  ;;  %v3891_v57 = vpop.f32.mrb[0].mxu1 }
 0x541   : > { %v3319_v60 = vpop.f32.mrb[1].mxu0  ;;  %v3893_v5 = vpop.f32.mrb[1].mxu1 }
 0x542   : > { %v3902_v61 = vcombine.low %v3317_v55, %v3319_v60  ;;  %v3903_v62 = vcombine.low %v3891_v57, %v3893_v5  ;;  %v3321_v63 = vpop.f32.mrb[2].mxu0  ;;  %v3895_v0 = vpop.f32.mrb[2].mxu1  ;;  %v4027_v55 = vld [vmem:[%s5736_s0 + $0xc8] sm:$0xff] (!%p4372_p0)  ;;  %v4462_v57 = vpack.c.bf16 (!%p4372_p0), %v4009_v4, %v4008_v46  ;;  %v4058_v60 = vld [vmem:[%s5736_s0 + $0x1c0] sm:$0xff] (!%p4372_p0)  ;;  %v4506_v46 = vpack.c.bf16 (!%p4372_p0), %v4047_v30, %v4046_v29 }
 0x543   : > { %v3322_v9 = vpop.f32.mrb[3].mxu0  ;;  %v3896_v1 = vpop.f32.mrb[3].mxu1  ;;  %v4059_v5 = vld [vmem:[%s5736_s0 + $0x1c8] sm:$0xff] (!%p4372_p0)  ;;  %v4010_v63 = vld [vmem:[%s5736_s0 + $0x40] sm:$0xff] (!%p4372_p0)  ;;  %v4476_v4 = vpack.c.bf16 (!%p4372_p0), %v4033_v32, %v4032_v31 }
 0x544   : > { %v3910_v19 = vrot.slane %v3902_v61, %v6337_v59  ;;  %v3917_v2 = vrot.slane %v3903_v62, %v6337_v59  ;;  %3925 = sbr.rel (%p4372_p0) target bundleno = 1593 (0x639), region = 75  ;;  %v4494_v61 = vpack.c.bf16 (!%p4372_p0), %v4041_v54, %v4040_v52  ;;  %v4464_v62 = vpack.c.bf16 (!%p4372_p0), %v4027_v55, %v4026_v7  ;;  %v4011_v0 = vld [vmem:[%s5736_s0 + $0x48] sm:$0xff] (!%p4372_p0)  ;;  %v4042_v9 = vld [vmem:[%s5736_s0 + $0x140] sm:$0xff] (!%p4372_p0)  ;;  %4463 = vmatpush3.bf16.msra.mxu0 (!%p4372_p0), %v4462_v57  ;;  %v4048_v7 = vld [vmem:[%s5736_s0 + $0x170] sm:$0xff] (!%p4372_p0) }
 0x545   : > { %v4496_v1 = vpack.c.bf16 (!%p4372_p0), %v4059_v5, %v4058_v60  ;;  %v4466_v21 = vpack.c.bf16 (!%p4372_p0), %v4011_v0, %v4010_v63  ;;  %v3982_v52 = vcombine.low (!%p4372_p0), %v3969_v45, %v3973_v58  ;;  %v4508_v54 = vpack.c.bf16 (!%p4372_p0), %v4065_v40, %v4064_v53  ;;  %v4049_v55 = vld [vmem:[%s5736_s0 + $0x178] sm:$0xff] (!%p4372_p0) }
 0x546   : > { %v3918_v6 = vcombine.low %v3910_v19, %v3917_v2  ;;  %v4043_v19 = vld [vmem:[%s5736_s0 + $0x148] sm:$0xff] (!%p4372_p0)  ;;  %v4028_v2 = vld [vmem:[%s5736_s0 + $0xd0] sm:$0xff] (!%p4372_p0)  ;;  %4495 = vmatpush3.bf16.msra.mxu1 (!%p4372_p0), %v4494_v61  ;;  %4465 = vmatprep.subr.bf16.mxu0 (!%p4372_p0), %v4464_v62  ;;  %v3953_v57 = vrot.slane (!%p4372_p0), %v3945_v47, %v6337_v59  ;;  %v3983_v60 = vcombine.low (!%p4372_p0), %v3977_v12, %v3981_v48 }
 0x547   : > { %v4498_v28 = vpack.c.bf16 (!%p4372_p0), %v4043_v19, %v4042_v9  ;;  %4497 = vmatprep.subr.bf16.mxu1 (!%p4372_p0), %v4496_v1  ;;  %v3960_v5 = vrot.slane (!%p4372_p0), %v3946_v51, %v6337_v59  ;;  %v3990_v61 = vrot.slane (!%p4372_p0), %v3982_v52, %v6337_v59  ;;  %v4478_v62 = vpack.c.bf16 (!%p4372_p0), %v4017_v42, %v4016_v50 }
 0x548   : > { %v3920_v25 = vadd.f32 %v3918_v6, %v2544_v3  ;;  %v4029_v3 = vld [vmem:[%s5736_s0 + $0xd8] sm:$0xff] (!%p4372_p0)  ;;  %v4060_v6 = vld [vmem:[%s5736_s0 + $0x1d0] sm:$0xff] (!%p4372_p0)  ;;  %4467 = vmatpush3.bf16.msra.mxu0 (!%p4372_p0), %v4466_v21  ;;  %v3997_v0 = vrot.slane (!%p4372_p0), %v3983_v60, %v6337_v59  ;;  %v4510_v9 = vpack.c.bf16 (!%p4372_p0), %v4049_v55, %v4048_v7 }
 0x549   : > { %v4468_v8 = vpack.c.bf16 (!%p4372_p0), %v4029_v3, %v4028_v2  ;;  %v3961_v1 = vcombine.low (!%p4372_p0), %v3953_v57, %v3960_v5 }
 0x54a   : > { %3921 = vst [vmem:[#allocation2] sm:$0xff] %v3920_v25  ;;  %v4061_v25 = vld [vmem:[%s5736_s0 + $0x1d8] sm:$0xff] (!%p4372_p0)  ;;  %4499 = vmatpush3.bf16.msra.mxu1 (!%p4372_p0), %v4498_v28  ;;  %v3998_v19 = vcombine.low (!%p4372_p0), %v3990_v61, %v3997_v0 }
 0x54b   : > { %v4500_v33 = vpack.c.bf16 %v4061_v25, %v4060_v6  ;;  %4469 = vmatprep.subr.bf16.mxu0 %v4468_v8 }
 0x54c   : > { %4471 = vmatpush3.bf16.msra.mxu0 %v4470_v20 }
 0x54d   : > { %4501 = vmatprep.subr.bf16.mxu1 %v4500_v33  ;;  %4473 = vmatprep.subr.bf16.mxu0 %v4472_v27 }
 0x54e   : > { %4503 = vmatpush3.bf16.msra.mxu1 %v4502_v26 }
 0x54f   : > { %4505 = vmatprep.subr.bf16.mxu1 %v4504_v22 }
 0x550   : > { %4475 = vmatpush3.bf16.msra.mxu0 %v4474_v34 }
 0x551   : > { %v3926_v63 = vld [vmem:[#allocation2] sm:$0xff]  ;;  %4477 = vmatprep.subr.bf16.mxu0 %v4476_v4 }
 0x552   : > { %4507 = vmatpush3.bf16.msra.mxu1 %v4506_v46  ;;  %v3963_v2 = vmul.f32 %v3961_v1, %v3926_v63 }
 0x553   : > { %4509 = vmatprep.subr.bf16.mxu1 %v4508_v54 }
 0x554   : > { %4479 = vmatpush3.bf16.msra.mxu0 %v4478_v62  ;;  %v4000_v3 = vadd.f32 %v3998_v19, %v3963_v2 }
 0x556   : > { %4511 = vmatpush3.bf16.msra.mxu1 %v4510_v9  ;;  %v4001_v6 = vmax.f32 %v4000_v3, 0.0 }
 0x558   : > { %v4081_v25 = vrot.slane %v4001_v6, %v6337_v59  ;;  %v4074_v21 = vcombine.high %v4001_v6, %v4001_v6 }
 0x55a   : > { %v4089_v28 = vcombine.high %v4081_v25, %v4081_v25  ;;  %v4088_v8 = vrot.slane %v4074_v21, %v6337_v59 }
 0x55c   : > { %4159 = vmatprep.mubr.f32.mxu0 %v4089_v28  ;;  %v4090_v10 = vcombine.high %v4088_v8, %v4088_v8 }
 0x55d   : > { %4160 = vmatmul.mubr.f32.vlgmr.msra.gmra.mrb[0].mxu0 %v4081_v25 }
 0x55e   : > { %4229 = vmatprep.mubr.f32.mxu1 %v4090_v10 }
 0x55f   : > { %4230 = vmatmul.mubr.f32.vlgmr.msra.gmra.mrb[0].mxu1 %v4088_v8 }
 0x630   : > { %v4410_v11 = vpop.f32.mrb[0].mxu0 }
 0x631   : > { %v4411_v33 = vpop.f32.mrb[1].mxu0 }
 0x632   : > { %v4412_v24 = vadd.f32 %v4411_v33, %v4410_v11  ;;  %v4445_v37 = vpop.f32.mrb[0].mxu1 }
 0x633   : > { %v4446_v13 = vpop.f32.mrb[1].mxu1 }
 0x634   : > { %v4162_v14 = vadd.f32 %v4412_v24, %v4373_v49  ;;  %v4447_v15 = vadd.f32 %v4446_v13, %v4445_v37 }
 0x636   : > { %v4232_v16 = vadd.f32 %v4447_v15, %v4162_v14 }
 0x638   : > { %4235 = vst [vmem:[%s5742_s16] sm:$0x3] %v4232_v16 }
 0x639 PF: > { %s16_s27 = sadd.s32 1, %s4735_s27   ;;  %s6463_s21 = smov %s4715_s22 }
 0x63a   : > { %p13_p1 = scmp.ge.s32.totalorder %s16_s27, 8   ;;  %s6464_s22 = smov %s4827_s10 }
 0x63b   : > { %s6465_s23 = smov %s4727_s25  ;;  %s6466_s24 = smov %s4731_s26 }
 0x63c   : > { %s6467_s25 = smov %s6470_s28  ;;  %s6468_s26 = smov %s6474_s29 }
 0x63d   :  { %15 = sbr.rel (!%p13_p1) target bundleno = 6 (0x6), region = 125 }

</bundles_post_ra>
